<compile_context>
chip_gen: v6e
topology: v6e:2x2x1
jax: 0.10.0
libtpu: 0.0.40
codegen_flags: <defaults>
</compile_context>

<pallas_src>
import jax
import jax.numpy as jnp
from jax import lax
from jax.experimental import pallas as pl
from jax.experimental.pallas import tpu as pltpu


def _vmem():
    return pl.BlockSpec(memory_space=pltpu.MemorySpace.VMEM)


def _smem():
    return pl.BlockSpec(memory_space=pltpu.MemorySpace.SMEM)


def _pick_even(n_keep, n_src, transposed=False):
    """0/1 selection matrix picking every even index (0, 2, ...) of the source axis.

    transposed=False: (n_keep, n_src), S[i, 2i] = 1   (use as  S @ X  to pick rows)
    transposed=True : (n_src, n_keep), S[2i, i] = 1   (use as  X @ S  to pick cols)
    """
    shape = (n_src, n_keep) if transposed else (n_keep, n_src)
    r = lax.broadcasted_iota(jnp.int32, shape, 0)
    c = lax.broadcasted_iota(jnp.int32, shape, 1)
    eq = (r == 2 * c) if transposed else (c == 2 * r)
    return eq.astype(jnp.float32)


def _conv_relu_pool(act, w_ref, b_ref, cin, cout, batch):
    """conv(2x2, stride 1, pad 1) + bias + ReLU + maxpool(2x2, stride 2), all on VMEM values.

    act   : (cin*batch, H, W) value, rows ordered (channel, batch)
    w_ref : SMEM f32[cout*cin*4], PyTorch OIHW order, flattened
    b_ref : SMEM f32[cout]
    returns (cout*batch, Hp, Wp) value, rows ordered (channel, batch)
    """
    _, H, W = act.shape
    Hc, Wc = H + 1, W + 1            # conv output size (k=2, stride 1, pad 1)
    Hp, Wp = Hc // 2, Wc // 2        # pooled size (floor mode, like MaxPool2d)
    Hf, Wf = Hc - 1, Wc - 1          # size of the "max over 2x2 window" map

    # zero-pad H and W by 1 on each side (concat: no lax.pad inside the kernel).
    cb = cin * batch
    zr = jnp.zeros((cb, 1, W), act.dtype)
    ap = jnp.concatenate([zr, act, zr], axis=1)              # (cb, H+2, W)
    zc = jnp.zeros((cb, H + 2, 1), act.dtype)
    ap = jnp.concatenate([zc, ap, zc], axis=2)               # (cb, H+2, W+2)

    # the 4*cin shifted input slabs, one per (ci, ki, kj): all unit-stride static slices.
    slabs = {}
    for ci in range(cin):
        base = ap[ci * batch:(ci + 1) * batch]               # (batch, H+2, W+2)
        for ki in range(2):
            for kj in range(2):
                slabs[(ci, ki, kj)] = base[:, ki:ki + Hc, kj:kj + Wc]    # (batch, Hc, Wc)

    # conv as unrolled scalar-weight VPU FMAs (bias folded in), then the 2x2 running max.
    mfull = []
    for co in range(cout):
        acc = None
        for ci in range(cin):
            for ki in range(2):
                for kj in range(2):
                    wv = w_ref[((co * cin + ci) * 2 + ki) * 2 + kj]
                    term = wv * slabs[(ci, ki, kj)]
                    acc = term if acc is None else acc + term
        acc = acc + b_ref[co]                                # (batch, Hc, Wc)
        m = jnp.maximum(
            jnp.maximum(acc[:, 0:Hf, 0:Wf], acc[:, 1:Hf + 1, 0:Wf]),
            jnp.maximum(acc[:, 0:Hf, 1:Wf + 1], acc[:, 1:Hf + 1, 1:Wf + 1]))
        mfull.append(m)                                      # (batch, Hf, Wf)
    mall = jnp.concatenate(mfull, axis=0)                    # (cout*batch, Hf, Wf)

    # stride-2 subsample of rows and cols via exact 0/1 selection matmuls.
    cbo = cout * batch
    sel_h = jnp.broadcast_to(_pick_even(Hp, Hf)[None], (cbo, Hp, Hf))
    sel_w = jnp.broadcast_to(_pick_even(Wp, Wf, transposed=True)[None], (cbo, Wf, Wp))
    t = jnp.einsum('bph,bhw->bpw', sel_h, mall,
                   preferred_element_type=jnp.float32, precision=lax.Precision.HIGHEST)
    pooled = jnp.einsum('bpw,bwq->bpq', t, sel_w,
                        preferred_element_type=jnp.float32, precision=lax.Precision.HIGHEST)
    return jnp.maximum(pooled, 0.0)                          # ReLU (exact to hoist past max/pool)


def cnn_fused_kernel(x_ref, w1_ref, b1_ref, w2_ref, b2_ref, w3_ref, b3_ref,
                     fw1t_ref, fb1_ref, fw2t_ref, fb2_ref, o_ref):
    batch = x_ref.shape[0]

    a = x_ref[...]                                                      # (B, 28, 28) == (1*B, H, W)
    a = _conv_relu_pool(a, w1_ref, b1_ref, cin=1, cout=2, batch=batch)  # (2B, 14, 14)
    a = _conv_relu_pool(a, w2_ref, b2_ref, cin=2, cout=4, batch=batch)  # (4B, 7, 7)
    a = _conv_relu_pool(a, w3_ref, b3_ref, cin=4, cout=4, batch=batch)  # (4B, 4, 4)

    # flatten in PyTorch NCHW order (c, h, w), using only slices + concats.
    c_last, hp = 4, a.shape[1]
    rows = jnp.concatenate([a[:, i, :] for i in range(hp)], axis=1)     # (4B, 16), cols (h, w)
    xflat = jnp.concatenate(
        [rows[c * batch:(c + 1) * batch, :] for c in range(c_last)], axis=1)   # (B, 64)

    h = jnp.dot(xflat, fw1t_ref[...], preferred_element_type=jnp.float32,
                precision=lax.Precision.HIGHEST) + fb1_ref[...]
    h = jnp.maximum(h, 0.0)
    o_ref[...] = jnp.dot(h, fw2t_ref[...], preferred_element_type=jnp.float32,
                         precision=lax.Precision.HIGHEST) + fb2_ref[...]


def cnn_forward_pallas(x_nchw, p):
    B, _, H, W = x_nchw.shape
    x3 = x_nchw.reshape(B, H, W).astype(jnp.float32)          # Cin == 1
    args = (
        x3,
        p["w1"].reshape(-1), p["b1"],
        p["w2"].reshape(-1), p["b2"],
        p["w3"].reshape(-1), p["b3"],
        p["fw1"].T, p["fb1"].reshape(1, -1),
        p["fw2"].T, p["fb2"].reshape(1, -1),
    )
    in_specs = [_vmem(),
                _smem(), _smem(), _smem(), _smem(), _smem(), _smem(),
                _vmem(), _vmem(), _vmem(), _vmem()]
    return pl.pallas_call(
        cnn_fused_kernel,
        out_shape=jax.ShapeDtypeStruct((B, 10), jnp.float32),
        in_specs=in_specs,
        out_specs=_vmem(),
    )(*args)


# --------------------------- pure-JAX reference ------------------------------

def cnn_forward_reference(x, p):
    def conv(x, w, b):
        y = lax.conv_general_dilated(
            x, w, window_strides=(1, 1), padding=((1, 1), (1, 1)),
            dimension_numbers=("NCHW", "OIHW", "NCHW"),
            precision=lax.Precision.HIGHEST)
        return jnp.maximum(y + b[None, :, None, None], 0.0)

    def pool(x):
        return lax.reduce_window(x, -jnp.inf, lax.max,
                                 (1, 1, 2, 2), (1, 1, 2, 2), "VALID")

    x = pool(conv(x, p["w1"], p["b1"]))
    x = pool(conv(x, p["w2"], p["b2"]))
    x = pool(conv(x, p["w3"], p["b3"]))
    x = x.reshape(x.shape[0], -1)
    x = jnp.maximum(
        jnp.dot(x, p["fw1"].T, precision=lax.Precision.HIGHEST) + p["fb1"], 0.0)
    return jnp.dot(x, p["fw2"].T, precision=lax.Precision.HIGHEST) + p["fb2"]


# --------------------------------- main --------------------------------------

def init_params(key):
    ks = jax.random.split(key, 10)
    f = jnp.float32
    return {
        "w1": 0.1 * jax.random.normal(ks[0], (2, 1, 2, 2), f),
        "b1": 0.1 * jax.random.normal(ks[1], (2,), f),
        "w2": 0.1 * jax.random.normal(ks[2], (4, 2, 2, 2), f),
        "b2": 0.1 * jax.random.normal(ks[3], (4,), f),
        "w3": 0.1 * jax.random.normal(ks[4], (4, 4, 2, 2), f),
        "b3": 0.1 * jax.random.normal(ks[5], (4,), f),
        "fw1": 0.1 * jax.random.normal(ks[6], (32, 64), f),
        "fb1": 0.1 * jax.random.normal(ks[7], (32,), f),
        "fw2": 0.1 * jax.random.normal(ks[8], (10, 32), f),
        "fb2": 0.1 * jax.random.normal(ks[9], (10,), f),
    }


if __name__ == "__main__":
    key = jax.random.PRNGKey(0)
    pkey, xkey = jax.random.split(key)
    params = init_params(pkey)

    # CNN.crop = 28  ->  MNIST-like 28x28 single-channel images, batch=2
    x = jax.random.normal(xkey, (2, 1, 28, 28), jnp.float32)

    fwd = jax.jit(cnn_forward_pallas)
    out = jax.block_until_ready(fwd(x, params))
    ref = jax.block_until_ready(cnn_forward_reference(x, params))

    assert out.shape == (2, 10), out.shape
    assert jnp.allclose(out, ref, rtol=1e-5, atol=1e-5), (out, ref)
    print("KERNEL_OK")
</pallas_src>

<mosaic_0001>
module attributes {stable_mosaic.version = 11 : i64} {
  func.func @cnn_fused_kernel(%arg0: memref<2x28x28xf32, #tpu.memory_space<vmem>>, %arg1: memref<8xf32, #tpu.memory_space<smem>>, %arg2: memref<2xf32, #tpu.memory_space<smem>>, %arg3: memref<32xf32, #tpu.memory_space<smem>>, %arg4: memref<4xf32, #tpu.memory_space<smem>>, %arg5: memref<64xf32, #tpu.memory_space<smem>>, %arg6: memref<4xf32, #tpu.memory_space<smem>>, %arg7: memref<64x32xf32, #tpu.memory_space<vmem>>, %arg8: memref<1x32xf32, #tpu.memory_space<vmem>>, %arg9: memref<32x10xf32, #tpu.memory_space<vmem>>, %arg10: memref<1x10xf32, #tpu.memory_space<vmem>>, %arg11: memref<2x10xf32, #tpu.memory_space<vmem>>) attributes {dimension_semantics = [], scalar_prefetch = 0 : i64, scratch_operands = 0 : i64, tpu.core_type = #tpu.core_type<tc>} {
    %c0 = arith.constant 0 : index
    %c0_0 = arith.constant 0 : index
    %c0_1 = arith.constant 0 : index
    %0 = vector.load %arg0[%c0, %c0_0, %c0_1] : memref<2x28x28xf32, #tpu.memory_space<vmem>>, vector<2x28x28xf32>
    %cst = arith.constant 0.000000e+00 : f32
    %1 = vector.broadcast %cst : f32 to vector<2x1x28xf32>
    %2 = tpu.concatenate %1, %0, %1 in 1 : vector<2x1x28xf32>, vector<2x28x28xf32>, vector<2x1x28xf32> -> vector<2x30x28xf32>
    %cst_2 = arith.constant 0.000000e+00 : f32
    %3 = vector.broadcast %cst_2 : f32 to vector<2x30x1xf32>
    %4 = tpu.concatenate %3, %2, %3 in 2 : vector<2x30x1xf32>, vector<2x30x28xf32>, vector<2x30x1xf32> -> vector<2x30x30xf32>
    %5 = vector.extract_strided_slice %4 {offsets = [0, 0, 0], sizes = [2, 29, 29], strides = [1, 1, 1]} : vector<2x30x30xf32> to vector<2x29x29xf32>
    %6 = vector.extract_strided_slice %4 {offsets = [0, 0, 1], sizes = [2, 29, 29], strides = [1, 1, 1]} : vector<2x30x30xf32> to vector<2x29x29xf32>
    %7 = vector.extract_strided_slice %4 {offsets = [0, 1, 0], sizes = [2, 29, 29], strides = [1, 1, 1]} : vector<2x30x30xf32> to vector<2x29x29xf32>
    %8 = vector.extract_strided_slice %4 {offsets = [0, 1, 1], sizes = [2, 29, 29], strides = [1, 1, 1]} : vector<2x30x30xf32> to vector<2x29x29xf32>
    %c0_3 = arith.constant 0 : index
    %9 = memref.load %arg1[%c0_3] : memref<8xf32, #tpu.memory_space<smem>>
    %10 = vector.broadcast %9 : f32 to vector<2x29x29xf32>
    %11 = arith.mulf %10, %5 : vector<2x29x29xf32>
    %c1 = arith.constant 1 : index
    %12 = memref.load %arg1[%c1] : memref<8xf32, #tpu.memory_space<smem>>
    %13 = vector.broadcast %12 : f32 to vector<2x29x29xf32>
    %14 = arith.mulf %13, %6 : vector<2x29x29xf32>
    %15 = arith.addf %11, %14 : vector<2x29x29xf32>
    %c2 = arith.constant 2 : index
    %16 = memref.load %arg1[%c2] : memref<8xf32, #tpu.memory_space<smem>>
    %17 = vector.broadcast %16 : f32 to vector<2x29x29xf32>
    %18 = arith.mulf %17, %7 : vector<2x29x29xf32>
    %19 = arith.addf %15, %18 : vector<2x29x29xf32>
    %c3 = arith.constant 3 : index
    %20 = memref.load %arg1[%c3] : memref<8xf32, #tpu.memory_space<smem>>
    %21 = vector.broadcast %20 : f32 to vector<2x29x29xf32>
    %22 = arith.mulf %21, %8 : vector<2x29x29xf32>
    %23 = arith.addf %19, %22 : vector<2x29x29xf32>
    %c0_4 = arith.constant 0 : index
    %24 = memref.load %arg2[%c0_4] : memref<2xf32, #tpu.memory_space<smem>>
    %25 = vector.broadcast %24 : f32 to vector<2x29x29xf32>
    %26 = arith.addf %23, %25 : vector<2x29x29xf32>
    %27 = vector.extract_strided_slice %26 {offsets = [0, 0, 0], sizes = [2, 28, 28], strides = [1, 1, 1]} : vector<2x29x29xf32> to vector<2x28x28xf32>
    %28 = vector.extract_strided_slice %26 {offsets = [0, 1, 0], sizes = [2, 28, 28], strides = [1, 1, 1]} : vector<2x29x29xf32> to vector<2x28x28xf32>
    %29 = arith.maximumf %27, %28 : vector<2x28x28xf32>
    %30 = vector.extract_strided_slice %26 {offsets = [0, 0, 1], sizes = [2, 28, 28], strides = [1, 1, 1]} : vector<2x29x29xf32> to vector<2x28x28xf32>
    %31 = vector.extract_strided_slice %26 {offsets = [0, 1, 1], sizes = [2, 28, 28], strides = [1, 1, 1]} : vector<2x29x29xf32> to vector<2x28x28xf32>
    %32 = arith.maximumf %30, %31 : vector<2x28x28xf32>
    %33 = arith.maximumf %29, %32 : vector<2x28x28xf32>
    %c4 = arith.constant 4 : index
    %34 = memref.load %arg1[%c4] : memref<8xf32, #tpu.memory_space<smem>>
    %35 = vector.broadcast %34 : f32 to vector<2x29x29xf32>
    %36 = arith.mulf %35, %5 : vector<2x29x29xf32>
    %c5 = arith.constant 5 : index
    %37 = memref.load %arg1[%c5] : memref<8xf32, #tpu.memory_space<smem>>
    %38 = vector.broadcast %37 : f32 to vector<2x29x29xf32>
    %39 = arith.mulf %38, %6 : vector<2x29x29xf32>
    %40 = arith.addf %36, %39 : vector<2x29x29xf32>
    %c6 = arith.constant 6 : index
    %41 = memref.load %arg1[%c6] : memref<8xf32, #tpu.memory_space<smem>>
    %42 = vector.broadcast %41 : f32 to vector<2x29x29xf32>
    %43 = arith.mulf %42, %7 : vector<2x29x29xf32>
    %44 = arith.addf %40, %43 : vector<2x29x29xf32>
    %c7 = arith.constant 7 : index
    %45 = memref.load %arg1[%c7] : memref<8xf32, #tpu.memory_space<smem>>
    %46 = vector.broadcast %45 : f32 to vector<2x29x29xf32>
    %47 = arith.mulf %46, %8 : vector<2x29x29xf32>
    %48 = arith.addf %44, %47 : vector<2x29x29xf32>
    %c1_5 = arith.constant 1 : index
    %49 = memref.load %arg2[%c1_5] : memref<2xf32, #tpu.memory_space<smem>>
    %50 = vector.broadcast %49 : f32 to vector<2x29x29xf32>
    %51 = arith.addf %48, %50 : vector<2x29x29xf32>
    %52 = vector.extract_strided_slice %51 {offsets = [0, 0, 0], sizes = [2, 28, 28], strides = [1, 1, 1]} : vector<2x29x29xf32> to vector<2x28x28xf32>
    %53 = vector.extract_strided_slice %51 {offsets = [0, 1, 0], sizes = [2, 28, 28], strides = [1, 1, 1]} : vector<2x29x29xf32> to vector<2x28x28xf32>
    %54 = arith.maximumf %52, %53 : vector<2x28x28xf32>
    %55 = vector.extract_strided_slice %51 {offsets = [0, 0, 1], sizes = [2, 28, 28], strides = [1, 1, 1]} : vector<2x29x29xf32> to vector<2x28x28xf32>
    %56 = vector.extract_strided_slice %51 {offsets = [0, 1, 1], sizes = [2, 28, 28], strides = [1, 1, 1]} : vector<2x29x29xf32> to vector<2x28x28xf32>
    %57 = arith.maximumf %55, %56 : vector<2x28x28xf32>
    %58 = arith.maximumf %54, %57 : vector<2x28x28xf32>
    %59 = tpu.concatenate %33, %58 in 0 : vector<2x28x28xf32>, vector<2x28x28xf32> -> vector<4x28x28xf32>
    %60 = tpu.iota {dimensions = array<i32: 0>} : vector<14x28xi32>
    %61 = tpu.iota {dimensions = array<i32: 1>} : vector<14x28xi32>
    %c2_i32 = arith.constant 2 : i32
    %62 = vector.broadcast %c2_i32 : i32 to vector<14x28xi32>
    %63 = arith.muli %62, %60 : vector<14x28xi32>
    %64 = arith.cmpi eq, %61, %63 : vector<14x28xi32>
    %65 = arith.extui %64 : vector<14x28xi1> to vector<14x28xi32>
    %66 = arith.sitofp %65 : vector<14x28xi32> to vector<14x28xf32>
    %67 = vector.shape_cast %66 : vector<14x28xf32> to vector<1x14x28xf32>
    %68 = vector.shape_cast %67 : vector<1x14x28xf32> to vector<1x14x28xf32>
    %69 = vector.broadcast %68 : vector<1x14x28xf32> to vector<4x14x28xf32>
    %70 = tpu.iota {dimensions = array<i32: 0>} : vector<28x14xi32>
    %71 = tpu.iota {dimensions = array<i32: 1>} : vector<28x14xi32>
    %c2_i32_6 = arith.constant 2 : i32
    %72 = vector.broadcast %c2_i32_6 : i32 to vector<28x14xi32>
    %73 = arith.muli %72, %71 : vector<28x14xi32>
    %74 = arith.cmpi eq, %70, %73 : vector<28x14xi32>
    %75 = arith.extui %74 : vector<28x14xi1> to vector<28x14xi32>
    %76 = arith.sitofp %75 : vector<28x14xi32> to vector<28x14xf32>
    %77 = vector.shape_cast %76 : vector<28x14xf32> to vector<1x28x14xf32>
    %78 = vector.shape_cast %77 : vector<1x28x14xf32> to vector<1x28x14xf32>
    %79 = vector.broadcast %78 : vector<1x28x14xf32> to vector<4x28x14xf32>
    "tpu.trace_start"() <{level = 10 : i32, message = "bph,bhw->bpw"}> : () -> ()
    %cst_7 = arith.constant dense<0.000000e+00> : vector<4x14x28xf32>
    %80 = tpu.matmul %69, %59, %cst_7 {dimension_numbers = #tpu.dot_dimension_numbers<[2], [1], [1], [2], [0, 0, 0, 1, 1, 2], [0], [0]>, precision = #tpu.contract_precision<fp32>} : vector<4x14x28xf32>, vector<4x28x28xf32>, vector<4x14x28xf32> -> vector<4x14x28xf32>
    "tpu.trace_stop"() : () -> ()
    "tpu.trace_start"() <{level = 10 : i32, message = "bpw,bwq->bpq"}> : () -> ()
    %cst_8 = arith.constant dense<0.000000e+00> : vector<4x14x14xf32>
    %81 = tpu.matmul %80, %79, %cst_8 {dimension_numbers = #tpu.dot_dimension_numbers<[2], [1], [1], [2], [0, 0, 0, 1, 1, 2], [0], [0]>, precision = #tpu.contract_precision<fp32>} : vector<4x14x28xf32>, vector<4x28x14xf32>, vector<4x14x14xf32> -> vector<4x14x14xf32>
    "tpu.trace_stop"() : () -> ()
    %cst_9 = arith.constant 0.000000e+00 : f32
    %82 = vector.broadcast %cst_9 : f32 to vector<4x14x14xf32>
    %83 = arith.maximumf %81, %82 : vector<4x14x14xf32>
    %cst_10 = arith.constant 0.000000e+00 : f32
    %84 = vector.broadcast %cst_10 : f32 to vector<4x1x14xf32>
    %85 = tpu.concatenate %84, %83, %84 in 1 : vector<4x1x14xf32>, vector<4x14x14xf32>, vector<4x1x14xf32> -> vector<4x16x14xf32>
    %cst_11 = arith.constant 0.000000e+00 : f32
    %86 = vector.broadcast %cst_11 : f32 to vector<4x16x1xf32>
    %87 = tpu.concatenate %86, %85, %86 in 2 : vector<4x16x1xf32>, vector<4x16x14xf32>, vector<4x16x1xf32> -> vector<4x16x16xf32>
    %88 = vector.extract_strided_slice %87 {offsets = [0, 0, 0], sizes = [2, 16, 16], strides = [1, 1, 1]} : vector<4x16x16xf32> to vector<2x16x16xf32>
    %89 = vector.extract_strided_slice %88 {offsets = [0, 0, 0], sizes = [2, 15, 15], strides = [1, 1, 1]} : vector<2x16x16xf32> to vector<2x15x15xf32>
    %90 = vector.extract_strided_slice %88 {offsets = [0, 0, 1], sizes = [2, 15, 15], strides = [1, 1, 1]} : vector<2x16x16xf32> to vector<2x15x15xf32>
    %91 = vector.extract_strided_slice %88 {offsets = [0, 1, 0], sizes = [2, 15, 15], strides = [1, 1, 1]} : vector<2x16x16xf32> to vector<2x15x15xf32>
    %92 = vector.extract_strided_slice %88 {offsets = [0, 1, 1], sizes = [2, 15, 15], strides = [1, 1, 1]} : vector<2x16x16xf32> to vector<2x15x15xf32>
    %93 = vector.extract_strided_slice %87 {offsets = [2, 0, 0], sizes = [2, 16, 16], strides = [1, 1, 1]} : vector<4x16x16xf32> to vector<2x16x16xf32>
    %94 = vector.extract_strided_slice %93 {offsets = [0, 0, 0], sizes = [2, 15, 15], strides = [1, 1, 1]} : vector<2x16x16xf32> to vector<2x15x15xf32>
    %95 = vector.extract_strided_slice %93 {offsets = [0, 0, 1], sizes = [2, 15, 15], strides = [1, 1, 1]} : vector<2x16x16xf32> to vector<2x15x15xf32>
    %96 = vector.extract_strided_slice %93 {offsets = [0, 1, 0], sizes = [2, 15, 15], strides = [1, 1, 1]} : vector<2x16x16xf32> to vector<2x15x15xf32>
    %97 = vector.extract_strided_slice %93 {offsets = [0, 1, 1], sizes = [2, 15, 15], strides = [1, 1, 1]} : vector<2x16x16xf32> to vector<2x15x15xf32>
    %c0_12 = arith.constant 0 : index
    %98 = memref.load %arg3[%c0_12] : memref<32xf32, #tpu.memory_space<smem>>
    %99 = vector.broadcast %98 : f32 to vector<2x15x15xf32>
    %100 = arith.mulf %99, %89 : vector<2x15x15xf32>
    %c1_13 = arith.constant 1 : index
    %101 = memref.load %arg3[%c1_13] : memref<32xf32, #tpu.memory_space<smem>>
    %102 = vector.broadcast %101 : f32 to vector<2x15x15xf32>
    %103 = arith.mulf %102, %90 : vector<2x15x15xf32>
    %104 = arith.addf %100, %103 : vector<2x15x15xf32>
    %c2_14 = arith.constant 2 : index
    %105 = memref.load %arg3[%c2_14] : memref<32xf32, #tpu.memory_space<smem>>
    %106 = vector.broadcast %105 : f32 to vector<2x15x15xf32>
    %107 = arith.mulf %106, %91 : vector<2x15x15xf32>
    %108 = arith.addf %104, %107 : vector<2x15x15xf32>
    %c3_15 = arith.constant 3 : index
    %109 = memref.load %arg3[%c3_15] : memref<32xf32, #tpu.memory_space<smem>>
    %110 = vector.broadcast %109 : f32 to vector<2x15x15xf32>
    %111 = arith.mulf %110, %92 : vector<2x15x15xf32>
    %112 = arith.addf %108, %111 : vector<2x15x15xf32>
    %c4_16 = arith.constant 4 : index
    %113 = memref.load %arg3[%c4_16] : memref<32xf32, #tpu.memory_space<smem>>
    %114 = vector.broadcast %113 : f32 to vector<2x15x15xf32>
    %115 = arith.mulf %114, %94 : vector<2x15x15xf32>
    %116 = arith.addf %112, %115 : vector<2x15x15xf32>
    %c5_17 = arith.constant 5 : index
    %117 = memref.load %arg3[%c5_17] : memref<32xf32, #tpu.memory_space<smem>>
    %118 = vector.broadcast %117 : f32 to vector<2x15x15xf32>
    %119 = arith.mulf %118, %95 : vector<2x15x15xf32>
    %120 = arith.addf %116, %119 : vector<2x15x15xf32>
    %c6_18 = arith.constant 6 : index
    %121 = memref.load %arg3[%c6_18] : memref<32xf32, #tpu.memory_space<smem>>
    %122 = vector.broadcast %121 : f32 to vector<2x15x15xf32>
    %123 = arith.mulf %122, %96 : vector<2x15x15xf32>
    %124 = arith.addf %120, %123 : vector<2x15x15xf32>
    %c7_19 = arith.constant 7 : index
    %125 = memref.load %arg3[%c7_19] : memref<32xf32, #tpu.memory_space<smem>>
    %126 = vector.broadcast %125 : f32 to vector<2x15x15xf32>
    %127 = arith.mulf %126, %97 : vector<2x15x15xf32>
    %128 = arith.addf %124, %127 : vector<2x15x15xf32>
    %c0_20 = arith.constant 0 : index
    %129 = memref.load %arg4[%c0_20] : memref<4xf32, #tpu.memory_space<smem>>
    %130 = vector.broadcast %129 : f32 to vector<2x15x15xf32>
    %131 = arith.addf %128, %130 : vector<2x15x15xf32>
    %132 = vector.extract_strided_slice %131 {offsets = [0, 0, 0], sizes = [2, 14, 14], strides = [1, 1, 1]} : vector<2x15x15xf32> to vector<2x14x14xf32>
    %133 = vector.extract_strided_slice %131 {offsets = [0, 1, 0], sizes = [2, 14, 14], strides = [1, 1, 1]} : vector<2x15x15xf32> to vector<2x14x14xf32>
    %134 = arith.maximumf %132, %133 : vector<2x14x14xf32>
    %135 = vector.extract_strided_slice %131 {offsets = [0, 0, 1], sizes = [2, 14, 14], strides = [1, 1, 1]} : vector<2x15x15xf32> to vector<2x14x14xf32>
    %136 = vector.extract_strided_slice %131 {offsets = [0, 1, 1], sizes = [2, 14, 14], strides = [1, 1, 1]} : vector<2x15x15xf32> to vector<2x14x14xf32>
    %137 = arith.maximumf %135, %136 : vector<2x14x14xf32>
    %138 = arith.maximumf %134, %137 : vector<2x14x14xf32>
    %c8 = arith.constant 8 : index
    %139 = memref.load %arg3[%c8] : memref<32xf32, #tpu.memory_space<smem>>
    %140 = vector.broadcast %139 : f32 to vector<2x15x15xf32>
    %141 = arith.mulf %140, %89 : vector<2x15x15xf32>
    %c9 = arith.constant 9 : index
    %142 = memref.load %arg3[%c9] : memref<32xf32, #tpu.memory_space<smem>>
    %143 = vector.broadcast %142 : f32 to vector<2x15x15xf32>
    %144 = arith.mulf %143, %90 : vector<2x15x15xf32>
    %145 = arith.addf %141, %144 : vector<2x15x15xf32>
    %c10 = arith.constant 10 : index
    %146 = memref.load %arg3[%c10] : memref<32xf32, #tpu.memory_space<smem>>
    %147 = vector.broadcast %146 : f32 to vector<2x15x15xf32>
    %148 = arith.mulf %147, %91 : vector<2x15x15xf32>
    %149 = arith.addf %145, %148 : vector<2x15x15xf32>
    %c11 = arith.constant 11 : index
    %150 = memref.load %arg3[%c11] : memref<32xf32, #tpu.memory_space<smem>>
    %151 = vector.broadcast %150 : f32 to vector<2x15x15xf32>
    %152 = arith.mulf %151, %92 : vector<2x15x15xf32>
    %153 = arith.addf %149, %152 : vector<2x15x15xf32>
    %c12 = arith.constant 12 : index
    %154 = memref.load %arg3[%c12] : memref<32xf32, #tpu.memory_space<smem>>
    %155 = vector.broadcast %154 : f32 to vector<2x15x15xf32>
    %156 = arith.mulf %155, %94 : vector<2x15x15xf32>
    %157 = arith.addf %153, %156 : vector<2x15x15xf32>
    %c13 = arith.constant 13 : index
    %158 = memref.load %arg3[%c13] : memref<32xf32, #tpu.memory_space<smem>>
    %159 = vector.broadcast %158 : f32 to vector<2x15x15xf32>
    %160 = arith.mulf %159, %95 : vector<2x15x15xf32>
    %161 = arith.addf %157, %160 : vector<2x15x15xf32>
    %c14 = arith.constant 14 : index
    %162 = memref.load %arg3[%c14] : memref<32xf32, #tpu.memory_space<smem>>
    %163 = vector.broadcast %162 : f32 to vector<2x15x15xf32>
    %164 = arith.mulf %163, %96 : vector<2x15x15xf32>
    %165 = arith.addf %161, %164 : vector<2x15x15xf32>
    %c15 = arith.constant 15 : index
    %166 = memref.load %arg3[%c15] : memref<32xf32, #tpu.memory_space<smem>>
    %167 = vector.broadcast %166 : f32 to vector<2x15x15xf32>
    %168 = arith.mulf %167, %97 : vector<2x15x15xf32>
    %169 = arith.addf %165, %168 : vector<2x15x15xf32>
    %c1_21 = arith.constant 1 : index
    %170 = memref.load %arg4[%c1_21] : memref<4xf32, #tpu.memory_space<smem>>
    %171 = vector.broadcast %170 : f32 to vector<2x15x15xf32>
    %172 = arith.addf %169, %171 : vector<2x15x15xf32>
    %173 = vector.extract_strided_slice %172 {offsets = [0, 0, 0], sizes = [2, 14, 14], strides = [1, 1, 1]} : vector<2x15x15xf32> to vector<2x14x14xf32>
    %174 = vector.extract_strided_slice %172 {offsets = [0, 1, 0], sizes = [2, 14, 14], strides = [1, 1, 1]} : vector<2x15x15xf32> to vector<2x14x14xf32>
    %175 = arith.maximumf %173, %174 : vector<2x14x14xf32>
    %176 = vector.extract_strided_slice %172 {offsets = [0, 0, 1], sizes = [2, 14, 14], strides = [1, 1, 1]} : vector<2x15x15xf32> to vector<2x14x14xf32>
    %177 = vector.extract_strided_slice %172 {offsets = [0, 1, 1], sizes = [2, 14, 14], strides = [1, 1, 1]} : vector<2x15x15xf32> to vector<2x14x14xf32>
    %178 = arith.maximumf %176, %177 : vector<2x14x14xf32>
    %179 = arith.maximumf %175, %178 : vector<2x14x14xf32>
    %c16 = arith.constant 16 : index
    %180 = memref.load %arg3[%c16] : memref<32xf32, #tpu.memory_space<smem>>
    %181 = vector.broadcast %180 : f32 to vector<2x15x15xf32>
    %182 = arith.mulf %181, %89 : vector<2x15x15xf32>
    %c17 = arith.constant 17 : index
    %183 = memref.load %arg3[%c17] : memref<32xf32, #tpu.memory_space<smem>>
    %184 = vector.broadcast %183 : f32 to vector<2x15x15xf32>
    %185 = arith.mulf %184, %90 : vector<2x15x15xf32>
    %186 = arith.addf %182, %185 : vector<2x15x15xf32>
    %c18 = arith.constant 18 : index
    %187 = memref.load %arg3[%c18] : memref<32xf32, #tpu.memory_space<smem>>
    %188 = vector.broadcast %187 : f32 to vector<2x15x15xf32>
    %189 = arith.mulf %188, %91 : vector<2x15x15xf32>
    %190 = arith.addf %186, %189 : vector<2x15x15xf32>
    %c19 = arith.constant 19 : index
    %191 = memref.load %arg3[%c19] : memref<32xf32, #tpu.memory_space<smem>>
    %192 = vector.broadcast %191 : f32 to vector<2x15x15xf32>
    %193 = arith.mulf %192, %92 : vector<2x15x15xf32>
    %194 = arith.addf %190, %193 : vector<2x15x15xf32>
    %c20 = arith.constant 20 : index
    %195 = memref.load %arg3[%c20] : memref<32xf32, #tpu.memory_space<smem>>
    %196 = vector.broadcast %195 : f32 to vector<2x15x15xf32>
    %197 = arith.mulf %196, %94 : vector<2x15x15xf32>
    %198 = arith.addf %194, %197 : vector<2x15x15xf32>
    %c21 = arith.constant 21 : index
    %199 = memref.load %arg3[%c21] : memref<32xf32, #tpu.memory_space<smem>>
    %200 = vector.broadcast %199 : f32 to vector<2x15x15xf32>
    %201 = arith.mulf %200, %95 : vector<2x15x15xf32>
    %202 = arith.addf %198, %201 : vector<2x15x15xf32>
    %c22 = arith.constant 22 : index
    %203 = memref.load %arg3[%c22] : memref<32xf32, #tpu.memory_space<smem>>
    %204 = vector.broadcast %203 : f32 to vector<2x15x15xf32>
    %205 = arith.mulf %204, %96 : vector<2x15x15xf32>
    %206 = arith.addf %202, %205 : vector<2x15x15xf32>
    %c23 = arith.constant 23 : index
    %207 = memref.load %arg3[%c23] : memref<32xf32, #tpu.memory_space<smem>>
    %208 = vector.broadcast %207 : f32 to vector<2x15x15xf32>
    %209 = arith.mulf %208, %97 : vector<2x15x15xf32>
    %210 = arith.addf %206, %209 : vector<2x15x15xf32>
    %c2_22 = arith.constant 2 : index
    %211 = memref.load %arg4[%c2_22] : memref<4xf32, #tpu.memory_space<smem>>
    %212 = vector.broadcast %211 : f32 to vector<2x15x15xf32>
    %213 = arith.addf %210, %212 : vector<2x15x15xf32>
    %214 = vector.extract_strided_slice %213 {offsets = [0, 0, 0], sizes = [2, 14, 14], strides = [1, 1, 1]} : vector<2x15x15xf32> to vector<2x14x14xf32>
    %215 = vector.extract_strided_slice %213 {offsets = [0, 1, 0], sizes = [2, 14, 14], strides = [1, 1, 1]} : vector<2x15x15xf32> to vector<2x14x14xf32>
    %216 = arith.maximumf %214, %215 : vector<2x14x14xf32>
    %217 = vector.extract_strided_slice %213 {offsets = [0, 0, 1], sizes = [2, 14, 14], strides = [1, 1, 1]} : vector<2x15x15xf32> to vector<2x14x14xf32>
    %218 = vector.extract_strided_slice %213 {offsets = [0, 1, 1], sizes = [2, 14, 14], strides = [1, 1, 1]} : vector<2x15x15xf32> to vector<2x14x14xf32>
    %219 = arith.maximumf %217, %218 : vector<2x14x14xf32>
    %220 = arith.maximumf %216, %219 : vector<2x14x14xf32>
    %c24 = arith.constant 24 : index
    %221 = memref.load %arg3[%c24] : memref<32xf32, #tpu.memory_space<smem>>
    %222 = vector.broadcast %221 : f32 to vector<2x15x15xf32>
    %223 = arith.mulf %222, %89 : vector<2x15x15xf32>
    %c25 = arith.constant 25 : index
    %224 = memref.load %arg3[%c25] : memref<32xf32, #tpu.memory_space<smem>>
    %225 = vector.broadcast %224 : f32 to vector<2x15x15xf32>
    %226 = arith.mulf %225, %90 : vector<2x15x15xf32>
    %227 = arith.addf %223, %226 : vector<2x15x15xf32>
    %c26 = arith.constant 26 : index
    %228 = memref.load %arg3[%c26] : memref<32xf32, #tpu.memory_space<smem>>
    %229 = vector.broadcast %228 : f32 to vector<2x15x15xf32>
    %230 = arith.mulf %229, %91 : vector<2x15x15xf32>
    %231 = arith.addf %227, %230 : vector<2x15x15xf32>
    %c27 = arith.constant 27 : index
    %232 = memref.load %arg3[%c27] : memref<32xf32, #tpu.memory_space<smem>>
    %233 = vector.broadcast %232 : f32 to vector<2x15x15xf32>
    %234 = arith.mulf %233, %92 : vector<2x15x15xf32>
    %235 = arith.addf %231, %234 : vector<2x15x15xf32>
    %c28 = arith.constant 28 : index
    %236 = memref.load %arg3[%c28] : memref<32xf32, #tpu.memory_space<smem>>
    %237 = vector.broadcast %236 : f32 to vector<2x15x15xf32>
    %238 = arith.mulf %237, %94 : vector<2x15x15xf32>
    %239 = arith.addf %235, %238 : vector<2x15x15xf32>
    %c29 = arith.constant 29 : index
    %240 = memref.load %arg3[%c29] : memref<32xf32, #tpu.memory_space<smem>>
    %241 = vector.broadcast %240 : f32 to vector<2x15x15xf32>
    %242 = arith.mulf %241, %95 : vector<2x15x15xf32>
    %243 = arith.addf %239, %242 : vector<2x15x15xf32>
    %c30 = arith.constant 30 : index
    %244 = memref.load %arg3[%c30] : memref<32xf32, #tpu.memory_space<smem>>
    %245 = vector.broadcast %244 : f32 to vector<2x15x15xf32>
    %246 = arith.mulf %245, %96 : vector<2x15x15xf32>
    %247 = arith.addf %243, %246 : vector<2x15x15xf32>
    %c31 = arith.constant 31 : index
    %248 = memref.load %arg3[%c31] : memref<32xf32, #tpu.memory_space<smem>>
    %249 = vector.broadcast %248 : f32 to vector<2x15x15xf32>
    %250 = arith.mulf %249, %97 : vector<2x15x15xf32>
    %251 = arith.addf %247, %250 : vector<2x15x15xf32>
    %c3_23 = arith.constant 3 : index
    %252 = memref.load %arg4[%c3_23] : memref<4xf32, #tpu.memory_space<smem>>
    %253 = vector.broadcast %252 : f32 to vector<2x15x15xf32>
    %254 = arith.addf %251, %253 : vector<2x15x15xf32>
    %255 = vector.extract_strided_slice %254 {offsets = [0, 0, 0], sizes = [2, 14, 14], strides = [1, 1, 1]} : vector<2x15x15xf32> to vector<2x14x14xf32>
    %256 = vector.extract_strided_slice %254 {offsets = [0, 1, 0], sizes = [2, 14, 14], strides = [1, 1, 1]} : vector<2x15x15xf32> to vector<2x14x14xf32>
    %257 = arith.maximumf %255, %256 : vector<2x14x14xf32>
    %258 = vector.extract_strided_slice %254 {offsets = [0, 0, 1], sizes = [2, 14, 14], strides = [1, 1, 1]} : vector<2x15x15xf32> to vector<2x14x14xf32>
    %259 = vector.extract_strided_slice %254 {offsets = [0, 1, 1], sizes = [2, 14, 14], strides = [1, 1, 1]} : vector<2x15x15xf32> to vector<2x14x14xf32>
    %260 = arith.maximumf %258, %259 : vector<2x14x14xf32>
    %261 = arith.maximumf %257, %260 : vector<2x14x14xf32>
    %262 = tpu.concatenate %138, %179, %220, %261 in 0 : vector<2x14x14xf32>, vector<2x14x14xf32>, vector<2x14x14xf32>, vector<2x14x14xf32> -> vector<8x14x14xf32>
    %263 = tpu.iota {dimensions = array<i32: 0>} : vector<7x14xi32>
    %264 = tpu.iota {dimensions = array<i32: 1>} : vector<7x14xi32>
    %c2_i32_24 = arith.constant 2 : i32
    %265 = vector.broadcast %c2_i32_24 : i32 to vector<7x14xi32>
    %266 = arith.muli %265, %263 : vector<7x14xi32>
    %267 = arith.cmpi eq, %264, %266 : vector<7x14xi32>
    %268 = arith.extui %267 : vector<7x14xi1> to vector<7x14xi32>
    %269 = arith.sitofp %268 : vector<7x14xi32> to vector<7x14xf32>
    %270 = vector.shape_cast %269 : vector<7x14xf32> to vector<1x7x14xf32>
    %271 = vector.shape_cast %270 : vector<1x7x14xf32> to vector<1x7x14xf32>
    %272 = vector.broadcast %271 : vector<1x7x14xf32> to vector<8x7x14xf32>
    %273 = tpu.iota {dimensions = array<i32: 0>} : vector<14x7xi32>
    %274 = tpu.iota {dimensions = array<i32: 1>} : vector<14x7xi32>
    %c2_i32_25 = arith.constant 2 : i32
    %275 = vector.broadcast %c2_i32_25 : i32 to vector<14x7xi32>
    %276 = arith.muli %275, %274 : vector<14x7xi32>
    %277 = arith.cmpi eq, %273, %276 : vector<14x7xi32>
    %278 = arith.extui %277 : vector<14x7xi1> to vector<14x7xi32>
    %279 = arith.sitofp %278 : vector<14x7xi32> to vector<14x7xf32>
    %280 = vector.shape_cast %279 : vector<14x7xf32> to vector<1x14x7xf32>
    %281 = vector.shape_cast %280 : vector<1x14x7xf32> to vector<1x14x7xf32>
    %282 = vector.broadcast %281 : vector<1x14x7xf32> to vector<8x14x7xf32>
    "tpu.trace_start"() <{level = 10 : i32, message = "bph,bhw->bpw"}> : () -> ()
    %cst_26 = arith.constant dense<0.000000e+00> : vector<8x7x14xf32>
    %283 = tpu.matmul %272, %262, %cst_26 {dimension_numbers = #tpu.dot_dimension_numbers<[2], [1], [1], [2], [0, 0, 0, 1, 1, 2], [0], [0]>, precision = #tpu.contract_precision<fp32>} : vector<8x7x14xf32>, vector<8x14x14xf32>, vector<8x7x14xf32> -> vector<8x7x14xf32>
    "tpu.trace_stop"() : () -> ()
    "tpu.trace_start"() <{level = 10 : i32, message = "bpw,bwq->bpq"}> : () -> ()
    %cst_27 = arith.constant dense<0.000000e+00> : vector<8x7x7xf32>
    %284 = tpu.matmul %283, %282, %cst_27 {dimension_numbers = #tpu.dot_dimension_numbers<[2], [1], [1], [2], [0, 0, 0, 1, 1, 2], [0], [0]>, precision = #tpu.contract_precision<fp32>} : vector<8x7x14xf32>, vector<8x14x7xf32>, vector<8x7x7xf32> -> vector<8x7x7xf32>
    "tpu.trace_stop"() : () -> ()
    %cst_28 = arith.constant 0.000000e+00 : f32
    %285 = vector.broadcast %cst_28 : f32 to vector<8x7x7xf32>
    %286 = arith.maximumf %284, %285 : vector<8x7x7xf32>
    %cst_29 = arith.constant 0.000000e+00 : f32
    %287 = vector.broadcast %cst_29 : f32 to vector<8x1x7xf32>
    %288 = tpu.concatenate %287, %286, %287 in 1 : vector<8x1x7xf32>, vector<8x7x7xf32>, vector<8x1x7xf32> -> vector<8x9x7xf32>
    %cst_30 = arith.constant 0.000000e+00 : f32
    %289 = vector.broadcast %cst_30 : f32 to vector<8x9x1xf32>
    %290 = tpu.concatenate %289, %288, %289 in 2 : vector<8x9x1xf32>, vector<8x9x7xf32>, vector<8x9x1xf32> -> vector<8x9x9xf32>
    %291 = vector.extract_strided_slice %290 {offsets = [0, 0, 0], sizes = [2, 9, 9], strides = [1, 1, 1]} : vector<8x9x9xf32> to vector<2x9x9xf32>
    %292 = vector.extract_strided_slice %291 {offsets = [0, 0, 0], sizes = [2, 8, 8], strides = [1, 1, 1]} : vector<2x9x9xf32> to vector<2x8x8xf32>
    %293 = vector.extract_strided_slice %291 {offsets = [0, 0, 1], sizes = [2, 8, 8], strides = [1, 1, 1]} : vector<2x9x9xf32> to vector<2x8x8xf32>
    %294 = vector.extract_strided_slice %291 {offsets = [0, 1, 0], sizes = [2, 8, 8], strides = [1, 1, 1]} : vector<2x9x9xf32> to vector<2x8x8xf32>
    %295 = vector.extract_strided_slice %291 {offsets = [0, 1, 1], sizes = [2, 8, 8], strides = [1, 1, 1]} : vector<2x9x9xf32> to vector<2x8x8xf32>
    %296 = vector.extract_strided_slice %290 {offsets = [2, 0, 0], sizes = [2, 9, 9], strides = [1, 1, 1]} : vector<8x9x9xf32> to vector<2x9x9xf32>
    %297 = vector.extract_strided_slice %296 {offsets = [0, 0, 0], sizes = [2, 8, 8], strides = [1, 1, 1]} : vector<2x9x9xf32> to vector<2x8x8xf32>
    %298 = vector.extract_strided_slice %296 {offsets = [0, 0, 1], sizes = [2, 8, 8], strides = [1, 1, 1]} : vector<2x9x9xf32> to vector<2x8x8xf32>
    %299 = vector.extract_strided_slice %296 {offsets = [0, 1, 0], sizes = [2, 8, 8], strides = [1, 1, 1]} : vector<2x9x9xf32> to vector<2x8x8xf32>
    %300 = vector.extract_strided_slice %296 {offsets = [0, 1, 1], sizes = [2, 8, 8], strides = [1, 1, 1]} : vector<2x9x9xf32> to vector<2x8x8xf32>
    %301 = vector.extract_strided_slice %290 {offsets = [4, 0, 0], sizes = [2, 9, 9], strides = [1, 1, 1]} : vector<8x9x9xf32> to vector<2x9x9xf32>
    %302 = vector.extract_strided_slice %301 {offsets = [0, 0, 0], sizes = [2, 8, 8], strides = [1, 1, 1]} : vector<2x9x9xf32> to vector<2x8x8xf32>
    %303 = vector.extract_strided_slice %301 {offsets = [0, 0, 1], sizes = [2, 8, 8], strides = [1, 1, 1]} : vector<2x9x9xf32> to vector<2x8x8xf32>
    %304 = vector.extract_strided_slice %301 {offsets = [0, 1, 0], sizes = [2, 8, 8], strides = [1, 1, 1]} : vector<2x9x9xf32> to vector<2x8x8xf32>
    %305 = vector.extract_strided_slice %301 {offsets = [0, 1, 1], sizes = [2, 8, 8], strides = [1, 1, 1]} : vector<2x9x9xf32> to vector<2x8x8xf32>
    %306 = vector.extract_strided_slice %290 {offsets = [6, 0, 0], sizes = [2, 9, 9], strides = [1, 1, 1]} : vector<8x9x9xf32> to vector<2x9x9xf32>
    %307 = vector.extract_strided_slice %306 {offsets = [0, 0, 0], sizes = [2, 8, 8], strides = [1, 1, 1]} : vector<2x9x9xf32> to vector<2x8x8xf32>
    %308 = vector.extract_strided_slice %306 {offsets = [0, 0, 1], sizes = [2, 8, 8], strides = [1, 1, 1]} : vector<2x9x9xf32> to vector<2x8x8xf32>
    %309 = vector.extract_strided_slice %306 {offsets = [0, 1, 0], sizes = [2, 8, 8], strides = [1, 1, 1]} : vector<2x9x9xf32> to vector<2x8x8xf32>
    %310 = vector.extract_strided_slice %306 {offsets = [0, 1, 1], sizes = [2, 8, 8], strides = [1, 1, 1]} : vector<2x9x9xf32> to vector<2x8x8xf32>
    %c0_31 = arith.constant 0 : index
    %311 = memref.load %arg5[%c0_31] : memref<64xf32, #tpu.memory_space<smem>>
    %312 = vector.broadcast %311 : f32 to vector<2x8x8xf32>
    %313 = arith.mulf %312, %292 : vector<2x8x8xf32>
    %c1_32 = arith.constant 1 : index
    %314 = memref.load %arg5[%c1_32] : memref<64xf32, #tpu.memory_space<smem>>
    %315 = vector.broadcast %314 : f32 to vector<2x8x8xf32>
    %316 = arith.mulf %315, %293 : vector<2x8x8xf32>
    %317 = arith.addf %313, %316 : vector<2x8x8xf32>
    %c2_33 = arith.constant 2 : index
    %318 = memref.load %arg5[%c2_33] : memref<64xf32, #tpu.memory_space<smem>>
    %319 = vector.broadcast %318 : f32 to vector<2x8x8xf32>
    %320 = arith.mulf %319, %294 : vector<2x8x8xf32>
    %321 = arith.addf %317, %320 : vector<2x8x8xf32>
    %c3_34 = arith.constant 3 : index
    %322 = memref.load %arg5[%c3_34] : memref<64xf32, #tpu.memory_space<smem>>
    %323 = vector.broadcast %322 : f32 to vector<2x8x8xf32>
    %324 = arith.mulf %323, %295 : vector<2x8x8xf32>
    %325 = arith.addf %321, %324 : vector<2x8x8xf32>
    %c4_35 = arith.constant 4 : index
    %326 = memref.load %arg5[%c4_35] : memref<64xf32, #tpu.memory_space<smem>>
    %327 = vector.broadcast %326 : f32 to vector<2x8x8xf32>
    %328 = arith.mulf %327, %297 : vector<2x8x8xf32>
    %329 = arith.addf %325, %328 : vector<2x8x8xf32>
    %c5_36 = arith.constant 5 : index
    %330 = memref.load %arg5[%c5_36] : memref<64xf32, #tpu.memory_space<smem>>
    %331 = vector.broadcast %330 : f32 to vector<2x8x8xf32>
    %332 = arith.mulf %331, %298 : vector<2x8x8xf32>
    %333 = arith.addf %329, %332 : vector<2x8x8xf32>
    %c6_37 = arith.constant 6 : index
    %334 = memref.load %arg5[%c6_37] : memref<64xf32, #tpu.memory_space<smem>>
    %335 = vector.broadcast %334 : f32 to vector<2x8x8xf32>
    %336 = arith.mulf %335, %299 : vector<2x8x8xf32>
    %337 = arith.addf %333, %336 : vector<2x8x8xf32>
    %c7_38 = arith.constant 7 : index
    %338 = memref.load %arg5[%c7_38] : memref<64xf32, #tpu.memory_space<smem>>
    %339 = vector.broadcast %338 : f32 to vector<2x8x8xf32>
    %340 = arith.mulf %339, %300 : vector<2x8x8xf32>
    %341 = arith.addf %337, %340 : vector<2x8x8xf32>
    %c8_39 = arith.constant 8 : index
    %342 = memref.load %arg5[%c8_39] : memref<64xf32, #tpu.memory_space<smem>>
    %343 = vector.broadcast %342 : f32 to vector<2x8x8xf32>
    %344 = arith.mulf %343, %302 : vector<2x8x8xf32>
    %345 = arith.addf %341, %344 : vector<2x8x8xf32>
    %c9_40 = arith.constant 9 : index
    %346 = memref.load %arg5[%c9_40] : memref<64xf32, #tpu.memory_space<smem>>
    %347 = vector.broadcast %346 : f32 to vector<2x8x8xf32>
    %348 = arith.mulf %347, %303 : vector<2x8x8xf32>
    %349 = arith.addf %345, %348 : vector<2x8x8xf32>
    %c10_41 = arith.constant 10 : index
    %350 = memref.load %arg5[%c10_41] : memref<64xf32, #tpu.memory_space<smem>>
    %351 = vector.broadcast %350 : f32 to vector<2x8x8xf32>
    %352 = arith.mulf %351, %304 : vector<2x8x8xf32>
    %353 = arith.addf %349, %352 : vector<2x8x8xf32>
    %c11_42 = arith.constant 11 : index
    %354 = memref.load %arg5[%c11_42] : memref<64xf32, #tpu.memory_space<smem>>
    %355 = vector.broadcast %354 : f32 to vector<2x8x8xf32>
    %356 = arith.mulf %355, %305 : vector<2x8x8xf32>
    %357 = arith.addf %353, %356 : vector<2x8x8xf32>
    %c12_43 = arith.constant 12 : index
    %358 = memref.load %arg5[%c12_43] : memref<64xf32, #tpu.memory_space<smem>>
    %359 = vector.broadcast %358 : f32 to vector<2x8x8xf32>
    %360 = arith.mulf %359, %307 : vector<2x8x8xf32>
    %361 = arith.addf %357, %360 : vector<2x8x8xf32>
    %c13_44 = arith.constant 13 : index
    %362 = memref.load %arg5[%c13_44] : memref<64xf32, #tpu.memory_space<smem>>
    %363 = vector.broadcast %362 : f32 to vector<2x8x8xf32>
    %364 = arith.mulf %363, %308 : vector<2x8x8xf32>
    %365 = arith.addf %361, %364 : vector<2x8x8xf32>
    %c14_45 = arith.constant 14 : index
    %366 = memref.load %arg5[%c14_45] : memref<64xf32, #tpu.memory_space<smem>>
    %367 = vector.broadcast %366 : f32 to vector<2x8x8xf32>
    %368 = arith.mulf %367, %309 : vector<2x8x8xf32>
    %369 = arith.addf %365, %368 : vector<2x8x8xf32>
    %c15_46 = arith.constant 15 : index
    %370 = memref.load %arg5[%c15_46] : memref<64xf32, #tpu.memory_space<smem>>
    %371 = vector.broadcast %370 : f32 to vector<2x8x8xf32>
    %372 = arith.mulf %371, %310 : vector<2x8x8xf32>
    %373 = arith.addf %369, %372 : vector<2x8x8xf32>
    %c0_47 = arith.constant 0 : index
    %374 = memref.load %arg6[%c0_47] : memref<4xf32, #tpu.memory_space<smem>>
    %375 = vector.broadcast %374 : f32 to vector<2x8x8xf32>
    %376 = arith.addf %373, %375 : vector<2x8x8xf32>
    %377 = vector.extract_strided_slice %376 {offsets = [0, 0, 0], sizes = [2, 7, 7], strides = [1, 1, 1]} : vector<2x8x8xf32> to vector<2x7x7xf32>
    %378 = vector.extract_strided_slice %376 {offsets = [0, 1, 0], sizes = [2, 7, 7], strides = [1, 1, 1]} : vector<2x8x8xf32> to vector<2x7x7xf32>
    %379 = arith.maximumf %377, %378 : vector<2x7x7xf32>
    %380 = vector.extract_strided_slice %376 {offsets = [0, 0, 1], sizes = [2, 7, 7], strides = [1, 1, 1]} : vector<2x8x8xf32> to vector<2x7x7xf32>
    %381 = vector.extract_strided_slice %376 {offsets = [0, 1, 1], sizes = [2, 7, 7], strides = [1, 1, 1]} : vector<2x8x8xf32> to vector<2x7x7xf32>
    %382 = arith.maximumf %380, %381 : vector<2x7x7xf32>
    %383 = arith.maximumf %379, %382 : vector<2x7x7xf32>
    %c16_48 = arith.constant 16 : index
    %384 = memref.load %arg5[%c16_48] : memref<64xf32, #tpu.memory_space<smem>>
    %385 = vector.broadcast %384 : f32 to vector<2x8x8xf32>
    %386 = arith.mulf %385, %292 : vector<2x8x8xf32>
    %c17_49 = arith.constant 17 : index
    %387 = memref.load %arg5[%c17_49] : memref<64xf32, #tpu.memory_space<smem>>
    %388 = vector.broadcast %387 : f32 to vector<2x8x8xf32>
    %389 = arith.mulf %388, %293 : vector<2x8x8xf32>
    %390 = arith.addf %386, %389 : vector<2x8x8xf32>
    %c18_50 = arith.constant 18 : index
    %391 = memref.load %arg5[%c18_50] : memref<64xf32, #tpu.memory_space<smem>>
    %392 = vector.broadcast %391 : f32 to vector<2x8x8xf32>
    %393 = arith.mulf %392, %294 : vector<2x8x8xf32>
    %394 = arith.addf %390, %393 : vector<2x8x8xf32>
    %c19_51 = arith.constant 19 : index
    %395 = memref.load %arg5[%c19_51] : memref<64xf32, #tpu.memory_space<smem>>
    %396 = vector.broadcast %395 : f32 to vector<2x8x8xf32>
    %397 = arith.mulf %396, %295 : vector<2x8x8xf32>
    %398 = arith.addf %394, %397 : vector<2x8x8xf32>
    %c20_52 = arith.constant 20 : index
    %399 = memref.load %arg5[%c20_52] : memref<64xf32, #tpu.memory_space<smem>>
    %400 = vector.broadcast %399 : f32 to vector<2x8x8xf32>
    %401 = arith.mulf %400, %297 : vector<2x8x8xf32>
    %402 = arith.addf %398, %401 : vector<2x8x8xf32>
    %c21_53 = arith.constant 21 : index
    %403 = memref.load %arg5[%c21_53] : memref<64xf32, #tpu.memory_space<smem>>
    %404 = vector.broadcast %403 : f32 to vector<2x8x8xf32>
    %405 = arith.mulf %404, %298 : vector<2x8x8xf32>
    %406 = arith.addf %402, %405 : vector<2x8x8xf32>
    %c22_54 = arith.constant 22 : index
    %407 = memref.load %arg5[%c22_54] : memref<64xf32, #tpu.memory_space<smem>>
    %408 = vector.broadcast %407 : f32 to vector<2x8x8xf32>
    %409 = arith.mulf %408, %299 : vector<2x8x8xf32>
    %410 = arith.addf %406, %409 : vector<2x8x8xf32>
    %c23_55 = arith.constant 23 : index
    %411 = memref.load %arg5[%c23_55] : memref<64xf32, #tpu.memory_space<smem>>
    %412 = vector.broadcast %411 : f32 to vector<2x8x8xf32>
    %413 = arith.mulf %412, %300 : vector<2x8x8xf32>
    %414 = arith.addf %410, %413 : vector<2x8x8xf32>
    %c24_56 = arith.constant 24 : index
    %415 = memref.load %arg5[%c24_56] : memref<64xf32, #tpu.memory_space<smem>>
    %416 = vector.broadcast %415 : f32 to vector<2x8x8xf32>
    %417 = arith.mulf %416, %302 : vector<2x8x8xf32>
    %418 = arith.addf %414, %417 : vector<2x8x8xf32>
    %c25_57 = arith.constant 25 : index
    %419 = memref.load %arg5[%c25_57] : memref<64xf32, #tpu.memory_space<smem>>
    %420 = vector.broadcast %419 : f32 to vector<2x8x8xf32>
    %421 = arith.mulf %420, %303 : vector<2x8x8xf32>
    %422 = arith.addf %418, %421 : vector<2x8x8xf32>
    %c26_58 = arith.constant 26 : index
    %423 = memref.load %arg5[%c26_58] : memref<64xf32, #tpu.memory_space<smem>>
    %424 = vector.broadcast %423 : f32 to vector<2x8x8xf32>
    %425 = arith.mulf %424, %304 : vector<2x8x8xf32>
    %426 = arith.addf %422, %425 : vector<2x8x8xf32>
    %c27_59 = arith.constant 27 : index
    %427 = memref.load %arg5[%c27_59] : memref<64xf32, #tpu.memory_space<smem>>
    %428 = vector.broadcast %427 : f32 to vector<2x8x8xf32>
    %429 = arith.mulf %428, %305 : vector<2x8x8xf32>
    %430 = arith.addf %426, %429 : vector<2x8x8xf32>
    %c28_60 = arith.constant 28 : index
    %431 = memref.load %arg5[%c28_60] : memref<64xf32, #tpu.memory_space<smem>>
    %432 = vector.broadcast %431 : f32 to vector<2x8x8xf32>
    %433 = arith.mulf %432, %307 : vector<2x8x8xf32>
    %434 = arith.addf %430, %433 : vector<2x8x8xf32>
    %c29_61 = arith.constant 29 : index
    %435 = memref.load %arg5[%c29_61] : memref<64xf32, #tpu.memory_space<smem>>
    %436 = vector.broadcast %435 : f32 to vector<2x8x8xf32>
    %437 = arith.mulf %436, %308 : vector<2x8x8xf32>
    %438 = arith.addf %434, %437 : vector<2x8x8xf32>
    %c30_62 = arith.constant 30 : index
    %439 = memref.load %arg5[%c30_62] : memref<64xf32, #tpu.memory_space<smem>>
    %440 = vector.broadcast %439 : f32 to vector<2x8x8xf32>
    %441 = arith.mulf %440, %309 : vector<2x8x8xf32>
    %442 = arith.addf %438, %441 : vector<2x8x8xf32>
    %c31_63 = arith.constant 31 : index
    %443 = memref.load %arg5[%c31_63] : memref<64xf32, #tpu.memory_space<smem>>
    %444 = vector.broadcast %443 : f32 to vector<2x8x8xf32>
    %445 = arith.mulf %444, %310 : vector<2x8x8xf32>
    %446 = arith.addf %442, %445 : vector<2x8x8xf32>
    %c1_64 = arith.constant 1 : index
    %447 = memref.load %arg6[%c1_64] : memref<4xf32, #tpu.memory_space<smem>>
    %448 = vector.broadcast %447 : f32 to vector<2x8x8xf32>
    %449 = arith.addf %446, %448 : vector<2x8x8xf32>
    %450 = vector.extract_strided_slice %449 {offsets = [0, 0, 0], sizes = [2, 7, 7], strides = [1, 1, 1]} : vector<2x8x8xf32> to vector<2x7x7xf32>
    %451 = vector.extract_strided_slice %449 {offsets = [0, 1, 0], sizes = [2, 7, 7], strides = [1, 1, 1]} : vector<2x8x8xf32> to vector<2x7x7xf32>
    %452 = arith.maximumf %450, %451 : vector<2x7x7xf32>
    %453 = vector.extract_strided_slice %449 {offsets = [0, 0, 1], sizes = [2, 7, 7], strides = [1, 1, 1]} : vector<2x8x8xf32> to vector<2x7x7xf32>
    %454 = vector.extract_strided_slice %449 {offsets = [0, 1, 1], sizes = [2, 7, 7], strides = [1, 1, 1]} : vector<2x8x8xf32> to vector<2x7x7xf32>
    %455 = arith.maximumf %453, %454 : vector<2x7x7xf32>
    %456 = arith.maximumf %452, %455 : vector<2x7x7xf32>
    %c32 = arith.constant 32 : index
    %457 = memref.load %arg5[%c32] : memref<64xf32, #tpu.memory_space<smem>>
    %458 = vector.broadcast %457 : f32 to vector<2x8x8xf32>
    %459 = arith.mulf %458, %292 : vector<2x8x8xf32>
    %c33 = arith.constant 33 : index
    %460 = memref.load %arg5[%c33] : memref<64xf32, #tpu.memory_space<smem>>
    %461 = vector.broadcast %460 : f32 to vector<2x8x8xf32>
    %462 = arith.mulf %461, %293 : vector<2x8x8xf32>
    %463 = arith.addf %459, %462 : vector<2x8x8xf32>
    %c34 = arith.constant 34 : index
    %464 = memref.load %arg5[%c34] : memref<64xf32, #tpu.memory_space<smem>>
    %465 = vector.broadcast %464 : f32 to vector<2x8x8xf32>
    %466 = arith.mulf %465, %294 : vector<2x8x8xf32>
    %467 = arith.addf %463, %466 : vector<2x8x8xf32>
    %c35 = arith.constant 35 : index
    %468 = memref.load %arg5[%c35] : memref<64xf32, #tpu.memory_space<smem>>
    %469 = vector.broadcast %468 : f32 to vector<2x8x8xf32>
    %470 = arith.mulf %469, %295 : vector<2x8x8xf32>
    %471 = arith.addf %467, %470 : vector<2x8x8xf32>
    %c36 = arith.constant 36 : index
    %472 = memref.load %arg5[%c36] : memref<64xf32, #tpu.memory_space<smem>>
    %473 = vector.broadcast %472 : f32 to vector<2x8x8xf32>
    %474 = arith.mulf %473, %297 : vector<2x8x8xf32>
    %475 = arith.addf %471, %474 : vector<2x8x8xf32>
    %c37 = arith.constant 37 : index
    %476 = memref.load %arg5[%c37] : memref<64xf32, #tpu.memory_space<smem>>
    %477 = vector.broadcast %476 : f32 to vector<2x8x8xf32>
    %478 = arith.mulf %477, %298 : vector<2x8x8xf32>
    %479 = arith.addf %475, %478 : vector<2x8x8xf32>
    %c38 = arith.constant 38 : index
    %480 = memref.load %arg5[%c38] : memref<64xf32, #tpu.memory_space<smem>>
    %481 = vector.broadcast %480 : f32 to vector<2x8x8xf32>
    %482 = arith.mulf %481, %299 : vector<2x8x8xf32>
    %483 = arith.addf %479, %482 : vector<2x8x8xf32>
    %c39 = arith.constant 39 : index
    %484 = memref.load %arg5[%c39] : memref<64xf32, #tpu.memory_space<smem>>
    %485 = vector.broadcast %484 : f32 to vector<2x8x8xf32>
    %486 = arith.mulf %485, %300 : vector<2x8x8xf32>
    %487 = arith.addf %483, %486 : vector<2x8x8xf32>
    %c40 = arith.constant 40 : index
    %488 = memref.load %arg5[%c40] : memref<64xf32, #tpu.memory_space<smem>>
    %489 = vector.broadcast %488 : f32 to vector<2x8x8xf32>
    %490 = arith.mulf %489, %302 : vector<2x8x8xf32>
    %491 = arith.addf %487, %490 : vector<2x8x8xf32>
    %c41 = arith.constant 41 : index
    %492 = memref.load %arg5[%c41] : memref<64xf32, #tpu.memory_space<smem>>
    %493 = vector.broadcast %492 : f32 to vector<2x8x8xf32>
    %494 = arith.mulf %493, %303 : vector<2x8x8xf32>
    %495 = arith.addf %491, %494 : vector<2x8x8xf32>
    %c42 = arith.constant 42 : index
    %496 = memref.load %arg5[%c42] : memref<64xf32, #tpu.memory_space<smem>>
    %497 = vector.broadcast %496 : f32 to vector<2x8x8xf32>
    %498 = arith.mulf %497, %304 : vector<2x8x8xf32>
    %499 = arith.addf %495, %498 : vector<2x8x8xf32>
    %c43 = arith.constant 43 : index
    %500 = memref.load %arg5[%c43] : memref<64xf32, #tpu.memory_space<smem>>
    %501 = vector.broadcast %500 : f32 to vector<2x8x8xf32>
    %502 = arith.mulf %501, %305 : vector<2x8x8xf32>
    %503 = arith.addf %499, %502 : vector<2x8x8xf32>
    %c44 = arith.constant 44 : index
    %504 = memref.load %arg5[%c44] : memref<64xf32, #tpu.memory_space<smem>>
    %505 = vector.broadcast %504 : f32 to vector<2x8x8xf32>
    %506 = arith.mulf %505, %307 : vector<2x8x8xf32>
    %507 = arith.addf %503, %506 : vector<2x8x8xf32>
    %c45 = arith.constant 45 : index
    %508 = memref.load %arg5[%c45] : memref<64xf32, #tpu.memory_space<smem>>
    %509 = vector.broadcast %508 : f32 to vector<2x8x8xf32>
    %510 = arith.mulf %509, %308 : vector<2x8x8xf32>
    %511 = arith.addf %507, %510 : vector<2x8x8xf32>
    %c46 = arith.constant 46 : index
    %512 = memref.load %arg5[%c46] : memref<64xf32, #tpu.memory_space<smem>>
    %513 = vector.broadcast %512 : f32 to vector<2x8x8xf32>
    %514 = arith.mulf %513, %309 : vector<2x8x8xf32>
    %515 = arith.addf %511, %514 : vector<2x8x8xf32>
    %c47 = arith.constant 47 : index
    %516 = memref.load %arg5[%c47] : memref<64xf32, #tpu.memory_space<smem>>
    %517 = vector.broadcast %516 : f32 to vector<2x8x8xf32>
    %518 = arith.mulf %517, %310 : vector<2x8x8xf32>
    %519 = arith.addf %515, %518 : vector<2x8x8xf32>
    %c2_65 = arith.constant 2 : index
    %520 = memref.load %arg6[%c2_65] : memref<4xf32, #tpu.memory_space<smem>>
    %521 = vector.broadcast %520 : f32 to vector<2x8x8xf32>
    %522 = arith.addf %519, %521 : vector<2x8x8xf32>
    %523 = vector.extract_strided_slice %522 {offsets = [0, 0, 0], sizes = [2, 7, 7], strides = [1, 1, 1]} : vector<2x8x8xf32> to vector<2x7x7xf32>
    %524 = vector.extract_strided_slice %522 {offsets = [0, 1, 0], sizes = [2, 7, 7], strides = [1, 1, 1]} : vector<2x8x8xf32> to vector<2x7x7xf32>
    %525 = arith.maximumf %523, %524 : vector<2x7x7xf32>
    %526 = vector.extract_strided_slice %522 {offsets = [0, 0, 1], sizes = [2, 7, 7], strides = [1, 1, 1]} : vector<2x8x8xf32> to vector<2x7x7xf32>
    %527 = vector.extract_strided_slice %522 {offsets = [0, 1, 1], sizes = [2, 7, 7], strides = [1, 1, 1]} : vector<2x8x8xf32> to vector<2x7x7xf32>
    %528 = arith.maximumf %526, %527 : vector<2x7x7xf32>
    %529 = arith.maximumf %525, %528 : vector<2x7x7xf32>
    %c48 = arith.constant 48 : index
    %530 = memref.load %arg5[%c48] : memref<64xf32, #tpu.memory_space<smem>>
    %531 = vector.broadcast %530 : f32 to vector<2x8x8xf32>
    %532 = arith.mulf %531, %292 : vector<2x8x8xf32>
    %c49 = arith.constant 49 : index
    %533 = memref.load %arg5[%c49] : memref<64xf32, #tpu.memory_space<smem>>
    %534 = vector.broadcast %533 : f32 to vector<2x8x8xf32>
    %535 = arith.mulf %534, %293 : vector<2x8x8xf32>
    %536 = arith.addf %532, %535 : vector<2x8x8xf32>
    %c50 = arith.constant 50 : index
    %537 = memref.load %arg5[%c50] : memref<64xf32, #tpu.memory_space<smem>>
    %538 = vector.broadcast %537 : f32 to vector<2x8x8xf32>
    %539 = arith.mulf %538, %294 : vector<2x8x8xf32>
    %540 = arith.addf %536, %539 : vector<2x8x8xf32>
    %c51 = arith.constant 51 : index
    %541 = memref.load %arg5[%c51] : memref<64xf32, #tpu.memory_space<smem>>
    %542 = vector.broadcast %541 : f32 to vector<2x8x8xf32>
    %543 = arith.mulf %542, %295 : vector<2x8x8xf32>
    %544 = arith.addf %540, %543 : vector<2x8x8xf32>
    %c52 = arith.constant 52 : index
    %545 = memref.load %arg5[%c52] : memref<64xf32, #tpu.memory_space<smem>>
    %546 = vector.broadcast %545 : f32 to vector<2x8x8xf32>
    %547 = arith.mulf %546, %297 : vector<2x8x8xf32>
    %548 = arith.addf %544, %547 : vector<2x8x8xf32>
    %c53 = arith.constant 53 : index
    %549 = memref.load %arg5[%c53] : memref<64xf32, #tpu.memory_space<smem>>
    %550 = vector.broadcast %549 : f32 to vector<2x8x8xf32>
    %551 = arith.mulf %550, %298 : vector<2x8x8xf32>
    %552 = arith.addf %548, %551 : vector<2x8x8xf32>
    %c54 = arith.constant 54 : index
    %553 = memref.load %arg5[%c54] : memref<64xf32, #tpu.memory_space<smem>>
    %554 = vector.broadcast %553 : f32 to vector<2x8x8xf32>
    %555 = arith.mulf %554, %299 : vector<2x8x8xf32>
    %556 = arith.addf %552, %555 : vector<2x8x8xf32>
    %c55 = arith.constant 55 : index
    %557 = memref.load %arg5[%c55] : memref<64xf32, #tpu.memory_space<smem>>
    %558 = vector.broadcast %557 : f32 to vector<2x8x8xf32>
    %559 = arith.mulf %558, %300 : vector<2x8x8xf32>
    %560 = arith.addf %556, %559 : vector<2x8x8xf32>
    %c56 = arith.constant 56 : index
    %561 = memref.load %arg5[%c56] : memref<64xf32, #tpu.memory_space<smem>>
    %562 = vector.broadcast %561 : f32 to vector<2x8x8xf32>
    %563 = arith.mulf %562, %302 : vector<2x8x8xf32>
    %564 = arith.addf %560, %563 : vector<2x8x8xf32>
    %c57 = arith.constant 57 : index
    %565 = memref.load %arg5[%c57] : memref<64xf32, #tpu.memory_space<smem>>
    %566 = vector.broadcast %565 : f32 to vector<2x8x8xf32>
    %567 = arith.mulf %566, %303 : vector<2x8x8xf32>
    %568 = arith.addf %564, %567 : vector<2x8x8xf32>
    %c58 = arith.constant 58 : index
    %569 = memref.load %arg5[%c58] : memref<64xf32, #tpu.memory_space<smem>>
    %570 = vector.broadcast %569 : f32 to vector<2x8x8xf32>
    %571 = arith.mulf %570, %304 : vector<2x8x8xf32>
    %572 = arith.addf %568, %571 : vector<2x8x8xf32>
    %c59 = arith.constant 59 : index
    %573 = memref.load %arg5[%c59] : memref<64xf32, #tpu.memory_space<smem>>
    %574 = vector.broadcast %573 : f32 to vector<2x8x8xf32>
    %575 = arith.mulf %574, %305 : vector<2x8x8xf32>
    %576 = arith.addf %572, %575 : vector<2x8x8xf32>
    %c60 = arith.constant 60 : index
    %577 = memref.load %arg5[%c60] : memref<64xf32, #tpu.memory_space<smem>>
    %578 = vector.broadcast %577 : f32 to vector<2x8x8xf32>
    %579 = arith.mulf %578, %307 : vector<2x8x8xf32>
    %580 = arith.addf %576, %579 : vector<2x8x8xf32>
    %c61 = arith.constant 61 : index
    %581 = memref.load %arg5[%c61] : memref<64xf32, #tpu.memory_space<smem>>
    %582 = vector.broadcast %581 : f32 to vector<2x8x8xf32>
    %583 = arith.mulf %582, %308 : vector<2x8x8xf32>
    %584 = arith.addf %580, %583 : vector<2x8x8xf32>
    %c62 = arith.constant 62 : index
    %585 = memref.load %arg5[%c62] : memref<64xf32, #tpu.memory_space<smem>>
    %586 = vector.broadcast %585 : f32 to vector<2x8x8xf32>
    %587 = arith.mulf %586, %309 : vector<2x8x8xf32>
    %588 = arith.addf %584, %587 : vector<2x8x8xf32>
    %c63 = arith.constant 63 : index
    %589 = memref.load %arg5[%c63] : memref<64xf32, #tpu.memory_space<smem>>
    %590 = vector.broadcast %589 : f32 to vector<2x8x8xf32>
    %591 = arith.mulf %590, %310 : vector<2x8x8xf32>
    %592 = arith.addf %588, %591 : vector<2x8x8xf32>
    %c3_66 = arith.constant 3 : index
    %593 = memref.load %arg6[%c3_66] : memref<4xf32, #tpu.memory_space<smem>>
    %594 = vector.broadcast %593 : f32 to vector<2x8x8xf32>
    %595 = arith.addf %592, %594 : vector<2x8x8xf32>
    %596 = vector.extract_strided_slice %595 {offsets = [0, 0, 0], sizes = [2, 7, 7], strides = [1, 1, 1]} : vector<2x8x8xf32> to vector<2x7x7xf32>
    %597 = vector.extract_strided_slice %595 {offsets = [0, 1, 0], sizes = [2, 7, 7], strides = [1, 1, 1]} : vector<2x8x8xf32> to vector<2x7x7xf32>
    %598 = arith.maximumf %596, %597 : vector<2x7x7xf32>
    %599 = vector.extract_strided_slice %595 {offsets = [0, 0, 1], sizes = [2, 7, 7], strides = [1, 1, 1]} : vector<2x8x8xf32> to vector<2x7x7xf32>
    %600 = vector.extract_strided_slice %595 {offsets = [0, 1, 1], sizes = [2, 7, 7], strides = [1, 1, 1]} : vector<2x8x8xf32> to vector<2x7x7xf32>
    %601 = arith.maximumf %599, %600 : vector<2x7x7xf32>
    %602 = arith.maximumf %598, %601 : vector<2x7x7xf32>
    %603 = tpu.concatenate %383, %456, %529, %602 in 0 : vector<2x7x7xf32>, vector<2x7x7xf32>, vector<2x7x7xf32>, vector<2x7x7xf32> -> vector<8x7x7xf32>
    %604 = tpu.iota {dimensions = array<i32: 0>} : vector<4x7xi32>
    %605 = tpu.iota {dimensions = array<i32: 1>} : vector<4x7xi32>
    %c2_i32_67 = arith.constant 2 : i32
    %606 = vector.broadcast %c2_i32_67 : i32 to vector<4x7xi32>
    %607 = arith.muli %606, %604 : vector<4x7xi32>
    %608 = arith.cmpi eq, %605, %607 : vector<4x7xi32>
    %609 = arith.extui %608 : vector<4x7xi1> to vector<4x7xi32>
    %610 = arith.sitofp %609 : vector<4x7xi32> to vector<4x7xf32>
    %611 = vector.shape_cast %610 : vector<4x7xf32> to vector<1x4x7xf32>
    %612 = vector.shape_cast %611 : vector<1x4x7xf32> to vector<1x4x7xf32>
    %613 = vector.broadcast %612 : vector<1x4x7xf32> to vector<8x4x7xf32>
    %614 = tpu.iota {dimensions = array<i32: 0>} : vector<7x4xi32>
    %615 = tpu.iota {dimensions = array<i32: 1>} : vector<7x4xi32>
    %c2_i32_68 = arith.constant 2 : i32
    %616 = vector.broadcast %c2_i32_68 : i32 to vector<7x4xi32>
    %617 = arith.muli %616, %615 : vector<7x4xi32>
    %618 = arith.cmpi eq, %614, %617 : vector<7x4xi32>
    %619 = arith.extui %618 : vector<7x4xi1> to vector<7x4xi32>
    %620 = arith.sitofp %619 : vector<7x4xi32> to vector<7x4xf32>
    %621 = vector.shape_cast %620 : vector<7x4xf32> to vector<1x7x4xf32>
    %622 = vector.shape_cast %621 : vector<1x7x4xf32> to vector<1x7x4xf32>
    %623 = vector.broadcast %622 : vector<1x7x4xf32> to vector<8x7x4xf32>
    "tpu.trace_start"() <{level = 10 : i32, message = "bph,bhw->bpw"}> : () -> ()
    %cst_69 = arith.constant dense<0.000000e+00> : vector<8x4x7xf32>
    %624 = tpu.matmul %613, %603, %cst_69 {dimension_numbers = #tpu.dot_dimension_numbers<[2], [1], [1], [2], [0, 0, 0, 1, 1, 2], [0], [0]>, precision = #tpu.contract_precision<fp32>} : vector<8x4x7xf32>, vector<8x7x7xf32>, vector<8x4x7xf32> -> vector<8x4x7xf32>
    "tpu.trace_stop"() : () -> ()
    "tpu.trace_start"() <{level = 10 : i32, message = "bpw,bwq->bpq"}> : () -> ()
    %cst_70 = arith.constant dense<0.000000e+00> : vector<8x4x4xf32>
    %625 = tpu.matmul %624, %623, %cst_70 {dimension_numbers = #tpu.dot_dimension_numbers<[2], [1], [1], [2], [0, 0, 0, 1, 1, 2], [0], [0]>, precision = #tpu.contract_precision<fp32>} : vector<8x4x7xf32>, vector<8x7x4xf32>, vector<8x4x4xf32> -> vector<8x4x4xf32>
    "tpu.trace_stop"() : () -> ()
    %cst_71 = arith.constant 0.000000e+00 : f32
    %626 = vector.broadcast %cst_71 : f32 to vector<8x4x4xf32>
    %627 = arith.maximumf %625, %626 : vector<8x4x4xf32>
    %628 = vector.extract_strided_slice %627 {offsets = [0, 0, 0], sizes = [8, 1, 4], strides = [1, 1, 1]} : vector<8x4x4xf32> to vector<8x1x4xf32>
    %629 = vector.shape_cast %628 : vector<8x1x4xf32> to vector<8x4xf32>
    %630 = vector.extract_strided_slice %627 {offsets = [0, 1, 0], sizes = [8, 1, 4], strides = [1, 1, 1]} : vector<8x4x4xf32> to vector<8x1x4xf32>
    %631 = vector.shape_cast %630 : vector<8x1x4xf32> to vector<8x4xf32>
    %632 = vector.extract_strided_slice %627 {offsets = [0, 2, 0], sizes = [8, 1, 4], strides = [1, 1, 1]} : vector<8x4x4xf32> to vector<8x1x4xf32>
    %633 = vector.shape_cast %632 : vector<8x1x4xf32> to vector<8x4xf32>
    %634 = vector.extract_strided_slice %627 {offsets = [0, 3, 0], sizes = [8, 1, 4], strides = [1, 1, 1]} : vector<8x4x4xf32> to vector<8x1x4xf32>
    %635 = vector.shape_cast %634 : vector<8x1x4xf32> to vector<8x4xf32>
    %636 = tpu.concatenate %629, %631, %633, %635 in 1 : vector<8x4xf32>, vector<8x4xf32>, vector<8x4xf32>, vector<8x4xf32> -> vector<8x16xf32>
    %637 = vector.extract_strided_slice %636 {offsets = [0, 0], sizes = [2, 16], strides = [1, 1]} : vector<8x16xf32> to vector<2x16xf32>
    %638 = vector.extract_strided_slice %636 {offsets = [2, 0], sizes = [2, 16], strides = [1, 1]} : vector<8x16xf32> to vector<2x16xf32>
    %639 = vector.extract_strided_slice %636 {offsets = [4, 0], sizes = [2, 16], strides = [1, 1]} : vector<8x16xf32> to vector<2x16xf32>
    %640 = vector.extract_strided_slice %636 {offsets = [6, 0], sizes = [2, 16], strides = [1, 1]} : vector<8x16xf32> to vector<2x16xf32>
    %641 = tpu.concatenate %637, %638, %639, %640 in 1 : vector<2x16xf32>, vector<2x16xf32>, vector<2x16xf32>, vector<2x16xf32> -> vector<2x64xf32>
    %c0_72 = arith.constant 0 : index
    %c0_73 = arith.constant 0 : index
    %642 = vector.load %arg7[%c0_72, %c0_73] : memref<64x32xf32, #tpu.memory_space<vmem>>, vector<64x32xf32>
    %cst_74 = arith.constant dense<0.000000e+00> : vector<2x32xf32>
    %643 = tpu.matmul %641, %642, %cst_74 {dimension_numbers = #tpu.dot_dimension_numbers<[1], [0], [0], [1], [0, 0, 1, 1], [], []>, precision = #tpu.contract_precision<fp32>} : vector<2x64xf32>, vector<64x32xf32>, vector<2x32xf32> -> vector<2x32xf32>
    %c0_75 = arith.constant 0 : index
    %c0_76 = arith.constant 0 : index
    %644 = vector.load %arg8[%c0_75, %c0_76] : memref<1x32xf32, #tpu.memory_space<vmem>>, vector<1x32xf32>
    %645 = vector.broadcast %644 : vector<1x32xf32> to vector<2x32xf32>
    %646 = arith.addf %643, %645 : vector<2x32xf32>
    %cst_77 = arith.constant 0.000000e+00 : f32
    %647 = vector.broadcast %cst_77 : f32 to vector<2x32xf32>
    %648 = arith.maximumf %646, %647 : vector<2x32xf32>
    %c0_78 = arith.constant 0 : index
    %c0_79 = arith.constant 0 : index
    %649 = vector.load %arg9[%c0_78, %c0_79] : memref<32x10xf32, #tpu.memory_space<vmem>>, vector<32x10xf32>
    %cst_80 = arith.constant dense<0.000000e+00> : vector<2x10xf32>
    %650 = tpu.matmul %648, %649, %cst_80 {dimension_numbers = #tpu.dot_dimension_numbers<[1], [0], [0], [1], [0, 0, 1, 1], [], []>, precision = #tpu.contract_precision<fp32>} : vector<2x32xf32>, vector<32x10xf32>, vector<2x10xf32> -> vector<2x10xf32>
    %c0_81 = arith.constant 0 : index
    %c0_82 = arith.constant 0 : index
    %651 = vector.load %arg10[%c0_81, %c0_82] : memref<1x10xf32, #tpu.memory_space<vmem>>, vector<1x10xf32>
    %652 = vector.broadcast %651 : vector<1x10xf32> to vector<2x10xf32>
    %653 = arith.addf %650, %652 : vector<2x10xf32>
    %c0_83 = arith.constant 0 : index
    %c0_84 = arith.constant 0 : index
    %654 = vector.load %arg11[%c0_83, %c0_84] : memref<2x10xf32, #tpu.memory_space<vmem>>, vector<2x10xf32>
    tpu.vector_store %arg11[%c0_83, %c0_84], %653 {strides = array<i32>} : memref<2x10xf32, #tpu.memory_space<vmem>>, vector<2x10xf32>,
    return
  }
}

</mosaic_0001>

<bundles_post_ra>
// kernel: cnn_forward_pallas.1
= control target key start
LH: loop header
LB: loop body
LE: loop exit
PB: predicated region body
PF: predicated region fallthrough
CT: control target
= control target key end

     0   :  { %16 = vsyncpa [#allocation4], 0  ;;  %s30732_s0 = inlined_call_operand.vmem [shape: f32[2,28,28], index: 0, kind: input, shape index: {}]   ;;  %s30733_s1 = inlined_call_operand.vmem [shape: f32[8], index: 1, kind: input, shape index: {}]   ;;  %s30734_s2 = inlined_call_operand.vmem [shape: f32[2], index: 2, kind: input, shape index: {}]   ;;  %s30735_s3 = inlined_call_operand.vmem [shape: f32[32], index: 3, kind: input, shape index: {}]   ;;  %s30736_s4 = inlined_call_operand.vmem [shape: f32[4], index: 4, kind: input, shape index: {}]   ;;  %s30737_s5 = inlined_call_operand.vmem [shape: f32[64], index: 5, kind: input, shape index: {}]   ;;  %s30738_s6 = inlined_call_operand.vmem [shape: f32[4], index: 6, kind: input, shape index: {}]   ;;  %s30739_s7 = inlined_call_operand.vmem [shape: f32[64,32], index: 7, kind: input, shape index: {}]   ;;  %s30740_s8 = inlined_call_operand.vmem [shape: f32[1,32], index: 8, kind: input, shape index: {}]   ;;  %s30741_s9 = inlined_call_operand.vmem [shape: f32[32,10], index: 9, kind: input, shape index: {}]   ;;  %s30742_s10 = inlined_call_operand.vmem [shape: f32[1,10], index: 10, kind: input, shape index: {}]   ;;  %s30743_s11 = inlined_call_operand.hbm [shape: f32[2,10], index: 11, kind: output, shape index: {}]  }
   0x1   :  { %17 = vsyncpa [#allocation6], 0 }
   0x2   :  { %18 = vsyncpa [#allocation9], 0 }
   0x3   :  { %19 = vsyncpa [#allocation12], 0  ;;  %s39_s19 = sshll.u32 %s30734_s2, 4  ;;  %s40_s19 = int_to_ptr.vmem [resolvable:$true] %s39_s19 }
   0x4   :  { %20 = vsyncpa [#allocation3], 0  ;;  %s59_s22 = sshll.u32 %s30736_s4, 4  ;;  %s25924_s23 = scalar_lea.vmem %s40_s19, 16  ;;  %s60_s22 = int_to_ptr.vmem [resolvable:$true] %s59_s22 }
   0x5   :  { %p25925_p0 = scmp.ne.s32.totalorder %s40_s19, %s25924_s23  ;;  %p25929_p1 = scmp.lt.s32.totalorder %s40_s19, %s40_s19 }
   0x6   :  { %p25930_p2 = scmp.lt.s32.totalorder %s25924_s23, %s25924_s23 }
   0x8   :  { %p25931_p3 = por %p25930_p2, %p25929_p1 }
   0xa   :  { %p25932_p4 = pnand %p25931_p3, %p25925_p0 }
   0xc   :  { %25935 = shalt.err (!%p25932_p4)
}
   0xd   :  { %s26026_s24 = smov [#allocation5]   ;;  %s25936_s25 = scalar_lea.vmem %s60_s22, 16 }
   0xe   :  { %42 = dma.vmem_to_smem %s40_s19, 16, %s26026_s24, [#allocation6]  }
   0xf   :  { %p25937_p5 = scmp.ne.s32.totalorder %s60_s22, %s25936_s25  ;;  %p25941_p6 = scmp.lt.s32.totalorder %s60_s22, %s60_s22 }
  0x10   :  { %p25942_p7 = scmp.lt.s32.totalorder %s25936_s25, %s25936_s25 }
  0x12   :  { %p25943_p8 = por %p25942_p7, %p25941_p6 }
  0x14   :  { %p25944_p9 = pnand %p25943_p8, %p25937_p5 }
  0x16   :  { %25947 = shalt.err (!%p25944_p9)
}
  0x17   :  { %s26027_s2 = smov [#allocation8]   ;;  %s29_s27 = sshll.u32 %s30733_s1, 4  ;;  %s30_s27 = int_to_ptr.vmem [resolvable:$true] %s29_s27 }
  0x18   :  { %62 = dma.vmem_to_smem %s60_s22, 16, %s26027_s2, [#allocation9]  }
  0x19   :  { %s49_s30 = sshll.u32 %s30735_s3, 4  ;;  %s25948_s12 = scalar_lea.vmem %s30_s27, 16  ;;  %s50_s30 = int_to_ptr.vmem [resolvable:$true] %s49_s30 }
  0x1a   :  { %p25949_p10 = scmp.ne.s32.totalorder %s30_s27, %s25948_s12  ;;  %p25953_p11 = scmp.lt.s32.totalorder %s30_s27, %s30_s27 }
  0x1b   :  { %p25954_p12 = scmp.lt.s32.totalorder %s25948_s12, %s25948_s12 }
  0x1d   :  { %p25955_p13 = por %p25954_p12, %p25953_p11 }
  0x1f   :  { %p25956_p0 = pnand %p25955_p13, %p25949_p10 }
  0x21   :  { %25959 = shalt.err (!%p25956_p0)
}
  0x22   :  { %s26028_s13 = smov [#allocation2]   ;;  %s25960_s14 = scalar_lea.vmem %s50_s30, 16 }
  0x23   :  { %32 = dma.vmem_to_smem %s30_s27, 16, %s26028_s13, [#allocation4]  }
  0x24   :  { %p25961_p1 = scmp.ne.s32.totalorder %s50_s30, %s25960_s14  ;;  %p25965_p2 = scmp.lt.s32.totalorder %s50_s30, %s50_s30 }
  0x25   :  { %p25966_p3 = scmp.lt.s32.totalorder %s25960_s14, %s25960_s14 }
  0x27   :  { %p25967_p4 = por %p25966_p3, %p25965_p2 }
  0x29   :  { %p25968_p5 = pnand %p25967_p4, %p25961_p1 }
  0x2b   :  { %25971 = shalt.err (!%p25968_p5)
}
  0x2c   :  { %s26029_s1 = smov [#allocation7]   ;;  %s69_s16 = sshll.u32 %s30737_s5, 4  ;;  %s70_s16 = int_to_ptr.vmem [resolvable:$true] %s69_s16 }
  0x2d   :  { %52 = dma.vmem_to_smem %s50_s30, 16, %s26029_s1, [#allocation6]  }
  0x2e   :  { %s79_s19 = sshll.u32 %s30738_s6, 4  ;;  %s25972_s20 = scalar_lea.vmem %s70_s16, 16  ;;  %s80_s19 = int_to_ptr.vmem [resolvable:$true] %s79_s19 }
  0x2f   :  { %p25973_p6 = scmp.ne.s32.totalorder %s70_s16, %s25972_s20  ;;  %p25977_p7 = scmp.lt.s32.totalorder %s70_s16, %s70_s16 }
  0x30   :  { %p25978_p8 = scmp.lt.s32.totalorder %s25972_s20, %s25972_s20 }
  0x32   :  { %p25979_p9 = por %p25978_p8, %p25977_p7 }
  0x34   :  { %p25980_p10 = pnand %p25979_p9, %p25973_p6 }
  0x36   :  { %25983 = shalt.err (!%p25980_p10)
}
  0x37   :  { %s26030_s21 = smov [#allocation10]   ;;  %s25984_s22 = scalar_lea.vmem %s80_s19, 16 }
  0x38   :  { %72 = dma.vmem_to_smem %s70_s16, 16, %s26030_s21, [#allocation9]  }
  0x39   :  { %p25985_p11 = scmp.ne.s32.totalorder %s80_s19, %s25984_s22  ;;  %p25989_p12 = scmp.lt.s32.totalorder %s80_s19, %s80_s19 }
  0x3a   :  { %p25990_p13 = scmp.lt.s32.totalorder %s25984_s22, %s25984_s22 }
  0x3c   :  { %p25991_p0 = por %p25990_p13, %p25989_p12 }
  0x3e   :  { %p25992_p1 = pnand %p25991_p0, %p25985_p11 }
  0x40   :  { %25995 = shalt.err (!%p25992_p1)
}
  0x41   :  { %s26031_s5 = smov [#allocation11]  }
  0x42   :  { %82 = dma.vmem_to_smem %s80_s19, 16, %s26031_s5, [#allocation12]  }
  0x43   :  { %26016 = dma.done.wait [#allocation4], 16  }
  0x44   :  { %26017 = vsyncadd [#allocation4], 4294967280 }
  0x45   :  { %26018 = dma.done.wait [#allocation6], 32  }
  0x46   :  { %26019 = vsyncadd [#allocation6], 4294967264 }
  0x47   :  { %26020 = dma.done.wait [#allocation9], 32  }
  0x48   :  { %26021 = vsyncadd [#allocation9], 4294967264 }
  0x49   :  { %26022 = dma.done.wait [#allocation12], 16  }
  0x4a   :  { %26023 = vsyncadd [#allocation12], 4294967280 }
  0x4b   :  { %109 = sfence }
  0x4c   :  { %v110_v0 = vld [vmem:[%s30732_s0] sm:$0xff]  ;;  %v111_v1 = vld [vmem:[%s30732_s0 + $0x8] sm:$0xff]  ;;  %vm126_vm0 = vcmask 1040384   ;;  %v112_v2 = vld [vmem:[%s30732_s0 + $0x10] sm:$0xff]  ;;  %vm147_vm1 = vcmask 1044480   ;;  %s26032_s1 = smov 1  }
  0x4d   :  { %v127_v3 = vrot.slane %v110_v0, 7  ;;  %v128_v4 = vrot.slane %v111_v1, 7  ;;  %v113_v5 = vld [vmem:[%s30732_s0 + $0x18] sm:$0xf]  ;;  %v130_v6 = vrot.slane %v112_v2, 7  ;;  %v116_v7 = vld [vmem:[%s30732_s0 + $0x30] sm:$0xff] }
  0x4e   :  { %v132_v8 = vrot.slane %v113_v5, 7  ;;  %v117_v9 = vld [vmem:[%s30732_s0 + $0x38] sm:$0xf]  ;;  %v115_v10 = vld [vmem:[%s30732_s0 + $0x28] sm:$0xff]  ;;  %v137_v13 = vrot.slane %v116_v7, 7  ;;  %v114_v20 = vld [vmem:[%s30732_s0 + $0x20] sm:$0xff] }
  0x4f   :  { %v129_v11 = vsel %vm126_vm0, %v127_v3, %v128_v4  ;;  %v139_v14 = vrot.slane %v117_v9, 7  ;;  %v145_v16 = vsel %vm126_vm0, 0.0, %v127_v3  ;;  %v135_v17 = vrot.slane %v115_v10, 7  ;;  %s22886_s0 = sld [smem:[#allocation2 + $0x1]]  ;;  %s26033_s17 = smov 127  }
  0x50   :  { %156 = vrot.lane.b32.xlu1 %v129_v11, %s26032_s1  ;;  %v133_v12 = vsel %vm126_vm0, %v130_v6, %v132_v8  ;;  %v131_v18 = vsel %vm126_vm0, %v128_v4, %v130_v6  ;;  %v134_v23 = vrot.slane %v114_v20, 7  ;;  %vm178_vm2 = vcmask 7168   ;;  %s22888_s16 = sld [smem:[#allocation2 + $0x3]] }
  0x51   :  { %v148_v15 = vsel %vm147_vm1, %v133_v12, 0.0  ;;  %v140_v19 = vsel %vm126_vm0, %v137_v13, %v139_v14  ;;  %v138_v21 = vsel %vm126_vm0, %v135_v17, %v137_v13  ;;  %vm187_vm3 = vcmask 236544   ;;  %s26181_s18 = sld [smem:[#allocation2 + $0x2]] }
  0x52   :  { %160 = vrot.lane.b32.xlu0 %v148_v15, %s26032_s1  ;;  %v149_v22 = vsel %vm147_vm1, %v140_v19, 0.0  ;;  %v146_v24 = vsel %vm126_vm0, 0.0, %v134_v23  ;;  %v136_v25 = vsel %vm126_vm0, %v134_v23, %v135_v17  ;;  %s22890_s19 = sld [smem:[#allocation2 + $0x5]]  ;;  %vm274_vm4 = vcmask 1046528  }
  0x53   :  { %s22892_s20 = sld [smem:[#allocation2 + $0x7]]  ;;  %vm745_vm5 = vcmask 228352   ;;  %vm752_vm12 = vcmask 1043456   ;;  %vm5100_vm13 = vcmask 121856   ;;  %vm26036_vm14 = vmmov 0  }
  0x54   :  { %154 = vrot.lane.b32.xlu1 %v145_v16, %s26032_s1  ;;  %s26200_s21 = sld [smem:[#allocation2 + $0x6]]  ;;  %vm6005_vm15 = vcmask 113664   ;;  %vm6008_vm1 = vcmask 1045504  }
  0x55   :  { %v26164_v27 = vstv %s22886_s0  ;;  %s26251_s22 = sld [smem:[#allocation2 + $0x4]] }
  0x56   :  { %158 = vrot.lane.b32.xlu0 %v131_v18, %s26032_s1  ;;  %v306_v37 = vstv %s22888_s16  ;;  %s196_s5 = sld [smem:[#allocation2]] }
  0x57   :  { %v257_v62 = vstv %s26181_s18  ;;  %s369_s6 = sld [smem:[#allocation5]] }
  0x58   :  { %166 = vrot.lane.b32.xlu1 %v138_v21, %s26032_s1  ;;  %v26227_v4 = vstv %s22890_s19  ;;  %s26486_s23 = sld [smem:[#allocation5 + $0x1]] }
  0x59   :  { %v26233_v7 = vstv %s22892_s20  ;;  %s22973_s24 = sld [smem:[#allocation7 + $0x2]] }
  0x5a   :  { %168 = vrot.lane.b32.xlu0 %v149_v22, %s26032_s1  ;;  %v26244_v12 = vstv %s26200_s21  ;;  %s22981_s25 = sld [smem:[#allocation7 + $0xa]] }
  0x5b   :  { %s22991_s2 = sld [smem:[#allocation7 + $0x13]] }
  0x5c   :  { %162 = vrot.lane.b32.xlu1 %v146_v24, %s26032_s1  ;;  %s22972_s4 = sld [smem:[#allocation7 + $0x1]] }
  0x5d   :  { %s22974_s26 = sld [smem:[#allocation7 + $0x3]] }
  0x5e   :  { %164 = vrot.lane.b32.xlu0 %v136_v25, %s26032_s1  ;;  %s23000_s27 = sld [smem:[#allocation7 + $0x1b]] }
  0x5f   :  { %s22990_s28 = sld [smem:[#allocation7 + $0x12]] }
  0x60   :  { %s27411_s29 = sld [smem:[#allocation7 + $0x1a]] }
  0x61   :  { %s27424_s30 = sld [smem:[#allocation7 + $0x9]] }
  0x62   :  { %s27445_s12 = sld [smem:[#allocation7 + $0xb]] }
  0x63   :  { %s22989_s13 = sld [smem:[#allocation7 + $0x11]] }
  0x64   :  { %s22995_s14 = sld [smem:[#allocation7 + $0x17]] }
  0x65   :  { %s27544_s3 = sld [smem:[#allocation7 + $0x5]] }
  0x66   :  { %s27548_s15 = sld [smem:[#allocation7 + $0x1f]] }
  0x67   :  { %s27556_s0 = sld [smem:[#allocation7 + $0x6]] }
  0x68   :  { %s27579_s16 = sld [smem:[#allocation7 + $0xd]] }
  0x69   :  { %s27582_s18 = sld [smem:[#allocation7 + $0x7]] }
  0x6a   :  { %s27591_s19 = sld [smem:[#allocation7 + $0xe]] }
  0x6b   :  { %s27594_s20 = sld [smem:[#allocation7 + $0xf]] }
  0x6c   :  { %s27608_s21 = sld [smem:[#allocation7 + $0x16]] }
  0xc2   :  { %v157_v26 = vpop.permute.xlu1 %156 }
  0xc3   :  { %v180_v28 = vsel %vm178_vm2, 0.0, %v157_v26 }
  0xc4   :  { %v26168_v29 = vsel %vm187_vm3, %v180_v28, 0.0  ;;  %v161_v30 = vpop.permute.xlu0 %160 }
  0xc5   :  { %v182_v31 = vsel %vm178_vm2, 0.0, %v161_v30  ;;  %v209_v32 = vmul.f32 %v26164_v27, %v26168_v29  ;;  %v308_v48 = vmul.f32 %v306_v37, %v26168_v29  ;;  %v259_v8 = vmul.f32 %v257_v62, %v26168_v29 }
  0xc6   :  { %v26174_v33 = vsel %vm187_vm3, %v182_v31, 0.0  ;;  %v155_v34 = vpop.permute.xlu1 %154 }
  0xc7   :  { %v179_v35 = vsel %vm178_vm2, 0.0, %v155_v34  ;;  %226 = vrot.lane.b32.xlu0 %v209_v32, %s26033_s17  ;;  %v211_v39 = vmul.f32 %v26164_v27, %v26174_v33  ;;  %v310_v45 = vmul.f32 %v306_v37, %v26174_v33  ;;  %v324_v56 = vrot.slane %v308_v48, 1 }
  0xc8   :  { %v159_v36 = vpop.permute.xlu0 %158  ;;  %v26184_v40 = vsel %vm187_vm3, %v179_v35, 0.0  ;;  %v26241_v11 = vmul.f32 %v257_v62, %v26174_v33  ;;  %v276_v23 = vrot.slane %v259_v8, 1 }
  0xc9   :  { %v181_v38 = vsel %vm178_vm2, 0.0, %v159_v36  ;;  %v208_v44 = vmul.f32 %v26164_v27, %v26184_v40  ;;  %v307_v50 = vmul.f32 %v306_v37, %v26184_v40  ;;  %v328_v54 = vrot.slane %v310_v45, 1 }
  0xca   :  { %v26187_v41 = vsel %vm187_vm3, %v181_v38, 0.0  ;;  %v167_v42 = vpop.permute.xlu1 %166  ;;  %v258_v20 = vmul.f32 %v257_v62, %v26184_v40  ;;  %v280_v22 = vrot.slane %v26241_v11, 1 }
  0xcb   :  { %230 = vrot.lane.b32.xlu0 %v211_v39, %s26033_s17  ;;  %v210_v43 = vmul.f32 %v26164_v27, %v26187_v41  ;;  %v309_v46 = vmul.f32 %v306_v37, %v26187_v41  ;;  %v185_v52 = vsel %vm178_vm2, 0.0, %v167_v42  ;;  %v323_v61 = vrot.slane %v307_v50, 1 }
  0xcc   :  { %v169_v47 = vpop.permute.xlu0 %168  ;;  %v26211_v60 = vsel %vm187_vm3, %v185_v52, 0.0  ;;  %v260_v16 = vmul.f32 %v257_v62, %v26187_v41  ;;  %v275_v25 = vrot.slane %v258_v20, 1  ;;  %v26312_v50 = vstv %s26251_s22  ;;  %s27658_s22 = sld [smem:[#allocation7 + $0x1e]] }
  0xcd   :  { %228 = vrot.lane.b32.xlu1 %v210_v43, %s26033_s17  ;;  %v186_v49 = vsel %vm178_vm2, 0.0, %v169_v47  ;;  %v326_v51 = vrot.slane %v309_v46, 1  ;;  %v26216_v0 = vmul.f32 %v306_v37, %v26211_v60  ;;  %v325_v9 = vsel %vm274_vm4, %v323_v61, %v324_v56 }
  0xce   :  { %v163_v53 = vpop.permute.xlu1 %162  ;;  %v26205_v55 = vsel %vm187_vm3, %v186_v49, 0.0  ;;  %v214_v10 = vmul.f32 %v26164_v27, %v26211_v60  ;;  %v278_v24 = vrot.slane %v260_v16, 1  ;;  %v264_v28 = vmul.f32 %v257_v62, %v26211_v60 }
  0xcf   :  { %224 = vrot.lane.b32.xlu0 %v208_v44, %s26033_s17  ;;  %v183_v58 = vsel %vm178_vm2, 0.0, %v163_v53  ;;  %v327_v63 = vsel %vm274_vm4, %v324_v56, %v326_v51  ;;  %v215_v2 = vmul.f32 %v26164_v27, %v26205_v55  ;;  %v329_v5 = vsel %vm274_vm4, %v326_v51, %v328_v54 }
  0xd0   :  { %v165_v57 = vpop.permute.xlu0 %164  ;;  %v26225_v3 = vsel %vm187_vm3, %v183_v58, 0.0  ;;  %v314_v14 = vmul.f32 %v306_v37, %v26205_v55  ;;  %v333_v15 = vrot.slane %v26216_v0, 1  ;;  %v26261_v19 = vmul.f32 %v26233_v7, %v26205_v55 }
  0xd1   :  { %343 = vrot.lane.b32.xlu1 %v328_v54, %s26033_s17  ;;  %v184_v59 = vsel %vm178_vm2, 0.0, %v165_v57  ;;  %v212_v13 = vmul.f32 %v26164_v27, %v26225_v3  ;;  %v26257_v18 = vmul.f32 %v306_v37, %v26225_v3  ;;  %v26268_v26 = vmul.f32 %v257_v62, %v26205_v55 }
  0xd2   :  { %v26220_v1 = vsel %vm187_vm3, %v184_v59, 0.0  ;;  %v26273_v30 = vsel %vm274_vm4, %v276_v23, %v278_v24  ;;  %v26278_v31 = vsel %vm274_vm4, %v278_v24, %v280_v22  ;;  %v26282_v32 = vmul.f32 %v26227_v4, %v26225_v3 }
  0xd3   :  { %339 = vrot.lane.b32.xlu0 %v327_v63, %s26033_s17  ;;  %v26231_v6 = vmul.f32 %v306_v37, %v26220_v1  ;;  %v213_v17 = vmul.f32 %v26164_v27, %v26220_v1  ;;  %v263_v27 = vmul.f32 %v257_v62, %v26220_v1  ;;  %v573_v34 = vmul.f32 %v26233_v7, %v26211_v60 }
  0xd4   :  { %v26288_v35 = vsel %vm274_vm4, %v275_v25, %v276_v23  ;;  %v287_v36 = vrot.slane %v26268_v26, 1  ;;  %v285_v38 = vrot.slane %v264_v28, 1  ;;  %v595_v39 = vrot.slane %v26261_v19, 1 }
  0xd5   :  { %341 = vrot.lane.b32.xlu1 %v329_v5, %s26033_s17  ;;  %v331_v21 = vrot.slane %v26231_v6, 1  ;;  %v283_v37 = vrot.slane %v263_v27, 1  ;;  %v593_v42 = vrot.slane %v573_v34, 1  ;;  %v262_v43 = vmul.f32 %v257_v62, %v26225_v3 }
  0xd6   :  { %v572_v44 = vmul.f32 %v26233_v7, %v26220_v1  ;;  %v335_v45 = vrot.slane %v314_v14, 1  ;;  %v26302_v47 = vsel %vm274_vm4, %v285_v38, %v287_v36  ;;  %v571_v48 = vmul.f32 %v26233_v7, %v26225_v3 }
  0xd7   :  { %238 = vrot.lane.b32.xlu0 %v215_v2, %s26033_s17  ;;  %v26297_v46 = vsel %vm274_vm4, %v283_v37, %v285_v38  ;;  %v26309_v49 = vsel %vm274_vm4, %v593_v42, %v595_v39  ;;  %v282_v51 = vrot.slane %v262_v43, 1  ;;  %v334_v53 = vsel %vm274_vm4, %v331_v21, %v333_v15 }
  0xd8   :  { %v591_v52 = vrot.slane %v572_v44, 1  ;;  %v590_v54 = vrot.slane %v571_v48, 1  ;;  %v26320_v56 = vmul.f32 %v26244_v12, %v26174_v33  ;;  %v520_v57 = vmul.f32 %v26244_v12, %v26168_v29 }
  0xd9   :  { %337 = vrot.lane.b32.xlu1 %v325_v9, %s26033_s17  ;;  %v26325_v58 = vsel %vm274_vm4, %v282_v51, %v283_v37  ;;  %v521_v61 = vmul.f32 %v26244_v12, %v26187_v41  ;;  %v519_v62 = vmul.f32 %v26244_v12, %v26184_v40  ;;  %v336_v63 = vsel %vm274_vm4, %v333_v15, %v335_v45 }
  0xda   :  { %v26328_v59 = vsel %vm274_vm4, %v591_v52, %v593_v42  ;;  %v330_v0 = vrot.slane %v26257_v18, 1  ;;  %v26338_v2 = vsel %vm274_vm4, %v590_v54, %v591_v52  ;;  %v540_v5 = vrot.slane %v26320_v56, 1 }
  0xdb   :  { %234 = vrot.lane.b32.xlu0 %v213_v17, %s26033_s17  ;;  %v536_v8 = vrot.slane %v520_v57, 1  ;;  %v538_v9 = vrot.slane %v521_v61, 1  ;;  %v26348_v14 = vmul.f32 %v26312_v50, %v26220_v1  ;;  %v26352_v15 = vmul.f32 %v26312_v50, %v26225_v3 }
  0xdc   :  { %v26356_v16 = vmul.f32 %v26244_v12, %v26211_v60  ;;  %v524_v17 = vmul.f32 %v26244_v12, %v26220_v1  ;;  %v472_v24 = vmul.f32 %v26227_v4, %v26174_v33  ;;  %v523_v28 = vmul.f32 %v26244_v12, %v26225_v3 }
  0xdd   :  { %236 = vrot.lane.b32.xlu1 %v214_v10, %s26033_s17  ;;  %v535_v10 = vrot.slane %v519_v62, 1  ;;  %v26361_v18 = vsel %vm274_vm4, %v536_v8, %v538_v9  ;;  %v26366_v20 = vsel %vm274_vm4, %v538_v9, %v540_v5  ;;  %v332_v34 = vsel %vm274_vm4, %v330_v0, %v331_v21 }
  0xde   :  { %v545_v25 = vrot.slane %v26356_v16, 1  ;;  %v543_v27 = vrot.slane %v524_v17, 1  ;;  %v542_v38 = vrot.slane %v523_v28, 1  ;;  %v470_v42 = vmul.f32 %v26227_v4, %v26168_v29 }
  0xdf   :  { %232 = vrot.lane.b32.xlu0 %v212_v13, %s26033_s17  ;;  %v26343_v13 = vmul.f32 %v26312_v50, %v26211_v60  ;;  %v26369_v23 = vsel %vm274_vm4, %v535_v10, %v536_v8  ;;  %v569_v6 = vmul.f32 %v26233_v7, %v26187_v41  ;;  %v471_v21 = vmul.f32 %v26227_v4, %v26187_v41 }
  0xe0   :  { %v26384_v37 = vsel %vm274_vm4, %v543_v27, %v545_v25  ;;  %v26390_v43 = vsel %vm274_vm4, %v542_v38, %v543_v27  ;;  %v570_v44 = vmul.f32 %v26233_v7, %v26174_v33  ;;  %v469_v48 = vmul.f32 %v26227_v4, %v26184_v40 }
  0xe1   :  { %351 = vrot.lane.b32.xlu1 %v335_v45, %s26033_s17  ;;  %v568_v45 = vmul.f32 %v26233_v7, %v26168_v29  ;;  %v586_v51 = vrot.slane %v569_v6, 1  ;;  %v567_v54 = vmul.f32 %v26233_v7, %v26184_v40  ;;  %v476_v7 = vmul.f32 %v26227_v4, %v26205_v55 }
  0xe2   :  { %v588_v52 = vrot.slane %v570_v44, 1  ;;  %v475_v0 = vmul.f32 %v26227_v4, %v26211_v60  ;;  %v474_v8 = vmul.f32 %v26227_v4, %v26220_v1  ;;  %v197_v19 = vstv %s196_s5  ;;  %s5109_s5 = sld [smem:[#allocation7]] }
  0xe3   :  { %347 = vrot.lane.b32.xlu0 %v334_v53, %s26033_s17  ;;  %v584_v53 = vrot.slane %v568_v45, 1  ;;  %v583_v62 = vrot.slane %v567_v54, 1  ;;  %v201_v17 = vmul.f32 %v197_v19, %v26174_v33  ;;  %v198_v4 = vmul.f32 %v197_v19, %v26184_v40 }
  0xe4   :  { %v589_v61 = vsel %vm274_vm4, %v586_v51, %v588_v52  ;;  %vm13489_vm3 = vcmask 64512  }
  0xe5   :  { %349 = vrot.lane.b32.xlu1 %v336_v63, %s26033_s17  ;;  %v587_v57 = vsel %vm274_vm4, %v584_v53, %v586_v51  ;;  %v585_v63 = vsel %vm274_vm4, %v583_v62, %v584_v53 }
  0xe7   :  { %491 = vrot.lane.b32.xlu0 %v472_v24, %s26033_s17 }
  0xe9   :  { %345 = vrot.lane.b32.xlu1 %v332_v34, %s26033_s17  ;;  %v200_v34 = vmul.f32 %v197_v19, %v26187_v41 }
  0xeb   :  { %487 = vrot.lane.b32.xlu0 %v470_v42, %s26033_s17 }
  0xed   :  { %489 = vrot.lane.b32.xlu1 %v471_v21, %s26033_s17 }
  0xef   :  { %485 = vrot.lane.b32.xlu0 %v469_v48, %s26033_s17  ;;  %v26434_v48 = vstv %s369_s6  ;;  %s22979_s6 = sld [smem:[#allocation7 + $0x8]] }
  0xf1   :  { %603 = vrot.lane.b32.xlu1 %v588_v52, %s26033_s17 }
  0xf3   :  { %599 = vrot.lane.b32.xlu0 %v587_v57, %s26033_s17 }
  0xf5   :  { %601 = vrot.lane.b32.xlu1 %v589_v61, %s26033_s17 }
  0xf7   :  { %611 = vrot.lane.b32.xlu0 %v595_v39, %s26033_s17  ;;  %v199_v39 = vmul.f32 %v197_v19, %v26168_v29 }
  0xf9   :  { %597 = vrot.lane.b32.xlu1 %v585_v63, %s26033_s17 }
  0xfd   :  { %499 = vrot.lane.b32.xlu1 %v476_v7, %s26033_s17 }
 0x101   :  { %497 = vrot.lane.b32.xlu1 %v475_v0, %s26033_s17 }
 0x105   :  { %495 = vrot.lane.b32.xlu1 %v474_v8, %s26033_s17  ;;  %v205_v8 = vmul.f32 %v197_v19, %v26205_v55 }
 0x139   :  { %v227_v9 = vpop.permute.xlu0 %226 }
 0x13a   :  { %v249_v10 = vadd.f32 %v227_v9, %v199_v39 }
 0x13c   :  { %v298_v24 = vadd.f32 %v26273_v30, %v249_v10  ;;  %v203_v10 = vmul.f32 %v197_v19, %v26220_v1  ;;  %v202_v1 = vmul.f32 %v197_v19, %v26225_v3 }
 0x13d   :  { %v231_v27 = vpop.permute.xlu0 %230 }
 0x13e   :  { %v251_v28 = vadd.f32 %v231_v27, %v201_v17  ;;  %v204_v27 = vmul.f32 %v197_v19, %v26211_v60  ;;  %v717_v19 = vlaneseq }
 0x13f   :  { %v229_v38 = vpop.permute.xlu1 %228 }
 0x140   :  { %v250_v42 = vadd.f32 %v229_v38, %v200_v34  ;;  %v300_v6 = vadd.f32 %v280_v22, %v251_v28 }
 0x141   :  { %v225_v21 = vpop.permute.xlu0 %224 }
 0x142   :  { %v248_v44 = vadd.f32 %v225_v21, %v198_v4  ;;  %v299_v45 = vadd.f32 %v26278_v31, %v250_v42 }
 0x143   :  { %v344_v51 = vpop.permute.xlu1 %343 }
 0x144   :  { %v364_v52 = vadd.f32 %v344_v51, %v300_v6  ;;  %v297_v30 = vadd.f32 %v26288_v35, %v248_v44 }
 0x145   :  { %v340_v53 = vpop.permute.xlu0 %339 }
 0x146   :  { %v374_v54 = vadd.f32 %v26434_v48, %v364_v52  ;;  %v362_v57 = vadd.f32 %v340_v53, %v298_v24 }
 0x147   :  { %v342_v61 = vpop.permute.xlu1 %341 }
 0x148   :  { %v392_v62 = vrot.slane %v374_v54, 1  ;;  %v372_v63 = vadd.f32 %v26434_v48, %v362_v57  ;;  %v363_v11 = vadd.f32 %v342_v61, %v299_v45 }
 0x149   :  { %v239_v22 = vpop.permute.xlu0 %238 }
 0x14a   :  { %v388_v7 = vrot.slane %v372_v63, 1  ;;  %v373_v0 = vadd.f32 %v26434_v48, %v363_v11  ;;  %v26440_v31 = vmax.f32 %v374_v54, %v392_v62  ;;  %v255_v17 = vadd.f32 %v239_v22, %v205_v8 }
 0x14b   :  { %v338_v39 = vpop.permute.xlu1 %337  ;;  %v460_v22 = vmul.f32 %v26312_v50, %v26168_v29 }
 0x14c   :  { %v390_v9 = vrot.slane %v373_v0, 1  ;;  %v361_v35 = vadd.f32 %v338_v39, %v297_v30  ;;  %431 = vrot.lane.b32.xlu0 %v26440_v31, %s26033_s17  ;;  %v304_v30 = vadd.f32 %v287_v36, %v255_v17 }
 0x14d   :  { %v235_v24 = vpop.permute.xlu0 %234 }
 0x14e   :  { %v371_v28 = vadd.f32 %v26434_v48, %v361_v35  ;;  %v253_v34 = vadd.f32 %v235_v24, %v203_v10  ;;  %v391_v38 = vsel %vm274_vm4, %v388_v7, %v390_v9  ;;  %v393_v42 = vsel %vm274_vm4, %v390_v9, %v392_v62 }
 0x14f   :  { %v237_v4 = vpop.permute.xlu1 %236  ;;  %v26450_v6 = vmax.f32 %v372_v63, %v391_v38  ;;  %v26452_v21 = vmax.f32 %v373_v0, %v393_v42  ;;  %v718_v63 = vshrl.u32 %v717_v19, 7 }
 0x150   :  { %v387_v44 = vrot.slane %v371_v28, 1  ;;  %v254_v45 = vadd.f32 %v237_v4, %v204_v27  ;;  %v302_v51 = vadd.f32 %v26297_v46, %v253_v34  ;;  %v30748_v4 = vmov 0.0  }
 0x151   :  { %427 = vrot.lane.b32.xlu0 %v26450_v6, %s26033_s17  ;;  %v233_v60 = vpop.permute.xlu0 %232  ;;  %v722_v39 = vmul.u32 2, %v718_v63  ;;  %v719_v35 = vadd.s32 8, %v718_v63  ;;  %v26481_v10 = vadd.s32 24, %v718_v63 }
 0x152   :  { %v252_v52 = vadd.f32 %v233_v60, %v202_v1  ;;  %v389_v53 = vsel %vm274_vm4, %v387_v44, %v388_v7  ;;  %v303_v54 = vadd.f32 %v26302_v47, %v254_v45  ;;  %v462_v47 = vmul.f32 %v26312_v50, %v26174_v33 }
 0x153   :  { %v352_v57 = vpop.permute.xlu1 %351  ;;  %v26462_v61 = vmax.f32 %v371_v28, %v389_v53  ;;  %v721_v7 = vand.u32 127, %v717_v19  ;;  %v730_v33 = vadd.s32 16, %v718_v63 }
 0x154   :  { %v368_v62 = vadd.f32 %v352_v57, %v304_v30  ;;  %v301_v3 = vadd.f32 %v26325_v58, %v252_v52  ;;  %v461_v58 = vmul.f32 %v26312_v50, %v26187_v41 }
 0x155   :  { %429 = vrot.lane.b32.xlu0 %v26452_v21, %s26033_s17  ;;  %425 = vrot.lane.b32.xlu1 %v26462_v61, %s26033_s17  ;;  %v348_v46 = vpop.permute.xlu0 %347  ;;  %v26483_v29 = vmul.u32 2, %v721_v7  ;;  %vm724_vm6 = vcmp.eq.s32.totalorder %v721_v7, %v722_v39 }
 0x156   :  { %v378_v26 = vadd.f32 %v26434_v48, %v368_v62  ;;  %v366_v36 = vadd.f32 %v348_v46, %v302_v51  ;;  %v26499_v44 = vsel %vm724_vm6, 1.0, %v30748_v4  ;;  %v459_v46 = vmul.f32 %v26312_v50, %v26184_v40 }
 0x157   :  { %v350_v11 = vpop.permute.xlu1 %349  ;;  %vm26489_vm7 = vcmp.eq.s32.totalorder %v718_v63, %v26483_v29  ;;  %vm26494_vm8 = vcmp.eq.s32.totalorder %v719_v35, %v26483_v29  ;;  %30792 = vst [vmem:[#allocation20_spill] sm:$0xff] %v26499_v44  ;;  %v747_v1 = vsel %vm745_vm5, %v26499_v44, 0  ;;  %vm26512_vm10 = vcmp.eq.s32.totalorder %v730_v33, %v26483_v29  ;;  %24065 = vmatprep.mubr.msk.f32.mxu1 %vm745_vm5, %v26499_v44 }
 0x158   :  { %v376_v0 = vadd.f32 %v26434_v48, %v366_v36  ;;  %v367_v8 = vadd.f32 %v350_v11, %v303_v54  ;;  %v399_v17 = vrot.slane %v378_v26, 1  ;;  %vm736_vm11 = vcmp.eq.s32.totalorder %v26481_v10, %v26483_v29 }
 0x159   :  { %493 = vrot.lane.b32.xlu0 %v26282_v32, %s26033_s17  ;;  %609 = vrot.lane.b32.xlu1 %v26309_v49, %s26033_s17  ;;  %v492_v9 = vpop.permute.xlu0 %491  ;;  %v723_v32 = vmul.u32 2, %v719_v35  ;;  %v30787_v49 = vmov 0  ;;  %v22898_v10 = vsel %vm26512_vm10, 1.0, %v30748_v4  ;;  %vm21723_vm6 = vcmask 1044484  }
 0x15a   :  { %v395_v41 = vrot.slane %v376_v0, 1  ;;  %v377_v24 = vadd.f32 %v26434_v48, %v367_v8  ;;  %v30788_v49 = vsel %vm26489_vm7, 4294967295, %v30787_v49  ;;  %v512_v38 = vadd.f32 %v492_v9, %v462_v47 }
 0x15b   :  { %v346_v27 = vpop.permute.xlu1 %345  ;;  %30789 = vst [vmem:[#allocation19_spill] sm:$0xff] %v30788_v49  ;;  %vm26507_vm9 = vcmp.eq.s32.totalorder %v721_v7, %v723_v32  ;;  %v26523_v54 = vmax.f32 %v378_v26, %v399_v17 }
 0x15c   :  { %v397_v34 = vrot.slane %v377_v24, 1  ;;  %v365_v42 = vadd.f32 %v346_v27, %v301_v3  ;;  %v26529_v3 = vsub.f32 %v747_v1, %v747_v1  ;;  %v560_v47 = vadd.f32 %v540_v5, %v512_v38 }
 0x15d   :  { %607 = vrot.lane.b32.xlu0 %v26328_v59, %s26033_s17  ;;  %605 = vrot.lane.b32.xlu1 %v26338_v2, %s26033_s17  ;;  %v488_v45 = vpop.permute.xlu0 %487  ;;  %v466_v1 = vmul.f32 %v26312_v50, %v26205_v55  ;;  %v26607_v16 = vsel %vm26507_vm9, 1.0, %v30748_v4  ;;  %vm21732_vm9 = vcmask 1047559  }
 0x15e   :  { %v375_v59 = vadd.f32 %v26434_v48, %v365_v42  ;;  %v510_v52 = vadd.f32 %v488_v45, %v460_v22  ;;  %v400_v2 = vsel %vm274_vm4, %v397_v34, %v399_v17  ;;  %v398_v30 = vsel %vm274_vm4, %v395_v41, %v397_v34 }
 0x15f   :  { %v490_v53 = vpop.permute.xlu1 %489  ;;  %v26525_v57 = vmax.f32 %v377_v24, %v400_v2  ;;  %v26527_v62 = vmax.f32 %v376_v0, %v398_v30  ;;  %v26539_v63 = vand.u32 4294901760, %v26529_v3  ;;  %v526_v42 = vmul.f32 %v26244_v12, %v26205_v55 }
 0x160   :  { %v394_v19 = vrot.slane %v375_v59, 1  ;;  %v511_v48 = vadd.f32 %v490_v53, %v461_v58  ;;  %v558_v36 = vadd.f32 %v26361_v18, %v510_v52  ;;  %v26546_v58 = vstv %s26486_s23  ;;  %s22975_s23 = sld [smem:[#allocation7 + $0x4]] }
 0x161   :  { %439 = vrot.lane.b32.xlu0 %v26523_v54, %s26033_s17  ;;  %437 = vrot.lane.b32.xlu1 %v26525_v57, %s26033_s17  ;;  %v486_v26 = vpop.permute.xlu0 %485  ;;  %v828_v0 = vsub.f32 %v26529_v3, %v26539_v63 }
 0x162   :  { %v509_v11 = vadd.f32 %v486_v26, %v459_v46  ;;  %v396_v22 = vsel %vm274_vm4, %v394_v19, %v395_v41  ;;  %v559_v40 = vadd.f32 %v26366_v20, %v511_v48  ;;  %v547_v46 = vrot.slane %v526_v42, 1 }
 0x163   :  { %v604_v18 = vpop.permute.xlu1 %603  ;;  %v26548_v7 = vmax.f32 %v375_v59, %v396_v22  ;;  %v26557_v5 = vand.u32 4294901760, %v828_v0 }
 0x164   :  { %v624_v8 = vadd.f32 %v604_v18, %v560_v47  ;;  %v557_v39 = vadd.f32 %v26369_v23, %v509_v11  ;;  %v548_v22 = vsel %vm274_vm4, %v545_v25, %v547_v46 }
 0x165   :  { %435 = vrot.lane.b32.xlu0 %v26527_v62, %s26033_s17  ;;  %433 = vrot.lane.b32.xlu1 %v26548_v7, %s26033_s17  ;;  %v600_v56 = vpop.permute.xlu0 %599 }
 0x166   :  { %v634_v20 = vadd.f32 %v26546_v58, %v624_v8  ;;  %v622_v9 = vadd.f32 %v600_v56, %v558_v36  ;;  %24054 = vmatprep.mubr.f32.mxu0 %v26557_v5 }
 0x167   :  { %v602_v35 = vpop.permute.xlu1 %601 }
 0x168   :  { %v652_v33 = vrot.slane %v634_v20, 1  ;;  %v632_v17 = vadd.f32 %v26546_v58, %v622_v9  ;;  %v623_v41 = vadd.f32 %v602_v35, %v559_v40 }
 0x169   :  { %v612_v12 = vpop.permute.xlu0 %611 }
 0x16a   :  { %v648_v23 = vrot.slane %v632_v17, 1  ;;  %v633_v24 = vadd.f32 %v26546_v58, %v623_v41  ;;  %v26563_v27 = vmax.f32 %v634_v20, %v652_v33 }
 0x16b   :  { %v598_v32 = vpop.permute.xlu1 %597 }
 0x16c   :  { %v650_v34 = vrot.slane %v633_v24, 1  ;;  %v621_v38 = vadd.f32 %v598_v32, %v557_v39  ;;  %691 = vrot.lane.b32.xlu0 %v26563_v27, %s26033_s17 }
 0x16e   :  { %v631_v45 = vadd.f32 %v26546_v58, %v621_v38  ;;  %v653_v59 = vsel %vm274_vm4, %v650_v34, %v652_v33  ;;  %v651_v52 = vsel %vm274_vm4, %v648_v23, %v650_v34 }
 0x16f   :  { %v500_v2 = vpop.permute.xlu1 %499  ;;  %v26574_v30 = vmax.f32 %v633_v24, %v653_v59  ;;  %v26576_v53 = vmax.f32 %v632_v17, %v651_v52 }
 0x170   :  { %v647_v19 = vrot.slane %v631_v45, 1  ;;  %v516_v48 = vadd.f32 %v500_v2, %v466_v1 }
 0x171   :  { %689 = vrot.lane.b32.xlu1 %v26574_v30, %s26033_s17  ;;  %687 = vrot.lane.b32.xlu0 %v26576_v53, %s26033_s17 }
 0x172   :  { %v564_v55 = vadd.f32 %v547_v46, %v516_v48  ;;  %v649_v50 = vsel %vm274_vm4, %v647_v19, %v648_v23 }
 0x173   :  { %v498_v36 = vpop.permute.xlu1 %497  ;;  %v26583_v26 = vmax.f32 %v631_v45, %v649_v50 }
 0x174   :  { %v628_v11 = vadd.f32 %v612_v12, %v564_v55  ;;  %v515_v47 = vadd.f32 %v498_v36, %v26343_v13 }
 0x175   :  { %685 = vrot.lane.b32.xlu1 %v26583_v26, %s26033_s17 }
 0x176   :  { %v26592_v40 = vadd.f32 %v26546_v58, %v628_v11  ;;  %v563_v18 = vadd.f32 %v548_v22, %v515_v47 }
 0x177   :  { %v496_v0 = vpop.permute.xlu1 %495 }
 0x178   :  { %v659_v8 = vrot.slane %v26592_v40, 1  ;;  %v514_v39 = vadd.f32 %v496_v0, %v26348_v14  ;;  %v750_v14 = vsel %vm745_vm5, %v26607_v16, 0 }
 0x179   :  { %v26613_v35 = vsub.f32 %v750_v14, %v750_v14 }
 0x17a   :  { %v26599_v13 = vmax.f32 %v26592_v40, %v659_v8  ;;  %v562_v56 = vadd.f32 %v26384_v37, %v514_v39 }
 0x17b   :  { %v26622_v41 = vand.u32 4294901760, %v26613_v35 }
 0x17c   :  { %699 = vrot.lane.b32.xlu0 %v26599_v13, %s26033_s17 }
 0x17d   :  { %v838_v45 = vsub.f32 %v26613_v35, %v26622_v41 }
 0x17f   :  { %v26648_v55 = vand.u32 4294901760, %v838_v45 }
 0x1be   :  { %v432_v25 = vpop.permute.xlu0 %431 }
 0x1bf   :  { %v452_v20 = vmax.f32 %v26440_v31, %v432_v25 }
 0x1c1   :  { %v754_v9 = vsel %vm752_vm12, %v452_v20, 0 }
 0x1c2   :  { %v26615_v37 = vand.u32 4294901760, %v754_v9 }
 0x1c3   :  { %v428_v33 = vpop.permute.xlu0 %427 }
 0x1c4   :  { %v871_v17 = vsub.f32 %v754_v9, %v26615_v37  ;;  %v450_v51 = vmax.f32 %v26450_v6, %v428_v33  ;;  %24046 = vmatprep.subr.mxu0 %v26615_v37 }
 0x1c5   :  { %24047 = vmatpush3.msra.mxu0 %v26615_v37 }
 0x1c6   :  { %v26624_v23 = vand.u32 4294901760, %v450_v51  ;;  %v26626_v31 = vand.u32 4294901760, %v871_v17 }
 0x1c7   :  { %v430_v24 = vpop.permute.xlu0 %429  ;;  %v426_v32 = vpop.permute.xlu1 %425 }
 0x1c8   :  { %v26629_v34 = vsub.f32 %v450_v51, %v26624_v23  ;;  %v451_v38 = vmax.f32 %v26452_v21, %v430_v24  ;;  %v449_v6 = vmax.f32 %v26462_v61, %v426_v32  ;;  %v873_v42 = vsub.f32 %v871_v17, %v26626_v31 }
 0x1ca   :  { %v26636_v1 = vand.u32 4294901760, %v451_v38  ;;  %v26638_v59 = vand.u32 4294901760, %v449_v6  ;;  %v874_v52 = vand.u32 4294901760, %v873_v42  ;;  %v26641_v48 = vand.u32 4294901760, %v26629_v34 }
 0x1cb   :  { %v494_v2 = vpop.permute.xlu0 %493  ;;  %v610_v19 = vpop.permute.xlu1 %609 }
 0x1cc   :  { %v878_v46 = vsub.f32 %v451_v38, %v26636_v1  ;;  %v892_v21 = vsub.f32 %v449_v6, %v26638_v59  ;;  %v513_v61 = vadd.f32 %v494_v2, %v26352_v15  ;;  %v627_v12 = vadd.f32 %v610_v19, %v563_v18  ;;  %24048 = vmatprep.subr.mxu0 %v26636_v1 }
 0x1cd   :  { %24057 = vmatprep.subr.mxu1 %v874_v52  ;;  %24049 = vmatpush3.msra.mxu0 %v26636_v1  ;;  %v887_v18 = vsub.f32 %v26629_v34, %v26641_v48 }
 0x1ce   :  { %v637_v50 = vadd.f32 %v26546_v58, %v627_v12  ;;  %24058 = vmatpush3.msra.mxu1 %v874_v52  ;;  %24050 = vmatprep.subr.mxu0 %v26624_v23  ;;  %v561_v36 = vadd.f32 %v26390_v43, %v513_v61  ;;  %v26653_v11 = vand.u32 4294901760, %v878_v46  ;;  %v26655_v47 = vand.u32 4294901760, %v892_v21 }
 0x1cf   :  { %24051 = vmatpush3.msra.mxu0 %v26624_v23  ;;  %v608_v15 = vpop.permute.xlu0 %607  ;;  %v606_v22 = vpop.permute.xlu1 %605  ;;  %v888_v6 = vand.u32 4294901760, %v887_v18 }
 0x1d0   :  { %v657_v0 = vrot.slane %v637_v50, 1  ;;  %v626_v39 = vadd.f32 %v608_v15, %v562_v56  ;;  %v625_v25 = vadd.f32 %v606_v22, %v561_v36  ;;  %24052 = vmatprep.subr.mxu0 %v26638_v59  ;;  %v880_v14 = vsub.f32 %v878_v46, %v26653_v11 }
 0x1d1   :  { %24053 = vmatpush3.msra.mxu0 %v26638_v59  ;;  %v894_v43 = vsub.f32 %v892_v21, %v26655_v47 }
 0x1d2   :  { %v636_v20 = vadd.f32 %v26546_v58, %v626_v39  ;;  %v635_v9 = vadd.f32 %v26546_v58, %v625_v25  ;;  %24068 = vmatprep.subr.mxu0 %v871_v17  ;;  %24055 = vmatmul.mubr.f32.vlgmr.msra.gmra.mxu0 %v26648_v55  ;;  %v881_v33 = vand.u32 4294901760, %v880_v14  ;;  %v660_v56 = vsel %vm274_vm4, %v657_v0, %v659_v8 }
 0x1d3   :  { %24069 = vmatpush3.msra.mxu0 %v871_v17  ;;  %v26670_v51 = vmax.f32 %v637_v50, %v660_v56  ;;  %24076 = vmatprep.mubr.f32.mxu0 %v26529_v3  ;;  %v440_v38 = vpop.permute.xlu0 %439  ;;  %v895_v58 = vand.u32 4294901760, %v894_v43  ;;  %v438_v42 = vpop.permute.xlu1 %437 }
 0x1d4   :  { %v655_v24 = vrot.slane %v636_v20, 1  ;;  %v654_v32 = vrot.slane %v635_v9, 1  ;;  %24059 = vmatprep.subr.mxu1 %v881_v33  ;;  %24070 = vmatprep.subr.mxu0 %v878_v46  ;;  %v456_v17 = vmax.f32 %v26523_v54, %v440_v38  ;;  %v455_v19 = vmax.f32 %v26525_v57, %v438_v42 }
 0x1d5   :  { %24060 = vmatpush3.msra.mxu1 %v881_v33  ;;  %24071 = vmatpush3.msra.mxu0 %v878_v46 }
 0x1d6   :  { %697 = vrot.lane.b32.xlu1 %v26670_v51, %s26033_s17  ;;  %24061 = vmatprep.subr.mxu1 %v888_v6  ;;  %v658_v40 = vsel %vm274_vm4, %v655_v24, %v657_v0  ;;  %v656_v8 = vsel %vm274_vm4, %v654_v32, %v655_v24  ;;  %v1285_v2 = vsel %vm752_vm12, %v456_v17, 0  ;;  %v26703_v57 = vand.u32 4294901760, %v455_v19 }
 0x1d7   :  { %24072 = vmatprep.subr.mxu0 %v26629_v34  ;;  %24062 = vmatpush3.msra.mxu1 %v888_v6  ;;  %v26679_v45 = vmax.f32 %v636_v20, %v658_v40  ;;  %v26681_v52 = vmax.f32 %v635_v9, %v656_v8  ;;  %v436_v54 = vpop.permute.xlu0 %435  ;;  %v26696_v46 = vand.u32 4294901760, %v1285_v2 }
 0x1d8   :  { %24073 = vmatpush3.msra.mxu0 %v26629_v34  ;;  %24063 = vmatprep.subr.mxu1 %v895_v58  ;;  %v434_v34 = vpop.permute.xlu1 %433 }
 0x1d9   :  { %24074 = vmatprep.subr.mxu0 %v892_v21  ;;  %24064 = vmatpush3.msra.mxu1 %v895_v58  ;;  %v453_v61 = vmax.f32 %v26548_v7, %v434_v34  ;;  %v1409_v7 = vsub.f32 %v455_v19, %v26703_v57 }
 0x1da   :  { %24075 = vmatpush3.msra.mxu0 %v892_v21  ;;  %695 = vrot.lane.b32.xlu0 %v26679_v45, %s26033_s17  ;;  %v454_v21 = vmax.f32 %v26527_v62, %v436_v54  ;;  %v1402_v62 = vsub.f32 %v1285_v2, %v26696_v46 }
 0x1db   :  { %693 = vrot.lane.b32.xlu1 %v26681_v52, %s26033_s17  ;;  %24079 = vmatprep.subr.mxu1 %v26615_v37  ;;  %v26718_v12 = vand.u32 4294901760, %v453_v61 }
 0x1dc   :  { %24090 = vmatprep.subr.mxu0 %v26626_v31  ;;  %24066 = vmatmul.mubr.msk.f32.vlgmr.msra.gmra.mxu1 %vm745_vm5, %v26607_v16  ;;  %v26728_v50 = vand.u32 4294901760, %v1402_v62 }
 0x1dd   :  { %24077 = vmatmul.mubr.f32.vlgmr.msra.gmra.mxu0 %v26613_v35  ;;  %24080 = vmatpush3.msra.mxu1 %v26615_v37  ;;  %v1423_v36 = vsub.f32 %v453_v61, %v26718_v12 }
 0x1de   :  { %24091 = vmatpush3.msra.mxu0 %v26626_v31  ;;  %24081 = vmatprep.subr.mxu1 %v26636_v1  ;;  %v26711_v31 = vand.u32 4294901760, %v454_v21 }
 0x1df   :  { %24092 = vmatprep.subr.mxu0 %v26653_v11  ;;  %24082 = vmatpush3.msra.mxu1 %v26636_v1  ;;  %v26750_v22 = vand.u32 4294901760, %v1423_v36 }
 0x1e0   :  { %24093 = vmatpush3.msra.mxu0 %v26653_v11  ;;  %24083 = vmatprep.subr.mxu1 %v26624_v23  ;;  %v26736_v11 = vand.u32 4294901760, %v1409_v7 }
 0x1e1   :  { %24094 = vmatprep.subr.mxu0 %v26641_v48  ;;  %24084 = vmatpush3.msra.mxu1 %v26624_v23  ;;  %v1425_v0 = vsub.f32 %v1423_v36, %v26750_v22 }
 0x1e2   :  { %24095 = vmatpush3.msra.mxu0 %v26641_v48  ;;  %24085 = vmatprep.subr.mxu1 %v26638_v59  ;;  %v1416_v48 = vsub.f32 %v454_v21, %v26711_v31 }
 0x1e3   :  { %24096 = vmatprep.subr.mxu0 %v26655_v47  ;;  %24086 = vmatpush3.msra.mxu1 %v26638_v59  ;;  %v1426_v25 = vand.u32 4294901760, %v1425_v0  ;;  %v690_v43 = vpop.permute.xlu1 %689 }
 0x1e4   :  { %24097 = vmatpush3.msra.mxu0 %v26655_v47  ;;  %24087 = vmatprep.mubr.f32.mxu1 %v26539_v63  ;;  %v1404_v47 = vsub.f32 %v1402_v62, %v26728_v50  ;;  %v26743_v15 = vand.u32 4294901760, %v1416_v48 }
 0x1e5   :  { %24098 = vmatprep.mubr.msk.f32.mxu0 %vm745_vm5, %v26499_v44  ;;  %24101 = vmatprep.subr.mxu1 %v26615_v37 }
 0x1e6   :  { %24112 = vmatprep.subr.mxu0 %v26696_v46  ;;  %24088 = vmatmul.mubr.f32.vlgmr.msra.gmra.mxu1 %v26622_v41 }
 0x1e7   :  { %24099 = vmatmul.mubr.msk.f32.vlgmr.msra.gmra.mxu0 %vm745_vm5, %v26607_v16  ;;  %24102 = vmatpush3.msra.mxu1 %v26615_v37  ;;  %v1411_v37 = vsub.f32 %v1409_v7, %v26736_v11  ;;  %v686_v33 = vpop.permute.xlu1 %685 }
 0x1e8   :  { %24113 = vmatpush3.msra.mxu0 %v26696_v46  ;;  %24103 = vmatprep.subr.mxu1 %v26636_v1  ;;  %v709_v32 = vmax.f32 %v26583_v26, %v686_v33  ;;  %v26899_v33 = vsel %vm736_vm11, 1.0, %v30748_v4  ;;  %vm21789_vm11 = vcmask 97280  }
 0x1e9   :  { %24114 = vmatprep.subr.mxu0 %v26703_v57  ;;  %24104 = vmatpush3.msra.mxu1 %v26636_v1  ;;  %v1405_v1 = vand.u32 4294901760, %v1404_v47  ;;  %v1412_v18 = vand.u32 4294901760, %v1411_v37 }
 0x1ea   :  { %24115 = vmatpush3.msra.mxu0 %v26703_v57  ;;  %24105 = vmatprep.subr.mxu1 %v26624_v23  ;;  %v26797_v6 = vand.u32 4294901760, %v709_v32 }
 0x1eb   :  { %24116 = vmatprep.subr.mxu0 %v26711_v31  ;;  %24106 = vmatpush3.msra.mxu1 %v26624_v23  ;;  %v1418_v23 = vsub.f32 %v1416_v48, %v26743_v15 }
 0x1ec   :  { %24117 = vmatpush3.msra.mxu0 %v26711_v31  ;;  %24107 = vmatprep.subr.mxu1 %v26638_v59  ;;  %v1954_v8 = vsub.f32 %v709_v32, %v26797_v6 }
 0x1ed   :  { %24118 = vmatprep.subr.mxu0 %v26718_v12  ;;  %24108 = vmatpush3.msra.mxu1 %v26638_v59  ;;  %v692_v59 = vpop.permute.xlu0 %691  ;;  %v1419_v39 = vand.u32 4294901760, %v1418_v23 }
 0x1ee   :  { %24109 = vmatprep.mubr.msk.f32.mxu1 %vm745_vm5, %v26499_v44  ;;  %24119 = vmatpush3.msra.mxu0 %v26718_v12  ;;  %v712_v14 = vmax.f32 %v26563_v27, %v692_v59  ;;  %v711_v27 = vmax.f32 %v26574_v30, %v690_v43  ;;  %v1955_v19 = vand.u32 4294901760, %v1954_v8 }
 0x1ef   :  { %24110 = vmatmul.mubr.msk.f32.vlgmr.msra.gmra.mxu1 %vm745_vm5, %v26607_v16  ;;  %24120 = vmatprep.mubr.f32.mxu0 %v26557_v5 }
 0x1f0   :  { %24123 = vmatprep.subr.mxu1 %v1405_v1  ;;  %24134 = vmatprep.subr.mxu0 %v1402_v62  ;;  %v1816_v20 = vsel %vm752_vm12, %v712_v14, 0  ;;  %v26782_v30 = vand.u32 4294901760, %v711_v27  ;;  %v1956_v61 = vsub.f32 %v1954_v8, %v1955_v19 }
 0x1f1   :  { %24121 = vmatmul.mubr.f32.vlgmr.msra.gmra.mxu0 %v26648_v55  ;;  %24124 = vmatpush3.msra.mxu1 %v1405_v1  ;;  %v688_v9 = vpop.permute.xlu0 %687  ;;  %v26775_v56 = vand.u32 4294901760, %v1816_v20 }
 0x1f2   :  { %24135 = vmatpush3.msra.mxu0 %v1402_v62  ;;  %24125 = vmatprep.subr.mxu1 %v1412_v18  ;;  %v710_v24 = vmax.f32 %v26576_v53, %v688_v9  ;;  %v1940_v26 = vsub.f32 %v711_v27, %v26782_v30 }
 0x1f3   :  { %24136 = vmatprep.subr.mxu0 %v1409_v7  ;;  %24126 = vmatpush3.msra.mxu1 %v1412_v18  ;;  %v1933_v53 = vsub.f32 %v1816_v20, %v26775_v56 }
 0x1f4   :  { %24137 = vmatpush3.msra.mxu0 %v1409_v7  ;;  %24127 = vmatprep.subr.mxu1 %v1419_v39  ;;  %v26790_v38 = vand.u32 4294901760, %v710_v24  ;;  %v1941_v17 = vand.u32 4294901760, %v1940_v26  ;;  %v1957_v7 = vand.u32 4294901760, %v1956_v61 }
 0x1f5   :  { %24138 = vmatprep.subr.mxu0 %v1416_v48  ;;  %24128 = vmatpush3.msra.mxu1 %v1419_v39  ;;  %v1934_v40 = vand.u32 4294901760, %v1933_v53  ;;  %v700_v21 = vpop.permute.xlu0 %699 }
 0x1f6   :  { %24139 = vmatpush3.msra.mxu0 %v1416_v48  ;;  %24129 = vmatprep.subr.mxu1 %v1426_v25  ;;  %v1947_v58 = vsub.f32 %v710_v24, %v26790_v38  ;;  %v1942_v54 = vsub.f32 %v1940_v26, %v1941_v17  ;;  %v26922_v24 = vsub.f32 %v22898_v10, %v22898_v10 }
 0x1f7   :  { %24140 = vmatprep.subr.mxu0 %v1423_v36  ;;  %24130 = vmatpush3.msra.mxu1 %v1426_v25  ;;  %v1935_v42 = vsub.f32 %v1933_v53, %v1934_v40 }
 0x1f8   :  { %24141 = vmatpush3.msra.mxu0 %v1423_v36  ;;  %24131 = vmatprep.mubr.msk.f32.mxu1 %vm745_vm5, %v26499_v44  ;;  %v1948_v2 = vand.u32 4294901760, %v1947_v58 }
 0x1f9   :  { %24142 = vmatprep.mubr.f32.mxu0 %v26529_v3  ;;  %24145 = vmatprep.subr.mxu1 %v26696_v46  ;;  %v1936_v34 = vand.u32 4294901760, %v1935_v42 }
 0x1fa   :  { %24156 = vmatprep.subr.mxu0 %v26728_v50  ;;  %24132 = vmatmul.mubr.msk.f32.vlgmr.msra.gmra.mxu1 %vm745_vm5, %v26607_v16 }
 0x1fb   :  { %24143 = vmatmul.mubr.f32.vlgmr.msra.gmra.mxu0 %v26613_v35  ;;  %24146 = vmatpush3.msra.mxu1 %v26696_v46 }
 0x1fc   :  { %24157 = vmatpush3.msra.mxu0 %v26728_v50  ;;  %24147 = vmatprep.subr.mxu1 %v26703_v57 }
 0x1fd   :  { %24158 = vmatprep.subr.mxu0 %v26736_v11  ;;  %24148 = vmatpush3.msra.mxu1 %v26703_v57 }
 0x1fe   :  { %24159 = vmatpush3.msra.mxu0 %v26736_v11  ;;  %24149 = vmatprep.subr.mxu1 %v26711_v31 }
 0x1ff   :  { %24160 = vmatprep.subr.mxu0 %v26743_v15  ;;  %24150 = vmatpush3.msra.mxu1 %v26711_v31 }
 0x200   :  { %24161 = vmatpush3.msra.mxu0 %v26743_v15  ;;  %24151 = vmatprep.subr.mxu1 %v26718_v12 }
 0x201   :  { %24162 = vmatprep.subr.mxu0 %v26750_v22  ;;  %24152 = vmatpush3.msra.mxu1 %v26718_v12 }
 0x202   :  { %24163 = vmatpush3.msra.mxu0 %v26750_v22  ;;  %24153 = vmatprep.mubr.f32.mxu1 %v26539_v63 }
 0x203   :  { %24164 = vmatprep.mubr.msk.f32.mxu0 %vm745_vm5, %v26499_v44  ;;  %24167 = vmatprep.subr.mxu1 %v26696_v46 }
 0x204   :  { %24178 = vmatprep.subr.mxu0 %v26775_v56  ;;  %24154 = vmatmul.mubr.f32.vlgmr.msra.gmra.mxu1 %v26622_v41 }
 0x205   :  { %24165 = vmatmul.mubr.msk.f32.vlgmr.msra.gmra.mxu0 %vm745_vm5, %v26607_v16  ;;  %24168 = vmatpush3.msra.mxu1 %v26696_v46  ;;  %v1949_v46 = vsub.f32 %v1947_v58, %v1948_v2 }
 0x206   :  { %24179 = vmatpush3.msra.mxu0 %v26775_v56  ;;  %24169 = vmatprep.subr.mxu1 %v26703_v57 }
 0x207   :  { %24180 = vmatprep.subr.mxu0 %v26782_v30  ;;  %24170 = vmatpush3.msra.mxu1 %v26703_v57  ;;  %v1943_v57 = vand.u32 4294901760, %v1942_v54  ;;  %v1950_v62 = vand.u32 4294901760, %v1949_v46 }
 0x208   :  { %24181 = vmatpush3.msra.mxu0 %v26782_v30  ;;  %24171 = vmatprep.subr.mxu1 %v26711_v31 }
 0x209   :  { %24182 = vmatprep.subr.mxu0 %v26790_v38  ;;  %24172 = vmatpush3.msra.mxu1 %v26711_v31  ;;  %v716_v31 = vmax.f32 %v26599_v13, %v700_v21 }
 0x20a   :  { %24183 = vmatpush3.msra.mxu0 %v26790_v38  ;;  %24173 = vmatprep.subr.mxu1 %v26718_v12 }
 0x20b   :  { %24184 = vmatprep.subr.mxu0 %v26797_v6  ;;  %24174 = vmatpush3.msra.mxu1 %v26718_v12  ;;  %v2347_v12 = vsel %vm752_vm12, %v716_v31, 0 }
 0x20c   :  { %24175 = vmatprep.mubr.msk.f32.mxu1 %vm745_vm5, %v26499_v44  ;;  %24185 = vmatpush3.msra.mxu0 %v26797_v6  ;;  %v26836_v13 = vand.u32 4294901760, %v2347_v12 }
 0x20d   :  { %24176 = vmatmul.mubr.msk.f32.vlgmr.msra.gmra.mxu1 %vm745_vm5, %v26607_v16  ;;  %24186 = vmatprep.mubr.f32.mxu0 %v26557_v5 }
 0x20e   :  { %24189 = vmatprep.subr.mxu1 %v1936_v34  ;;  %24200 = vmatprep.subr.mxu0 %v1933_v53  ;;  %v2464_v48 = vsub.f32 %v2347_v12, %v26836_v13 }
 0x20f   :  { %24187 = vmatmul.mubr.f32.vlgmr.msra.gmra.mxu0 %v26648_v55  ;;  %24190 = vmatpush3.msra.mxu1 %v1936_v34 }
 0x210   :  { %24201 = vmatpush3.msra.mxu0 %v1933_v53  ;;  %24191 = vmatprep.subr.mxu1 %v1943_v57  ;;  %v26850_v50 = vand.u32 4294901760, %v2464_v48  ;;  %v26941_v53 = vand.u32 4294901760, %v26922_v24 }
 0x211   :  { %24202 = vmatprep.subr.mxu0 %v1940_v26  ;;  %24192 = vmatpush3.msra.mxu1 %v1943_v57 }
 0x212   :  { %24203 = vmatpush3.msra.mxu0 %v1940_v26  ;;  %24193 = vmatprep.subr.mxu1 %v1950_v62  ;;  %v2466_v36 = vsub.f32 %v2464_v48, %v26850_v50 }
 0x213   :  { %24204 = vmatprep.subr.mxu0 %v1947_v58  ;;  %24194 = vmatpush3.msra.mxu1 %v1950_v62 }
 0x214   :  { %24205 = vmatpush3.msra.mxu0 %v1947_v58  ;;  %24195 = vmatprep.subr.mxu1 %v1957_v7  ;;  %v2467_v11 = vand.u32 4294901760, %v2466_v36 }
 0x215   :  { %24206 = vmatprep.subr.mxu0 %v1954_v8  ;;  %24196 = vmatpush3.msra.mxu1 %v1957_v7 }
 0x216   :  { %24207 = vmatpush3.msra.mxu0 %v1954_v8  ;;  %24197 = vmatprep.mubr.msk.f32.mxu1 %vm745_vm5, %v26499_v44  ;;  %v30744_v8 = vmov 1.0  }
 0x217   :  { %24208 = vmatprep.mubr.f32.mxu0 %v26529_v3  ;;  %24211 = vmatprep.subr.mxu1 %v26775_v56 }
 0x218   :  { %24222 = vmatprep.subr.mxu0 %v1934_v40  ;;  %24198 = vmatmul.mubr.msk.f32.vlgmr.msra.gmra.mxu1 %vm745_vm5, %v26607_v16 }
 0x219   :  { %24209 = vmatmul.mubr.f32.vlgmr.msra.gmra.mxu0 %v26613_v35  ;;  %24212 = vmatpush3.msra.mxu1 %v26775_v56 }
 0x21a   :  { %24223 = vmatpush3.msra.mxu0 %v1934_v40  ;;  %24213 = vmatprep.subr.mxu1 %v26782_v30 }
 0x21b   :  { %24224 = vmatprep.subr.mxu0 %v1941_v17  ;;  %24214 = vmatpush3.msra.mxu1 %v26782_v30 }
 0x21c   :  { %24225 = vmatpush3.msra.mxu0 %v1941_v17  ;;  %24215 = vmatprep.subr.mxu1 %v26790_v38 }
 0x21d   :  { %24226 = vmatprep.subr.mxu0 %v1948_v2  ;;  %24216 = vmatpush3.msra.mxu1 %v26790_v38 }
 0x21e   :  { %24227 = vmatpush3.msra.mxu0 %v1948_v2  ;;  %24217 = vmatprep.subr.mxu1 %v26797_v6 }
 0x21f   :  { %24228 = vmatprep.subr.mxu0 %v1955_v19  ;;  %24218 = vmatpush3.msra.mxu1 %v26797_v6 }
 0x220   :  { %24229 = vmatpush3.msra.mxu0 %v1955_v19  ;;  %24219 = vmatprep.mubr.f32.mxu1 %v26539_v63 }
 0x221   :  { %24230 = vmatprep.mubr.msk.f32.mxu0 %vm745_vm5, %v26499_v44  ;;  %24233 = vmatprep.subr.mxu1 %v26775_v56 }
 0x222   :  { %24244 = vmatprep.subr.mxu0 %v26836_v13  ;;  %24220 = vmatmul.mubr.f32.vlgmr.msra.gmra.mxu1 %v26622_v41 }
 0x223   :  { %24231 = vmatmul.mubr.msk.f32.vlgmr.msra.gmra.mxu0 %vm745_vm5, %v26607_v16  ;;  %24234 = vmatpush3.msra.mxu1 %v26775_v56 }
 0x224   :  { %24245 = vmatpush3.msra.mxu0 %v26836_v13  ;;  %24235 = vmatprep.subr.mxu1 %v26782_v30 }
 0x225   :  { %24236 = vmatpush3.msra.mxu1 %v26782_v30  ;;  %24241 = vmatprep.mubr.msk.f32.mxu1 %vm745_vm5, %v26499_v44 }
 0x226   :  { %24237 = vmatprep.subr.mxu1 %v26790_v38  ;;  %24252 = vmatprep.mubr.f32.mxu0 %v26557_v5 }
 0x227   :  { %24238 = vmatpush3.msra.mxu1 %v26790_v38 }
 0x228   :  { %24239 = vmatprep.subr.mxu1 %v26797_v6 }
 0x229   :  { %24240 = vmatpush3.msra.mxu1 %v26797_v6 }
 0x22a   :  { %24242 = vmatmul.mubr.msk.f32.vlgmr.msra.gmra.mxu1 %vm745_vm5, %v26607_v16  ;;  %24255 = vmatprep.subr.mxu1 %v2467_v11 }
 0x22b   :  { %24256 = vmatpush3.msra.mxu1 %v2467_v11  ;;  %24263 = vmatprep.mubr.msk.f32.mxu1 %vm745_vm5, %v26499_v44 }
 0x248   :  { %v698_v47 = vpop.permute.xlu1 %697 }
 0x249   :  { %v715_v15 = vmax.f32 %v26670_v51, %v698_v47 }
 0x24b   :  { %v26876_v37 = vand.u32 4294901760, %v715_v15 }
 0x24c   :  { %v696_v5 = vpop.permute.xlu0 %695 }
 0x24d   :  { %v2471_v22 = vsub.f32 %v715_v15, %v26876_v37  ;;  %v714_v1 = vmax.f32 %v26679_v45, %v696_v5  ;;  %v694_v23 = vpop.permute.xlu1 %693  ;;  %24246 = vmatprep.subr.mxu0 %v26876_v37 }
 0x24e   :  { %v713_v18 = vmax.f32 %v26681_v52, %v694_v23  ;;  %24247 = vmatpush3.msra.mxu0 %v26876_v37 }
 0x24f   :  { %v26883_v0 = vand.u32 4294901760, %v714_v1  ;;  %v2472_v59 = vand.u32 4294901760, %v2471_v22 }
 0x250   :  { %v26885_v39 = vand.u32 4294901760, %v713_v18 }
 0x251   :  { %v2478_v51 = vsub.f32 %v714_v1, %v26883_v0  ;;  %24248 = vmatprep.subr.mxu0 %v26883_v0  ;;  %v2473_v25 = vsub.f32 %v2471_v22, %v2472_v59 }
 0x252   :  { %v2485_v14 = vsub.f32 %v713_v18, %v26885_v39  ;;  %24249 = vmatpush3.msra.mxu0 %v26883_v0 }
 0x253   :  { %24250 = vmatprep.subr.mxu0 %v26885_v39  ;;  %v2474_v45 = vand.u32 4294901760, %v2473_v25  ;;  %v2479_v52 = vand.u32 4294901760, %v2478_v51 }
 0x254   :  { %24251 = vmatpush3.msra.mxu0 %v26885_v39  ;;  %v2486_v43 = vand.u32 4294901760, %v2485_v14 }
 0x255   :  { %24257 = vmatprep.subr.mxu1 %v2474_v45  ;;  %24266 = vmatprep.subr.mxu0 %v2464_v48  ;;  %v2480_v20 = vsub.f32 %v2478_v51, %v2479_v52 }
 0x256   :  { %24253 = vmatmul.mubr.f32.vlgmr.msra.gmra.mxu0 %v26648_v55  ;;  %24258 = vmatpush3.msra.mxu1 %v2474_v45  ;;  %v2487_v9 = vsub.f32 %v2485_v14, %v2486_v43  ;;  %v2884_v55 = vsel %vm752_vm12, %v26899_v33, 0 }
 0x257   :  { %24267 = vmatpush3.msra.mxu0 %v2464_v48  ;;  %v2481_v27 = vand.u32 4294901760, %v2480_v20  ;;  %24274 = vmatprep.mubr.f32.mxu0 %v26529_v3  ;;  %v26912_v29 = vsub.f32 %v2884_v55, %v2884_v55  ;;  %v26917_v3 = vsel %vm26494_vm8, 1.0, %v30748_v4 }
 0x258   :  { %24268 = vmatprep.subr.mxu0 %v2471_v22  ;;  %v2488_v56 = vand.u32 4294901760, %v2487_v9  ;;  %30797 = vst [vmem:[#allocation21_spill] sm:$0xff] %v26917_v3  ;;  %v26936_v32 = vsub.f32 %v26917_v3, %v26917_v3 }
 0x259   :  { %24269 = vmatpush3.msra.mxu0 %v2471_v22  ;;  %24259 = vmatprep.subr.mxu1 %v2481_v27  ;;  %v26932_v30 = vand.u32 4294901760, %v26912_v29 }
 0x25a   :  { %24270 = vmatprep.subr.mxu0 %v2478_v51  ;;  %24260 = vmatpush3.msra.mxu1 %v2481_v27  ;;  %v26953_v6 = vand.u32 4294901760, %v26936_v32 }
 0x25b   :  { %24271 = vmatpush3.msra.mxu0 %v2478_v51  ;;  %24261 = vmatprep.subr.mxu1 %v2488_v56  ;;  %v3003_v26 = vsub.f32 %v26912_v29, %v26932_v30 }
 0x25c   :  { %24272 = vmatprep.subr.mxu0 %v2485_v14  ;;  %24262 = vmatpush3.msra.mxu1 %v2488_v56  ;;  %v3017_v40 = vsub.f32 %v26936_v32, %v26953_v6 }
 0x25d   :  { %24273 = vmatpush3.msra.mxu0 %v2485_v14  ;;  %24264 = vmatmul.mubr.msk.f32.vlgmr.msra.gmra.mxu1 %vm745_vm5, %v26607_v16  ;;  %v26972_v58 = vand.u32 4294901760, %v3003_v26 }
 0x25e   :  { %24277 = vmatprep.subr.mxu1 %v26836_v13  ;;  %24288 = vmatprep.subr.mxu0 %v26850_v50  ;;  %v26994_v2 = vand.u32 4294901760, %v3017_v40 }
 0x25f   :  { %24275 = vmatmul.mubr.f32.vlgmr.msra.gmra.mxu0 %v26613_v35  ;;  %24278 = vmatpush3.msra.mxu1 %v26836_v13  ;;  %v26928_v35 = vsel %vm26489_vm7, 1.0, %v30748_v4 }
 0x260   :  { %24289 = vmatpush3.msra.mxu0 %v26850_v50  ;;  %24279 = vmatprep.subr.mxu1 %v26876_v37  ;;  %30798 = vst [vmem:[#allocation22_spill] sm:$0xff] %v26928_v35  ;;  %v26945_v38 = vsub.f32 %v26928_v35, %v26928_v35 }
 0x261   :  { %24290 = vmatprep.subr.mxu0 %v2472_v59  ;;  %24280 = vmatpush3.msra.mxu1 %v26876_v37 }
 0x262   :  { %24291 = vmatpush3.msra.mxu0 %v2472_v59  ;;  %24281 = vmatprep.subr.mxu1 %v26883_v0  ;;  %30799 = vst [vmem:[#allocation23_spill] sm:$0xff] %v26945_v38 }
 0x263   :  { %24292 = vmatprep.subr.mxu0 %v2479_v52  ;;  %24282 = vmatpush3.msra.mxu1 %v26883_v0 }
 0x264   :  { %24293 = vmatpush3.msra.mxu0 %v2479_v52  ;;  %24283 = vmatprep.subr.mxu1 %v26885_v39 }
 0x265   :  { %24294 = vmatprep.subr.mxu0 %v2486_v43  ;;  %24284 = vmatpush3.msra.mxu1 %v26885_v39 }
 0x266   :  { %24285 = vmatprep.mubr.f32.mxu1 %v26539_v63  ;;  %24295 = vmatpush3.msra.mxu0 %v2486_v43  ;;  %v3010_v63 = vsub.f32 %v26922_v24, %v26941_v53 }
 0x267   :  { %24286 = vmatmul.mubr.f32.vlgmr.msra.gmra.mxu1 %v26622_v41  ;;  %24299 = vmatprep.subr.mxu1 %v26836_v13  ;;  %v26964_v41 = vand.u32 4294901760, %v26945_v38 }
 0x268   :  { %24296 = vmatprep.mubr.msk.f32.mxu0 %vm745_vm5, %v26499_v44  ;;  %24300 = vmatpush3.msra.mxu1 %v26836_v13  ;;  %v26983_v17 = vand.u32 4294901760, %v3010_v63 }
 0x269   :  { %24297 = vmatmul.mubr.msk.f32.vlgmr.msra.gmra.mxu0 %vm745_vm5, %v26607_v16  ;;  %24301 = vmatprep.subr.mxu1 %v26876_v37  ;;  %30800 = vst [vmem:[#allocation24_spill] sm:$0xff] %v26964_v41  ;;  %v3024_v42 = vsub.f32 %v26945_v38, %v26964_v41 }
 0x26a   :  { %24302 = vmatpush3.msra.mxu1 %v26876_v37  ;;  %24307 = vmatprep.mubr.msk.f32.mxu1 %vm745_vm5, %v26499_v44 }
 0x26b   :  { %24303 = vmatprep.subr.mxu1 %v26883_v0  ;;  %24310 = vmatprep.subr.msk.mxu0 %vm752_vm12, %v26899_v33  ;;  %v27004_v54 = vand.u32 4294901760, %v3024_v42 }
 0x26c   :  { %24304 = vmatpush3.msra.mxu1 %v26883_v0  ;;  %24311 = vmatpush3.msk.msra.mxu0 %vm752_vm12, %v26899_v33 }
 0x26d   :  { %24305 = vmatprep.subr.mxu1 %v26885_v39  ;;  %24312 = vmatprep.subr.msk.mxu0 %vm26512_vm10, %v30744_v8  ;;  %30801 = vst [vmem:[#allocation25_spill] sm:$0xff] %v27004_v54 }
 0x26e   :  { %24306 = vmatpush3.msra.mxu1 %v26885_v39  ;;  %24313 = vmatpush3.msk.msra.mxu0 %vm26512_vm10, %v30744_v8 }
 0x26f   :  { %24308 = vmatmul.mubr.msk.f32.vlgmr.msra.gmra.mxu1 %vm745_vm5, %v26607_v16  ;;  %24321 = vmatprep.subr.mxu1 %v26972_v58 }
 0x270   :  { %24322 = vmatpush3.msra.mxu1 %v26972_v58  ;;  %24314 = vmatprep.subr.msk.mxu0 %vm26494_vm8, %v30744_v8 }
 0x271   :  { %24323 = vmatprep.subr.mxu1 %v26983_v17  ;;  %24315 = vmatpush3.msk.msra.mxu0 %vm26494_vm8, %v30744_v8 }
 0x272   :  { %24324 = vmatpush3.msra.mxu1 %v26983_v17  ;;  %24316 = vmatprep.subr.msk.mxu0 %vm26489_vm7, %v30744_v8 }
 0x273   :  { %24325 = vmatprep.subr.mxu1 %v26994_v2  ;;  %24317 = vmatpush3.msk.msra.mxu0 %vm26489_vm7, %v30744_v8 }
 0x274   :  { %24326 = vmatpush3.msra.mxu1 %v26994_v2  ;;  %24332 = vmatprep.subr.mxu0 %v26912_v29 }
 0x275   :  { %24327 = vmatprep.subr.mxu1 %v27004_v54 }
 0x276   :  { %24328 = vmatpush3.msra.mxu1 %v27004_v54 }
 0x277   :  { %24343 = vmatprep.subr.msk.mxu1 %vm752_vm12, %v26899_v33 }
 0x292   :  { %v24056_v16 = vpop.f32.mrf.mxu0 }
 0x294   :  { %v831_v19 = vpop.f32.mrf.mxu0 }
 0x29c   :  { %v24067_v34 = vpop.f32.mrf.mxu1 }
 0x29d   :  { %v24078_v21 = vpop.f32.mrf.mxu0  ;;  %v939_v57 = vadd.f32 %v24067_v34, %v24056_v16 }
 0x29e   :  { %v932_v46 = vpop.f32.mrf.mxu1 }
 0x29f   :  { %v933_v61 = vadd.f32 %v932_v46, %v831_v19  ;;  %v1018_v62 = vpop.f32.mrf.mxu0  ;;  %v1026_v31 = vadd.f32 %v24078_v21, %v939_v57 }
 0x2a1   :  { %v1019_v7 = vadd.f32 %v1018_v62, %v933_v61 }
 0x2a6   :  { %v24089_v12 = vpop.f32.mrf.mxu1 }
 0x2a7   :  { %v24100_v13 = vpop.f32.mrf.mxu0  ;;  %v1111_v48 = vadd.f32 %v24089_v12, %v1026_v31 }
 0x2a8   :  { %v1102_v50 = vpop.f32.mrf.mxu1 }
 0x2a9   :  { %v1103_v36 = vadd.f32 %v1102_v50, %v1019_v7  ;;  %v1193_v11 = vpop.f32.mrf.mxu0  ;;  %v1200_v47 = vadd.f32 %v24100_v13, %v1111_v48 }
 0x2ab   :  { %v1194_v15 = vadd.f32 %v1193_v11, %v1103_v36 }
 0x2af   :  { %v24111_v37 = vpop.f32.mrf.mxu1 }
 0x2b0   :  { %v1281_v5 = vadd.f32 %v24111_v37, %v1200_v47 }
 0x2b1   :  { %v1274_v22 = vpop.f32.mrf.mxu1  ;;  %v24122_v51 = vpop.f32.mrf.mxu0 }
 0x2b2   :  { %v2881_v1 = vsel %vm745_vm5, %v1281_v5, 0  ;;  %v1275_v23 = vadd.f32 %v1274_v22, %v1194_v15 }
 0x2b3   :  { %v27021_v18 = vand.u32 4294901760, %v2881_v1  ;;  %v1362_v45 = vpop.f32.mrf.mxu0 }
 0x2b4   :  { %v2878_v0 = vsel %vm745_vm5, %v1275_v23, 0 }
 0x2b5   :  { %v2966_v59 = vsub.f32 %v2881_v1, %v27021_v18  ;;  %v2955_v39 = vand.u32 4294901760, %v2878_v0 }
 0x2b7   :  { %v2967_v25 = vand.u32 4294901760, %v2966_v59  ;;  %v2956_v14 = vsub.f32 %v2878_v0, %v2955_v39  ;;  %24329 = vmatprep.mubr.f32.mxu1 %v2955_v39 }
 0x2b8   :  { %24330 = vmatmul.mubr.f32.vlgmr.msra.gmra.mxu1 %v27021_v18 }
 0x2b9   :  { %v2957_v52 = vand.u32 4294901760, %v2956_v14  ;;  %v2968_v43 = vsub.f32 %v2966_v59, %v2967_v25  ;;  %24344 = vmatpush3.msk.msra.mxu1 %vm752_vm12, %v26899_v33 }
 0x2ba   :  { %v24133_v20 = vpop.f32.mrf.mxu1  ;;  %24345 = vmatprep.subr.msk.mxu1 %vm26512_vm10, %v30744_v8 }
 0x2bb   :  { %v2958_v9 = vsub.f32 %v2956_v14, %v2957_v52  ;;  %24346 = vmatpush3.msk.msra.mxu1 %vm26512_vm10, %v30744_v8  ;;  %24351 = vmatprep.mubr.f32.mxu1 %v2957_v52  ;;  %v2969_v27 = vand.u32 4294901760, %v2968_v43  ;;  %v24144_v10 = vpop.f32.mrf.mxu0  ;;  %v1470_v26 = vadd.f32 %v24133_v20, %v24122_v51 }
 0x2bc   :  { %24347 = vmatprep.subr.msk.mxu1 %vm26494_vm8, %v30744_v8  ;;  %v1463_v55 = vpop.f32.mrf.mxu1 }
 0x2bd   :  { %v2959_v56 = vand.u32 4294901760, %v2958_v9  ;;  %24348 = vmatpush3.msk.msra.mxu1 %vm26494_vm8, %v30744_v8  ;;  %v1464_v63 = vadd.f32 %v1463_v55, %v1362_v45  ;;  %v1549_v40 = vpop.f32.mrf.mxu0  ;;  %v1557_v42 = vadd.f32 %v24144_v10, %v1470_v26 }
 0x2be   :  { %24349 = vmatprep.subr.msk.mxu1 %vm26489_vm7, %v30744_v8 }
 0x2bf   :  { %24318 = vmatprep.mubr.f32.mxu0 %v2959_v56  ;;  %24350 = vmatpush3.msk.msra.mxu1 %vm26489_vm7, %v30744_v8  ;;  %v1550_v16 = vadd.f32 %v1549_v40, %v1464_v63 }
 0x2c0   :  { %24319 = vmatmul.mubr.f32.vlgmr.msra.gmra.mxu0 %v2969_v27  ;;  %24365 = vmatprep.subr.msk.mxu1 %vm752_vm12, %v26899_v33 }
 0x2c1   :  { %24333 = vmatpush3.msra.mxu0 %v26912_v29  ;;  %24340 = vmatprep.mubr.f32.mxu0 %v2956_v14 }
 0x2c2   :  { %24334 = vmatprep.subr.mxu0 %v26922_v24  ;;  %24352 = vmatmul.mubr.f32.vlgmr.msra.gmra.mxu1 %v2967_v25 }
 0x2c3   :  { %24335 = vmatpush3.msra.mxu0 %v26922_v24  ;;  %24366 = vmatpush3.msk.msra.mxu1 %vm752_vm12, %v26899_v33 }
 0x2c4   :  { %v24155_v19 = vpop.f32.mrf.mxu1  ;;  %24336 = vmatprep.subr.mxu0 %v26936_v32  ;;  %24367 = vmatprep.subr.msk.mxu1 %vm26512_vm10, %v30744_v8 }
 0x2c5   :  { %24337 = vmatpush3.msra.mxu0 %v26936_v32  ;;  %v24166_v34 = vpop.f32.mrf.mxu0  ;;  %24368 = vmatpush3.msk.msra.mxu1 %vm26512_vm10, %v30744_v8  ;;  %v1642_v46 = vadd.f32 %v24155_v19, %v1557_v42 }
 0x2c6   :  { %v1633_v21 = vpop.f32.mrf.mxu1  ;;  %24338 = vmatprep.subr.mxu0 %v26945_v38  ;;  %24369 = vmatprep.subr.msk.mxu1 %vm26494_vm8, %v30744_v8 }
 0x2c7   :  { %24339 = vmatpush3.msra.mxu0 %v26945_v38  ;;  %24370 = vmatpush3.msk.msra.mxu1 %vm26494_vm8, %v30744_v8  ;;  %v1634_v57 = vadd.f32 %v1633_v21, %v1550_v16  ;;  %v1724_v61 = vpop.f32.mrf.mxu0  ;;  %v1731_v62 = vadd.f32 %v24166_v34, %v1642_v46 }
 0x2c8   :  { %24354 = vmatprep.subr.mxu0 %v26932_v30  ;;  %24341 = vmatmul.mubr.f32.vlgmr.msra.gmra.mxu0 %v2966_v59 }
 0x2c9   :  { %24355 = vmatpush3.msra.mxu0 %v26932_v30  ;;  %24362 = vmatprep.mubr.f32.mxu0 %v2955_v39  ;;  %v1725_v31 = vadd.f32 %v1724_v61, %v1634_v57 }
 0x2ca   :  { %24356 = vmatprep.subr.mxu0 %v26941_v53  ;;  %24371 = vmatprep.subr.msk.mxu1 %vm26489_vm7, %v30744_v8 }
 0x2cb   :  { %24357 = vmatpush3.msra.mxu0 %v26941_v53  ;;  %24372 = vmatpush3.msk.msra.mxu1 %vm26489_vm7, %v30744_v8 }
 0x2cc   :  { %24358 = vmatprep.subr.mxu0 %v26953_v6  ;;  %24373 = vmatprep.mubr.f32.mxu1 %v2955_v39 }
 0x2cd   :  { %v24177_v7 = vpop.f32.mrf.mxu1  ;;  %24359 = vmatpush3.msra.mxu0 %v26953_v6  ;;  %24387 = vmatprep.subr.mxu1 %v26972_v58 }
 0x2ce   :  { %v1812_v12 = vadd.f32 %v24177_v7, %v1731_v62  ;;  %24360 = vmatprep.subr.mxu0 %v26964_v41  ;;  %24374 = vmatmul.mubr.f32.vlgmr.msra.gmra.mxu1 %v27021_v18 }
 0x2cf   :  { %v1805_v13 = vpop.f32.mrf.mxu1  ;;  %24361 = vmatpush3.msra.mxu0 %v26964_v41  ;;  %24388 = vmatpush3.msra.mxu1 %v26972_v58  ;;  %v24188_v47 = vpop.f32.mrf.mxu0 }
 0x2d0   :  { %v3418_v48 = vsel %vm745_vm5, %v1812_v12, 0  ;;  %v1806_v50 = vadd.f32 %v1805_v13, %v1725_v31  ;;  %24376 = vmatprep.subr.msk.mxu0 %vm752_vm12, %v26899_v33  ;;  %24363 = vmatmul.mubr.f32.vlgmr.msra.gmra.mxu0 %v27021_v18 }
 0x2d1   :  { %v27090_v36 = vand.u32 4294901760, %v3418_v48  ;;  %24377 = vmatpush3.msk.msra.mxu0 %vm752_vm12, %v26899_v33  ;;  %24389 = vmatprep.subr.mxu1 %v26983_v17  ;;  %v1893_v1 = vpop.f32.mrf.mxu0 }
 0x2d2   :  { %v3415_v11 = vsel %vm745_vm5, %v1806_v50, 0  ;;  %24378 = vmatprep.subr.msk.mxu0 %vm26512_vm10, %v30744_v8  ;;  %24390 = vmatpush3.msra.mxu1 %v26983_v17 }
 0x2d3   :  { %v3500_v15 = vsub.f32 %v3418_v48, %v27090_v36  ;;  %v27101_v37 = vand.u32 4294901760, %v3415_v11  ;;  %24379 = vmatpush3.msk.msra.mxu0 %vm26512_vm10, %v30744_v8  ;;  %24391 = vmatprep.subr.mxu1 %v26994_v2 }
 0x2d4   :  { %24380 = vmatprep.subr.msk.mxu0 %vm26494_vm8, %v30744_v8  ;;  %24392 = vmatpush3.msra.mxu1 %v26994_v2 }
 0x2d5   :  { %v3501_v5 = vand.u32 4294901760, %v3500_v15  ;;  %v3490_v22 = vsub.f32 %v3415_v11, %v27101_v37  ;;  %24381 = vmatpush3.msk.msra.mxu0 %vm26494_vm8, %v30744_v8  ;;  %24393 = vmatprep.subr.mxu1 %v27004_v54 }
 0x2d6   :  { %24382 = vmatprep.subr.msk.mxu0 %vm26489_vm7, %v30744_v8  ;;  %24394 = vmatpush3.msra.mxu1 %v27004_v54 }
 0x2d7   :  { %24383 = vmatpush3.msk.msra.mxu0 %vm26489_vm7, %v30744_v8  ;;  %v3491_v23 = vand.u32 4294901760, %v3490_v22  ;;  %v3502_v18 = vsub.f32 %v3500_v15, %v3501_v5  ;;  %24395 = vmatprep.mubr.f32.mxu1 %v27101_v37 }
 0x2d8   :  { %v24199_v0 = vpop.f32.mrf.mxu1  ;;  %24398 = vmatprep.subr.mxu0 %v26912_v29  ;;  %24409 = vmatprep.subr.msk.mxu1 %vm752_vm12, %v26899_v33 }
 0x2d9   :  { %v3492_v59 = vsub.f32 %v3490_v22, %v3491_v23  ;;  %24396 = vmatmul.mubr.f32.vlgmr.msra.gmra.mxu1 %v27090_v36  ;;  %v3503_v39 = vand.u32 4294901760, %v3502_v18  ;;  %v24210_v25 = vpop.f32.mrf.mxu0  ;;  %v2001_v14 = vadd.f32 %v24199_v0, %v24188_v47 }
 0x2da   :  { %v1994_v51 = vpop.f32.mrf.mxu1  ;;  %24410 = vmatpush3.msk.msra.mxu1 %vm752_vm12, %v26899_v33  ;;  %24417 = vmatprep.mubr.f32.mxu1 %v3491_v23 }
 0x2db   :  { %v3493_v45 = vand.u32 4294901760, %v3492_v59  ;;  %24411 = vmatprep.subr.msk.mxu1 %vm26512_vm10, %v30744_v8  ;;  %v1995_v52 = vadd.f32 %v1994_v51, %v1893_v1  ;;  %v2080_v43 = vpop.f32.mrf.mxu0  ;;  %v2088_v20 = vadd.f32 %v24210_v25, %v2001_v14 }
 0x2dc   :  { %24412 = vmatpush3.msk.msra.mxu1 %vm26512_vm10, %v30744_v8 }
 0x2dd   :  { %24384 = vmatprep.mubr.f32.mxu0 %v3493_v45  ;;  %24413 = vmatprep.subr.msk.mxu1 %vm26494_vm8, %v30744_v8  ;;  %v2081_v9 = vadd.f32 %v2080_v43, %v1995_v52 }
 0x2de   :  { %24385 = vmatmul.mubr.f32.vlgmr.msra.gmra.mxu0 %v3503_v39  ;;  %24414 = vmatpush3.msk.msra.mxu1 %vm26494_vm8, %v30744_v8 }
 0x2df   :  { %24399 = vmatpush3.msra.mxu0 %v26912_v29  ;;  %24406 = vmatprep.mubr.f32.mxu0 %v3490_v22 }
 0x2e0   :  { %24400 = vmatprep.subr.mxu0 %v26922_v24  ;;  %24415 = vmatprep.subr.msk.mxu1 %vm26489_vm7, %v30744_v8 }
 0x2e1   :  { %24401 = vmatpush3.msra.mxu0 %v26922_v24  ;;  %24416 = vmatpush3.msk.msra.mxu1 %vm26489_vm7, %v30744_v8 }
 0x2e2   :  { %v24221_v27 = vpop.f32.mrf.mxu1  ;;  %24402 = vmatprep.subr.mxu0 %v26936_v32  ;;  %24431 = vmatprep.subr.msk.mxu1 %vm752_vm12, %v26899_v33 }
 0x2e3   :  { %v2173_v56 = vadd.f32 %v24221_v27, %v2088_v20  ;;  %24403 = vmatpush3.msra.mxu0 %v26936_v32  ;;  %v24232_v55 = vpop.f32.mrf.mxu0  ;;  %24418 = vmatmul.mubr.f32.vlgmr.msra.gmra.mxu1 %v3501_v5 }
 0x2e4   :  { %v2164_v10 = vpop.f32.mrf.mxu1  ;;  %24404 = vmatprep.subr.mxu0 %v26945_v38  ;;  %24432 = vmatpush3.msk.msra.mxu1 %vm752_vm12, %v26899_v33 }
 0x2e5   :  { %v2165_v26 = vadd.f32 %v2164_v10, %v2081_v9  ;;  %24405 = vmatpush3.msra.mxu0 %v26945_v38  ;;  %24433 = vmatprep.subr.msk.mxu1 %vm26512_vm10, %v30744_v8  ;;  %v2255_v63 = vpop.f32.mrf.mxu0  ;;  %v2262_v40 = vadd.f32 %v24232_v55, %v2173_v56 }
 0x2e6   :  { %24420 = vmatprep.subr.mxu0 %v26932_v30  ;;  %24407 = vmatmul.mubr.f32.vlgmr.msra.gmra.mxu0 %v3500_v15 }
 0x2e7   :  { %24421 = vmatpush3.msra.mxu0 %v26932_v30  ;;  %24434 = vmatpush3.msk.msra.mxu1 %vm26512_vm10, %v30744_v8  ;;  %v2256_v42 = vadd.f32 %v2255_v63, %v2165_v26 }
 0x2e8   :  { %24422 = vmatprep.subr.mxu0 %v26941_v53  ;;  %24435 = vmatprep.subr.msk.mxu1 %vm26494_vm8, %v30744_v8 }
 0x2e9   :  { %24423 = vmatpush3.msra.mxu0 %v26941_v53  ;;  %24436 = vmatpush3.msk.msra.mxu1 %vm26494_vm8, %v30744_v8 }
 0x2ea   :  { %v24243_v16 = vpop.f32.mrf.mxu1  ;;  %24424 = vmatprep.subr.mxu0 %v26953_v6  ;;  %24428 = vmatprep.mubr.f32.mxu0 %v27101_v37 }
 0x2eb   :  { %v2343_v19 = vadd.f32 %v24243_v16, %v2262_v40  ;;  %24425 = vmatpush3.msra.mxu0 %v26953_v6  ;;  %24437 = vmatprep.subr.msk.mxu1 %vm26489_vm7, %v30744_v8 }
 0x2ec   :  { %v2336_v34 = vpop.f32.mrf.mxu1  ;;  %24426 = vmatprep.subr.mxu0 %v26964_v41  ;;  %24438 = vmatpush3.msk.msra.mxu1 %vm26489_vm7, %v30744_v8 }
 0x2ed   :  { %v3952_v46 = vsel %vm745_vm5, %v2343_v19, 0  ;;  %v2337_v21 = vadd.f32 %v2336_v34, %v2256_v42  ;;  %24427 = vmatpush3.msra.mxu0 %v26964_v41  ;;  %24439 = vmatprep.mubr.f32.mxu1 %v27101_v37 }
 0x2ee   :  { %v27188_v57 = vand.u32 4294901760, %v3952_v46  ;;  %24442 = vmatprep.subr.msk.mxu0 %vm752_vm12, %v26899_v33  ;;  %24429 = vmatmul.mubr.f32.vlgmr.msra.gmra.mxu0 %v27090_v36 }
 0x2ef   :  { %v3949_v61 = vsel %vm745_vm5, %v2337_v21, 0  ;;  %24443 = vmatpush3.msk.msra.mxu0 %vm752_vm12, %v26899_v33  ;;  %24453 = vmatprep.subr.mxu1 %v26972_v58 }
 0x2f0   :  { %v4034_v62 = vsub.f32 %v3952_v46, %v27188_v57  ;;  %v27198_v31 = vand.u32 4294901760, %v3949_v61  ;;  %24444 = vmatprep.subr.msk.mxu0 %vm26512_vm10, %v30744_v8  ;;  %24440 = vmatmul.mubr.f32.vlgmr.msra.gmra.mxu1 %v27090_v36 }
 0x2f1   :  { %24445 = vmatpush3.msk.msra.mxu0 %vm26512_vm10, %v30744_v8  ;;  %24454 = vmatpush3.msra.mxu1 %v26972_v58 }
 0x2f2   :  { %v4035_v7 = vand.u32 4294901760, %v4034_v62  ;;  %v4024_v12 = vsub.f32 %v3949_v61, %v27198_v31  ;;  %24446 = vmatprep.subr.msk.mxu0 %vm26494_vm8, %v30744_v8  ;;  %24455 = vmatprep.subr.mxu1 %v26983_v17 }
 0x2f3   :  { %24447 = vmatpush3.msk.msra.mxu0 %vm26494_vm8, %v30744_v8  ;;  %24456 = vmatpush3.msra.mxu1 %v26983_v17 }
 0x2f4   :  { %24448 = vmatprep.subr.msk.mxu0 %vm26489_vm7, %v30744_v8  ;;  %24457 = vmatprep.subr.mxu1 %v26994_v2  ;;  %v4025_v13 = vand.u32 4294901760, %v4024_v12  ;;  %v4036_v48 = vsub.f32 %v4034_v62, %v4035_v7 }
 0x2f5   :  { %24449 = vmatpush3.msk.msra.mxu0 %vm26489_vm7, %v30744_v8  ;;  %24458 = vmatpush3.msra.mxu1 %v26994_v2 }
 0x2f6   :  { %v4026_v50 = vsub.f32 %v4024_v12, %v4025_v13  ;;  %24459 = vmatprep.subr.mxu1 %v27004_v54  ;;  %24464 = vmatprep.subr.mxu0 %v26912_v29  ;;  %v4037_v36 = vand.u32 4294901760, %v4036_v48 }
 0x2f7   :  { %24460 = vmatpush3.msra.mxu1 %v27004_v54  ;;  %24461 = vmatprep.mubr.f32.mxu1 %v27198_v31 }
 0x2f8   :  { %v4027_v11 = vand.u32 4294901760, %v4026_v50  ;;  %24475 = vmatprep.subr.msk.mxu1 %vm752_vm12, %v26899_v33  ;;  %24462 = vmatmul.mubr.f32.vlgmr.msra.gmra.mxu1 %v27188_v57 }
 0x2f9   :  { %24476 = vmatpush3.msk.msra.mxu1 %vm752_vm12, %v26899_v33  ;;  %24483 = vmatprep.mubr.f32.mxu1 %v4025_v13 }
 0x2fa   :  { %24450 = vmatprep.mubr.f32.mxu0 %v4027_v11  ;;  %24477 = vmatprep.subr.msk.mxu1 %vm26512_vm10, %v30744_v8 }
 0x2fb   :  { %24451 = vmatmul.mubr.f32.vlgmr.msra.gmra.mxu0 %v4037_v36  ;;  %24478 = vmatpush3.msk.msra.mxu1 %vm26512_vm10, %v30744_v8 }
 0x2fc   :  { %24465 = vmatpush3.msra.mxu0 %v26912_v29  ;;  %24479 = vmatprep.subr.msk.mxu1 %vm26494_vm8, %v30744_v8 }
 0x2fd   :  { %24466 = vmatprep.subr.mxu0 %v26922_v24  ;;  %24480 = vmatpush3.msk.msra.mxu1 %vm26494_vm8, %v30744_v8 }
 0x2fe   :  { %24467 = vmatpush3.msra.mxu0 %v26922_v24  ;;  %24472 = vmatprep.mubr.f32.mxu0 %v4024_v12 }
 0x2ff   :  { %24468 = vmatprep.subr.mxu0 %v26936_v32  ;;  %24481 = vmatprep.subr.msk.mxu1 %vm26489_vm7, %v30744_v8 }
 0x300   :  { %24469 = vmatpush3.msra.mxu0 %v26936_v32  ;;  %24482 = vmatpush3.msk.msra.mxu1 %vm26489_vm7, %v30744_v8 }
 0x301   :  { %24470 = vmatprep.subr.mxu0 %v26945_v38  ;;  %24497 = vmatprep.subr.msk.mxu1 %vm752_vm12, %v26899_v33 }
 0x302   :  { %24471 = vmatpush3.msra.mxu0 %v26945_v38  ;;  %24484 = vmatmul.mubr.f32.vlgmr.msra.gmra.mxu1 %v4035_v7 }
 0x303   :  { %24486 = vmatprep.subr.mxu0 %v26932_v30  ;;  %24473 = vmatmul.mubr.f32.vlgmr.msra.gmra.mxu0 %v4034_v62 }
 0x304   :  { %24487 = vmatpush3.msra.mxu0 %v26932_v30  ;;  %24498 = vmatpush3.msk.msra.mxu1 %vm752_vm12, %v26899_v33 }
 0x305   :  { %24488 = vmatprep.subr.mxu0 %v26941_v53  ;;  %24499 = vmatprep.subr.msk.mxu1 %vm26512_vm10, %v30744_v8 }
 0x306   :  { %24489 = vmatpush3.msra.mxu0 %v26941_v53  ;;  %24500 = vmatpush3.msk.msra.mxu1 %vm26512_vm10, %v30744_v8 }
 0x307   :  { %24490 = vmatprep.subr.mxu0 %v26953_v6  ;;  %24501 = vmatprep.subr.msk.mxu1 %vm26494_vm8, %v30744_v8 }
 0x308   :  { %24491 = vmatpush3.msra.mxu0 %v26953_v6  ;;  %24494 = vmatprep.mubr.f32.mxu0 %v27198_v31 }
 0x309   :  { %24492 = vmatprep.subr.mxu0 %v26964_v41  ;;  %24502 = vmatpush3.msk.msra.mxu1 %vm26494_vm8, %v30744_v8 }
 0x30a   :  { %24493 = vmatpush3.msra.mxu0 %v26964_v41  ;;  %24503 = vmatprep.subr.msk.mxu1 %vm26489_vm7, %v30744_v8 }
 0x30b   :  { %24495 = vmatmul.mubr.f32.vlgmr.msra.gmra.mxu0 %v27188_v57  ;;  %24504 = vmatpush3.msk.msra.mxu1 %vm26489_vm7, %v30744_v8 }
 0x30c   :  { %24505 = vmatprep.mubr.f32.mxu1 %v27198_v31  ;;  %24519 = vmatprep.subr.mxu1 %v26972_v58 }
 0x30d   :  { %24506 = vmatmul.mubr.f32.vlgmr.msra.gmra.mxu1 %v27188_v57  ;;  %24508 = vmatprep.subr.msk.mxu0 %vm752_vm12, %v26899_v33 }
 0x30e   :  { %24520 = vmatpush3.msra.mxu1 %v26972_v58  ;;  %24509 = vmatpush3.msk.msra.mxu0 %vm752_vm12, %v26899_v33 }
 0x30f   :  { %24521 = vmatprep.subr.mxu1 %v26983_v17  ;;  %24510 = vmatprep.subr.msk.mxu0 %vm26512_vm10, %v30744_v8 }
 0x310   :  { %24522 = vmatpush3.msra.mxu1 %v26983_v17  ;;  %24511 = vmatpush3.msk.msra.mxu0 %vm26512_vm10, %v30744_v8 }
 0x311   :  { %24523 = vmatprep.subr.mxu1 %v26994_v2  ;;  %24512 = vmatprep.subr.msk.mxu0 %vm26494_vm8, %v30744_v8 }
 0x312   :  { %24524 = vmatpush3.msra.mxu1 %v26994_v2  ;;  %24513 = vmatpush3.msk.msra.mxu0 %vm26494_vm8, %v30744_v8 }
 0x313   :  { %24525 = vmatprep.subr.mxu1 %v27004_v54  ;;  %24514 = vmatprep.subr.msk.mxu0 %vm26489_vm7, %v30744_v8 }
 0x314   :  { %24526 = vmatpush3.msra.mxu1 %v27004_v54  ;;  %24515 = vmatpush3.msk.msra.mxu0 %vm26489_vm7, %v30744_v8 }
 0x315   :  { %24541 = vmatprep.subr.msk.mxu1 %vm752_vm12, %v26899_v33  ;;  %24530 = vmatprep.subr.mxu0 %v26912_v29 }
 0x316   :  { %v24254_v58 = vpop.f32.mrf.mxu0 }
 0x318   :  { %v2424_v17 = vpop.f32.mrf.mxu0 }
 0x31d   :  { %v24265_v2 = vpop.f32.mrf.mxu1 }
 0x31e   :  { %v2532_v37 = vadd.f32 %v24265_v2, %v24254_v58 }
 0x31f   :  { %v2525_v47 = vpop.f32.mrf.mxu1  ;;  %v24276_v15 = vpop.f32.mrf.mxu0 }
 0x320   :  { %v2526_v5 = vadd.f32 %v2525_v47, %v2424_v17  ;;  %v2619_v23 = vadd.f32 %v24276_v15, %v2532_v37 }
 0x321   :  { %v2611_v22 = vpop.f32.mrf.mxu0 }
 0x322   :  { %v2612_v59 = vadd.f32 %v2611_v22, %v2526_v5 }
 0x327   :  { %v24287_v1 = vpop.f32.mrf.mxu1 }
 0x328   :  { %v2704_v39 = vadd.f32 %v24287_v1, %v2619_v23 }
 0x329   :  { %v2695_v18 = vpop.f32.mrf.mxu1  ;;  %v24298_v0 = vpop.f32.mrf.mxu0 }
 0x32a   :  { %v2696_v51 = vadd.f32 %v2695_v18, %v2612_v59  ;;  %v2793_v14 = vadd.f32 %v24298_v0, %v2704_v39 }
 0x32b   :  { %v2786_v25 = vpop.f32.mrf.mxu0 }
 0x32c   :  { %v2787_v52 = vadd.f32 %v2786_v25, %v2696_v51 }
 0x32f   :  { %v24309_v45 = vpop.f32.mrf.mxu1 }
 0x330   :  { %v2874_v43 = vadd.f32 %v24309_v45, %v2793_v14 }
 0x331   :  { %v2867_v20 = vpop.f32.mrf.mxu1 }
 0x332   :  { %v4486_v9 = vsel %vm745_vm5, %v2874_v43, 0  ;;  %v2868_v27 = vadd.f32 %v2867_v20, %v2787_v52 }
 0x333   :  { %v4567_v56 = vand.u32 4294901760, %v4486_v9 }
 0x334   :  { %v4483_v55 = vsel %vm745_vm5, %v2868_v27, 0  ;;  %vm21720_vm5 = vcmask 1043459  }
 0x335   :  { %v4568_v10 = vsub.f32 %v4486_v9, %v4567_v56  ;;  %v4557_v26 = vand.u32 4294901760, %v4483_v55 }
 0x337   :  { %v4558_v63 = vsub.f32 %v4483_v55, %v4557_v26  ;;  %24527 = vmatprep.mubr.f32.mxu1 %v4557_v26  ;;  %v4569_v40 = vand.u32 4294901760, %v4568_v10 }
 0x338   :  { %24528 = vmatmul.mubr.f32.vlgmr.msra.gmra.mxu1 %v4567_v56 }
 0x339   :  { %24542 = vmatpush3.msk.msra.mxu1 %vm752_vm12, %v26899_v33  ;;  %v4559_v42 = vand.u32 4294901760, %v4558_v63  ;;  %v4570_v19 = vsub.f32 %v4568_v10, %v4569_v40 }
 0x33a   :  { %24543 = vmatprep.subr.msk.mxu1 %vm26512_vm10, %v30744_v8 }
 0x33b   :  { %24544 = vmatpush3.msk.msra.mxu1 %vm26512_vm10, %v30744_v8  ;;  %24549 = vmatprep.mubr.f32.mxu1 %v4559_v42  ;;  %v4560_v16 = vsub.f32 %v4558_v63, %v4559_v42  ;;  %v4571_v46 = vand.u32 4294901760, %v4570_v19 }
 0x33c   :  { %24545 = vmatprep.subr.msk.mxu1 %vm26494_vm8, %v30744_v8 }
 0x33d   :  { %24546 = vmatpush3.msk.msra.mxu1 %vm26494_vm8, %v30744_v8  ;;  %v4561_v34 = vand.u32 4294901760, %v4560_v16 }
 0x33e   :  { %24547 = vmatprep.subr.msk.mxu1 %vm26489_vm7, %v30744_v8 }
 0x33f   :  { %24548 = vmatpush3.msk.msra.mxu1 %vm26489_vm7, %v30744_v8  ;;  %24516 = vmatprep.mubr.f32.mxu0 %v4561_v34 }
 0x340   :  { %24550 = vmatmul.mubr.f32.vlgmr.msra.gmra.mxu1 %v4569_v40  ;;  %24563 = vmatprep.subr.msk.mxu1 %vm752_vm12, %v26899_v33 }
 0x341   :  { %24517 = vmatmul.mubr.f32.vlgmr.msra.gmra.mxu0 %v4571_v46  ;;  %24564 = vmatpush3.msk.msra.mxu1 %vm752_vm12, %v26899_v33  ;;  %vm21804_vm12 = vcmask 130048  }
 0x342   :  { %24531 = vmatpush3.msra.mxu0 %v26912_v29  ;;  %24571 = vmatprep.mubr.f32.mxu1 %v4557_v26 }
 0x343   :  { %24532 = vmatprep.subr.mxu0 %v26922_v24  ;;  %24538 = vmatprep.mubr.f32.mxu0 %v4558_v63 }
 0x344   :  { %24565 = vmatprep.subr.msk.mxu1 %vm26512_vm10, %v30744_v8  ;;  %24533 = vmatpush3.msra.mxu0 %v26922_v24 }
 0x345   :  { %24566 = vmatpush3.msk.msra.mxu1 %vm26512_vm10, %v30744_v8  ;;  %24534 = vmatprep.subr.mxu0 %v26936_v32  ;;  %vm21786_vm10 = vcmask 31744  }
 0x346   :  { %24567 = vmatprep.subr.msk.mxu1 %vm26494_vm8, %v30744_v8  ;;  %24535 = vmatpush3.msra.mxu0 %v26936_v32 }
 0x347   :  { %24568 = vmatpush3.msk.msra.mxu1 %vm26494_vm8, %v30744_v8  ;;  %24536 = vmatprep.subr.mxu0 %v26945_v38  ;;  %vm21729_vm8 = vcmask 1046534  }
 0x348   :  { %24569 = vmatprep.subr.msk.mxu1 %vm26489_vm7, %v30744_v8  ;;  %24537 = vmatpush3.msra.mxu0 %v26945_v38 }
 0x349   :  { %24570 = vmatpush3.msk.msra.mxu1 %vm26489_vm7, %v30744_v8  ;;  %24539 = vmatmul.mubr.f32.vlgmr.msra.gmra.mxu0 %v4568_v10 }
 0x34a   :  { %24552 = vmatprep.subr.mxu0 %v26932_v30  ;;  %24572 = vmatmul.mubr.f32.vlgmr.msra.gmra.mxu1 %v4567_v56 }
 0x34b   :  { %24553 = vmatpush3.msra.mxu0 %v26932_v30  ;;  %24560 = vmatprep.mubr.f32.mxu0 %v4557_v26 }
 0x34c   :  { %24554 = vmatprep.subr.mxu0 %v26941_v53  ;;  %24581 = vmatprep.subr.mxu1 %v30748_v4 }
 0x34d   :  { %24555 = vmatpush3.msra.mxu0 %v26941_v53 }
 0x34e   :  { %24556 = vmatprep.subr.mxu0 %v26953_v6 }
 0x34f   :  { %24557 = vmatpush3.msra.mxu0 %v26953_v6 }
 0x350   :  { %24558 = vmatprep.subr.mxu0 %v26964_v41 }
 0x351   :  { %24559 = vmatpush3.msra.mxu0 %v26964_v41 }
 0x352   :  { %24561 = vmatmul.mubr.f32.vlgmr.msra.gmra.mxu0 %v4567_v56  ;;  %24574 = vmatprep.subr.mxu0 %v30748_v4 }
 0x378   :  { %v24331_v28 = vpop.f32.mrf.mxu1 }
 0x37a   :  { %v3062_v33 = vpop.f32.mrf.mxu1 }
 0x380   :  { %v24320_v60 = vpop.f32.mrf.mxu0 }
 0x381   :  { %v3069_v24 = vadd.f32 %v24331_v28, %v24320_v60 }
 0x382   :  { %v2961_v29 = vpop.f32.mrf.mxu0  ;;  %v24353_v30 = vpop.f32.mrf.mxu1 }
 0x383   :  { %v3063_v32 = vadd.f32 %v3062_v33, %v2961_v29 }
 0x384   :  { %v3232_v61 = vpop.f32.mrf.mxu1 }
 0x388   :  { %v24342_v21 = vpop.f32.mrf.mxu0 }
 0x389   :  { %v3156_v53 = vadd.f32 %v24342_v21, %v3069_v24 }
 0x38a   :  { %v3148_v57 = vpop.f32.mrf.mxu0 }
 0x38b   :  { %v3149_v62 = vadd.f32 %v3148_v57, %v3063_v32  ;;  %v3241_v6 = vadd.f32 %v24353_v30, %v3156_v53 }
 0x38d   :  { %v3233_v7 = vadd.f32 %v3232_v61, %v3149_v62 }
 0x38e   :  { %v24375_v31 = vpop.f32.mrf.mxu1 }
 0x390   :  { %v24364_v12 = vpop.f32.mrf.mxu0  ;;  %v3404_v50 = vpop.f32.mrf.mxu1 }
 0x391   :  { %v3330_v13 = vadd.f32 %v24364_v12, %v3241_v6 }
 0x392   :  { %v3323_v48 = vpop.f32.mrf.mxu0 }
 0x393   :  { %v3324_v36 = vadd.f32 %v3323_v48, %v3233_v7  ;;  %v3411_v11 = vadd.f32 %v24375_v31, %v3330_v13 }
 0x395   :  { %v5017_v58 = vmax.f32 %v3411_v11, 0.0  ;;  %v3405_v17 = vadd.f32 %v3404_v50, %v3324_v36 }
 0x397   :  { %v5033_v2 = vrot.slane %v5017_v58, 7  ;;  %v5016_v47 = vmax.f32 %v3405_v17, 0.0 }
 0x399   :  { %v5032_v15 = vrot.slane %v5016_v47, 7  ;;  %v24397_v23 = vpop.f32.mrf.mxu1 }
 0x39b   :  { %v5052_v37 = vsel %vm126_vm0, 0.0, %v5032_v15  ;;  %v5034_v5 = vsel %vm126_vm0, %v5032_v15, %v5033_v2  ;;  %v3596_v0 = vpop.f32.mrf.mxu1 }
 0x39c   :  { %5068 = vrot.lane.b32.xlu1 %v5052_v37, %s26032_s1  ;;  %v5056_v22 = vsel %vm274_vm4, %v5034_v5, 0.0 }
 0x39d   :  { %5070 = vrot.lane.b32.xlu0 %v5056_v22, %s26032_s1 }
 0x39e   :  { %v24386_v1 = vpop.f32.mrf.mxu0 }
 0x39f   :  { %v3603_v27 = vadd.f32 %v24397_v23, %v24386_v1 }
 0x3a0   :  { %v3495_v18 = vpop.f32.mrf.mxu0 }
 0x3a1   :  { %v3597_v56 = vadd.f32 %v3596_v0, %v3495_v18 }
 0x3a3   :  { %v24419_v39 = vpop.f32.mrf.mxu1 }
 0x3a5   :  { %v3766_v25 = vpop.f32.mrf.mxu1 }
 0x3a6   :  { %v24408_v59 = vpop.f32.mrf.mxu0 }
 0x3a7   :  { %v3690_v26 = vadd.f32 %v24408_v59, %v3603_v27 }
 0x3a8   :  { %v3682_v51 = vpop.f32.mrf.mxu0 }
 0x3a9   :  { %v3683_v63 = vadd.f32 %v3682_v51, %v3597_v56  ;;  %v3775_v34 = vadd.f32 %v24419_v39, %v3690_v26 }
 0x3ab   :  { %v3767_v46 = vadd.f32 %v3766_v25, %v3683_v63 }
 0x3ae   :  { %v24430_v14 = vpop.f32.mrf.mxu0 }
 0x3af   :  { %v3864_v24 = vadd.f32 %v24430_v14, %v3775_v34 }
 0x3b0   :  { %v24441_v45 = vpop.f32.mrf.mxu1  ;;  %v3857_v52 = vpop.f32.mrf.mxu0 }
 0x3b1   :  { %v3858_v30 = vadd.f32 %v3857_v52, %v3767_v46  ;;  %v3945_v57 = vadd.f32 %v24441_v45, %v3864_v24  ;;  %v27407_v46 = vstv %s22973_s24  ;;  %s22983_s24 = sld [smem:[#allocation7 + $0xc]] }
 0x3b2   :  { %v3938_v43 = vpop.f32.mrf.mxu1 }
 0x3b3   :  { %v3939_v61 = vadd.f32 %v3938_v43, %v3858_v30  ;;  %v5019_v48 = vmax.f32 %v3945_v57, 0.0  ;;  %v27416_v30 = vstv %s22991_s2  ;;  %s23001_s2 = sld [smem:[#allocation7 + $0x1c]] }
 0x3b5   :  { %v5018_v50 = vmax.f32 %v3939_v61, 0.0  ;;  %v5036_v2 = vrot.slane %v5019_v48, 7  ;;  %v27422_v61 = vstv %s22972_s4  ;;  %s22998_s4 = sld [smem:[#allocation7 + $0x19]] }
 0x3b7   :  { %v5035_v47 = vrot.slane %v5018_v50, 7 }
 0x3b8   :  { %v24463_v9 = vpop.f32.mrf.mxu1 }
 0x3b9   :  { %v5037_v1 = vsel %vm126_vm0, %v5035_v47, %v5036_v2  ;;  %v5053_v23 = vsel %vm126_vm0, 0.0, %v5035_v47 }
 0x3ba   :  { %v4130_v10 = vpop.f32.mrf.mxu1  ;;  %v5057_v18 = vsel %vm274_vm4, %v5037_v1, 0.0 }
 0x3bb   :  { %v24452_v20 = vpop.f32.mrf.mxu0 }
 0x3bc   :  { %v4137_v40 = vadd.f32 %v24463_v9, %v24452_v20 }
 0x3bd   :  { %v4029_v55 = vpop.f32.mrf.mxu0 }
 0x3be   :  { %v4131_v42 = vadd.f32 %v4130_v10, %v4029_v55 }
 0x3c2   :  { %v24485_v19 = vpop.f32.mrf.mxu1 }
 0x3c3   :  { %v24474_v16 = vpop.f32.mrf.mxu0 }
 0x3c4   :  { %v4224_v28 = vadd.f32 %v24474_v16, %v4137_v40  ;;  %v4300_v29 = vpop.f32.mrf.mxu1 }
 0x3c5   :  { %v4216_v60 = vpop.f32.mrf.mxu0 }
 0x3c6   :  { %v4217_v33 = vadd.f32 %v4216_v60, %v4131_v42  ;;  %v4309_v32 = vadd.f32 %v24485_v19, %v4224_v28  ;;  %v27409_v60 = vstv %s22981_s25  ;;  %s27816_s25 = sld [smem:[#allocation7 + $0x15]] }
 0x3c8   :  { %v4301_v21 = vadd.f32 %v4300_v29, %v4217_v33 }
 0x3cb   :  { %v24496_v53 = vpop.f32.mrf.mxu0 }
 0x3cc   :  { %v4398_v62 = vadd.f32 %v24496_v53, %v4309_v32 }
 0x3cd   :  { %v4391_v6 = vpop.f32.mrf.mxu0  ;;  %v24507_v31 = vpop.f32.mrf.mxu1 }
 0x3ce   :  { %v4392_v7 = vadd.f32 %v4391_v6, %v4301_v21  ;;  %v4479_v12 = vadd.f32 %v24507_v31, %v4398_v62  ;;  %v27430_v6 = vstv %s22974_s26  ;;  %s23002_s26 = sld [smem:[#allocation7 + $0x1d]] }
 0x3cf   :  { %v4472_v13 = vpop.f32.mrf.mxu1 }
 0x3d0   :  { %v5021_v36 = vmax.f32 %v4479_v12, 0.0  ;;  %v4473_v11 = vadd.f32 %v4472_v13, %v4392_v7  ;;  %v27438_v12 = vstv %s23000_s27  ;;  %s5289_s27 = sld [smem:[#allocation8]] }
 0x3d2   :  { %v5039_v58 = vrot.slane %v5021_v36, 7  ;;  %v5020_v17 = vmax.f32 %v4473_v11, 0.0  ;;  %v27443_v36 = vstv %s22990_s28  ;;  %s22987_s28 = sld [smem:[#allocation8 + $0x1]] }
 0x3d4   :  { %v5038_v15 = vrot.slane %v5020_v17, 7 }
 0x3d6   :  { %v5054_v37 = vsel %vm126_vm0, 0.0, %v5038_v15  ;;  %v5040_v5 = vsel %vm126_vm0, %v5038_v15, %v5039_v58 }
 0x3d7   :  { %5076 = vrot.lane.b32.xlu1 %v5054_v37, %s26032_s1  ;;  %v5058_v22 = vsel %vm274_vm4, %v5040_v5, 0.0 }
 0x3d8   :  { %5078 = vrot.lane.b32.xlu0 %v5058_v22, %s26032_s1 }
 0x3db   :  { %5072 = vrot.lane.b32.xlu1 %v5053_v23, %s26032_s1 }
 0x3dc   :  { %5074 = vrot.lane.b32.xlu0 %v5057_v18, %s26032_s1  ;;  %v27463_v18 = vstv %s27411_s29  ;;  %s22988_s29 = sld [smem:[#allocation7 + $0x10]] }
 0x3f8   :  { %v24529_v59 = vpop.f32.mrf.mxu1 }
 0x3fa   :  { %v4664_v25 = vpop.f32.mrf.mxu1 }
 0x400   :  { %v24551_v45 = vpop.f32.mrf.mxu1 }
 0x401   :  { %v24518_v0 = vpop.f32.mrf.mxu0 }
 0x402   :  { %v4671_v14 = vadd.f32 %v24529_v59, %v24518_v0  ;;  %v4834_v55 = vpop.f32.mrf.mxu1 }
 0x403   :  { %v4563_v39 = vpop.f32.mrf.mxu0 }
 0x404   :  { %v4665_v43 = vadd.f32 %v4664_v25, %v4563_v39 }
 0x409   :  { %v24540_v51 = vpop.f32.mrf.mxu0 }
 0x40a   :  { %v4758_v20 = vadd.f32 %v24540_v51, %v4671_v14  ;;  %v24573_v63 = vpop.f32.mrf.mxu1 }
 0x40b   :  { %v4750_v52 = vpop.f32.mrf.mxu0 }
 0x40c   :  { %v4751_v9 = vadd.f32 %v4750_v52, %v4665_v43  ;;  %v4843_v26 = vadd.f32 %v24551_v45, %v4758_v20  ;;  %v5006_v32 = vpop.f32.mrf.mxu1  ;;  %v27484_v43 = vstv %s27424_s30  ;;  %s22992_s30 = sld [smem:[#allocation7 + $0x14]] }
 0x40e   :  { %v5069_v27 = vpop.permute.xlu1 %5068  ;;  %v4835_v19 = vadd.f32 %v4834_v55, %v4751_v9 }
 0x40f   :  { %v5071_v56 = vpop.permute.xlu0 %5070  ;;  %v5092_v42 = vsel %vm178_vm2, 0.0, %v5069_v27 }
 0x410   :  { %v5093_v10 = vsel %vm178_vm2, 0.0, %v5071_v56  ;;  %v27414_v24 = vsel %vm5100_vm13, %v5092_v42, 0.0 }
 0x411   :  { %v27405_v34 = vsel %vm5100_vm13, %v5093_v10, 0.0  ;;  %v5615_v31 = vmul.f32 %v27416_v30, %v27414_v24  ;;  %v5143_v50 = vmul.f32 %v27407_v46, %v27414_v24  ;;  %v5367_v2 = vmul.f32 %v27409_v60, %v27414_v24 }
 0x412   :  { %v24562_v40 = vpop.f32.mrf.mxu0  ;;  %v27420_v21 = vmul.f32 %v27407_v46, %v27405_v34  ;;  %v27428_v62 = vmul.f32 %v27409_v60, %v27405_v34  ;;  %v27436_v7 = vmul.f32 %v27416_v30, %v27405_v34  ;;  %v27453_v5 = vmul.f32 %v27438_v12, %v27405_v34 }
 0x413   :  { %v4932_v16 = vadd.f32 %v24562_v40, %v4843_v26  ;;  %v5623_v58 = vrot.slane %v5615_v31, 1  ;;  %v5151_v37 = vrot.slane %v5143_v50, 1  ;;  %v5375_v1 = vrot.slane %v5367_v2, 1 }
 0x414   :  { %v4925_v28 = vpop.f32.mrf.mxu0  ;;  %v30757_v48 = vrot.slane %v27420_v21, 1  ;;  %v30756_v11 = vrot.slane %v27428_v62, 1  ;;  %v30753_v17 = vrot.slane %v27436_v7, 1  ;;  %v5839_v23 = vmul.f32 %v27438_v12, %v27414_v24 }
 0x415   :  { %v5013_v33 = vadd.f32 %v24573_v63, %v4932_v16  ;;  %v4926_v29 = vadd.f32 %v4925_v28, %v4835_v19  ;;  %v30751_v51 = vrot.slane %v27453_v5, 1  ;;  %v5591_v52 = vmul.f32 %v27443_v36, %v27414_v24 }
 0x416   :  { %v27458_v22 = vsel %vm274_vm4, %v5623_v58, %v30753_v17  ;;  %v27470_v39 = vsel %vm274_vm4, %v5151_v37, %v30757_v48  ;;  %v27478_v14 = vsel %vm274_vm4, %v5375_v1, %v30756_v11  ;;  %v5847_v45 = vrot.slane %v5839_v23, 1 }
 0x417   :  { %v5023_v53 = vmax.f32 %v5013_v33, 0.0  ;;  %v5007_v57 = vadd.f32 %v5006_v32, %v4926_v29  ;;  %v27488_v20 = vmul.f32 %v27443_v36, %v27405_v34  ;;  %v27492_v9 = vmul.f32 %v27463_v18, %v27405_v34 }
 0x418   :  { %v5117_v27 = vmul.f32 %v27422_v61, %v27414_v24  ;;  %v27499_v56 = vsel %vm274_vm4, %v5847_v45, %v30751_v51  ;;  %v5599_v55 = vrot.slane %v5591_v52, 1  ;;  %v5815_v10 = vmul.f32 %v27463_v18, %v27414_v24 }
 0x419   :  { %v5022_v13 = vmax.f32 %v5007_v57, 0.0  ;;  %v5042_v47 = vrot.slane %v5023_v53, 7  ;;  %30802 = vst [vmem:[#allocation26_spill] sm:$0xff] %v27488_v20  ;;  %30803 = vst [vmem:[#allocation27_spill] sm:$0xff] %v27492_v9  ;;  %v5118_v26 = vmul.f32 %v27422_v61, %v27405_v34  ;;  %v5168_v63 = vmul.f32 %v27430_v6, %v27405_v34 }
 0x41a   :  { %v30747_v40 = vrot.slane %v27488_v20, 1  ;;  %v30746_v42 = vrot.slane %v27492_v9, 1  ;;  %v5390_v16 = vstv %s27445_s12  ;;  %v5823_v19 = vrot.slane %v5815_v10, 1  ;;  %s22996_s12 = sld [smem:[#allocation8 + $0x2]] }
 0x41b   :  { %v5041_v15 = vrot.slane %v5022_v13, 7  ;;  %v5341_v33 = vmul.f32 %v27484_v43, %v27414_v24  ;;  %v5176_v32 = vrot.slane %v5168_v63, 1  ;;  %v5392_v53 = vmul.f32 %v5390_v16, %v27405_v34 }
 0x41c   :  { %v27515_v28 = vsel %vm274_vm4, %v5599_v55, %v30747_v40  ;;  %v27522_v29 = vsel %vm274_vm4, %v5823_v19, %v30746_v42  ;;  %v5342_v57 = vmul.f32 %v27484_v43, %v27405_v34  ;;  %v27529_v13 = vstv %s22989_s13  ;;  %s22997_s13 = sld [smem:[#allocation7 + $0x18]] }
 0x41d   :  { %v5055_v0 = vsel %vm126_vm0, 0.0, %v5041_v15  ;;  %v5043_v59 = vsel %vm126_vm0, %v5041_v15, %v5042_v47  ;;  %30804 = vst [vmem:[#allocation28_spill] sm:$0xff] %v27515_v28  ;;  %30805 = vst [vmem:[#allocation29_spill] sm:$0xff] %v27522_v29  ;;  %v5400_v31 = vrot.slane %v5392_v53, 1  ;;  %v5167_v50 = vmul.f32 %v27430_v6, %v27414_v24 }
 0x41e   :  { %5080 = vrot.lane.b32.xlu1 %v5055_v0, %s26032_s1  ;;  %v5059_v25 = vsel %vm274_vm4, %v5043_v59, 0.0  ;;  %v5566_v58 = vmul.f32 %v27529_v13, %v27405_v34  ;;  %v5391_v47 = vmul.f32 %v5390_v16, %v27414_v24  ;;  %v27678_v42 = vstv %s27594_s20  ;;  %s29094_s20 = sld [smem:[#allocation10 + $0x5]] }
 0x41f   :  { %5082 = vrot.lane.b32.xlu0 %v5059_v25, %s26032_s1  ;;  %v5175_v2 = vrot.slane %v5167_v50, 1  ;;  %v27694_v51 = vstv %s27608_s21  ;;  %s29097_s21 = sld [smem:[#allocation10 + $0x15]] }
 0x420   :  { %v5399_v37 = vrot.slane %v5391_v47, 1 }
 0x421   :  { %v5177_v15 = vsel %vm274_vm4, %v5175_v2, %v5176_v32 }
 0x422   :  { %5125 = vrot.lane.b32.xlu1 %v5117_v27, %s26033_s17  ;;  %v5401_v1 = vsel %vm274_vm4, %v5399_v37, %v5400_v31 }
 0x423   :  { %5127 = vrot.lane.b32.xlu0 %v5118_v26, %s26033_s17  ;;  %v27554_v26 = vstv %s22995_s14  ;;  %s23005_s14 = sld [smem:[#allocation8 + $0x3]] }
 0x426   :  { %5349 = vrot.lane.b32.xlu1 %v5341_v33, %s26033_s17 }
 0x427   :  { %5183 = vrot.lane.b32.xlu0 %v5176_v32, %s26033_s17 }
 0x42a   :  { %5351 = vrot.lane.b32.xlu1 %v5342_v57, %s26033_s17 }
 0x42b   :  { %5407 = vrot.lane.b32.xlu0 %v5400_v31, %s26033_s17 }
 0x42e   :  { %5575 = vrot.lane.b32.xlu1 %v5566_v58, %s26033_s17 }
 0x432   :  { %5181 = vrot.lane.b32.xlu1 %v5177_v15, %s26033_s17 }
 0x436   :  { %5405 = vrot.lane.b32.xlu1 %v5401_v1, %s26033_s17 }
 0x449   :  { %v5077_v23 = vpop.permute.xlu1 %5076 }
 0x44a   :  { %v5079_v0 = vpop.permute.xlu0 %5078  ;;  %v5096_v45 = vsel %vm178_vm2, 0.0, %v5077_v23 }
 0x44b   :  { %v5097_v59 = vsel %vm178_vm2, 0.0, %v5079_v0  ;;  %v27569_v53 = vsel %vm5100_vm13, %v5096_v45, 0.0 }
 0x44c   :  { %v27559_v63 = vsel %vm5100_vm13, %v5097_v59, 0.0  ;;  %v5707_v37 = vmul.f32 %v27554_v26, %v27569_v53 }
 0x44d   :  { %v5073_v25 = vpop.permute.xlu1 %5072  ;;  %v27736_v38 = vmul.f32 %v27694_v51, %v27559_v63 }
 0x44e   :  { %v5094_v52 = vsel %vm178_vm2, 0.0, %v5073_v25  ;;  %v5075_v27 = vpop.permute.xlu0 %5074  ;;  %v27613_v25 = vstv %s27544_s3  ;;  %v5715_v45 = vrot.slane %v5707_v37, 1  ;;  %s23096_s3 = sld [smem:[#allocation10 + $0x13]] }
 0x44f   :  { %v27551_v55 = vsel %vm5100_vm13, %v5094_v52, 0.0  ;;  %v5095_v10 = vsel %vm178_vm2, 0.0, %v5075_v27  ;;  %v27616_v27 = vstv %s27548_s15  ;;  %30807 = vst [vmem:[#allocation30_spill] sm:$0xff] %v27736_v38  ;;  %s29047_s15 = sld [smem:[#allocation10 + $0x1]] }
 0x450   :  { %v27562_v19 = vsel %vm5100_vm13, %v5095_v10, 0.0  ;;  %v5119_v33 = vmul.f32 %v27422_v61, %v27551_v55  ;;  %v5169_v32 = vmul.f32 %v27430_v6, %v27551_v55  ;;  %v5393_v31 = vmul.f32 %v5390_v16, %v27551_v55 }
 0x451   :  { %v27573_v57 = vmul.f32 %v27430_v6, %v27562_v19  ;;  %v27577_v50 = vmul.f32 %v5390_v16, %v27562_v19  ;;  %v5343_v47 = vmul.f32 %v27484_v43, %v27551_v55  ;;  %v27589_v6 = vmul.f32 %v27554_v26, %v27559_v63 }
 0x452   :  { %5129 = vrot.lane.b32.xlu0 %v5119_v33, %s26033_s17  ;;  %v5178_v58 = vrot.slane %v5169_v32, 1  ;;  %v5402_v16 = vrot.slane %v5393_v31, 1  ;;  %v5617_v1 = vmul.f32 %v27416_v30, %v27551_v55  ;;  %v27606_v59 = vmul.f32 %v27416_v30, %v27562_v19 }
 0x453   :  { %v30759_v2 = vrot.slane %v27573_v57, 1  ;;  %v30758_v15 = vrot.slane %v27577_v50, 1  ;;  %v30755_v0 = vrot.slane %v27589_v6, 1  ;;  %v5145_v30 = vmul.f32 %v27407_v46, %v27551_v55 }
 0x454   :  { %v5626_v52 = vrot.slane %v5617_v1, 1  ;;  %v30752_v10 = vrot.slane %v27606_v59, 1  ;;  %v27623_v33 = vmul.f32 %v27407_v46, %v27562_v19  ;;  %v27626_v32 = vstv %s27556_s0  ;;  %s29079_s0 = sld [smem:[#allocation10 + $0x11]] }
 0x455   :  { %v5180_v23 = vsel %vm274_vm4, %v5178_v58, %v30759_v2  ;;  %v5404_v31 = vsel %vm274_vm4, %v5402_v16, %v30758_v15  ;;  %v5120_v58 = vmul.f32 %v27422_v61, %v27562_v19  ;;  %v5369_v37 = vmul.f32 %v27409_v60, %v27551_v55 }
 0x456   :  { %5185 = vrot.lane.b32.xlu1 %v5180_v23, %s26033_s17  ;;  %5353 = vrot.lane.b32.xlu0 %v5343_v47, %s26033_s17  ;;  %v27636_v47 = vsel %vm274_vm4, %v5715_v45, %v30755_v0  ;;  %v27643_v46 = vsel %vm274_vm4, %v5626_v52, %v30752_v10  ;;  %v5154_v1 = vrot.slane %v5145_v30, 1  ;;  %v30750_v16 = vrot.slane %v27623_v33, 1 }
 0x457   :  { %v27648_v61 = vmul.f32 %v27409_v60, %v27562_v19  ;;  %v27653_v23 = vstv %s27579_s16  ;;  %v27656_v45 = vstv %s27582_s18  ;;  %v5378_v8 = vrot.slane %v5369_v37, 1  ;;  %s29081_s16 = sld [smem:[#allocation10 + $0x21]] }
 0x458   :  { %v27663_v52 = vsel %vm274_vm4, %v5154_v1, %v30750_v16  ;;  %v27668_v30 = vmul.f32 %v27616_v27, %v27559_v63  ;;  %v5344_v37 = vmul.f32 %v27484_v43, %v27562_v19  ;;  %v27682_v1 = vmul.f32 %v27626_v32, %v27559_v63  ;;  %s23080_s18 = sld [smem:[#allocation10 + $0x3]] }
 0x459   :  { %v30754_v60 = vrot.slane %v27648_v61, 1  ;;  %v5433_v40 = vmul.f32 %v27653_v23, %v27569_v53  ;;  %v5235_v16 = vmul.f32 %v27626_v32, %v27569_v53  ;;  %v5931_v0 = vmul.f32 %v27616_v27, %v27569_v53 }
 0x45a   :  { %5409 = vrot.lane.b32.xlu1 %v5404_v31, %s26033_s17  ;;  %5131 = vrot.lane.b32.xlu0 %v5120_v58, %s26033_s17  ;;  %v27671_v31 = vstv %s27591_s19  ;;  %v5209_v58 = vmul.f32 %v27613_v25, %v27569_v53  ;;  %v30767_v10 = vrot.slane %v27682_v1, 1  ;;  %v5260_v11 = vmul.f32 %v27656_v45, %v27559_v63  ;;  %s23084_s19 = sld [smem:[#allocation10 + $0x7]] }
 0x45b   :  { %v27689_v4 = vsel %vm274_vm4, %v5378_v8, %v30754_v60  ;;  %v27702_v17 = vmul.f32 %v27671_v31, %v27559_v63  ;;  %v5459_v8 = vmul.f32 %v27671_v31, %v27569_v53  ;;  %v5243_v60 = vrot.slane %v5235_v16, 1 }
 0x45c   :  { %v5683_v16 = vmul.f32 %v27694_v51, %v27569_v53  ;;  %v5939_v2 = vrot.slane %v5931_v0, 1  ;;  %v27739_v0 = vstv %s27658_s22  ;;  %v27760_v54 = vmul.f32 %v27443_v36, %v27562_v19  ;;  %s23100_s22 = sld [smem:[#allocation10 + $0x17]] }
 0x45d   :  { %v30766_v48 = vrot.slane %v27702_v17, 1  ;;  %v5467_v15 = vrot.slane %v5459_v8, 1  ;;  %v27722_v43 = vsel %vm274_vm4, %v5243_v60, %v30767_v10  ;;  %v5593_v10 = vmul.f32 %v27443_v36, %v27551_v55 }
 0x45e   :  { %5217 = vrot.lane.b32.xlu1 %v5209_v58, %s26033_s17  ;;  %5355 = vrot.lane.b32.xlu0 %v5344_v37, %s26033_s17  ;;  %v27710_v58 = vmul.f32 %v27438_v12, %v27562_v19  ;;  %v5841_v37 = vmul.f32 %v27438_v12, %v27551_v55  ;;  %v30806_v12 = vrot.slane %v27573_v57, 1  ;;  %v5691_v60 = vrot.slane %v5683_v16, 1  ;;  %30810 = vst [vmem:[#allocation32_spill] sm:$0xff] %v27760_v54 }
 0x45f   :  { %v27732_v8 = vsel %vm274_vm4, %v5467_v15, %v30766_v48  ;;  %v30808_v57 = vrot.slane %v27668_v30, 1  ;;  %v5268_v48 = vrot.slane %v5260_v11, 1  ;;  %v30775_v16 = vrot.slane %v27736_v38, 1 }
 0x460   :  { %v30772_v35 = vrot.slane %v27710_v58, 1  ;;  %v5850_v41 = vrot.slane %v5841_v37, 1  ;;  %v5484_v37 = vmul.f32 %v27678_v42, %v27559_v63  ;;  %v27764_v49 = vmul.f32 %v27739_v0, %v27559_v63 }
 0x461   :  { %v27773_v11 = vsel %vm274_vm4, %v5691_v60, %v30775_v16  ;;  %v27781_v3 = vmul.f32 %v27463_v18, %v27562_v19  ;;  %v5210_v60 = vmul.f32 %v27613_v25, %v27559_v63  ;;  %v5483_v36 = vmul.f32 %v27678_v42, %v27569_v53 }
 0x462   :  { %5441 = vrot.lane.b32.xlu1 %v5433_v40, %s26033_s17  ;;  %5187 = vrot.lane.b32.xlu0 %v30806_v12, %s26033_s17  ;;  %v5259_v40 = vmul.f32 %v27656_v45, %v27569_v53  ;;  %v27748_v12 = vsel %vm274_vm4, %v5939_v2, %v30808_v57  ;;  %v27753_v15 = vsel %vm274_vm4, %v5850_v41, %v30772_v35  ;;  %v30812_v41 = vrot.slane %v27577_v50, 1 }
 0x463   :  { %30809 = vst [vmem:[#allocation31_spill] sm:$0xff] %v27753_v15  ;;  %30811 = vst [vmem:[#allocation33_spill] sm:$0xff] %v27764_v49  ;;  %v5602_v2 = vrot.slane %v5593_v10, 1  ;;  %v30780_v57 = vrot.slane %v27760_v54, 1  ;;  %v5907_v35 = vmul.f32 %v27739_v0, %v27569_v53  ;;  %v5817_v50 = vmul.f32 %v27463_v18, %v27551_v55 }
 0x464   :  { %30813 = vst [vmem:[#allocation34_spill] sm:$0xff] %v27773_v11  ;;  %30814 = vst [vmem:[#allocation35_spill] sm:$0xff] %v27781_v3  ;;  %v5267_v16 = vrot.slane %v5259_v40, 1  ;;  %v30779_v9 = vrot.slane %v27781_v3, 1  ;;  %v30816_v18 = vrot.slane %v27764_v49, 1 }
 0x465   :  { %v27790_v10 = vsel %vm274_vm4, %v5602_v2, %v30780_v57  ;;  %v5915_v44 = vrot.slane %v5907_v35, 1  ;;  %v5826_v29 = vrot.slane %v5817_v50, 1  ;;  %v5434_v35 = vmul.f32 %v27653_v23, %v27559_v63 }
 0x466   :  { %5275 = vrot.lane.b32.xlu1 %v5268_v48, %s26033_s17  ;;  %5411 = vrot.lane.b32.xlu0 %v30812_v41, %s26033_s17  ;;  %v5492_v41 = vrot.slane %v5484_v37, 1  ;;  %30815 = vst [vmem:[#allocation36_spill] sm:$0xff] %v27790_v10  ;;  %v5269_v2 = vsel %vm274_vm4, %v5267_v16, %v5268_v48  ;;  %v5491_v50 = vrot.slane %v5483_v36, 1  ;;  %v27838_v57 = vstv %s22975_s23  ;;  %s23104_s23 = sld [smem:[#allocation10 + $0x1b]] }
 0x467   :  { %v27800_v37 = vsel %vm274_vm4, %v5915_v44, %v30816_v18  ;;  %v27805_v40 = vsel %vm274_vm4, %v5826_v29, %v30779_v9  ;;  %v27814_v29 = vstv %s5109_s5  ;;  %s29147_s5 = sld [smem:[#allocation10 + $0x9]] }
 0x468   :  { %30817 = vst [vmem:[#allocation37_spill] sm:$0xff] %v27800_v37  ;;  %30818 = vst [vmem:[#allocation38_spill] sm:$0xff] %v27805_v40  ;;  %v5565_v40 = vmul.f32 %v27529_v13, %v27414_v24  ;;  %v27845_v37 = vstv %s22983_s24  ;;  %s23092_s24 = sld [smem:[#allocation10 + $0xf]] }
 0x46a   :  { %5499 = vrot.lane.b32.xlu1 %v5492_v41, %s26033_s17  ;;  %5219 = vrot.lane.b32.xlu0 %v5210_v60, %s26033_s17  ;;  %v5493_v60 = vsel %vm274_vm4, %v5491_v50, %v5492_v41 }
 0x46e   :  { %5273 = vrot.lane.b32.xlu1 %v5269_v2, %s26033_s17  ;;  %5443 = vrot.lane.b32.xlu0 %v5434_v35, %s26033_s17  ;;  %v5111_v35 = vmul.f32 %v27814_v29, %v27414_v24 }
 0x472   :  { %5497 = vrot.lane.b32.xlu1 %v5493_v60, %s26033_s17  ;;  %v5112_v60 = vmul.f32 %v27814_v29, %v27405_v34 }
 0x490   :  { %v5081_v44 = vpop.permute.xlu1 %5080 }
 0x491   :  { %v5098_v48 = vsel %vm178_vm2, 0.0, %v5081_v44  ;;  %v5083_v16 = vpop.permute.xlu0 %5082 }
 0x492   :  { %v27820_v36 = vsel %vm5100_vm13, %v5098_v48, 0.0  ;;  %v5099_v41 = vsel %vm178_vm2, 0.0, %v5083_v16  ;;  %v27834_v48 = vstv %s22979_s6  ;;  %s29150_s6 = sld [smem:[#allocation10 + $0x19]] }
 0x493   :  { %v27824_v18 = vsel %vm5100_vm13, %v5099_v41, 0.0  ;;  %v5211_v2 = vmul.f32 %v27613_v25, %v27820_v36  ;;  %v5335_v3 = vmul.f32 %v27834_v48, %v27414_v24  ;;  %v5336_v54 = vmul.f32 %v27834_v48, %v27405_v34 }
 0x494   :  { %v5126_v50 = vpop.permute.xlu1 %5125  ;;  %v5212_v44 = vmul.f32 %v27613_v25, %v27824_v18  ;;  %v5237_v38 = vmul.f32 %v27626_v32, %v27820_v36  ;;  %v5933_v20 = vmul.f32 %v27616_v27, %v27820_v36  ;;  %v27893_v28 = vmul.f32 %v27616_v27, %v27824_v18 }
 0x495   :  { %v5137_v9 = vadd.f32 %v5126_v50, %v5111_v35  ;;  %5221 = vrot.lane.b32.xlu1 %v5211_v2, %s26033_s17  ;;  %v5128_v16 = vpop.permute.xlu0 %5127  ;;  %v30819_v2 = vrot.slane %v27420_v21, 1  ;;  %v5435_v21 = vmul.f32 %v27653_v23, %v27820_v36  ;;  %v27905_v27 = vmul.f32 %v27694_v51, %v27824_v18 }
 0x496   :  { %v5138_v41 = vadd.f32 %v5128_v16, %v5112_v60  ;;  %5223 = vrot.lane.b32.xlu0 %v5212_v44, %s26033_s17  ;;  %v5436_v60 = vmul.f32 %v27653_v23, %v27824_v18  ;;  %v5262_v44 = vmul.f32 %v27656_v45, %v27824_v18  ;;  %vm21806_vm13 = vcmask 261120  }
 0x497   :  { %v5161_v25 = vadd.f32 %v27470_v39, %v5137_v9  ;;  %v27857_v39 = vstv %s27816_s25  ;;  %v27859_v9 = vstv %s23001_s2  ;;  %s23108_s25 = sld [smem:[#allocation10 + $0x1f]] }
 0x498   :  { %v5350_v35 = vpop.permute.xlu1 %5349  ;;  %v5162_v50 = vadd.f32 %v30819_v2, %v5138_v41  ;;  %v5200_v41 = vmul.f32 %v27838_v57, %v27559_v63  ;;  %v27879_v2 = vmul.f32 %v27671_v31, %v27824_v18  ;;  %s29193_s2 = sld [smem:[#allocation10 + $0xd]] }
 0x499   :  { %v5361_v16 = vadd.f32 %v5350_v35, %v5335_v3  ;;  %5573 = vrot.lane.b32.xlu1 %v5565_v40, %s26033_s17  ;;  %v5184_v49 = vpop.permute.xlu0 %5183  ;;  %v5424_v3 = vmul.f32 %v27845_v37, %v27559_v63  ;;  %v27870_v40 = vmul.f32 %v27678_v42, %v27824_v18 }
 0x49a   :  { %v5194_v10 = vadd.f32 %v5184_v49, %v5162_v50  ;;  %5447 = vrot.lane.b32.xlu0 %v5436_v60, %s26033_s17  ;;  %v27875_v49 = vmul.f32 %v27626_v32, %v27824_v18  ;;  %v5271_v50 = vrot.slane %v5262_v44, 1  ;;  %v5246_v32 = vrot.slane %v5237_v38, 1 }
 0x49b   :  { %v5385_v35 = vadd.f32 %v27478_v14, %v5361_v16  ;;  %v5261_v14 = vmul.f32 %v27656_v45, %v27820_v36  ;;  %v5942_v44 = vrot.slane %v5933_v20, 1  ;;  %v5495_v45 = vrot.slane %v27870_v40, 1 }
 0x49c   :  { %v5352_v23 = vpop.permute.xlu1 %5351  ;;  %v27881_v60 = vadd.f32 %v5200_v41, %v5194_v10  ;;  %v30821_v38 = vrot.slane %v27875_v49, 1 }
 0x49d   :  { %v5362_v11 = vadd.f32 %v5352_v23, %v5336_v54  ;;  %5445 = vrot.lane.b32.xlu1 %v5435_v21, %s26033_s17  ;;  %v5461_v54 = vmul.f32 %v27671_v31, %v27820_v36  ;;  %v30820_v21 = vrot.slane %v27428_v62, 1  ;;  %v30786_v23 = vrot.slane %v27893_v28, 1  ;;  %v5408_v16 = vpop.permute.xlu0 %5407 }
 0x49e   :  { %5279 = vrot.lane.b32.xlu0 %v5271_v50, %s26033_s17  ;;  %v27912_v20 = vsel %vm274_vm4, %v5246_v32, %v30821_v38  ;;  %v5685_v62 = vmul.f32 %v27694_v51, %v27820_v36  ;;  %v5695_v32 = vrot.slane %v27905_v27, 1  ;;  %v30822_v51 = vrot.slane %v27879_v2, 1 }
 0x49f   :  { %v5386_v41 = vadd.f32 %v30820_v21, %v5362_v11  ;;  %v5470_v31 = vrot.slane %v5461_v54, 1  ;;  %v27918_v11 = vmul.f32 %v27859_v9, %v27824_v18  ;;  %v5270_v21 = vrot.slane %v5261_v14, 1 }
 0x4a0   :  { %v27907_v15 = vpop.permute.xlu1 %5575  ;;  %v27925_v10 = vsel %vm274_vm4, %v5942_v44, %v30786_v23  ;;  %v5694_v38 = vrot.slane %v5685_v62, 1  ;;  %v5657_v14 = vmul.f32 %v27857_v39, %v27569_v53  ;;  %v5872_v27 = vmul.f32 %v27859_v9, %v27559_v63 }
 0x4a1   :  { %v5418_v40 = vadd.f32 %v5408_v16, %v5386_v41  ;;  %5629 = vrot.lane.b32.xlu1 %v27458_v22, %s26033_s17  ;;  %v27932_v54 = vsel %vm274_vm4, %v5470_v31, %v30822_v51  ;;  %v27936_v16 = vmul.f32 %v27859_v9, %v27820_v36  ;;  %v5909_v22 = vmul.f32 %v27739_v0, %v27820_v36 }
 0x4a2   :  { %5503 = vrot.lane.b32.xlu0 %v5495_v45, %s26033_s17  ;;  %v27946_v41 = vmul.f32 %v27739_v0, %v27824_v18  ;;  %v27951_v31 = vsel %vm274_vm4, %v5694_v38, %v5695_v32 }
 0x4a3   :  { %30823 = vst [vmem:[#allocation39_spill] sm:$0xff] %v27936_v16  ;;  %v27942_v44 = vadd.f32 %v5424_v3, %v5418_v40  ;;  %v5918_v62 = vrot.slane %v5909_v22, 1  ;;  %v5272_v16 = vsel %vm274_vm4, %v5270_v21, %v5271_v50  ;;  %v5199_v3 = vmul.f32 %v27838_v57, %v27569_v53 }
 0x4a4   :  { %v5182_v23 = vpop.permute.xlu1 %5181  ;;  %v5919_v40 = vrot.slane %v27946_v41, 1  ;;  %v5423_v50 = vmul.f32 %v27845_v37, %v27569_v53  ;;  %v30825_v21 = vrot.slane %v27436_v7, 1  ;;  %v5659_v7 = vmul.f32 %v27857_v39, %v27820_v36 }
 0x4a5   :  { %v5193_v51 = vadd.f32 %v5182_v23, %v5161_v25  ;;  %5665 = vrot.lane.b32.xlu1 %v5657_v14, %s26033_s17  ;;  %v30824_v23 = vrot.slane %v27589_v6, 1  ;;  %v5658_v14 = vmul.f32 %v27857_v39, %v27559_v63  ;;  %v5568_v6 = vmul.f32 %v27529_v13, %v27562_v19 }
 0x4a6   :  { %5277 = vrot.lane.b32.xlu0 %v5272_v16, %s26033_s17  ;;  %v27964_v38 = vsel %vm274_vm4, %v5918_v62, %v5919_v40  ;;  %v27990_v62 = vstv %s22998_s4  ;;  %s23113_s4 = sld [smem:[#allocation10 + $0x23]] }
 0x4a7   :  { %v27959_v0 = vadd.f32 %v5199_v3, %v5193_v51  ;;  %v30826_v3 = vrot.slane %v27606_v59, 1  ;;  %v5710_v59 = vmul.f32 %v27554_v26, %v27824_v18 }
 0x4a8   :  { %v5406_v22 = vpop.permute.xlu1 %5405 }
 0x4a9   :  { %v5417_v25 = vadd.f32 %v5406_v22, %v5385_v35  ;;  %5723 = vrot.lane.b32.xlu1 %v30824_v23, %s26033_s17  ;;  %v5567_v35 = vmul.f32 %v27529_v13, %v27551_v55  ;;  %v5789_v13 = vmul.f32 %v27990_v62, %v27414_v24  ;;  %v28004_v22 = vstv %s23002_s26  ;;  %s29214_s26 = sld [smem:[#allocation10 + $0x1d]] }
 0x4aa   :  { %5631 = vrot.lane.b32.xlu0 %v30825_v21, %s26033_s17  ;;  %v5660_v23 = vmul.f32 %v27857_v39, %v27824_v18 }
 0x4ab   :  { %v27974_v16 = vadd.f32 %v5423_v50, %v5417_v25  ;;  %v5882_v25 = vmul.f32 %v28004_v22, %v27559_v63  ;;  %v5113_v50 = vmul.f32 %v27814_v29, %v27551_v55 }
 0x4ad   :  { %5721 = vrot.lane.b32.xlu1 %v27636_v47, %s26033_s17  ;;  %v5485_v47 = vmul.f32 %v27678_v42, %v27820_v36 }
 0x4ae   :  { %5667 = vrot.lane.b32.xlu0 %v5658_v14, %s26033_s17  ;;  %v5719_v14 = vrot.slane %v5710_v59, 1 }
 0x4af   :  { %v5494_v51 = vrot.slane %v5485_v47, 1 }
 0x4b1   :  { %5633 = vrot.lane.b32.xlu1 %v27643_v46, %s26033_s17  ;;  %v5790_v46 = vmul.f32 %v27990_v62, %v27405_v34  ;;  %v5496_v42 = vsel %vm274_vm4, %v5494_v51, %v5495_v45  ;;  %v5881_v45 = vmul.f32 %v28004_v22, %v27569_v53 }
 0x4b2   :  { %5579 = vrot.lane.b32.xlu0 %v5568_v6, %s26033_s17 }
 0x4b5   :  { %5669 = vrot.lane.b32.xlu1 %v5659_v7, %s26033_s17  ;;  %v5337_v7 = vmul.f32 %v27834_v48, %v27551_v55 }
 0x4b6   :  { %5577 = vrot.lane.b32.xlu0 %v5567_v35, %s26033_s17 }
 0x4b9   :  { %5799 = vrot.lane.b32.xlu1 %v5790_v46, %s26033_s17 }
 0x4ba   :  { %5635 = vrot.lane.b32.xlu0 %v30826_v3, %s26033_s17  ;;  %v30827_v3 = vrot.slane %v27668_v30, 1  ;;  %v5709_v30 = vmul.f32 %v27554_v26, %v27820_v36 }
 0x4bc   :  { %v5718_v26 = vrot.slane %v5709_v30, 1 }
 0x4bd   :  { %5797 = vrot.lane.b32.xlu1 %v5789_v13, %s26033_s17  ;;  %v5201_v13 = vmul.f32 %v27838_v57, %v27820_v36 }
 0x4be   :  { %5501 = vrot.lane.b32.xlu0 %v5496_v42, %s26033_s17  ;;  %v30828_v42 = vrot.slane %v27453_v5, 1 }
 0x4c1   :  { %5891 = vrot.lane.b32.xlu1 %v5882_v25, %s26033_s17 }
 0x4c2   :  { %5671 = vrot.lane.b32.xlu0 %v5660_v23, %s26033_s17 }
 0x4c4   :  { %v5130_v21 = vpop.permute.xlu0 %5129 }
 0x4c5   :  { %v5139_v6 = vadd.f32 %v5130_v21, %v5113_v50  ;;  %5889 = vrot.lane.b32.xlu1 %v5881_v45, %s26033_s17  ;;  %v5114_v45 = vmul.f32 %v27814_v29, %v27562_v19  ;;  %v5425_v21 = vmul.f32 %v27845_v37, %v27820_v36  ;;  %v5338_v29 = vmul.f32 %v27834_v48, %v27562_v19 }
 0x4c6   :  { %5727 = vrot.lane.b32.xlu0 %v5719_v14, %s26033_s17  ;;  %v30830_v48 = vrot.slane %v27648_v61, 1 }
 0x4c7   :  { %v5163_v39 = vadd.f32 %v27663_v52, %v5139_v6 }
 0x4c8   :  { %v5186_v35 = vpop.permute.xlu1 %5185  ;;  %v5354_v47 = vpop.permute.xlu0 %5353 }
 0x4c9   :  { %v5195_v46 = vadd.f32 %v5186_v35, %v5163_v39  ;;  %v5363_v51 = vadd.f32 %v5354_v47, %v5337_v7  ;;  %5947 = vrot.lane.b32.xlu1 %v30827_v3, %s26033_s17  ;;  %v5792_v7 = vmul.f32 %v27990_v62, %v27562_v19 }
 0x4ca   :  { %5855 = vrot.lane.b32.xlu0 %v30828_v42, %s26033_s17 }
 0x4cb   :  { %v5387_v52 = vadd.f32 %v27689_v4, %v5363_v51  ;;  %v28035_v25 = vadd.f32 %v5201_v13, %v5195_v46  ;;  %v30829_v46 = vrot.slane %v27623_v33, 1 }
 0x4cc   :  { %v5410_v23 = vpop.permute.xlu1 %5409  ;;  %v5132_v59 = vpop.permute.xlu0 %5131 }
 0x4cd   :  { %v5419_v50 = vadd.f32 %v5410_v23, %v5387_v52  ;;  %v5140_v5 = vadd.f32 %v5132_v59, %v5114_v45  ;;  %v5720_v23 = vsel %vm274_vm4, %v5718_v26, %v5719_v14  ;;  %v5426_v14 = vmul.f32 %v27845_v37, %v27824_v18 }
 0x4ce   :  { %5853 = vrot.lane.b32.xlu0 %v27499_v56, %s26033_s17 }
 0x4cf   :  { %v28045_v6 = vadd.f32 %v5425_v21, %v5419_v50  ;;  %v5164_v56 = vadd.f32 %v30829_v46, %v5140_v5  ;;  %v30832_v46 = vrot.slane %v27702_v17, 1 }
 0x4d0   :  { %v5218_v4 = vpop.permute.xlu1 %5217  ;;  %v5356_v39 = vpop.permute.xlu0 %5355 }
 0x4d1   :  { %v5229_v35 = vadd.f32 %v5218_v4, %v27959_v0  ;;  %v5364_v47 = vadd.f32 %v5356_v39, %v5338_v29  ;;  %v5202_v0 = vmul.f32 %v27838_v57, %v27824_v18  ;;  %v28072_v39 = vstv %s5289_s27  ;;  %s23095_s27 = sld [smem:[#allocation10 + $0x12]] }
 0x4d2   :  { %5803 = vrot.lane.b32.xlu0 %v5792_v7, %s26033_s17 }
 0x4d3   :  { %v5253_v51 = vadd.f32 %v27722_v43, %v5229_v35  ;;  %v5388_v59 = vadd.f32 %v30830_v48, %v5364_v47 }
 0x4d4   :  { %v5442_v3 = vpop.permute.xlu1 %5441  ;;  %v5188_v13 = vpop.permute.xlu0 %5187 }
 0x4d5   :  { %v5453_v42 = vadd.f32 %v5442_v3, %v27974_v16  ;;  %v5196_v52 = vadd.f32 %v5188_v13, %v5164_v56  ;;  %v5791_v16 = vmul.f32 %v27990_v62, %v27551_v55  ;;  %v28079_v3 = vstv %s22987_s28  ;;  %s29254_s28 = sld [smem:[#allocation10 + $0x10]] }
 0x4d6   :  { %5725 = vrot.lane.b32.xlu0 %v5720_v23, %s26033_s17 }
 0x4d7   :  { %v5477_v33 = vadd.f32 %v27732_v8, %v5453_v42  ;;  %v5206_v50 = vadd.f32 %v5202_v0, %v5196_v52  ;;  %v30831_v8 = vrot.slane %v27682_v1, 1 }
 0x4d8   :  { %v5276_v45 = vpop.permute.xlu1 %5275  ;;  %v5412_v43 = vpop.permute.xlu0 %5411 }
 0x4d9   :  { %v5420_v30 = vadd.f32 %v5412_v43, %v5388_v59 }
 0x4da   :  { %5801 = vrot.lane.b32.xlu0 %v5791_v16, %s26033_s17  ;;  %v30834_v16 = vrot.slane %v27710_v58, 1 }
 0x4db   :  { %v5430_v57 = vadd.f32 %v5426_v14, %v5420_v30  ;;  %v5884_v30 = vmul.f32 %v28004_v22, %v27824_v18  ;;  %v30835_v14 = vld [vmem:[#allocation31_spill] sm:$0xff] }
 0x4dc   :  { %v5500_v21 = vpop.permute.xlu1 %5499  ;;  %v5220_v5 = vpop.permute.xlu0 %5219 }
 0x4dd   :  { %v5230_v61 = vadd.f32 %v5220_v5, %v27881_v60 }
 0x4df   :  { %v5254_v4 = vadd.f32 %v30831_v8, %v5230_v61 }
 0x4e0   :  { %v5274_v7 = vpop.permute.xlu1 %5273  ;;  %v5444_v35 = vpop.permute.xlu0 %5443 }
 0x4e1   :  { %v5286_v62 = vadd.f32 %v5276_v45, %v5254_v4  ;;  %v5285_v29 = vadd.f32 %v5274_v7, %v5253_v51  ;;  %v5454_v26 = vadd.f32 %v5444_v35, %v27942_v44  ;;  %v30833_v45 = vmov 0.0  }
 0x4e2   :  { %24578 = vmatprep.mubr.msk.f32.mxu0 %vm26036_vm14, %v30833_v45  ;;  %24585 = vmatprep.mubr.msk.f32.mxu1 %vm26036_vm14, %v30833_v45  ;;  %v30836_v35 = vrot.slane %v27875_v49, 1 }
 0x4e3   :  { %v5292_v37 = vadd.f32 %v28072_v39, %v5286_v62  ;;  %v5291_v47 = vadd.f32 %v28072_v39, %v5285_v29  ;;  %v5478_v56 = vadd.f32 %v30832_v46, %v5454_v26 }
 0x4e4   :  { %v5498_v60 = vpop.permute.xlu1 %5497 }
 0x4e5   :  { %v5300_v1 = vrot.slane %v5292_v37, 1  ;;  %v5299_v13 = vrot.slane %v5291_v47, 1  ;;  %v5510_v42 = vadd.f32 %v5500_v21, %v5478_v56  ;;  %v5509_v52 = vadd.f32 %v5498_v60, %v5477_v33 }
 0x4e6   :  { %v28114_v21 = vstv %s22988_s29  ;;  %s23079_s29 = sld [smem:[#allocation10 + $0x2]] }
 0x4e7   :  { %v5301_v23 = vsel %vm274_vm4, %v5299_v13, %v5300_v1  ;;  %v28083_v51 = vadd.f32 %v28079_v3, %v5510_v42  ;;  %v5515_v44 = vadd.f32 %v28079_v3, %v5509_v52  ;;  %v28086_v0 = vmax.f32 %v5292_v37, %v5300_v1 }
 0x4e8   :  { %v28088_v48 = vmax.f32 %v5291_v47, %v5301_v23  ;;  %v5559_v58 = vmul.f32 %v28114_v21, %v27414_v24  ;;  %v30837_v47 = vld [vmem:[#allocation28_spill] sm:$0xff]  ;;  %v28126_v42 = vstv %s22992_s30  ;;  %s23112_s30 = sld [smem:[#allocation10 + $0x22]] }
 0x4e9   :  { %v5524_v17 = vrot.slane %v28083_v51, 1  ;;  %v5523_v59 = vrot.slane %v5515_v44, 1  ;;  %5319 = vrot.lane.b32.xlu1 %v28086_v0, %s26033_s17 }
 0x4ea   :  { %5317 = vrot.lane.b32.xlu0 %v28088_v48, %s26033_s17 }
 0x4eb   :  { %v5525_v33 = vsel %vm274_vm4, %v5523_v59, %v5524_v17 }
 0x4ec   :  { %v28102_v43 = vmax.f32 %v5515_v44, %v5525_v33  ;;  %v5647_v44 = vmul.f32 %v28126_v42, %v27569_v53 }
 0x4ed   :  { %5945 = vrot.lane.b32.xlu1 %v27748_v12, %s26033_s17 }
 0x4ee   :  { %5859 = vrot.lane.b32.xlu0 %v30834_v16, %s26033_s17 }
 0x4f1   :  { %5895 = vrot.lane.b32.xlu1 %v5884_v30, %s26033_s17 }
 0x4f2   :  { %5857 = vrot.lane.b32.xlu0 %v30835_v14, %s26033_s17 }
 0x507   :  { %v5222_v5 = vpop.permute.xlu1 %5221 }
 0x508   :  { %v5231_v61 = vadd.f32 %v5222_v5, %v28035_v25  ;;  %v5224_v8 = vpop.permute.xlu0 %5223  ;;  %v30838_v25 = vrot.slane %v27879_v2, 1  ;;  %v5560_v2 = vmul.f32 %v28114_v21, %v27405_v34 }
 0x509   :  { %v5232_v12 = vadd.f32 %v5224_v8, %v5206_v50 }
 0x50a   :  { %v5255_v4 = vadd.f32 %v27912_v20, %v5231_v61  ;;  %v5586_v33 = vadd.f32 %v27907_v15, %v5560_v2  ;;  %v30839_v61 = vld [vmem:[#allocation34_spill] sm:$0xff]  ;;  %v5883_v15 = vmul.f32 %v28004_v22, %v27820_v36  ;;  %v28155_v22 = vstv %s22996_s12  ;;  %s29260_s12 = sld [smem:[#allocation10]] }
 0x50b   :  { %v5574_v7 = vpop.permute.xlu1 %5573  ;;  %v5256_v62 = vadd.f32 %v30836_v35, %v5232_v12 }
 0x50c   :  { %v5585_v29 = vadd.f32 %v5574_v7, %v5559_v58  ;;  %v5448_v26 = vpop.permute.xlu0 %5447  ;;  %v30840_v7 = vld [vmem:[#allocation26_spill] sm:$0xff] }
 0x50d   :  { %v5456_v37 = vadd.f32 %v5448_v26, %v5430_v57  ;;  %v30841_v35 = vrot.slane %v30840_v7, 1 }
 0x50e   :  { %v5609_v46 = vadd.f32 %v30837_v47, %v5585_v29 }
 0x50f   :  { %v5446_v56 = vpop.permute.xlu1 %5445  ;;  %v5480_v60 = vadd.f32 %v30838_v25, %v5456_v37 }
 0x510   :  { %v5455_v50 = vadd.f32 %v5446_v56, %v28045_v6  ;;  %v5280_v1 = vpop.permute.xlu0 %5279 }
 0x511   :  { %v5288_v13 = vadd.f32 %v5280_v1, %v5256_v62  ;;  %v5610_v62 = vadd.f32 %v30841_v35, %v5586_v33 }
 0x512   :  { %v28129_v20 = vadd.f32 %v27932_v54, %v5455_v50 }
 0x513   :  { %v5294_v49 = vadd.f32 %v28072_v39, %v5288_v13  ;;  %v5630_v52 = vpop.permute.xlu1 %5629 }
 0x514   :  { %v5641_v23 = vadd.f32 %v5630_v52, %v5609_v46  ;;  %v5504_v57 = vpop.permute.xlu0 %5503 }
 0x515   :  { %v5303_v59 = vrot.slane %v5294_v49, 1 }
 0x516   :  { %v5651_v6 = vadd.f32 %v5647_v44, %v5641_v23 }
 0x517   :  { %v28137_v16 = vmax.f32 %v5294_v49, %v5303_v59  ;;  %v5666_v30 = vpop.permute.xlu1 %5665  ;;  %v30842_v49 = vld [vmem:[#allocation30_spill] sm:$0xff] }
 0x518   :  { %v5677_v54 = vadd.f32 %v5666_v30, %v5651_v6  ;;  %v5278_v14 = vpop.permute.xlu0 %5277  ;;  %v30843_v52 = vrot.slane %v30842_v49, 1  ;;  %v5562_v6 = vmul.f32 %v28114_v21, %v27562_v19 }
 0x519   :  { %v5287_v5 = vadd.f32 %v5278_v14, %v5255_v4  ;;  %5323 = vrot.lane.b32.xlu1 %v28137_v16, %s26033_s17  ;;  %v5648_v4 = vmul.f32 %v28126_v42, %v27559_v63  ;;  %v5561_v14 = vmul.f32 %v28114_v21, %v27551_v55 }
 0x51a   :  { %v5701_v8 = vadd.f32 %v30839_v61, %v5677_v54 }
 0x51b   :  { %v5293_v12 = vadd.f32 %v28072_v39, %v5287_v5  ;;  %v5724_v58 = vpop.permute.xlu1 %5723  ;;  %v5512_v39 = vadd.f32 %v5504_v57, %v5480_v60 }
 0x51c   :  { %v5632_v29 = vpop.permute.xlu0 %5631 }
 0x51d   :  { %v5302_v26 = vrot.slane %v5293_v12, 1  ;;  %v5642_v37 = vadd.f32 %v5632_v29, %v5610_v62  ;;  %5893 = vrot.lane.b32.xlu1 %v5883_v15, %s26033_s17  ;;  %v5518_v60 = vadd.f32 %v28079_v3, %v5512_v39  ;;  %v28181_v62 = vstv %s22997_s13  ;;  %v30846_v29 = vld [vmem:[#allocation32_spill] sm:$0xff]  ;;  %s29264_s13 = sld [smem:[#allocation10 + $0x20]] }
 0x51e   :  { %v30847_v21 = vrot.slane %v30846_v29, 1  ;;  %v5649_v39 = vmul.f32 %v28126_v42, %v27820_v36  ;;  %v30848_v36 = vld [vmem:[#allocation29_spill] sm:$0xff] }
 0x51f   :  { %v5304_v47 = vsel %vm274_vm4, %v5302_v26, %v5303_v59  ;;  %v5722_v46 = vpop.permute.xlu1 %5721  ;;  %v5652_v56 = vadd.f32 %v5648_v4, %v5642_v37  ;;  %v5527_v5 = vrot.slane %v5518_v60, 1 }
 0x520   :  { %v28151_v25 = vmax.f32 %v5293_v12, %v5304_v47  ;;  %v5668_v50 = vpop.permute.xlu0 %5667  ;;  %v5733_v1 = vadd.f32 %v5722_v46, %v5701_v8  ;;  %v28176_v8 = vmax.f32 %v28083_v51, %v5524_v17 }
 0x521   :  { %v5678_v13 = vadd.f32 %v5668_v50, %v5652_v56  ;;  %5949 = vrot.lane.b32.xlu1 %v27925_v10, %s26033_s17  ;;  %v30844_v10 = vrot.slane %v27893_v28, 1  ;;  %v30845_v28 = vld [vmem:[#allocation36_spill] sm:$0xff]  ;;  %v28186_v4 = vmax.f32 %v5518_v60, %v5527_v5  ;;  %v5650_v56 = vmul.f32 %v28126_v42, %v27824_v18 }
 0x522   :  { %5321 = vrot.lane.b32.xlu0 %v28151_v25, %s26033_s17  ;;  %v5739_v2 = vadd.f32 %v28155_v22, %v5733_v1  ;;  %v5783_v50 = vmul.f32 %v28181_v62, %v27414_v24 }
 0x523   :  { %v5702_v23 = vadd.f32 %v30843_v52, %v5678_v13  ;;  %v5634_v44 = vpop.permute.xlu1 %5633 }
 0x524   :  { %v5580_v57 = vpop.permute.xlu0 %5579  ;;  %v5747_v12 = vrot.slane %v5739_v2, 1 }
 0x525   :  { %v5734_v59 = vadd.f32 %v5724_v58, %v5702_v23  ;;  %5541 = vrot.lane.b32.xlu1 %v28102_v43, %s26033_s17  ;;  %v5588_v30 = vadd.f32 %v5580_v57, %v5562_v6 }
 0x526   :  { %5951 = vrot.lane.b32.xlu0 %v30844_v10, %s26033_s17 }
 0x527   :  { %v5740_v33 = vadd.f32 %v28155_v22, %v5734_v59  ;;  %v5670_v54 = vpop.permute.xlu1 %5669  ;;  %v5612_v26 = vadd.f32 %v30847_v21, %v5588_v30  ;;  %v5784_v59 = vmul.f32 %v28181_v62, %v27405_v34 }
 0x528   :  { %v5578_v61 = vpop.permute.xlu0 %5577 }
 0x529   :  { %v5587_v58 = vadd.f32 %v5578_v61, %v5561_v14  ;;  %v5748_v7 = vrot.slane %v5740_v33, 1 }
 0x52a   :  { %5543 = vrot.lane.b32.xlu0 %v28176_v8, %s26033_s17 }
 0x52b   :  { %v5611_v35 = vadd.f32 %v30845_v28, %v5587_v58  ;;  %v5800_v15 = vpop.permute.xlu1 %5799  ;;  %v5749_v37 = vsel %vm274_vm4, %v5747_v12, %v5748_v7  ;;  %v28198_v60 = vmax.f32 %v5740_v33, %v5748_v7 }
 0x52c   :  { %v5636_v51 = vpop.permute.xlu0 %5635  ;;  %v28188_v17 = vmax.f32 %v5739_v2, %v5749_v37  ;;  %v5810_v33 = vadd.f32 %v5800_v15, %v5784_v59 }
 0x52d   :  { %v5643_v47 = vadd.f32 %v5634_v44, %v5611_v35  ;;  %v5644_v46 = vadd.f32 %v5636_v51, %v5612_v26  ;;  %v5871_v26 = vmul.f32 %v27859_v9, %v27569_v53  ;;  %v30851_v51 = vld [vmem:[#allocation33_spill] sm:$0xff] }
 0x52e   :  { %5547 = vrot.lane.b32.xlu0 %v28186_v4, %s26033_s17 }
 0x52f   :  { %v5798_v1 = vpop.permute.xlu1 %5797  ;;  %v5654_v13 = vadd.f32 %v5650_v56, %v5644_v46  ;;  %v5653_v49 = vadd.f32 %v5649_v39, %v5643_v47  ;;  %v30852_v47 = vrot.slane %v30851_v51, 1 }
 0x530   :  { %v5809_v52 = vadd.f32 %v5798_v1, %v5783_v50  ;;  %v5502_v23 = vpop.permute.xlu0 %5501  ;;  %v28230_v50 = vstv %s23005_s14  ;;  %s23117_s14 = sld [smem:[#allocation10 + $0x27]] }
 0x531   :  { %v5511_v44 = vadd.f32 %v5502_v23, %v28129_v20  ;;  %v5679_v57 = vadd.f32 %v5670_v54, %v5653_v49 }
 0x532   :  { %5767 = vrot.lane.b32.xlu0 %v28198_v60, %s26033_s17  ;;  %v5833_v18 = vadd.f32 %v30848_v36, %v5809_v52  ;;  %v30853_v52 = vld [vmem:[#allocation37_spill] sm:$0xff]  ;;  %v5785_v36 = vmul.f32 %v28181_v62, %v27551_v55 }
 0x533   :  { %v5517_v42 = vadd.f32 %v28079_v3, %v5511_v44  ;;  %v5703_v2 = vadd.f32 %v27951_v31, %v5679_v57  ;;  %v5892_v14 = vpop.permute.xlu1 %5891  ;;  %v30849_v3 = vld [vmem:[#allocation27_spill] sm:$0xff] }
 0x534   :  { %v5672_v24 = vpop.permute.xlu0 %5671  ;;  %v30850_v34 = vrot.slane %v30849_v3, 1 }
 0x535   :  { %v5526_v6 = vrot.slane %v5517_v42, 1  ;;  %v5680_v10 = vadd.f32 %v5672_v24, %v5654_v13 }
 0x536   :  { %v5834_v58 = vadd.f32 %v30850_v34, %v5810_v33 }
 0x537   :  { %v5528_v30 = vsel %vm274_vm4, %v5526_v6, %v5527_v5  ;;  %v5704_v20 = vadd.f32 %v5695_v32, %v5680_v10  ;;  %v5890_v5 = vpop.permute.xlu1 %5889  ;;  %v30854_v10 = vld [vmem:[#allocation38_spill] sm:$0xff] }
 0x538   :  { %v28211_v54 = vmax.f32 %v5517_v42, %v5528_v30  ;;  %v5728_v61 = vpop.permute.xlu0 %5727  ;;  %v30855_v30 = vld [vmem:[#allocation20_spill] sm:$0xff] }
 0x539   :  { %v5736_v12 = vadd.f32 %v5728_v61, %v5704_v20 }
 0x53a   :  { %5545 = vrot.lane.b32.xlu1 %v28211_v54, %s26033_s17 }
 0x53b   :  { %v5742_v31 = vadd.f32 %v28155_v22, %v5736_v12  ;;  %v5948_v56 = vpop.permute.xlu1 %5947 }
 0x53c   :  { %v5856_v7 = vpop.permute.xlu0 %5855 }
 0x53d   :  { %v5751_v28 = vrot.slane %v5742_v31, 1  ;;  %v5866_v32 = vadd.f32 %v5856_v7, %v5834_v58 }
 0x53e   :  { %5765 = vrot.lane.b32.xlu1 %v28188_v17, %s26033_s17 }
 0x53f   :  { %v28222_v35 = vmax.f32 %v5742_v31, %v5751_v28  ;;  %v5876_v15 = vadd.f32 %v5872_v27, %v5866_v32 }
 0x540   :  { %v5854_v29 = vpop.permute.xlu0 %5853 }
 0x541   :  { %v5902_v21 = vadd.f32 %v5892_v14, %v5876_v15  ;;  %v5865_v37 = vadd.f32 %v5854_v29, %v5833_v18  ;;  %5771 = vrot.lane.b32.xlu0 %v28222_v35, %s26033_s17  ;;  %v5786_v14 = vmul.f32 %v28181_v62, %v27562_v19 }
 0x543   :  { %v5926_v63 = vadd.f32 %v30852_v47, %v5902_v21  ;;  %v5875_v46 = vadd.f32 %v5871_v26, %v5865_v37 }
 0x544   :  { %v5804_v39 = vpop.permute.xlu0 %5803 }
 0x545   :  { %v5958_v1 = vadd.f32 %v5948_v56, %v5926_v63  ;;  %v5901_v13 = vadd.f32 %v5890_v5, %v5875_v46  ;;  %v5812_v61 = vadd.f32 %v5804_v39, %v5786_v14  ;;  %v30856_v5 = vld [vmem:[#allocation35_spill] sm:$0xff] }
 0x546   :  { %v30857_v15 = vrot.slane %v30856_v5, 1 }
 0x547   :  { %v5964_v49 = vadd.f32 %v28230_v50, %v5958_v1  ;;  %v5925_v23 = vadd.f32 %v30853_v52, %v5901_v13 }
 0x548   :  { %v5726_v44 = vpop.permute.xlu0 %5725  ;;  %v5836_v29 = vadd.f32 %v30857_v15, %v5812_v61 }
 0x549   :  { %v5735_v53 = vadd.f32 %v5726_v44, %v5703_v2  ;;  %v5972_v9 = vrot.slane %v5964_v49, 1 }
 0x54b   :  { %v5741_v57 = vadd.f32 %v28155_v22, %v5735_v53  ;;  %v28237_v18 = vmax.f32 %v5964_v49, %v5972_v9  ;;  %v6006_v22 = vsel %vm6005_vm15, %v30855_v30, 0  ;;  %v30858_v53 = vld [vmem:[#allocation39_spill] sm:$0xff] }
 0x54c   :  { %v5802_v42 = vpop.permute.xlu0 %5801  ;;  %v28249_v55 = vsub.f32 %v6006_v22, %v6006_v22 }
 0x54d   :  { %v5750_v24 = vrot.slane %v5741_v57, 1  ;;  %v5811_v59 = vadd.f32 %v5802_v42, %v5785_v36  ;;  %5991 = vrot.lane.b32.xlu0 %v28237_v18, %s26033_s17 }
 0x54e   :  { %v28252_v20 = vand.u32 4294901760, %v28249_v55 }
 0x54f   :  { %v5752_v6 = vsel %vm274_vm4, %v5750_v24, %v5751_v28  ;;  %v5835_v33 = vadd.f32 %v30854_v10, %v5811_v59 }
 0x550   :  { %v28243_v2 = vmax.f32 %v5741_v57, %v5752_v6  ;;  %v6082_v34 = vsub.f32 %v28249_v55, %v28252_v20 }
 0x552   :  { %5769 = vrot.lane.b32.xlu1 %v28243_v2, %s26033_s17  ;;  %v28263_v21 = vand.u32 4294901760, %v6082_v34 }
 0x55b   :  { %v5320_v12 = vpop.permute.xlu1 %5319 }
 0x55c   :  { %v5330_v31 = vmax.f32 %v28086_v0, %v5320_v12  ;;  %v5318_v3 = vpop.permute.xlu0 %5317 }
 0x55d   :  { %v5329_v58 = vmax.f32 %v28088_v48, %v5318_v3 }
 0x55e   :  { %v6010_v7 = vsel %vm6008_vm1, %v5330_v31, 0 }
 0x55f   :  { %v6041_v28 = vand.u32 4294901760, %v6010_v7  ;;  %v6044_v27 = vand.u32 4294901760, %v5329_v58  ;;  %v5946_v32 = vpop.permute.xlu1 %5945 }
 0x560   :  { %v5957_v19 = vadd.f32 %v5946_v32, %v5925_v23  ;;  %v5860_v62 = vpop.permute.xlu0 %5859 }
 0x561   :  { %v6119_v26 = vsub.f32 %v6010_v7, %v6041_v28  ;;  %v6126_v0 = vsub.f32 %v5329_v58, %v6044_v27  ;;  %v5868_v37 = vadd.f32 %v5860_v62, %v5836_v29  ;;  %24575 = vmatpush3.msra.mxu0 %v6041_v28 }
 0x562   :  { %v5963_v51 = vadd.f32 %v28230_v50, %v5957_v19  ;;  %24576 = vmatprep.subr.mxu0 %v30833_v45 }
 0x563   :  { %v6120_v48 = vand.u32 4294901760, %v6119_v26  ;;  %v6127_v47 = vand.u32 4294901760, %v6126_v0  ;;  %v5896_v63 = vpop.permute.xlu1 %5895  ;;  %v5878_v46 = vadd.f32 %v27918_v11, %v5868_v37  ;;  %24577 = vmatpush3.msra.mxu0 %v6044_v27 }
 0x564   :  { %v5971_v56 = vrot.slane %v5963_v51, 1  ;;  %24588 = vmatprep.subr.mxu0 %v30833_v45  ;;  %v5858_v39 = vpop.permute.xlu0 %5857  ;;  %24579 = vmatmul.mubr.f32.vlgmr.msra.gmra.mxu0 %v28263_v21 }
 0x565   :  { %v5904_v1 = vadd.f32 %v5896_v63, %v5878_v46  ;;  %v5867_v13 = vadd.f32 %v5858_v39, %v5835_v33  ;;  %24589 = vmatpush3.msra.mxu0 %v6119_v26  ;;  %24592 = vmatprep.mubr.msk.f32.mxu0 %vm26036_vm14, %v30833_v45  ;;  %v6121_v49 = vsub.f32 %v6119_v26, %v6120_v48 }
 0x566   :  { %v5973_v52 = vsel %vm274_vm4, %v5971_v56, %v5972_v9  ;;  %24590 = vmatprep.subr.mxu0 %v30833_v45  ;;  %v6128_v23 = vsub.f32 %v6126_v0, %v6127_v47 }
 0x567   :  { %v28274_v11 = vmax.f32 %v5963_v51, %v5973_v52  ;;  %24591 = vmatpush3.msra.mxu0 %v6126_v0  ;;  %v6122_v44 = vand.u32 4294901760, %v6121_v49  ;;  %v5877_v57 = vadd.f32 %v30858_v53, %v5867_v13  ;;  %v5928_v36 = vadd.f32 %v5919_v40, %v5904_v1 }
 0x568   :  { %24602 = vmatprep.subr.mxu0 %v30833_v45  ;;  %24593 = vmatmul.mubr.f32.vlgmr.msra.gmra.mxu0 %v28249_v55  ;;  %v6129_v9 = vand.u32 4294901760, %v6128_v23 }
 0x569   :  { %24582 = vmatpush3.msra.mxu1 %v6122_v44  ;;  %5989 = vrot.lane.b32.xlu1 %v28274_v11, %s26033_s17 }
 0x56a   :  { %24603 = vmatpush3.msra.mxu0 %v6120_v48  ;;  %24583 = vmatprep.subr.mxu1 %v30833_v45 }
 0x56b   :  { %24604 = vmatprep.subr.mxu0 %v30833_v45  ;;  %24584 = vmatpush3.msra.mxu1 %v6129_v9 }
 0x56c   :  { %24605 = vmatpush3.msra.mxu0 %v6127_v47  ;;  %24586 = vmatmul.mubr.msk.f32.vlgmr.msra.gmra.mxu1 %vm6005_vm15, %v30855_v30 }
 0x56d   :  { %24595 = vmatprep.subr.mxu1 %v30833_v45  ;;  %24599 = vmatprep.mubr.msk.f32.mxu1 %vm26036_vm14, %v30833_v45 }
 0x56e   :  { %24596 = vmatpush3.msra.mxu1 %v6041_v28  ;;  %24606 = vmatprep.mubr.msk.f32.mxu0 %vm26036_vm14, %v30833_v45 }
 0x56f   :  { %24597 = vmatprep.subr.mxu1 %v30833_v45  ;;  %24607 = vmatmul.mubr.msk.f32.vlgmr.msra.gmra.mxu0 %vm6005_vm15, %v30855_v30 }
 0x570   :  { %24598 = vmatpush3.msra.mxu1 %v6044_v27  ;;  %24616 = vmatprep.subr.mxu0 %v30833_v45 }
 0x571   :  { %24600 = vmatmul.mubr.f32.vlgmr.msra.gmra.mxu1 %v28252_v20  ;;  %24609 = vmatprep.subr.mxu1 %v30833_v45 }
 0x572   :  { %24610 = vmatpush3.msra.mxu1 %v6041_v28  ;;  %24613 = vmatprep.mubr.msk.f32.mxu1 %vm26036_vm14, %v30833_v45 }
 0x573   :  { %24611 = vmatprep.subr.mxu1 %v30833_v45  ;;  %24620 = vmatprep.mubr.msk.f32.mxu0 %vm26036_vm14, %v30833_v45 }
 0x574   :  { %24612 = vmatpush3.msra.mxu1 %v6044_v27 }
 0x575   :  { %24614 = vmatmul.mubr.msk.f32.vlgmr.msra.gmra.mxu1 %vm6005_vm15, %v30855_v30  ;;  %24623 = vmatprep.subr.mxu1 %v30833_v45 }
 0x576   :  { %24627 = vmatprep.mubr.msk.f32.mxu1 %vm26036_vm14, %v30833_v45 }
 0x58b   :  { %v5324_v41 = vpop.permute.xlu1 %5323 }
 0x58c   :  { %v5332_v40 = vmax.f32 %v28137_v16, %v5324_v41 }
 0x58e   :  { %v6472_v42 = vsel %vm6008_vm1, %v5332_v40, 0 }
 0x58f   :  { %v28310_v24 = vand.u32 4294901760, %v6472_v42  ;;  %v5894_v59 = vpop.permute.xlu1 %5893 }
 0x590   :  { %v5903_v6 = vadd.f32 %v5894_v59, %v5877_v57 }
 0x591   :  { %v6581_v10 = vsub.f32 %v6472_v42, %v28310_v24  ;;  %24617 = vmatpush3.msra.mxu0 %v28310_v24 }
 0x592   :  { %v5927_v33 = vadd.f32 %v27964_v38, %v5903_v6  ;;  %24618 = vmatprep.subr.mxu0 %v30833_v45 }
 0x593   :  { %v6582_v22 = vand.u32 4294901760, %v6581_v10  ;;  %v5950_v14 = vpop.permute.xlu1 %5949 }
 0x594   :  { %v5322_v61 = vpop.permute.xlu0 %5321  ;;  %v5959_v12 = vadd.f32 %v5950_v14, %v5927_v33 }
 0x595   :  { %v5331_v16 = vmax.f32 %v28151_v25, %v5322_v61  ;;  %v6583_v31 = vsub.f32 %v6581_v10, %v6582_v22 }
 0x596   :  { %v5965_v7 = vadd.f32 %v28230_v50, %v5959_v12 }
 0x597   :  { %v28317_v3 = vand.u32 4294901760, %v5331_v16  ;;  %v6584_v34 = vand.u32 4294901760, %v6583_v31  ;;  %v5542_v27 = vpop.permute.xlu1 %5541 }
 0x598   :  { %v5952_v58 = vpop.permute.xlu0 %5951  ;;  %v5553_v5 = vmax.f32 %v28102_v43, %v5542_v27  ;;  %v5974_v29 = vrot.slane %v5965_v7, 1 }
 0x599   :  { %v6588_v28 = vsub.f32 %v5331_v16, %v28317_v3  ;;  %v5960_v32 = vadd.f32 %v5952_v58, %v5928_v36  ;;  %24619 = vmatpush3.msra.mxu0 %v28317_v3  ;;  %24624 = vmatpush3.msra.mxu1 %v6584_v34 }
 0x59a   :  { %24630 = vmatprep.subr.mxu0 %v30833_v45  ;;  %24621 = vmatmul.mubr.f32.vlgmr.msra.gmra.mxu0 %v28263_v21  ;;  %v28339_v51 = vand.u32 4294901760, %v5553_v5 }
 0x59b   :  { %v6589_v38 = vand.u32 4294901760, %v6588_v28  ;;  %v5966_v25 = vadd.f32 %v28230_v50, %v5960_v32  ;;  %24631 = vmatpush3.msra.mxu0 %v6581_v10  ;;  %24634 = vmatprep.mubr.msk.f32.mxu0 %vm26036_vm14, %v30833_v45 }
 0x59c   :  { %24632 = vmatprep.subr.mxu0 %v30833_v45  ;;  %v5544_v15 = vpop.permute.xlu0 %5543  ;;  %24625 = vmatprep.subr.mxu1 %v30833_v45  ;;  %v7050_v63 = vsub.f32 %v5553_v5, %v28339_v51 }
 0x59d   :  { %v5975_v19 = vrot.slane %v5966_v25, 1  ;;  %v5554_v62 = vmax.f32 %v28176_v8, %v5544_v15  ;;  %24633 = vmatpush3.msra.mxu0 %v6588_v28  ;;  %v6590_v26 = vsub.f32 %v6588_v28, %v6589_v38 }
 0x59e   :  { %24644 = vmatprep.subr.mxu0 %v30833_v45  ;;  %24635 = vmatmul.mubr.f32.vlgmr.msra.gmra.mxu0 %v28249_v55  ;;  %v7051_v39 = vand.u32 4294901760, %v7050_v63 }
 0x59f   :  { %v28333_v50 = vmax.f32 %v5966_v25, %v5975_v19  ;;  %v6934_v0 = vsel %vm6008_vm1, %v5554_v62, 0  ;;  %24645 = vmatpush3.msra.mxu0 %v6582_v22  ;;  %v6591_v43 = vand.u32 4294901760, %v6590_v26  ;;  %24648 = vmatprep.mubr.msk.f32.mxu0 %vm26036_vm14, %v30833_v45  ;;  %v5976_v37 = vsel %vm274_vm4, %v5974_v29, %v5975_v19 }
 0x5a0   :  { %v28341_v8 = vand.u32 4294901760, %v6934_v0  ;;  %24646 = vmatprep.subr.mxu0 %v30833_v45  ;;  %v28344_v48 = vmax.f32 %v5965_v7, %v5976_v37  ;;  %v5548_v56 = vpop.permute.xlu0 %5547  ;;  %v7052_v49 = vsub.f32 %v7050_v63, %v7051_v39 }
 0x5a1   :  { %24626 = vmatpush3.msra.mxu1 %v6591_v43  ;;  %24647 = vmatpush3.msra.mxu0 %v6589_v38  ;;  %v5556_v13 = vmax.f32 %v28186_v4, %v5548_v56 }
 0x5a2   :  { %v7043_v47 = vsub.f32 %v6934_v0, %v28341_v8  ;;  %5995 = vrot.lane.b32.xlu0 %v28333_v50, %s26033_s17  ;;  %24628 = vmatmul.mubr.msk.f32.vlgmr.msra.gmra.mxu1 %vm6005_vm15, %v30855_v30  ;;  %v7053_v36 = vand.u32 4294901760, %v7052_v49 }
 0x5a3   :  { %24637 = vmatprep.subr.mxu1 %v30833_v45  ;;  %24658 = vmatprep.subr.mxu0 %v30833_v45  ;;  %v7396_v4 = vsel %vm6008_vm1, %v5556_v13, 0 }
 0x5a4   :  { %v7044_v46 = vand.u32 4294901760, %v7043_v47  ;;  %5993 = vrot.lane.b32.xlu1 %v28344_v48, %s26033_s17  ;;  %24638 = vmatpush3.msra.mxu1 %v28310_v24  ;;  %v28386_v53 = vand.u32 4294901760, %v7396_v4  ;;  %v5768_v40 = vpop.permute.xlu0 %5767 }
 0x5a5   :  { %24649 = vmatmul.mubr.msk.f32.vlgmr.msra.gmra.mxu0 %vm6005_vm15, %v30855_v30  ;;  %24639 = vmatprep.subr.mxu1 %v30833_v45 }
 0x5a6   :  { %24659 = vmatpush3.msra.mxu0 %v28341_v8  ;;  %24640 = vmatpush3.msra.mxu1 %v28317_v3  ;;  %v7045_v1 = vsub.f32 %v7043_v47, %v7044_v46 }
 0x5a7   :  { %24660 = vmatprep.subr.mxu0 %v30833_v45  ;;  %24641 = vmatprep.mubr.msk.f32.mxu1 %vm26036_vm14, %v30833_v45 }
 0x5a8   :  { %24661 = vmatpush3.msra.mxu0 %v28339_v51  ;;  %24642 = vmatmul.mubr.f32.vlgmr.msra.gmra.mxu1 %v28252_v20  ;;  %v7046_v52 = vand.u32 4294901760, %v7045_v1 }
 0x5a9   :  { %24651 = vmatprep.subr.mxu1 %v30833_v45  ;;  %24662 = vmatprep.mubr.msk.f32.mxu0 %vm26036_vm14, %v30833_v45 }
 0x5aa   :  { %24672 = vmatprep.subr.mxu0 %v30833_v45  ;;  %24652 = vmatpush3.msra.mxu1 %v28310_v24  ;;  %v5778_v24 = vmax.f32 %v28198_v60, %v5768_v40 }
 0x5ab   :  { %24663 = vmatmul.mubr.f32.vlgmr.msra.gmra.mxu0 %v28263_v21  ;;  %24653 = vmatprep.subr.mxu1 %v30833_v45 }
 0x5ac   :  { %24673 = vmatpush3.msra.mxu0 %v7043_v47  ;;  %24654 = vmatpush3.msra.mxu1 %v28317_v3  ;;  %v5546_v23 = vpop.permute.xlu1 %5545  ;;  %v7858_v60 = vsel %vm6008_vm1, %v5778_v24, 0 }
 0x5ad   :  { %24674 = vmatprep.subr.mxu0 %v30833_v45  ;;  %24655 = vmatprep.mubr.msk.f32.mxu1 %vm26036_vm14, %v30833_v45  ;;  %v5555_v44 = vmax.f32 %v28211_v54, %v5546_v23  ;;  %v7505_v54 = vsub.f32 %v7396_v4, %v28386_v53  ;;  %v28434_v61 = vand.u32 4294901760, %v7858_v60 }
 0x5ae   :  { %24675 = vmatpush3.msra.mxu0 %v7050_v63  ;;  %24656 = vmatmul.mubr.msk.f32.vlgmr.msra.gmra.mxu1 %vm6005_vm15, %v30855_v30 }
 0x5af   :  { %24665 = vmatprep.subr.mxu1 %v30833_v45  ;;  %24676 = vmatprep.mubr.msk.f32.mxu0 %vm26036_vm14, %v30833_v45  ;;  %v28389_v57 = vand.u32 4294901760, %v5555_v44  ;;  %v7506_v41 = vand.u32 4294901760, %v7505_v54  ;;  %v7967_v12 = vsub.f32 %v7858_v60, %v28434_v61 }
 0x5b0   :  { %24686 = vmatprep.subr.mxu0 %v30833_v45  ;;  %24666 = vmatpush3.msra.mxu1 %v7046_v52  ;;  %v5766_v10 = vpop.permute.xlu1 %5765 }
 0x5b1   :  { %24677 = vmatmul.mubr.f32.vlgmr.msra.gmra.mxu0 %v28249_v55  ;;  %24667 = vmatprep.subr.mxu1 %v30833_v45  ;;  %v7512_v9 = vsub.f32 %v5555_v44, %v28389_v57  ;;  %v7507_v6 = vsub.f32 %v7505_v54, %v7506_v41  ;;  %v5777_v33 = vmax.f32 %v28188_v17, %v5766_v10  ;;  %v7968_v31 = vand.u32 4294901760, %v7967_v12 }
 0x5b2   :  { %24687 = vmatpush3.msra.mxu0 %v7044_v46  ;;  %24668 = vmatpush3.msra.mxu1 %v7053_v36 }
 0x5b3   :  { %24688 = vmatprep.subr.mxu0 %v30833_v45  ;;  %24669 = vmatprep.mubr.msk.f32.mxu1 %vm26036_vm14, %v30833_v45  ;;  %v7513_v42 = vand.u32 4294901760, %v7512_v9  ;;  %v7508_v22 = vand.u32 4294901760, %v7507_v6  ;;  %v28439_v17 = vand.u32 4294901760, %v5777_v33  ;;  %v5772_v3 = vpop.permute.xlu0 %5771  ;;  %v7969_v28 = vsub.f32 %v7967_v12, %v7968_v31 }
 0x5b4   :  { %24689 = vmatpush3.msra.mxu0 %v7051_v39  ;;  %24670 = vmatmul.mubr.msk.f32.vlgmr.msra.gmra.mxu1 %vm6005_vm15, %v30855_v30  ;;  %v5780_v58 = vmax.f32 %v28222_v35, %v5772_v3 }
 0x5b5   :  { %24679 = vmatprep.subr.mxu1 %v30833_v45  ;;  %24690 = vmatprep.mubr.msk.f32.mxu0 %vm26036_vm14, %v30833_v45  ;;  %v7514_v59 = vsub.f32 %v7512_v9, %v7513_v42  ;;  %v7974_v16 = vsub.f32 %v5777_v33, %v28439_v17  ;;  %v7970_v38 = vand.u32 4294901760, %v7969_v28 }
 0x5b6   :  { %24700 = vmatprep.subr.mxu0 %v30833_v45  ;;  %24680 = vmatpush3.msra.mxu1 %v28341_v8  ;;  %v8320_v32 = vsel %vm6008_vm1, %v5780_v58, 0 }
 0x5b7   :  { %24691 = vmatmul.mubr.msk.f32.vlgmr.msra.gmra.mxu0 %vm6005_vm15, %v30855_v30  ;;  %24681 = vmatprep.subr.mxu1 %v30833_v45  ;;  %v7515_v14 = vand.u32 4294901760, %v7514_v59  ;;  %v7975_v34 = vand.u32 4294901760, %v7974_v16  ;;  %v28482_v25 = vand.u32 4294901760, %v8320_v32  ;;  %v30859_v59 = vld [vmem:[#allocation21_spill] sm:$0xff] }
 0x5b8   :  { %24701 = vmatpush3.msra.mxu0 %v28386_v53  ;;  %24682 = vmatpush3.msra.mxu1 %v28339_v51  ;;  %v9709_v6 = vsel %vm6008_vm1, %v30859_v59, 0 }
 0x5b9   :  { %24702 = vmatprep.subr.mxu0 %v30833_v45  ;;  %24683 = vmatprep.mubr.msk.f32.mxu1 %vm26036_vm14, %v30833_v45  ;;  %v7976_v27 = vsub.f32 %v7974_v16, %v7975_v34  ;;  %v8429_v15 = vsub.f32 %v8320_v32, %v28482_v25  ;;  %v28621_v60 = vsub.f32 %v9709_v6, %v9709_v6 }
 0x5ba   :  { %24703 = vmatpush3.msra.mxu0 %v28389_v57  ;;  %24684 = vmatmul.mubr.f32.vlgmr.msra.gmra.mxu1 %v28252_v20 }
 0x5bb   :  { %24693 = vmatprep.subr.mxu1 %v30833_v45  ;;  %24704 = vmatprep.mubr.msk.f32.mxu0 %vm26036_vm14, %v30833_v45  ;;  %v7977_v5 = vand.u32 4294901760, %v7976_v27  ;;  %v8430_v19 = vand.u32 4294901760, %v8429_v15 }
 0x5bc   :  { %24714 = vmatprep.subr.mxu0 %v30833_v45  ;;  %24694 = vmatpush3.msra.mxu1 %v28341_v8 }
 0x5bd   :  { %24705 = vmatmul.mubr.f32.vlgmr.msra.gmra.mxu0 %v28263_v21  ;;  %24695 = vmatprep.subr.mxu1 %v30833_v45 }
 0x5be   :  { %24715 = vmatpush3.msra.mxu0 %v7505_v54  ;;  %24696 = vmatpush3.msra.mxu1 %v28339_v51  ;;  %v8431_v51 = vsub.f32 %v8429_v15, %v8430_v19 }
 0x5bf   :  { %24716 = vmatprep.subr.mxu0 %v30833_v45  ;;  %24697 = vmatprep.mubr.msk.f32.mxu1 %vm26036_vm14, %v30833_v45  ;;  %v5992_v62 = vpop.permute.xlu0 %5991 }
 0x5c0   :  { %24717 = vmatpush3.msra.mxu0 %v7512_v9  ;;  %24698 = vmatmul.mubr.msk.f32.vlgmr.msra.gmra.mxu1 %vm6005_vm15, %v30855_v30  ;;  %v6002_v0 = vmax.f32 %v28237_v18, %v5992_v62  ;;  %v8432_v47 = vand.u32 4294901760, %v8431_v51  ;;  %v30863_v51 = vld [vmem:[#allocation23_spill] sm:$0xff] }
 0x5c1   :  { %24707 = vmatprep.subr.mxu1 %v30833_v45  ;;  %24718 = vmatprep.mubr.msk.f32.mxu0 %vm26036_vm14, %v30833_v45 }
 0x5c2   :  { %24728 = vmatprep.subr.mxu0 %v30833_v45  ;;  %24708 = vmatpush3.msra.mxu1 %v7508_v22  ;;  %v8782_v8 = vsel %vm6008_vm1, %v6002_v0, 0 }
 0x5c3   :  { %24719 = vmatmul.mubr.f32.vlgmr.msra.gmra.mxu0 %v28249_v55  ;;  %24709 = vmatprep.subr.mxu1 %v30833_v45  ;;  %v28530_v46 = vand.u32 4294901760, %v8782_v8 }
 0x5c4   :  { %24729 = vmatpush3.msra.mxu0 %v7506_v41  ;;  %24710 = vmatpush3.msra.mxu1 %v7515_v14  ;;  %v5770_v7 = vpop.permute.xlu1 %5769 }
 0x5c5   :  { %24730 = vmatprep.subr.mxu0 %v30833_v45  ;;  %24711 = vmatprep.mubr.msk.f32.mxu1 %vm26036_vm14, %v30833_v45  ;;  %v5779_v35 = vmax.f32 %v28243_v2, %v5770_v7  ;;  %v8891_v56 = vsub.f32 %v8782_v8, %v28530_v46 }
 0x5c6   :  { %24731 = vmatpush3.msra.mxu0 %v7513_v42  ;;  %24712 = vmatmul.mubr.msk.f32.vlgmr.msra.gmra.mxu1 %vm6005_vm15, %v30855_v30 }
 0x5c7   :  { %24721 = vmatprep.subr.mxu1 %v30833_v45  ;;  %24732 = vmatprep.mubr.msk.f32.mxu0 %vm26036_vm14, %v30833_v45  ;;  %v28485_v2 = vand.u32 4294901760, %v5779_v35  ;;  %v8892_v1 = vand.u32 4294901760, %v8891_v56 }
 0x5c8   :  { %24742 = vmatprep.subr.mxu0 %v30833_v45  ;;  %24722 = vmatpush3.msra.mxu1 %v28386_v53 }
 0x5c9   :  { %24733 = vmatmul.mubr.msk.f32.vlgmr.msra.gmra.mxu0 %vm6005_vm15, %v30855_v30  ;;  %24723 = vmatprep.subr.mxu1 %v30833_v45  ;;  %v8436_v29 = vsub.f32 %v5779_v35, %v28485_v2  ;;  %v8893_v52 = vsub.f32 %v8891_v56, %v8892_v1  ;;  %v30862_v35 = vld [vmem:[#allocation25_spill] sm:$0xff] }
 0x5ca   :  { %24743 = vmatpush3.msra.mxu0 %v28434_v61  ;;  %24724 = vmatpush3.msra.mxu1 %v28389_v57 }
 0x5cb   :  { %24744 = vmatprep.subr.mxu0 %v30833_v45  ;;  %24725 = vmatprep.mubr.msk.f32.mxu1 %vm26036_vm14, %v30833_v45  ;;  %v8437_v26 = vand.u32 4294901760, %v8436_v29  ;;  %v8894_v23 = vand.u32 4294901760, %v8893_v52 }
 0x5cc   :  { %24745 = vmatpush3.msra.mxu0 %v28439_v17  ;;  %24726 = vmatmul.mubr.f32.vlgmr.msra.gmra.mxu1 %v28252_v20 }
 0x5cd   :  { %24735 = vmatprep.subr.mxu1 %v30833_v45  ;;  %24746 = vmatprep.mubr.msk.f32.mxu0 %vm26036_vm14, %v30833_v45  ;;  %v8438_v37 = vsub.f32 %v8436_v29, %v8437_v26 }
 0x5ce   :  { %24756 = vmatprep.subr.mxu0 %v30833_v45  ;;  %24736 = vmatpush3.msra.mxu1 %v28386_v53 }
 0x5cf   :  { %24747 = vmatmul.mubr.f32.vlgmr.msra.gmra.mxu0 %v28263_v21  ;;  %24737 = vmatprep.subr.mxu1 %v30833_v45  ;;  %v8439_v63 = vand.u32 4294901760, %v8438_v37 }
 0x5d0   :  { %24757 = vmatpush3.msra.mxu0 %v7967_v12  ;;  %24738 = vmatpush3.msra.mxu1 %v28389_v57 }
 0x5d1   :  { %24758 = vmatprep.subr.mxu0 %v30833_v45  ;;  %24739 = vmatprep.mubr.msk.f32.mxu1 %vm26036_vm14, %v30833_v45 }
 0x5d2   :  { %24759 = vmatpush3.msra.mxu0 %v7974_v16  ;;  %24740 = vmatmul.mubr.msk.f32.vlgmr.msra.gmra.mxu1 %vm6005_vm15, %v30855_v30 }
 0x5d3   :  { %24749 = vmatprep.subr.mxu1 %v30833_v45  ;;  %24760 = vmatprep.mubr.msk.f32.mxu0 %vm26036_vm14, %v30833_v45 }
 0x5d4   :  { %24770 = vmatprep.subr.mxu0 %v30833_v45  ;;  %24750 = vmatpush3.msra.mxu1 %v7970_v38 }
 0x5d5   :  { %24761 = vmatmul.mubr.f32.vlgmr.msra.gmra.mxu0 %v28249_v55  ;;  %24751 = vmatprep.subr.mxu1 %v30833_v45 }
 0x5d6   :  { %24771 = vmatpush3.msra.mxu0 %v7968_v31  ;;  %24752 = vmatpush3.msra.mxu1 %v7977_v5 }
 0x5d7   :  { %24772 = vmatprep.subr.mxu0 %v30833_v45  ;;  %24753 = vmatprep.mubr.msk.f32.mxu1 %vm26036_vm14, %v30833_v45 }
 0x5d8   :  { %24773 = vmatpush3.msra.mxu0 %v7975_v34  ;;  %24754 = vmatmul.mubr.msk.f32.vlgmr.msra.gmra.mxu1 %vm6005_vm15, %v30855_v30  ;;  %v30860_v34 = vmov 1.0  }
 0x5d9   :  { %24763 = vmatprep.subr.mxu1 %v30833_v45  ;;  %24774 = vmatprep.mubr.msk.f32.mxu0 %vm26036_vm14, %v30833_v45 }
 0x5da   :  { %24784 = vmatprep.subr.mxu0 %v30833_v45  ;;  %24764 = vmatpush3.msra.mxu1 %v28434_v61 }
 0x5db   :  { %24775 = vmatmul.mubr.msk.f32.vlgmr.msra.gmra.mxu0 %vm6005_vm15, %v30855_v30  ;;  %24765 = vmatprep.subr.mxu1 %v30833_v45  ;;  %v5990_v43 = vpop.permute.xlu1 %5989 }
 0x5dc   :  { %24785 = vmatpush3.msra.mxu0 %v28482_v25  ;;  %24766 = vmatpush3.msra.mxu1 %v28439_v17  ;;  %v6001_v18 = vmax.f32 %v28274_v11, %v5990_v43 }
 0x5dd   :  { %24786 = vmatprep.subr.mxu0 %v30833_v45  ;;  %24767 = vmatprep.mubr.msk.f32.mxu1 %vm26036_vm14, %v30833_v45 }
 0x5de   :  { %24787 = vmatpush3.msra.mxu0 %v28485_v2  ;;  %24768 = vmatmul.mubr.f32.vlgmr.msra.gmra.mxu1 %v28252_v20  ;;  %v28533_v11 = vand.u32 4294901760, %v6001_v18 }
 0x5df   :  { %24777 = vmatprep.subr.mxu1 %v30833_v45  ;;  %24788 = vmatprep.mubr.msk.f32.mxu0 %vm26036_vm14, %v30833_v45 }
 0x5e0   :  { %24798 = vmatprep.subr.mxu0 %v30833_v45  ;;  %24778 = vmatpush3.msra.mxu1 %v28434_v61  ;;  %v8898_v39 = vsub.f32 %v6001_v18, %v28533_v11  ;;  %v30864_v18 = vld [vmem:[#allocation24_spill] sm:$0xff] }
 0x5e1   :  { %24789 = vmatmul.mubr.f32.vlgmr.msra.gmra.mxu0 %v28263_v21  ;;  %24779 = vmatprep.subr.mxu1 %v30833_v45 }
 0x5e2   :  { %24799 = vmatpush3.msra.mxu0 %v8429_v15  ;;  %24780 = vmatpush3.msra.mxu1 %v28439_v17  ;;  %v8899_v13 = vand.u32 4294901760, %v8898_v39 }
 0x5e3   :  { %24800 = vmatprep.subr.mxu0 %v30833_v45  ;;  %24781 = vmatprep.mubr.msk.f32.mxu1 %vm26036_vm14, %v30833_v45 }
 0x5e4   :  { %24801 = vmatpush3.msra.mxu0 %v8436_v29  ;;  %24782 = vmatmul.mubr.msk.f32.vlgmr.msra.gmra.mxu1 %vm6005_vm15, %v30855_v30  ;;  %v8900_v49 = vsub.f32 %v8898_v39, %v8899_v13 }
 0x5e5   :  { %24791 = vmatprep.subr.mxu1 %v30833_v45  ;;  %24802 = vmatprep.mubr.msk.f32.mxu0 %vm26036_vm14, %v30833_v45 }
 0x5e6   :  { %24812 = vmatprep.subr.mxu0 %v30833_v45  ;;  %24792 = vmatpush3.msra.mxu1 %v8432_v47  ;;  %v8901_v4 = vand.u32 4294901760, %v8900_v49 }
 0x5e7   :  { %24803 = vmatmul.mubr.f32.vlgmr.msra.gmra.mxu0 %v28249_v55  ;;  %24793 = vmatprep.subr.mxu1 %v30833_v45 }
 0x5e8   :  { %24813 = vmatpush3.msra.mxu0 %v8430_v19  ;;  %24794 = vmatpush3.msra.mxu1 %v8439_v63 }
 0x5e9   :  { %24814 = vmatprep.subr.mxu0 %v30833_v45  ;;  %24795 = vmatprep.mubr.msk.f32.mxu1 %vm26036_vm14, %v30833_v45 }
 0x5ea   :  { %24815 = vmatpush3.msra.mxu0 %v8437_v26  ;;  %24796 = vmatmul.mubr.msk.f32.vlgmr.msra.gmra.mxu1 %vm6005_vm15, %v30855_v30 }
 0x5eb   :  { %24805 = vmatprep.subr.mxu1 %v30833_v45  ;;  %24816 = vmatprep.mubr.msk.f32.mxu0 %vm26036_vm14, %v30833_v45 }
 0x5ec   :  { %24826 = vmatprep.subr.mxu0 %v30833_v45  ;;  %24806 = vmatpush3.msra.mxu1 %v28482_v25 }
 0x5ed   :  { %24817 = vmatmul.mubr.msk.f32.vlgmr.msra.gmra.mxu0 %vm6005_vm15, %v30855_v30  ;;  %24807 = vmatprep.subr.mxu1 %v30833_v45 }
 0x5ee   :  { %24827 = vmatpush3.msra.mxu0 %v28530_v46  ;;  %24808 = vmatpush3.msra.mxu1 %v28485_v2 }
 0x5ef   :  { %24828 = vmatprep.subr.mxu0 %v30833_v45  ;;  %24809 = vmatprep.mubr.msk.f32.mxu1 %vm26036_vm14, %v30833_v45 }
 0x5f0   :  { %24829 = vmatpush3.msra.mxu0 %v28533_v11  ;;  %24810 = vmatmul.mubr.f32.vlgmr.msra.gmra.mxu1 %v28252_v20 }
 0x5f1   :  { %24819 = vmatprep.subr.mxu1 %v30833_v45  ;;  %24830 = vmatprep.mubr.msk.f32.mxu0 %vm26036_vm14, %v30833_v45 }
 0x5f2   :  { %24840 = vmatprep.subr.mxu0 %v30833_v45  ;;  %24820 = vmatpush3.msra.mxu1 %v28482_v25 }
 0x5f3   :  { %24831 = vmatmul.mubr.f32.vlgmr.msra.gmra.mxu0 %v28263_v21  ;;  %24821 = vmatprep.subr.mxu1 %v30833_v45 }
 0x5f4   :  { %24841 = vmatpush3.msra.mxu0 %v8891_v56  ;;  %24822 = vmatpush3.msra.mxu1 %v28485_v2 }
 0x5f5   :  { %24842 = vmatprep.subr.mxu0 %v30833_v45  ;;  %24823 = vmatprep.mubr.msk.f32.mxu1 %vm26036_vm14, %v30833_v45 }
 0x5f6   :  { %24843 = vmatpush3.msra.mxu0 %v8898_v39  ;;  %24824 = vmatmul.mubr.msk.f32.vlgmr.msra.gmra.mxu1 %vm6005_vm15, %v30855_v30 }
 0x5f7   :  { %24833 = vmatprep.subr.mxu1 %v30833_v45  ;;  %24844 = vmatprep.mubr.msk.f32.mxu0 %vm26036_vm14, %v30833_v45 }
 0x5f8   :  { %24854 = vmatprep.subr.mxu0 %v30833_v45  ;;  %24834 = vmatpush3.msra.mxu1 %v8894_v23 }
 0x5f9   :  { %24845 = vmatmul.mubr.f32.vlgmr.msra.gmra.mxu0 %v28249_v55  ;;  %24835 = vmatprep.subr.mxu1 %v30833_v45 }
 0x5fa   :  { %24855 = vmatpush3.msra.mxu0 %v8892_v1  ;;  %24836 = vmatpush3.msra.mxu1 %v8901_v4 }
 0x5fb   :  { %24856 = vmatprep.subr.mxu0 %v30833_v45  ;;  %24837 = vmatprep.mubr.msk.f32.mxu1 %vm26036_vm14, %v30833_v45 }
 0x5fc   :  { %24857 = vmatpush3.msra.mxu0 %v8899_v13  ;;  %24838 = vmatmul.mubr.msk.f32.vlgmr.msra.gmra.mxu1 %vm6005_vm15, %v30855_v30 }
 0x5fd   :  { %24847 = vmatprep.subr.mxu1 %v30833_v45  ;;  %24851 = vmatprep.mubr.msk.f32.mxu1 %vm26036_vm14, %v30833_v45 }
 0x5fe   :  { %24848 = vmatpush3.msra.mxu1 %v28530_v46  ;;  %24858 = vmatprep.mubr.msk.f32.mxu0 %vm26036_vm14, %v30833_v45 }
 0x5ff   :  { %24849 = vmatprep.subr.mxu1 %v30833_v45  ;;  %24859 = vmatmul.mubr.msk.f32.vlgmr.msra.gmra.mxu0 %vm6005_vm15, %v30855_v30 }
 0x600   :  { %24850 = vmatpush3.msra.mxu1 %v28533_v11  ;;  %24868 = vmatprep.subr.mxu0 %v30833_v45 }
 0x601   :  { %24852 = vmatmul.mubr.f32.vlgmr.msra.gmra.mxu1 %v28252_v20  ;;  %24861 = vmatprep.subr.mxu1 %v30833_v45 }
 0x602   :  { %24862 = vmatpush3.msra.mxu1 %v28530_v46  ;;  %24865 = vmatprep.mubr.msk.f32.mxu1 %vm26036_vm14, %v30833_v45 }
 0x603   :  { %24863 = vmatprep.subr.mxu1 %v30833_v45  ;;  %24872 = vmatprep.mubr.msk.f32.mxu0 %vm26036_vm14, %v30833_v45 }
 0x604   :  { %24864 = vmatpush3.msra.mxu1 %v28533_v11  ;;  %13455 = vrot.lane.b32.xlu1 %v30833_v45, %s26032_s1 }
 0x605   :  { %24866 = vmatmul.mubr.msk.f32.vlgmr.msra.gmra.mxu1 %vm6005_vm15, %v30855_v30  ;;  %24875 = vmatprep.subr.mxu1 %v30833_v45 }
 0x606   :  { %24879 = vmatprep.mubr.msk.f32.mxu1 %vm26036_vm14, %v30833_v45 }
 0x614   :  { %v5996_v44 = vpop.permute.xlu0 %5995 }
 0x615   :  { %v6004_v53 = vmax.f32 %v28333_v50, %v5996_v44 }
 0x616   :  { %v5994_v57 = vpop.permute.xlu1 %5993 }
 0x617   :  { %v9244_v36 = vsel %vm6008_vm1, %v6004_v53, 0  ;;  %v6003_v54 = vmax.f32 %v28344_v48, %v5994_v57 }
 0x618   :  { %v9275_v9 = vand.u32 4294901760, %v9244_v36 }
 0x619   :  { %v9278_v41 = vand.u32 4294901760, %v6003_v54 }
 0x61a   :  { %v9353_v40 = vsub.f32 %v9244_v36, %v9275_v9  ;;  %24869 = vmatpush3.msra.mxu0 %v9275_v9 }
 0x61b   :  { %v9360_v42 = vsub.f32 %v6003_v54, %v9278_v41  ;;  %24870 = vmatprep.subr.mxu0 %v30833_v45 }
 0x61c   :  { %v9354_v24 = vand.u32 4294901760, %v9353_v40  ;;  %24871 = vmatpush3.msra.mxu0 %v9278_v41 }
 0x61d   :  { %v9361_v10 = vand.u32 4294901760, %v9360_v42  ;;  %24882 = vmatprep.subr.mxu0 %v30833_v45  ;;  %24873 = vmatmul.mubr.f32.vlgmr.msra.gmra.mxu0 %v28263_v21  ;;  %v28628_v21 = vand.u32 4294901760, %v28621_v60 }
 0x61e   :  { %24883 = vmatpush3.msra.mxu0 %v9353_v40  ;;  %24886 = vmatprep.mubr.msk.f32.mxu0 %vm26036_vm14, %v30833_v45  ;;  %v9355_v50 = vsub.f32 %v9353_v40, %v9354_v24 }
 0x61f   :  { %v9362_v48 = vsub.f32 %v9360_v42, %v9361_v10  ;;  %24884 = vmatprep.subr.mxu0 %v30833_v45 }
 0x620   :  { %24885 = vmatpush3.msra.mxu0 %v9360_v42  ;;  %v9356_v33 = vand.u32 4294901760, %v9355_v50 }
 0x621   :  { %24896 = vmatprep.subr.mxu0 %v30833_v45  ;;  %24887 = vmatmul.mubr.f32.vlgmr.msra.gmra.mxu0 %v28249_v55  ;;  %v9363_v22 = vand.u32 4294901760, %v9362_v48  ;;  %v9820_v55 = vsub.f32 %v28621_v60, %v28628_v21 }
 0x622   :  { %24876 = vmatpush3.msra.mxu1 %v9356_v33  ;;  %24897 = vmatpush3.msra.mxu0 %v9354_v24 }
 0x623   :  { %24877 = vmatprep.subr.mxu1 %v30833_v45  ;;  %24898 = vmatprep.subr.mxu0 %v30833_v45  ;;  %v28648_v16 = vand.u32 4294901760, %v9820_v55 }
 0x624   :  { %v6085_v14 = vpop.f32.mrf.mxu0  ;;  %24878 = vmatpush3.msra.mxu1 %v9363_v22  ;;  %24899 = vmatpush3.msra.mxu0 %v9361_v10 }
 0x625   :  { %24880 = vmatmul.mubr.msk.f32.vlgmr.msra.gmra.mxu1 %vm6005_vm15, %v30855_v30  ;;  %24889 = vmatprep.subr.mxu1 %v30833_v45 }
 0x626   :  { %v24580_v61 = vpop.f32.mrf.mxu0  ;;  %24890 = vmatpush3.msra.mxu1 %v9275_v9  ;;  %24893 = vmatprep.mubr.msk.f32.mxu1 %vm26036_vm14, %v30833_v45 }
 0x627   :  { %24891 = vmatprep.subr.mxu1 %v30833_v45  ;;  %24900 = vmatprep.mubr.msk.f32.mxu0 %vm26036_vm14, %v30833_v45 }
 0x628   :  { %v6242_v17 = vpop.f32.mrf.mxu0  ;;  %24892 = vmatpush3.msra.mxu1 %v9278_v41  ;;  %24901 = vmatmul.mubr.msk.f32.vlgmr.msra.gmra.mxu0 %vm6005_vm15, %v30855_v30 }
 0x629   :  { %24894 = vmatmul.mubr.f32.vlgmr.msra.gmra.mxu1 %v28252_v20  ;;  %24903 = vmatprep.subr.mxu1 %v30833_v45 }
 0x62a   :  { %v24594_v12 = vpop.f32.mrf.mxu0  ;;  %24904 = vmatpush3.msra.mxu1 %v9275_v9  ;;  %24907 = vmatprep.mubr.msk.f32.mxu1 %vm26036_vm14, %v30833_v45 }
 0x62b   :  { %24905 = vmatprep.subr.mxu1 %v30833_v45  ;;  %24910 = vmatprep.subr.mxu0 %v30833_v45 }
 0x62c   :  { %v6166_v31 = vpop.f32.mrf.mxu1  ;;  %24906 = vmatpush3.msra.mxu1 %v9278_v41  ;;  %24911 = vmatpush3.msk.msra.mxu0 %vm6008_vm1, %v30859_v59 }
 0x62d   :  { %v6167_v3 = vadd.f32 %v6166_v31, %v6085_v14  ;;  %24908 = vmatmul.mubr.msk.f32.vlgmr.msra.gmra.mxu1 %vm6005_vm15, %v30855_v30  ;;  %24912 = vmatprep.subr.mxu0 %v30833_v45 }
 0x62e   :  { %v24587_v20 = vpop.f32.mrf.mxu1  ;;  %24917 = vmatprep.subr.mxu1 %v30833_v45  ;;  %24913 = vmatpush3.msk.msra.mxu0 %vm26489_vm7, %v30860_v34 }
 0x62f   :  { %v6243_v7 = vadd.f32 %v6242_v17, %v6167_v3  ;;  %v6394_v28 = vpop.f32.mrf.mxu0  ;;  %24914 = vmatprep.mubr.msk.f32.mxu0 %vm26036_vm14, %v30833_v45  ;;  %24918 = vmatpush3.msra.mxu1 %v28648_v16 }
 0x630   :  { %24919 = vmatprep.subr.mxu1 %v30833_v45  ;;  %24924 = vmatprep.subr.mxu0 %v30833_v45 }
 0x631   :  { %v6317_v27 = vpop.f32.mrf.mxu1  ;;  %24920 = vmatpush3.msra.mxu1 %v30862_v35  ;;  %24921 = vmatprep.mubr.msk.f32.mxu1 %vm26036_vm14, %v30833_v45  ;;  %v24608_v32 = vpop.f32.mrf.mxu0 }
 0x632   :  { %v6318_v38 = vadd.f32 %v6317_v27, %v6243_v7  ;;  %24931 = vmatprep.subr.mxu1 %v30833_v45 }
 0x633   :  { %v24601_v25 = vpop.f32.mrf.mxu1 }
 0x634   :  { %v6395_v2 = vadd.f32 %v6394_v28, %v6318_v38 }
 0x635   :  { %v6467_v5 = vpop.f32.mrf.mxu1 }
 0x636   :  { %v6468_v15 = vadd.f32 %v6467_v5, %v6395_v2 }
 0x637   :  { %v24615_v29 = vpop.f32.mrf.mxu1 }
 0x638   :  { %v9706_v19 = vsel %vm6005_vm15, %v6468_v15, 0 }
 0x639   :  { %v9778_v62 = vand.u32 4294901760, %v9706_v19 }
 0x63b   :  { %v9779_v26 = vsub.f32 %v9706_v19, %v9778_v62  ;;  %24922 = vmatmul.mubr.f32.vlgmr.msra.gmra.mxu1 %v9778_v62 }
 0x63c   :  { %24932 = vmatpush3.msk.msra.mxu1 %vm6008_vm1, %v30859_v59  ;;  %24935 = vmatprep.mubr.msk.f32.mxu1 %vm26036_vm14, %v30833_v45 }
 0x63d   :  { %v9780_v0 = vand.u32 4294901760, %v9779_v26  ;;  %24933 = vmatprep.subr.mxu1 %v30833_v45 }
 0x63e   :  { %24934 = vmatpush3.msk.msra.mxu1 %vm26489_vm7, %v30860_v34 }
 0x63f   :  { %v9781_v43 = vsub.f32 %v9779_v26, %v9780_v0  ;;  %24936 = vmatmul.mubr.f32.vlgmr.msra.gmra.mxu1 %v9780_v0  ;;  %24945 = vmatprep.subr.mxu1 %v30833_v45 }
 0x640   :  { %24946 = vmatpush3.msk.msra.mxu1 %vm6008_vm1, %v30859_v59  ;;  %24949 = vmatprep.mubr.msk.f32.mxu1 %vm26036_vm14, %v30833_v45 }
 0x641   :  { %v9782_v37 = vand.u32 4294901760, %v9781_v43  ;;  %24947 = vmatprep.subr.mxu1 %v30833_v45 }
 0x642   :  { %24948 = vmatpush3.msk.msra.mxu1 %vm26489_vm7, %v30860_v34 }
 0x643   :  { %24915 = vmatmul.mubr.f32.vlgmr.msra.gmra.mxu0 %v9782_v37  ;;  %24950 = vmatmul.mubr.f32.vlgmr.msra.gmra.mxu1 %v9778_v62 }
 0x644   :  { %24925 = vmatpush3.msra.mxu0 %v28621_v60  ;;  %24928 = vmatprep.mubr.msk.f32.mxu0 %vm26036_vm14, %v30833_v45 }
 0x645   :  { %24926 = vmatprep.subr.mxu0 %v30833_v45  ;;  %24959 = vmatprep.subr.mxu1 %v30833_v45 }
 0x646   :  { %24927 = vmatpush3.msra.mxu0 %v30863_v51  ;;  %24960 = vmatpush3.msra.mxu1 %v28648_v16 }
 0x647   :  { %24929 = vmatmul.mubr.f32.vlgmr.msra.gmra.mxu0 %v9779_v26  ;;  %24938 = vmatprep.subr.mxu0 %v30833_v45 }
 0x648   :  { %24939 = vmatpush3.msra.mxu0 %v28628_v21  ;;  %24942 = vmatprep.mubr.msk.f32.mxu0 %vm26036_vm14, %v30833_v45 }
 0x649   :  { %24940 = vmatprep.subr.mxu0 %v30833_v45  ;;  %24961 = vmatprep.subr.mxu1 %v30833_v45 }
 0x64a   :  { %24941 = vmatpush3.msra.mxu0 %v30864_v18  ;;  %24962 = vmatpush3.msra.mxu1 %v30862_v35 }
 0x64b   :  { %24943 = vmatmul.mubr.f32.vlgmr.msra.gmra.mxu0 %v9778_v62  ;;  %24952 = vmatprep.subr.mxu0 %v30833_v45 }
 0x64c   :  { %24953 = vmatpush3.msk.msra.mxu0 %vm6008_vm1, %v30859_v59  ;;  %24956 = vmatprep.mubr.msk.f32.mxu0 %vm26036_vm14, %v30833_v45 }
 0x64d   :  { %24954 = vmatprep.subr.mxu0 %v30833_v45  ;;  %24963 = vmatprep.mubr.msk.f32.mxu1 %vm26036_vm14, %v30833_v45 }
 0x64e   :  { %24955 = vmatpush3.msk.msra.mxu0 %vm26489_vm7, %v30860_v34  ;;  %24973 = vmatprep.subr.mxu1 %v30833_v45 }
 0x64f   :  { %24966 = vmatprep.subr.mxu0 %v30833_v45 }
 0x65a   :  { %v6547_v8 = vpop.f32.mrf.mxu0 }
 0x65c   :  { %v24622_v47 = vpop.f32.mrf.mxu0 }
 0x65e   :  { %v6704_v63 = vpop.f32.mrf.mxu0 }
 0x660   :  { %v24636_v46 = vpop.f32.mrf.mxu0 }
 0x662   :  { %v6628_v11 = vpop.f32.mrf.mxu1 }
 0x663   :  { %v6629_v56 = vadd.f32 %v6628_v11, %v6547_v8 }
 0x664   :  { %v24629_v39 = vpop.f32.mrf.mxu1 }
 0x665   :  { %v6705_v1 = vadd.f32 %v6704_v63, %v6629_v56  ;;  %v6856_v13 = vpop.f32.mrf.mxu0 }
 0x667   :  { %v24650_v49 = vpop.f32.mrf.mxu0 }
 0x668   :  { %v6779_v52 = vpop.f32.mrf.mxu1 }
 0x669   :  { %v6780_v23 = vadd.f32 %v6779_v52, %v6705_v1 }
 0x66a   :  { %v24643_v4 = vpop.f32.mrf.mxu1 }
 0x66b   :  { %v6857_v44 = vadd.f32 %v6856_v13, %v6780_v23  ;;  %v7009_v53 = vpop.f32.mrf.mxu0 }
 0x66d   :  { %v24664_v57 = vpop.f32.mrf.mxu0 }
 0x66e   :  { %v6929_v36 = vpop.f32.mrf.mxu1 }
 0x66f   :  { %v6930_v54 = vadd.f32 %v6929_v36, %v6857_v44 }
 0x670   :  { %v24657_v9 = vpop.f32.mrf.mxu1 }
 0x671   :  { %v10171_v41 = vsel %vm6005_vm15, %v6930_v54, 0  ;;  %v7166_v40 = vpop.f32.mrf.mxu0 }
 0x672   :  { %v10240_v42 = vand.u32 4294901760, %v10171_v41 }
 0x673   :  { %v24678_v24 = vpop.f32.mrf.mxu0 }
 0x674   :  { %v10241_v6 = vsub.f32 %v10171_v41, %v10240_v42  ;;  %v7090_v10 = vpop.f32.mrf.mxu1  ;;  %24964 = vmatmul.mubr.f32.vlgmr.msra.gmra.mxu1 %v10240_v42 }
 0x675   :  { %v7091_v50 = vadd.f32 %v7090_v10, %v7009_v53  ;;  %24974 = vmatpush3.msk.msra.mxu1 %vm6008_vm1, %v30859_v59  ;;  %24977 = vmatprep.mubr.msk.f32.mxu1 %vm26036_vm14, %v30833_v45 }
 0x676   :  { %v10242_v48 = vand.u32 4294901760, %v10241_v6  ;;  %v24671_v33 = vpop.f32.mrf.mxu1  ;;  %24975 = vmatprep.subr.mxu1 %v30833_v45 }
 0x677   :  { %v7167_v22 = vadd.f32 %v7166_v40, %v7091_v50  ;;  %v7318_v14 = vpop.f32.mrf.mxu0  ;;  %24976 = vmatpush3.msk.msra.mxu1 %vm26489_vm7, %v30860_v34 }
 0x678   :  { %v10243_v61 = vsub.f32 %v10241_v6, %v10242_v48  ;;  %24978 = vmatmul.mubr.f32.vlgmr.msra.gmra.mxu1 %v10242_v48  ;;  %24987 = vmatprep.subr.mxu1 %v30833_v45 }
 0x679   :  { %v24692_v55 = vpop.f32.mrf.mxu0  ;;  %24988 = vmatpush3.msk.msra.mxu1 %vm6008_vm1, %v30859_v59  ;;  %24991 = vmatprep.mubr.msk.f32.mxu1 %vm26036_vm14, %v30833_v45 }
 0x67a   :  { %v7241_v17 = vpop.f32.mrf.mxu1  ;;  %v10244_v12 = vand.u32 4294901760, %v10243_v61  ;;  %24989 = vmatprep.subr.mxu1 %v30833_v45 }
 0x67b   :  { %v7242_v31 = vadd.f32 %v7241_v17, %v7167_v22  ;;  %24990 = vmatpush3.msk.msra.mxu1 %vm26489_vm7, %v30860_v34 }
 0x67c   :  { %v24685_v3 = vpop.f32.mrf.mxu1  ;;  %24957 = vmatmul.mubr.f32.vlgmr.msra.gmra.mxu0 %v10244_v12  ;;  %24992 = vmatmul.mubr.f32.vlgmr.msra.gmra.mxu1 %v10240_v42 }
 0x67d   :  { %v7319_v20 = vadd.f32 %v7318_v14, %v7242_v31  ;;  %v7471_v7 = vpop.f32.mrf.mxu0  ;;  %24967 = vmatpush3.msra.mxu0 %v28621_v60  ;;  %24970 = vmatprep.mubr.msk.f32.mxu0 %vm26036_vm14, %v30833_v45 }
 0x67e   :  { %24968 = vmatprep.subr.mxu0 %v30833_v45  ;;  %25001 = vmatprep.subr.mxu1 %v30833_v45 }
 0x67f   :  { %v24706_v28 = vpop.f32.mrf.mxu0  ;;  %24969 = vmatpush3.msra.mxu0 %v30863_v51  ;;  %25002 = vmatpush3.msra.mxu1 %v28648_v16 }
 0x680   :  { %v7391_v27 = vpop.f32.mrf.mxu1  ;;  %24971 = vmatmul.mubr.f32.vlgmr.msra.gmra.mxu0 %v10241_v6  ;;  %24980 = vmatprep.subr.mxu0 %v30833_v45 }
 0x681   :  { %v7392_v32 = vadd.f32 %v7391_v27, %v7319_v20  ;;  %24981 = vmatpush3.msra.mxu0 %v28628_v21  ;;  %24984 = vmatprep.mubr.msk.f32.mxu0 %vm26036_vm14, %v30833_v45 }
 0x682   :  { %v24699_v38 = vpop.f32.mrf.mxu1  ;;  %24982 = vmatprep.subr.mxu0 %v30833_v45  ;;  %25003 = vmatprep.subr.mxu1 %v30833_v45 }
 0x683   :  { %v10633_v25 = vsel %vm6005_vm15, %v7392_v32, 0  ;;  %v7628_v2 = vpop.f32.mrf.mxu0  ;;  %24983 = vmatpush3.msra.mxu0 %v30864_v18  ;;  %25004 = vmatpush3.msra.mxu1 %v30862_v35 }
 0x684   :  { %v10702_v5 = vand.u32 4294901760, %v10633_v25  ;;  %24985 = vmatmul.mubr.f32.vlgmr.msra.gmra.mxu0 %v10240_v42  ;;  %24994 = vmatprep.subr.mxu0 %v30833_v45 }
 0x685   :  { %v24720_v15 = vpop.f32.mrf.mxu0  ;;  %24995 = vmatpush3.msk.msra.mxu0 %vm6008_vm1, %v30859_v59  ;;  %24998 = vmatprep.mubr.msk.f32.mxu0 %vm26036_vm14, %v30833_v45 }
 0x686   :  { %v10703_v29 = vsub.f32 %v10633_v25, %v10702_v5  ;;  %v7552_v19 = vpop.f32.mrf.mxu1  ;;  %24996 = vmatprep.subr.mxu0 %v30833_v45  ;;  %25005 = vmatprep.mubr.msk.f32.mxu1 %vm26036_vm14, %v30833_v45 }
 0x687   :  { %v7553_v62 = vadd.f32 %v7552_v19, %v7471_v7  ;;  %24997 = vmatpush3.msk.msra.mxu0 %vm26489_vm7, %v30860_v34  ;;  %25006 = vmatmul.mubr.f32.vlgmr.msra.gmra.mxu1 %v10702_v5 }
 0x688   :  { %v10704_v26 = vand.u32 4294901760, %v10703_v29  ;;  %v24713_v0 = vpop.f32.mrf.mxu1  ;;  %25008 = vmatprep.subr.mxu0 %v30833_v45  ;;  %25015 = vmatprep.subr.mxu1 %v30833_v45 }
 0x689   :  { %v7629_v43 = vadd.f32 %v7628_v2, %v7553_v62  ;;  %v7780_v37 = vpop.f32.mrf.mxu0  ;;  %25016 = vmatpush3.msk.msra.mxu1 %vm6008_vm1, %v30859_v59  ;;  %25019 = vmatprep.mubr.msk.f32.mxu1 %vm26036_vm14, %v30833_v45 }
 0x68a   :  { %v10705_v8 = vsub.f32 %v10703_v29, %v10704_v26  ;;  %25017 = vmatprep.subr.mxu1 %v30833_v45 }
 0x68b   :  { %v24734_v47 = vpop.f32.mrf.mxu0  ;;  %25018 = vmatpush3.msk.msra.mxu1 %vm26489_vm7, %v30860_v34 }
 0x68c   :  { %v7703_v63 = vpop.f32.mrf.mxu1  ;;  %v10706_v46 = vand.u32 4294901760, %v10705_v8  ;;  %25020 = vmatmul.mubr.f32.vlgmr.msra.gmra.mxu1 %v10704_v26  ;;  %25029 = vmatprep.subr.mxu1 %v30833_v45 }
 0x68d   :  { %v7704_v11 = vadd.f32 %v7703_v63, %v7629_v43  ;;  %25030 = vmatpush3.msk.msra.mxu1 %vm6008_vm1, %v30859_v59  ;;  %25033 = vmatprep.mubr.msk.f32.mxu1 %vm26036_vm14, %v30833_v45 }
 0x68e   :  { %v24727_v56 = vpop.f32.mrf.mxu1  ;;  %24999 = vmatmul.mubr.f32.vlgmr.msra.gmra.mxu0 %v10706_v46  ;;  %25031 = vmatprep.subr.mxu1 %v30833_v45 }
 0x68f   :  { %v7781_v39 = vadd.f32 %v7780_v37, %v7704_v11  ;;  %v7933_v1 = vpop.f32.mrf.mxu0  ;;  %25009 = vmatpush3.msra.mxu0 %v28621_v60  ;;  %25012 = vmatprep.mubr.msk.f32.mxu0 %vm26036_vm14, %v30833_v45 }
 0x690   :  { %25010 = vmatprep.subr.mxu0 %v30833_v45  ;;  %25032 = vmatpush3.msk.msra.mxu1 %vm26489_vm7, %v30860_v34 }
 0x691   :  { %v24748_v13 = vpop.f32.mrf.mxu0  ;;  %25011 = vmatpush3.msra.mxu0 %v30863_v51  ;;  %25034 = vmatmul.mubr.f32.vlgmr.msra.gmra.mxu1 %v10702_v5 }
 0x692   :  { %v7853_v49 = vpop.f32.mrf.mxu1  ;;  %25013 = vmatmul.mubr.f32.vlgmr.msra.gmra.mxu0 %v10703_v29  ;;  %25022 = vmatprep.subr.mxu0 %v30833_v45 }
 0x693   :  { %v7854_v52 = vadd.f32 %v7853_v49, %v7781_v39  ;;  %25023 = vmatpush3.msra.mxu0 %v28628_v21  ;;  %25026 = vmatprep.mubr.msk.f32.mxu0 %vm26036_vm14, %v30833_v45 }
 0x694   :  { %v24741_v23 = vpop.f32.mrf.mxu1  ;;  %25024 = vmatprep.subr.mxu0 %v30833_v45  ;;  %25043 = vmatprep.subr.mxu1 %v30833_v45 }
 0x695   :  { %v11095_v4 = vsel %vm6005_vm15, %v7854_v52, 0  ;;  %v8090_v44 = vpop.f32.mrf.mxu0  ;;  %25025 = vmatpush3.msra.mxu0 %v30864_v18  ;;  %25044 = vmatpush3.msra.mxu1 %v28648_v16 }
 0x696   :  { %v11164_v53 = vand.u32 4294901760, %v11095_v4  ;;  %25027 = vmatmul.mubr.f32.vlgmr.msra.gmra.mxu0 %v10702_v5  ;;  %25036 = vmatprep.subr.mxu0 %v30833_v45 }
 0x697   :  { %v24762_v57 = vpop.f32.mrf.mxu0  ;;  %25037 = vmatpush3.msk.msra.mxu0 %vm6008_vm1, %v30859_v59  ;;  %25040 = vmatprep.mubr.msk.f32.mxu0 %vm26036_vm14, %v30833_v45 }
 0x698   :  { %v11165_v36 = vsub.f32 %v11095_v4, %v11164_v53  ;;  %v8014_v54 = vpop.f32.mrf.mxu1  ;;  %25038 = vmatprep.subr.mxu0 %v30833_v45  ;;  %25045 = vmatprep.subr.mxu1 %v30833_v45 }
 0x699   :  { %v8015_v9 = vadd.f32 %v8014_v54, %v7933_v1  ;;  %25039 = vmatpush3.msk.msra.mxu0 %vm26489_vm7, %v30860_v34  ;;  %25046 = vmatpush3.msra.mxu1 %v30862_v35 }
 0x69a   :  { %v11166_v41 = vand.u32 4294901760, %v11165_v36  ;;  %v24755_v40 = vpop.f32.mrf.mxu1  ;;  %25050 = vmatprep.subr.mxu0 %v30833_v45  ;;  %25047 = vmatprep.mubr.msk.f32.mxu1 %vm26036_vm14, %v30833_v45 }
 0x69b   :  { %v8091_v42 = vadd.f32 %v8090_v44, %v8015_v9  ;;  %v8242_v24 = vpop.f32.mrf.mxu0  ;;  %25048 = vmatmul.mubr.f32.vlgmr.msra.gmra.mxu1 %v11164_v53  ;;  %25057 = vmatprep.subr.mxu1 %v30833_v45 }
 0x69c   :  { %v11167_v6 = vsub.f32 %v11165_v36, %v11166_v41  ;;  %25058 = vmatpush3.msk.msra.mxu1 %vm6008_vm1, %v30859_v59  ;;  %25061 = vmatprep.mubr.msk.f32.mxu1 %vm26036_vm14, %v30833_v45 }
 0x69d   :  { %v24776_v10 = vpop.f32.mrf.mxu0  ;;  %25059 = vmatprep.subr.mxu1 %v30833_v45 }
 0x69e   :  { %v11168_v50 = vand.u32 4294901760, %v11167_v6  ;;  %v8165_v48 = vpop.f32.mrf.mxu1  ;;  %25060 = vmatpush3.msk.msra.mxu1 %vm26489_vm7, %v30860_v34 }
 0x69f   :  { %v8166_v33 = vadd.f32 %v8165_v48, %v8091_v42  ;;  %25062 = vmatmul.mubr.f32.vlgmr.msra.gmra.mxu1 %v11166_v41  ;;  %25071 = vmatprep.subr.mxu1 %v30833_v45 }
 0x6a0   :  { %v24769_v22 = vpop.f32.mrf.mxu1  ;;  %25041 = vmatmul.mubr.f32.vlgmr.msra.gmra.mxu0 %v11168_v50  ;;  %25072 = vmatpush3.msk.msra.mxu1 %vm6008_vm1, %v30859_v59 }
 0x6a1   :  { %v8243_v14 = vadd.f32 %v8242_v24, %v8166_v33  ;;  %v8395_v61 = vpop.f32.mrf.mxu0  ;;  %25051 = vmatpush3.msra.mxu0 %v28621_v60  ;;  %25054 = vmatprep.mubr.msk.f32.mxu0 %vm26036_vm14, %v30833_v45 }
 0x6a2   :  { %25052 = vmatprep.subr.mxu0 %v30833_v45  ;;  %25073 = vmatprep.subr.mxu1 %v30833_v45 }
 0x6a3   :  { %v24790_v55 = vpop.f32.mrf.mxu0  ;;  %25053 = vmatpush3.msra.mxu0 %v30863_v51  ;;  %25074 = vmatpush3.msk.msra.mxu1 %vm26489_vm7, %v30860_v34 }
 0x6a4   :  { %v8315_v17 = vpop.f32.mrf.mxu1  ;;  %25055 = vmatmul.mubr.f32.vlgmr.msra.gmra.mxu0 %v11165_v36  ;;  %25064 = vmatprep.subr.mxu0 %v30833_v45 }
 0x6a5   :  { %v8316_v12 = vadd.f32 %v8315_v17, %v8243_v14  ;;  %25065 = vmatpush3.msra.mxu0 %v28628_v21  ;;  %25068 = vmatprep.mubr.msk.f32.mxu0 %vm26036_vm14, %v30833_v45 }
 0x6a6   :  { %v24783_v31 = vpop.f32.mrf.mxu1  ;;  %25066 = vmatprep.subr.mxu0 %v30833_v45  ;;  %25075 = vmatprep.mubr.msk.f32.mxu1 %vm26036_vm14, %v30833_v45 }
 0x6a7   :  { %v11557_v3 = vsel %vm6005_vm15, %v8316_v12, 0  ;;  %v8552_v20 = vpop.f32.mrf.mxu0  ;;  %25067 = vmatpush3.msra.mxu0 %v30864_v18  ;;  %25076 = vmatmul.mubr.f32.vlgmr.msra.gmra.mxu1 %v11164_v53 }
 0x6a8   :  { %v28836_v7 = vand.u32 4294901760, %v11557_v3  ;;  %25069 = vmatmul.mubr.f32.vlgmr.msra.gmra.mxu0 %v11164_v53  ;;  %25078 = vmatprep.subr.mxu0 %v30833_v45 }
 0x6a9   :  { %v24804_v28 = vpop.f32.mrf.mxu0  ;;  %25079 = vmatpush3.msk.msra.mxu0 %vm6008_vm1, %v30859_v59  ;;  %25085 = vmatprep.subr.mxu1 %v30833_v45 }
 0x6aa   :  { %v11627_v27 = vsub.f32 %v11557_v3, %v28836_v7  ;;  %v8476_v32 = vpop.f32.mrf.mxu1  ;;  %25080 = vmatprep.subr.mxu0 %v30833_v45  ;;  %25082 = vmatprep.mubr.msk.f32.mxu0 %vm26036_vm14, %v30833_v45 }
 0x6ab   :  { %v8477_v38 = vadd.f32 %v8476_v32, %v8395_v61  ;;  %25081 = vmatpush3.msk.msra.mxu0 %vm26489_vm7, %v30860_v34  ;;  %25086 = vmatpush3.msra.mxu1 %v28648_v16 }
 0x6ac   :  { %v11628_v25 = vand.u32 4294901760, %v11627_v27  ;;  %v24797_v2 = vpop.f32.mrf.mxu1  ;;  %25087 = vmatprep.subr.mxu1 %v30833_v45  ;;  %25092 = vmatprep.subr.mxu0 %v30833_v45 }
 0x6ad   :  { %v8553_v5 = vadd.f32 %v8552_v20, %v8477_v38  ;;  %v8704_v15 = vpop.f32.mrf.mxu0  ;;  %25088 = vmatpush3.msra.mxu1 %v30862_v35  ;;  %25089 = vmatprep.mubr.msk.f32.mxu1 %vm26036_vm14, %v30833_v45 }
 0x6ae   :  { %v11629_v29 = vsub.f32 %v11627_v27, %v11628_v25  ;;  %25090 = vmatmul.mubr.f32.vlgmr.msra.gmra.mxu1 %v28836_v7  ;;  %25099 = vmatprep.subr.mxu1 %v30833_v45 }
 0x6af   :  { %v24818_v19 = vpop.f32.mrf.mxu0  ;;  %25100 = vmatpush3.msk.msra.mxu1 %vm6008_vm1, %v30859_v59  ;;  %25103 = vmatprep.mubr.msk.f32.mxu1 %vm26036_vm14, %v30833_v45 }
 0x6b0   :  { %v11630_v62 = vand.u32 4294901760, %v11629_v29  ;;  %v8627_v26 = vpop.f32.mrf.mxu1  ;;  %25101 = vmatprep.subr.mxu1 %v30833_v45 }
 0x6b1   :  { %v8628_v0 = vadd.f32 %v8627_v26, %v8553_v5  ;;  %25102 = vmatpush3.msk.msra.mxu1 %vm26489_vm7, %v30860_v34 }
 0x6b2   :  { %v24811_v43 = vpop.f32.mrf.mxu1  ;;  %25083 = vmatmul.mubr.f32.vlgmr.msra.gmra.mxu0 %v11630_v62  ;;  %25104 = vmatmul.mubr.f32.vlgmr.msra.gmra.mxu1 %v11628_v25 }
 0x6b3   :  { %v8705_v37 = vadd.f32 %v8704_v15, %v8628_v0  ;;  %v8857_v8 = vpop.f32.mrf.mxu0  ;;  %25093 = vmatpush3.msra.mxu0 %v28621_v60  ;;  %25096 = vmatprep.mubr.msk.f32.mxu0 %vm26036_vm14, %v30833_v45 }
 0x6b4   :  { %25094 = vmatprep.subr.mxu0 %v30833_v45  ;;  %25113 = vmatprep.subr.mxu1 %v30833_v45 }
 0x6b5   :  { %v24832_v47 = vpop.f32.mrf.mxu0  ;;  %25095 = vmatpush3.msra.mxu0 %v30863_v51  ;;  %25114 = vmatpush3.msk.msra.mxu1 %vm6008_vm1, %v30859_v59 }
 0x6b6   :  { %v8777_v63 = vpop.f32.mrf.mxu1  ;;  %25097 = vmatmul.mubr.f32.vlgmr.msra.gmra.mxu0 %v11627_v27  ;;  %25106 = vmatprep.subr.mxu0 %v30833_v45 }
 0x6b7   :  { %v8778_v46 = vadd.f32 %v8777_v63, %v8705_v37  ;;  %25107 = vmatpush3.msra.mxu0 %v28628_v21  ;;  %25110 = vmatprep.mubr.msk.f32.mxu0 %vm26036_vm14, %v30833_v45 }
 0x6b8   :  { %v24825_v11 = vpop.f32.mrf.mxu1  ;;  %25108 = vmatprep.subr.mxu0 %v30833_v45  ;;  %25115 = vmatprep.subr.mxu1 %v30833_v45 }
 0x6b9   :  { %v12019_v56 = vsel %vm6005_vm15, %v8778_v46, 0  ;;  %v9014_v39 = vpop.f32.mrf.mxu0  ;;  %25109 = vmatpush3.msra.mxu0 %v30864_v18  ;;  %25116 = vmatpush3.msk.msra.mxu1 %vm26489_vm7, %v30860_v34 }
 0x6ba   :  { %v28884_v1 = vand.u32 4294901760, %v12019_v56  ;;  %25111 = vmatmul.mubr.f32.vlgmr.msra.gmra.mxu0 %v28836_v7  ;;  %25120 = vmatprep.subr.mxu0 %v30833_v45 }
 0x6bb   :  { %v24846_v13 = vpop.f32.mrf.mxu0  ;;  %25117 = vmatprep.mubr.msk.f32.mxu1 %vm26036_vm14, %v30833_v45  ;;  %25121 = vmatpush3.msk.msra.mxu0 %vm6008_vm1, %v30859_v59 }
 0x6bc   :  { %v12089_v49 = vsub.f32 %v12019_v56, %v28884_v1  ;;  %v8938_v52 = vpop.f32.mrf.mxu1  ;;  %25118 = vmatmul.mubr.f32.vlgmr.msra.gmra.mxu1 %v28836_v7  ;;  %25122 = vmatprep.subr.mxu0 %v30833_v45 }
 0x6bd   :  { %v8939_v23 = vadd.f32 %v8938_v52, %v8857_v8  ;;  %25127 = vmatprep.subr.mxu1 %v30833_v45  ;;  %25123 = vmatpush3.msk.msra.mxu0 %vm26489_vm7, %v30860_v34 }
 0x6be   :  { %v12090_v4 = vand.u32 4294901760, %v12089_v49  ;;  %v24839_v44 = vpop.f32.mrf.mxu1  ;;  %25124 = vmatprep.mubr.msk.f32.mxu0 %vm26036_vm14, %v30833_v45  ;;  %25128 = vmatpush3.msra.mxu1 %v28648_v16 }
 0x6bf   :  { %v9015_v53 = vadd.f32 %v9014_v39, %v8939_v23  ;;  %v9166_v57 = vpop.f32.mrf.mxu0  ;;  %25129 = vmatprep.subr.mxu1 %v30833_v45  ;;  %25134 = vmatprep.subr.mxu0 %v30833_v45 }
 0x6c0   :  { %v12091_v36 = vsub.f32 %v12089_v49, %v12090_v4  ;;  %25130 = vmatpush3.msra.mxu1 %v30862_v35  ;;  %25131 = vmatprep.mubr.msk.f32.mxu1 %vm26036_vm14, %v30833_v45 }
 0x6c1   :  { %v9089_v54 = vpop.f32.mrf.mxu1  ;;  %25132 = vmatmul.mubr.f32.vlgmr.msra.gmra.mxu1 %v28884_v1  ;;  %25141 = vmatprep.subr.mxu1 %v30833_v45  ;;  %v24860_v9 = vpop.f32.mrf.mxu0 }
 0x6c2   :  { %v12092_v41 = vand.u32 4294901760, %v12091_v36  ;;  %v9090_v40 = vadd.f32 %v9089_v54, %v9015_v53  ;;  %25142 = vmatpush3.msk.msra.mxu1 %vm6008_vm1, %v30859_v59  ;;  %25145 = vmatprep.mubr.msk.f32.mxu1 %vm26036_vm14, %v30833_v45 }
 0x6c3   :  { %v24853_v42 = vpop.f32.mrf.mxu1  ;;  %25143 = vmatprep.subr.mxu1 %v30833_v45 }
 0x6c4   :  { %v9167_v24 = vadd.f32 %v9166_v57, %v9090_v40  ;;  %25125 = vmatmul.mubr.f32.vlgmr.msra.gmra.mxu0 %v12092_v41  ;;  %25144 = vmatpush3.msk.msra.mxu1 %vm26489_vm7, %v30860_v34 }
 0x6c5   :  { %v9239_v6 = vpop.f32.mrf.mxu1  ;;  %25135 = vmatpush3.msra.mxu0 %v28621_v60  ;;  %25138 = vmatprep.mubr.msk.f32.mxu0 %vm26036_vm14, %v30833_v45 }
 0x6c6   :  { %v9240_v10 = vadd.f32 %v9239_v6, %v9167_v24  ;;  %25136 = vmatprep.subr.mxu0 %v30833_v45  ;;  %25146 = vmatmul.mubr.f32.vlgmr.msra.gmra.mxu1 %v12090_v4 }
 0x6c7   :  { %25137 = vmatpush3.msra.mxu0 %v30863_v51  ;;  %25155 = vmatprep.subr.mxu1 %v30833_v45  ;;  %v24867_v50 = vpop.f32.mrf.mxu1 }
 0x6c8   :  { %v12481_v48 = vsel %vm6005_vm15, %v9240_v10, 0  ;;  %25139 = vmatmul.mubr.f32.vlgmr.msra.gmra.mxu0 %v12089_v49  ;;  %25148 = vmatprep.subr.mxu0 %v30833_v45 }
 0x6c9   :  { %v12550_v33 = vand.u32 4294901760, %v12481_v48  ;;  %25149 = vmatpush3.msra.mxu0 %v28628_v21  ;;  %25152 = vmatprep.mubr.msk.f32.mxu0 %vm26036_vm14, %v30833_v45 }
 0x6ca   :  { %25150 = vmatprep.subr.mxu0 %v30833_v45  ;;  %25156 = vmatpush3.msk.msra.mxu1 %vm6008_vm1, %v30859_v59 }
 0x6cb   :  { %v12551_v22 = vsub.f32 %v12481_v48, %v12550_v33  ;;  %25151 = vmatpush3.msra.mxu0 %v30864_v18  ;;  %25157 = vmatprep.subr.mxu1 %v30833_v45 }
 0x6cc   :  { %25153 = vmatmul.mubr.f32.vlgmr.msra.gmra.mxu0 %v28884_v1  ;;  %25162 = vmatprep.subr.mxu0 %v30833_v45 }
 0x6cd   :  { %v12552_v14 = vand.u32 4294901760, %v12551_v22  ;;  %25158 = vmatpush3.msk.msra.mxu1 %vm26489_vm7, %v30860_v34  ;;  %25159 = vmatprep.mubr.msk.f32.mxu1 %vm26036_vm14, %v30833_v45 }
 0x6ce   :  { %25163 = vmatpush3.msk.msra.mxu0 %vm6008_vm1, %v30859_v59  ;;  %25160 = vmatmul.mubr.f32.vlgmr.msra.gmra.mxu1 %v28884_v1 }
 0x6cf   :  { %v12553_v61 = vsub.f32 %v12551_v22, %v12552_v14  ;;  %25164 = vmatprep.subr.mxu0 %v30833_v45  ;;  %25169 = vmatprep.subr.mxu1 %v30833_v45 }
 0x6d0   :  { %25165 = vmatpush3.msk.msra.mxu0 %vm26489_vm7, %v30860_v34  ;;  %25166 = vmatprep.mubr.msk.f32.mxu0 %vm26036_vm14, %v30833_v45 }
 0x6d1   :  { %v12554_v55 = vand.u32 4294901760, %v12553_v61  ;;  %25170 = vmatpush3.msra.mxu1 %v28648_v16  ;;  %25176 = vmatprep.subr.mxu0 %v30833_v45 }
 0x6d2   :  { %25171 = vmatprep.subr.mxu1 %v30833_v45  ;;  %25173 = vmatprep.mubr.msk.f32.mxu1 %vm26036_vm14, %v30833_v45 }
 0x6d3   :  { %25167 = vmatmul.mubr.f32.vlgmr.msra.gmra.mxu0 %v12554_v55  ;;  %25172 = vmatpush3.msra.mxu1 %v30862_v35 }
 0x6d4   :  { %25177 = vmatpush3.msra.mxu0 %v28621_v60  ;;  %25174 = vmatmul.mubr.f32.vlgmr.msra.gmra.mxu1 %v12550_v33 }
 0x6d5   :  { %25178 = vmatprep.subr.mxu0 %v30833_v45  ;;  %25183 = vmatprep.subr.mxu1 %v30833_v45 }
 0x6d6   :  { %25179 = vmatpush3.msra.mxu0 %v30863_v51  ;;  %25180 = vmatprep.mubr.msk.f32.mxu0 %vm26036_vm14, %v30833_v45 }
 0x6d7   :  { %25184 = vmatpush3.msk.msra.mxu1 %vm6008_vm1, %v30859_v59  ;;  %25181 = vmatmul.mubr.f32.vlgmr.msra.gmra.mxu0 %v12551_v22 }
 0x6d8   :  { %25185 = vmatprep.subr.mxu1 %v30833_v45  ;;  %25190 = vmatprep.subr.mxu0 %v30833_v45 }
 0x6d9   :  { %25186 = vmatpush3.msk.msra.mxu1 %vm26489_vm7, %v30860_v34  ;;  %25187 = vmatprep.mubr.msk.f32.mxu1 %vm26036_vm14, %v30833_v45 }
 0x6da   :  { %25191 = vmatpush3.msra.mxu0 %v28628_v21  ;;  %25188 = vmatmul.mubr.f32.vlgmr.msra.gmra.mxu1 %v12552_v14 }
 0x6db   :  { %25192 = vmatprep.subr.mxu0 %v30833_v45  ;;  %25197 = vmatprep.subr.mxu1 %v30833_v45 }
 0x6dc   :  { %25193 = vmatpush3.msra.mxu0 %v30864_v18  ;;  %25194 = vmatprep.mubr.msk.f32.mxu0 %vm26036_vm14, %v30833_v45 }
 0x6dd   :  { %25198 = vmatpush3.msk.msra.mxu1 %vm6008_vm1, %v30859_v59  ;;  %25195 = vmatmul.mubr.f32.vlgmr.msra.gmra.mxu0 %v12550_v33  ;;  %v9319_v17 = vpop.f32.mrf.mxu0 }
 0x6de   :  { %25199 = vmatprep.subr.mxu1 %v30833_v45  ;;  %25201 = vmatprep.mubr.msk.f32.mxu1 %vm26036_vm14, %v30833_v45 }
 0x6df   :  { %25200 = vmatpush3.msk.msra.mxu1 %vm26489_vm7, %v30860_v34  ;;  %v24874_v12 = vpop.f32.mrf.mxu0  ;;  %25204 = vmatprep.subr.mxu0 %v30833_v45 }
 0x6e0   :  { %25202 = vmatmul.mubr.f32.vlgmr.msra.gmra.mxu1 %v12550_v33  ;;  %25211 = vmatprep.subr.mxu1 %v30833_v45 }
 0x6e1   :  { %v9476_v31 = vpop.f32.mrf.mxu0  ;;  %25212 = vmatpush3.msra.mxu1 %v28648_v16  ;;  %25215 = vmatprep.mubr.msk.f32.mxu1 %vm26036_vm14, %v30833_v45 }
 0x6e2   :  { %25213 = vmatprep.subr.mxu1 %v30833_v45  ;;  %25205 = vmatpush3.msk.msra.mxu0 %vm6008_vm1, %v30859_v59 }
 0x6e3   :  { %v24888_v3 = vpop.f32.mrf.mxu0  ;;  %25214 = vmatpush3.msra.mxu1 %v30862_v35  ;;  %25206 = vmatprep.subr.mxu0 %v30833_v45 }
 0x6e4   :  { %25225 = vmatprep.subr.mxu1 %v30833_v45  ;;  %25207 = vmatpush3.msk.msra.mxu0 %vm26489_vm7, %v30860_v34 }
 0x6e5   :  { %v9400_v16 = vpop.f32.mrf.mxu1  ;;  %25208 = vmatprep.mubr.msk.f32.mxu0 %vm26036_vm14, %v30833_v45  ;;  %25218 = vmatprep.subr.mxu0 %v30833_v45 }
 0x6e6   :  { %v9401_v20 = vadd.f32 %v9400_v16, %v9319_v17 }
 0x6e7   :  { %v24881_v7 = vpop.f32.mrf.mxu1 }
 0x6e8   :  { %v9477_v28 = vadd.f32 %v9476_v31, %v9401_v20  ;;  %v9628_v27 = vpop.f32.mrf.mxu0 }
 0x6e9   :  { %v9551_v32 = vpop.f32.mrf.mxu1 }
 0x6ea   :  { %v9552_v35 = vadd.f32 %v9551_v32, %v9477_v28  ;;  %v24902_v38 = vpop.f32.mrf.mxu0 }
 0x6eb   :  { %v24895_v25 = vpop.f32.mrf.mxu1 }
 0x6ec   :  { %v9629_v2 = vadd.f32 %v9628_v27, %v9552_v35 }
 0x6ed   :  { %v9701_v5 = vpop.f32.mrf.mxu1 }
 0x6ee   :  { %v9702_v15 = vadd.f32 %v9701_v5, %v9629_v2 }
 0x6ef   :  { %v24909_v29 = vpop.f32.mrf.mxu1 }
 0x6f0   :  { %v12943_v19 = vsel %vm6005_vm15, %v9702_v15, 0  ;;  %vm21808_vm15 = vcmask 392192  }
 0x6f1   :  { %v13012_v62 = vand.u32 4294901760, %v12943_v19 }
 0x6f3   :  { %v13013_v26 = vsub.f32 %v12943_v19, %v13012_v62  ;;  %25216 = vmatmul.mubr.f32.vlgmr.msra.gmra.mxu1 %v13012_v62 }
 0x6f4   :  { %25226 = vmatpush3.msk.msra.mxu1 %vm6008_vm1, %v30859_v59  ;;  %25229 = vmatprep.mubr.msk.f32.mxu1 %vm26036_vm14, %v30833_v45 }
 0x6f5   :  { %v13014_v0 = vand.u32 4294901760, %v13013_v26  ;;  %25227 = vmatprep.subr.mxu1 %v30833_v45 }
 0x6f6   :  { %25228 = vmatpush3.msk.msra.mxu1 %vm26489_vm7, %v30860_v34 }
 0x6f7   :  { %v13015_v43 = vsub.f32 %v13013_v26, %v13014_v0  ;;  %25230 = vmatmul.mubr.f32.vlgmr.msra.gmra.mxu1 %v13014_v0  ;;  %25239 = vmatprep.subr.mxu1 %v30833_v45 }
 0x6f8   :  { %25240 = vmatpush3.msk.msra.mxu1 %vm6008_vm1, %v30859_v59  ;;  %25243 = vmatprep.mubr.msk.f32.mxu1 %vm26036_vm14, %v30833_v45  ;;  %vm21825_vm1 = vcmask 523264  }
 0x6f9   :  { %v13016_v37 = vand.u32 4294901760, %v13015_v43  ;;  %25241 = vmatprep.subr.mxu1 %v30833_v45 }
 0x6fa   :  { %25242 = vmatpush3.msk.msra.mxu1 %vm26489_vm7, %v30860_v34  ;;  %vm21726_vm7 = vcmask 1045509  }
 0x6fb   :  { %v9865_v8 = vpop.f32.mrf.mxu1  ;;  %25209 = vmatmul.mubr.f32.vlgmr.msra.gmra.mxu0 %v13016_v37  ;;  %25244 = vmatmul.mubr.f32.vlgmr.msra.gmra.mxu1 %v13012_v62 }
 0x6fc   :  { %25219 = vmatpush3.msra.mxu0 %v28621_v60  ;;  %25222 = vmatprep.mubr.msk.f32.mxu0 %vm26036_vm14, %v30833_v45 }
 0x6fd   :  { %v24923_v47 = vpop.f32.mrf.mxu1  ;;  %25220 = vmatprep.subr.mxu0 %v30833_v45  ;;  %25251 = vmatprep.subr.mxu1 %v30833_v45 }
 0x6fe   :  { %25221 = vmatpush3.msra.mxu0 %v30863_v51  ;;  %25253 = vmatprep.mubr.msk.f32.mxu1 %vm26036_vm14, %v30833_v45 }
 0x6ff   :  { %v10016_v59 = vpop.f32.mrf.mxu1  ;;  %25223 = vmatmul.mubr.f32.vlgmr.msra.gmra.mxu0 %v13013_v26  ;;  %25232 = vmatprep.subr.mxu0 %v30833_v45 }
 0x700   :  { %25233 = vmatpush3.msra.mxu0 %v28628_v21  ;;  %25236 = vmatprep.mubr.msk.f32.mxu0 %vm26036_vm14, %v30833_v45 }
 0x701   :  { %v24937_v60 = vpop.f32.mrf.mxu1  ;;  %25234 = vmatprep.subr.mxu0 %v30833_v45 }
 0x702   :  { %25235 = vmatpush3.msra.mxu0 %v30864_v18 }
 0x703   :  { %v9784_v34 = vpop.f32.mrf.mxu0  ;;  %v10166_v58 = vpop.f32.mrf.mxu1  ;;  %25237 = vmatmul.mubr.f32.vlgmr.msra.gmra.mxu0 %v13012_v62  ;;  %25246 = vmatprep.subr.mxu0 %v30833_v45 }
 0x704   :  { %v9866_v51 = vadd.f32 %v9865_v8, %v9784_v34  ;;  %25248 = vmatprep.mubr.msk.f32.mxu0 %vm26036_vm14, %v30833_v45 }
 0x705   :  { %v24916_v63 = vpop.f32.mrf.mxu0  ;;  %v24951_v46 = vpop.f32.mrf.mxu1 }
 0x707   :  { %v9941_v21 = vpop.f32.mrf.mxu0 }
 0x708   :  { %v9942_v11 = vadd.f32 %v9941_v21, %v9866_v51 }
 0x709   :  { %v24930_v56 = vpop.f32.mrf.mxu0 }
 0x70a   :  { %v10017_v39 = vadd.f32 %v10016_v59, %v9942_v11 }
 0x70b   :  { %v10093_v1 = vpop.f32.mrf.mxu0 }
 0x70c   :  { %v10094_v13 = vadd.f32 %v10093_v1, %v10017_v39 }
 0x70d   :  { %v24944_v49 = vpop.f32.mrf.mxu0 }
 0x70e   :  { %v10167_v52 = vadd.f32 %v10166_v58, %v10094_v13 }
 0x710   :  { %v13404_v18 = vmax.f32 %v10167_v52, 0.0 }
 0x712   :  { %v13420_v23 = vrot.slane %v13404_v18, 7 }
 0x714   :  { %v13436_v4 = vsel %vm126_vm0, 0.0, %v13420_v23 }
 0x715   :  { %13453 = vrot.lane.b32.xlu0 %v13436_v4, %s26032_s1 }
 0x734   :  { %v10327_v44 = vpop.f32.mrf.mxu1 }
 0x736   :  { %v24965_v53 = vpop.f32.mrf.mxu1 }
 0x738   :  { %v10478_v57 = vpop.f32.mrf.mxu1 }
 0x73a   :  { %v24979_v36 = vpop.f32.mrf.mxu1 }
 0x73c   :  { %v10246_v54 = vpop.f32.mrf.mxu0  ;;  %v10628_v9 = vpop.f32.mrf.mxu1 }
 0x73d   :  { %v10328_v41 = vadd.f32 %v10327_v44, %v10246_v54 }
 0x73e   :  { %v24958_v40 = vpop.f32.mrf.mxu0  ;;  %v24993_v42 = vpop.f32.mrf.mxu1 }
 0x740   :  { %v10403_v24 = vpop.f32.mrf.mxu0 }
 0x741   :  { %v10404_v6 = vadd.f32 %v10403_v24, %v10328_v41 }
 0x742   :  { %v24972_v10 = vpop.f32.mrf.mxu0 }
 0x743   :  { %v10479_v50 = vadd.f32 %v10478_v57, %v10404_v6 }
 0x744   :  { %v10555_v48 = vpop.f32.mrf.mxu0 }
 0x745   :  { %v10556_v33 = vadd.f32 %v10555_v48, %v10479_v50 }
 0x746   :  { %v24986_v22 = vpop.f32.mrf.mxu0 }
 0x747   :  { %v10629_v14 = vadd.f32 %v10628_v9, %v10556_v33  ;;  %v10789_v61 = vpop.f32.mrf.mxu1 }
 0x749   :  { %v13405_v55 = vmax.f32 %v10629_v14, 0.0  ;;  %v25007_v17 = vpop.f32.mrf.mxu1 }
 0x74b   :  { %v13421_v12 = vrot.slane %v13405_v55, 7 }
 0x74c   :  { %v10940_v31 = vpop.f32.mrf.mxu1 }
 0x74d   :  { %v13437_v3 = vsel %vm126_vm0, 0.0, %v13421_v12 }
 0x74e   :  { %v10708_v16 = vpop.f32.mrf.mxu0  ;;  %13457 = vrot.lane.b32.xlu1 %v13437_v3, %s26032_s1  ;;  %v25021_v20 = vpop.f32.mrf.mxu1 }
 0x74f   :  { %v10790_v7 = vadd.f32 %v10789_v61, %v10708_v16 }
 0x750   :  { %v25000_v28 = vpop.f32.mrf.mxu0 }
 0x751   :  { %v11090_v27 = vpop.f32.mrf.mxu1 }
 0x752   :  { %v10865_v32 = vpop.f32.mrf.mxu0 }
 0x753   :  { %v10866_v35 = vadd.f32 %v10865_v32, %v10790_v7  ;;  %v25035_v38 = vpop.f32.mrf.mxu1  ;;  %v13456_v32 = vpop.permute.xlu1 %13455 }
 0x754   :  { %v25014_v25 = vpop.f32.mrf.mxu0 }
 0x755   :  { %v10941_v2 = vadd.f32 %v10940_v31, %v10866_v35 }
 0x756   :  { %v11017_v5 = vpop.f32.mrf.mxu0 }
 0x757   :  { %v11018_v15 = vadd.f32 %v11017_v5, %v10941_v2  ;;  %v13481_v5 = vsel %vm178_vm2, 0.0, %v13456_v32 }
 0x758   :  { %v25028_v29 = vpop.f32.mrf.mxu0 }
 0x759   :  { %v11091_v19 = vadd.f32 %v11090_v27, %v11018_v15 }
 0x75b   :  { %v13406_v62 = vmax.f32 %v11091_v19, 0.0  ;;  %v11251_v26 = vpop.f32.mrf.mxu1 }
 0x75d   :  { %v13422_v0 = vrot.slane %v13406_v62, 7  ;;  %v25049_v43 = vpop.f32.mrf.mxu1 }
 0x75e   :  { %v29054_v43 = vstv %s23096_s3  ;;  %s29268_s3 = sld [smem:[#allocation10 + $0x14]] }
 0x75f   :  { %v11402_v37 = vpop.f32.mrf.mxu1  ;;  %v13438_v8 = vsel %vm126_vm0, 0.0, %v13422_v0  ;;  %v29052_v0 = vsel %vm13489_vm3, %v13481_v5, 0.0 }
 0x760   :  { %v11170_v47 = vpop.f32.mrf.mxu0  ;;  %13459 = vrot.lane.b32.xlu0 %v13438_v8, %s26032_s1 }
 0x761   :  { %v11252_v59 = vadd.f32 %v11251_v26, %v11170_v47  ;;  %v25063_v60 = vpop.f32.mrf.mxu1 }
 0x762   :  { %v25042_v34 = vpop.f32.mrf.mxu0  ;;  %v13504_v60 = vstv %s29047_s15  ;;  %s23083_s15 = sld [smem:[#allocation10 + $0x6]] }
 0x764   :  { %v11327_v58 = vpop.f32.mrf.mxu0 }
 0x765   :  { %v11328_v51 = vadd.f32 %v11327_v58, %v11252_v59  ;;  %v29064_v58 = vmul.f32 %v29054_v43, %v29052_v0 }
 0x766   :  { %v25056_v63 = vpop.f32.mrf.mxu0 }
 0x767   :  { %v11403_v46 = vadd.f32 %v11402_v37, %v11328_v51  ;;  %v11552_v21 = vpop.f32.mrf.mxu1 }
 0x768   :  { %v11479_v11 = vpop.f32.mrf.mxu0 }
 0x769   :  { %v11480_v56 = vadd.f32 %v11479_v11, %v11403_v46  ;;  %v25077_v39 = vpop.f32.mrf.mxu1 }
 0x76a   :  { %v25070_v1 = vpop.f32.mrf.mxu0 }
 0x76b   :  { %v11553_v13 = vadd.f32 %v11552_v21, %v11480_v56 }
 0x76d   :  { %v13407_v49 = vmax.f32 %v11553_v13, 0.0  ;;  %v13795_v13 = vrot.slane %v29064_v58, 1 }
 0x76e   :  { %v11713_v52 = vpop.f32.mrf.mxu1 }
 0x76f   :  { %v13423_v18 = vrot.slane %v13407_v49, 7 }
 0x770   :  { %v25091_v23 = vpop.f32.mrf.mxu1 }
 0x771   :  { %v13439_v4 = vsel %vm126_vm0, 0.0, %v13423_v18 }
 0x772   :  { %v11632_v44 = vpop.f32.mrf.mxu0  ;;  %v11864_v53 = vpop.f32.mrf.mxu1  ;;  %13461 = vrot.lane.b32.xlu1 %v13439_v4, %s26032_s1 }
 0x773   :  { %v11714_v57 = vadd.f32 %v11713_v52, %v11632_v44 }
 0x774   :  { %v25084_v36 = vpop.f32.mrf.mxu0  ;;  %v25105_v54 = vpop.f32.mrf.mxu1 }
 0x776   :  { %v11789_v9 = vpop.f32.mrf.mxu0 }
 0x777   :  { %v11790_v41 = vadd.f32 %v11789_v9, %v11714_v57 }
 0x778   :  { %v25098_v40 = vpop.f32.mrf.mxu0 }
 0x779   :  { %v11865_v42 = vadd.f32 %v11864_v53, %v11790_v41 }
 0x77a   :  { %v11941_v24 = vpop.f32.mrf.mxu0 }
 0x77b   :  { %v11942_v6 = vadd.f32 %v11941_v24, %v11865_v42 }
 0x77c   :  { %v25112_v10 = vpop.f32.mrf.mxu0  ;;  %v12014_v50 = vpop.f32.mrf.mxu1 }
 0x77d   :  { %v12015_v48 = vadd.f32 %v12014_v50, %v11942_v6 }
 0x77e   :  { %v25119_v33 = vpop.f32.mrf.mxu1 }
 0x77f   :  { %v13408_v22 = vmax.f32 %v12015_v48, 0.0 }
 0x781   :  { %v13424_v14 = vrot.slane %v13408_v22, 7  ;;  %v12175_v61 = vpop.f32.mrf.mxu1 }
 0x783   :  { %v25133_v55 = vpop.f32.mrf.mxu1  ;;  %v13440_v17 = vsel %vm126_vm0, 0.0, %v13424_v14 }
 0x784   :  { %v12094_v12 = vpop.f32.mrf.mxu0  ;;  %13463 = vrot.lane.b32.xlu0 %v13440_v17, %s26032_s1 }
 0x785   :  { %v12176_v31 = vadd.f32 %v12175_v61, %v12094_v12 }
 0x786   :  { %v25126_v3 = vpop.f32.mrf.mxu0  ;;  %v12326_v16 = vpop.f32.mrf.mxu1 }
 0x787   :  { %v13454_v25 = vpop.permute.xlu0 %13453  ;;  %v13756_v3 = vstv %s29079_s0  ;;  %s29275_s0 = sld [smem:[#allocation10 + $0x25]] }
 0x788   :  { %v12251_v20 = vpop.f32.mrf.mxu0  ;;  %v25147_v7 = vpop.f32.mrf.mxu1  ;;  %v13480_v62 = vsel %vm178_vm2, 0.0, %v13454_v25 }
 0x789   :  { %v12252_v28 = vadd.f32 %v12251_v20, %v12176_v31  ;;  %v29057_v8 = vsel %vm13489_vm3, %v13480_v62, 0.0 }
 0x78a   :  { %v25140_v27 = vpop.f32.mrf.mxu0  ;;  %v13788_v34 = vmul.f32 %v29054_v43, %v29057_v8  ;;  %v13505_v56 = vmul.f32 %v13504_v60, %v29057_v8 }
 0x78b   :  { %v12327_v35 = vadd.f32 %v12326_v16, %v12252_v28 }
 0x78c   :  { %v12403_v38 = vpop.f32.mrf.mxu0  ;;  %v13794_v1 = vrot.slane %v13788_v34, 1  ;;  %v13593_v34 = vstv %s23084_s19  ;;  %s29310_s19 = sld [smem:[#allocation10 + $0x2b]] }
 0x78d   :  { %v12404_v2 = vadd.f32 %v12403_v38, %v12327_v35  ;;  %v14008_v35 = vstv %s29081_s16  ;;  %s29281_s16 = sld [smem:[#allocation10 + $0x16]] }
 0x78e   :  { %v25154_v15 = vpop.f32.mrf.mxu0  ;;  %v12476_v29 = vpop.f32.mrf.mxu1  ;;  %v13796_v4 = vsel %vm274_vm4, %v13794_v1, %v13795_v13  ;;  %v13595_v1 = vmul.f32 %v13593_v34, %v29052_v0 }
 0x78f   :  { %v12477_v19 = vadd.f32 %v12476_v29, %v12404_v2 }
 0x790   :  { %v25161_v26 = vpop.f32.mrf.mxu1 }
 0x791   :  { %v13409_v37 = vmax.f32 %v12477_v19, 0.0  ;;  %v13535_v19 = vstv %s23080_s18  ;;  %v13757_v26 = vmul.f32 %v13756_v3, %v29057_v8  ;;  %s29291_s18 = sld [smem:[#allocation10 + $0x4]] }
 0x793   :  { %v13425_v47 = vrot.slane %v13409_v37, 7  ;;  %v12556_v59 = vpop.f32.mrf.mxu0  ;;  %v13536_v37 = vmul.f32 %v13535_v19, %v29057_v8 }
 0x794   :  { %v12637_v51 = vpop.f32.mrf.mxu1 }
 0x795   :  { %v25168_v63 = vpop.f32.mrf.mxu0  ;;  %v12638_v46 = vadd.f32 %v12637_v51, %v12556_v59  ;;  %v13441_v21 = vsel %vm126_vm0, 0.0, %v13425_v47  ;;  %v13537_v47 = vmul.f32 %v13535_v19, %v29052_v0  ;;  %v14009_v59 = vmul.f32 %v14008_v35, %v29057_v8 }
 0x796   :  { %v25175_v11 = vpop.f32.mrf.mxu1  ;;  %13465 = vrot.lane.b32.xlu1 %v13441_v21, %s26032_s1  ;;  %v13562_v63 = vstv %s29094_s20  ;;  %s29341_s20 = sld [smem:[#allocation10 + $0x29]] }
 0x797   :  { %v12713_v39 = vpop.f32.mrf.mxu0  ;;  %v13543_v21 = vrot.slane %v13537_v47, 1 }
 0x798   :  { %v12714_v49 = vadd.f32 %v12713_v39, %v12638_v46  ;;  %v13542_v46 = vrot.slane %v13536_v37, 1  ;;  %v13814_v39 = vstv %s29097_s21  ;;  %s29378_s21 = sld [smem:[#allocation10 + $0x8]] }
 0x799   :  { %v25182_v52 = vpop.f32.mrf.mxu0 }
 0x79a   :  { %v12788_v18 = vpop.f32.mrf.mxu1  ;;  %13509 = vrot.lane.b32.xlu1 %v13505_v56, %s26033_s17 }
 0x79b   :  { %v12789_v23 = vadd.f32 %v12788_v18, %v12714_v49  ;;  %v13544_v18 = vsel %vm274_vm4, %v13542_v46, %v13543_v21 }
 0x79c   :  { %v25189_v44 = vpop.f32.mrf.mxu1 }
 0x79d   :  { %v12865_v53 = vpop.f32.mrf.mxu0 }
 0x79e   :  { %v12866_v57 = vadd.f32 %v12865_v53, %v12789_v23  ;;  %13799 = vrot.lane.b32.xlu1 %v13796_v4, %s26033_s17  ;;  %v13601_v53 = vrot.slane %v13595_v1, 1 }
 0x79f   :  { %v25196_v36 = vpop.f32.mrf.mxu0 }
 0x7a0   :  { %v12938_v54 = vpop.f32.mrf.mxu1 }
 0x7a1   :  { %v12939_v9 = vadd.f32 %v12938_v54, %v12866_v57 }
 0x7a2   :  { %v25203_v41 = vpop.f32.mrf.mxu1 }
 0x7a3   :  { %v13410_v40 = vmax.f32 %v12939_v9, 0.0  ;;  %v13845_v9 = vstv %s23100_s22  ;;  %s29399_s22 = sld [smem:[#allocation10 + $0x2d]] }
 0x7a5   :  { %v13426_v42 = vrot.slane %v13410_v40, 7 }
 0x7a7   :  { %v13442_v24 = vsel %vm126_vm0, 0.0, %v13426_v42 }
 0x7a8   :  { %13467 = vrot.lane.b32.xlu0 %v13442_v24, %s26032_s1 }
 0x7b3   :  { %v13099_v6 = vpop.f32.mrf.mxu1 }
 0x7b5   :  { %v25217_v10 = vpop.f32.mrf.mxu1 }
 0x7b7   :  { %v13250_v50 = vpop.f32.mrf.mxu1 }
 0x7b9   :  { %v25231_v48 = vpop.f32.mrf.mxu1 }
 0x7bb   :  { %v13018_v33 = vpop.f32.mrf.mxu0  ;;  %v13400_v22 = vpop.f32.mrf.mxu1 }
 0x7bc   :  { %v13100_v55 = vadd.f32 %v13099_v6, %v13018_v33  ;;  %v13847_v6 = vmul.f32 %v13845_v9, %v29052_v0 }
 0x7bd   :  { %v25245_v14 = vpop.f32.mrf.mxu1  ;;  %v25210_v61 = vpop.f32.mrf.mxu0 }
 0x7be   :  { %v13853_v10 = vrot.slane %v13847_v6, 1 }
 0x7bf   :  { %v13175_v17 = vpop.f32.mrf.mxu0 }
 0x7c0   :  { %v13458_v12 = vpop.permute.xlu1 %13457  ;;  %v13176_v31 = vadd.f32 %v13175_v17, %v13100_v55 }
 0x7c1   :  { %v13482_v16 = vsel %vm178_vm2, 0.0, %v13458_v12  ;;  %v25224_v20 = vpop.f32.mrf.mxu0 }
 0x7c2   :  { %v29086_v7 = vsel %vm13489_vm3, %v13482_v16, 0.0  ;;  %v13251_v28 = vadd.f32 %v13250_v50, %v13176_v31  ;;  %v13620_v16 = vstv %s29147_s5  ;;  %s29417_s5 = sld [smem:[#allocation10 + $0x2f]] }
 0x7c3   :  { %v13758_v27 = vmul.f32 %v13756_v3, %v29086_v7  ;;  %v13327_v32 = vpop.f32.mrf.mxu0  ;;  %v29091_v25 = vmul.f32 %v14008_v35, %v29086_v7  ;;  %v13538_v23 = vmul.f32 %v13535_v19, %v29086_v7  ;;  %v13506_v57 = vmul.f32 %v13504_v60, %v29086_v7 }
 0x7c4   :  { %v13328_v38 = vadd.f32 %v13327_v32, %v13251_v28  ;;  %v13790_v54 = vmul.f32 %v29054_v43, %v29086_v7  ;;  %v13872_v32 = vstv %s29150_s6  ;;  %s29429_s6 = sld [smem:[#allocation10 + $0x18]] }
 0x7c5   :  { %13763 = vrot.lane.b32.xlu1 %v13758_v27, %s26033_s17  ;;  %v25238_v2 = vpop.f32.mrf.mxu0  ;;  %v13545_v36 = vrot.slane %v13538_v23, 1 }
 0x7c6   :  { %v13401_v5 = vadd.f32 %v13400_v22, %v13328_v38  ;;  %v13797_v42 = vrot.slane %v13790_v54, 1 }
 0x7c7   :  { %v13546_v40 = vsel %vm274_vm4, %v13545_v36, %v13543_v21 }
 0x7c8   :  { %v13411_v15 = vmax.f32 %v13401_v5, 0.0  ;;  %v13798_v43 = vsel %vm274_vm4, %v13797_v42, %v13795_v13  ;;  %v29165_v5 = vstv %s23104_s23  ;;  %s29438_s23 = sld [smem:[#allocation10 + $0x31]] }
 0x7ca   :  { %v13427_v29 = vrot.slane %v13411_v15, 7 }
 0x7cc   :  { %v13443_v62 = vsel %vm126_vm0, 0.0, %v13427_v29  ;;  %vm14507_vm0 = vcmask 56320  }
 0x7cd   :  { %13469 = vrot.lane.b32.xlu0 %v13443_v62, %s26032_s1  ;;  %s23088_s1 = sld [smem:[#allocation10 + $0xb]] }
 0x7d1   :  { %13761 = vrot.lane.b32.xlu0 %v13757_v26, %s26033_s17  ;;  %v29174_v26 = vmul.f32 %v29165_v5, %v29052_v0 }
 0x7d2   :  { %v13460_v51 = vpop.permute.xlu0 %13459 }
 0x7d3   :  { %v13483_v11 = vsel %vm178_vm2, 0.0, %v13460_v51  ;;  %v13651_v31 = vstv %s23088_s1  ;;  %s29414_s1 = sld [smem:[#allocation10 + $0x33]] }
 0x7d4   :  { %v29108_v56 = vsel %vm13489_vm3, %v13483_v11, 0.0  ;;  %v13653_v35 = vmul.f32 %v13651_v31, %v29052_v0 }
 0x7d5   :  { %v13563_v49 = vmul.f32 %v13562_v63, %v29108_v56  ;;  %14013 = vrot.lane.b32.xlu0 %v14009_v59, %s26033_s17  ;;  %v13594_v52 = vmul.f32 %v13593_v34, %v29108_v56  ;;  %v13815_v4 = vmul.f32 %v13814_v39, %v29108_v56  ;;  %v13846_v24 = vmul.f32 %v13845_v9, %v29108_v56 }
 0x7d6   :  { %v13659_v19 = vrot.slane %v13653_v35, 1  ;;  %v13911_v59 = vrot.slane %v29174_v26, 1 }
 0x7d7   :  { %13567 = vrot.lane.b32.xlu1 %v13563_v49, %s26033_s17  ;;  %v13600_v44 = vrot.slane %v13594_v52, 1  ;;  %v13852_v60 = vrot.slane %v13846_v24, 1  ;;  %v29195_v49 = vstv %s23092_s24  ;;  %v29197_v52 = vstv %s23108_s25  ;;  %s29476_s24 = sld [smem:[#allocation10 + $0x37]] }
 0x7d8   :  { %s23087_s25 = sld [smem:[#allocation10 + $0xa]] }
 0x7d9   :  { %13547 = vrot.lane.b32.xlu0 %v13544_v18, %s26033_s17  ;;  %v13602_v41 = vsel %vm274_vm4, %v13600_v44, %v13601_v53  ;;  %v13854_v22 = vsel %vm274_vm4, %v13852_v60, %v13853_v10  ;;  %v29201_v18 = vmul.f32 %v29195_v49, %v29052_v0 }
 0x7db   :  { %13819 = vrot.lane.b32.xlu1 %v13815_v4, %s26033_s17  ;;  %v13678_v4 = vstv %s29193_s2  ;;  %s29499_s2 = sld [smem:[#allocation10 + $0x35]] }
 0x7dd   :  { %13511 = vrot.lane.b32.xlu0 %v13506_v57, %s26033_s17  ;;  %v29209_v57 = vmul.f32 %v29197_v52, %v29052_v0 }
 0x7df   :  { %13605 = vrot.lane.b32.xlu1 %v13602_v41, %s26033_s17  ;;  %v13717_v41 = vrot.slane %v29201_v18, 1 }
 0x7e1   :  { %13549 = vrot.lane.b32.xlu0 %v13546_v40, %s26033_s17 }
 0x7e4   :  { %v13462_v50 = vpop.permute.xlu1 %13461 }
 0x7e5   :  { %13801 = vrot.lane.b32.xlu0 %v13798_v43, %s26033_s17  ;;  %v13484_v48 = vsel %vm178_vm2, 0.0, %v13462_v50 }
 0x7e6   :  { %v29139_v33 = vsel %vm13489_vm3, %v13484_v48, 0.0 }
 0x7e7   :  { %v13564_v14 = vmul.f32 %v13562_v63, %v29139_v33  ;;  %v13596_v58 = vmul.f32 %v13593_v34, %v29139_v33  ;;  %v13816_v13 = vmul.f32 %v13814_v39, %v29139_v33  ;;  %v13848_v55 = vmul.f32 %v13845_v9, %v29139_v33 }
 0x7e9   :  { %13857 = vrot.lane.b32.xlu0 %v13854_v22, %s26033_s17  ;;  %v13603_v61 = vrot.slane %v13596_v58, 1  ;;  %v13855_v12 = vrot.slane %v13848_v55, 1  ;;  %v13930_v58 = vstv %s29214_s26  ;;  %s29540_s26 = sld [smem:[#allocation10 + $0x39]] }
 0x7eb   :  { %v13604_v17 = vsel %vm274_vm4, %v13603_v61, %v13601_v53  ;;  %v13856_v20 = vsel %vm274_vm4, %v13855_v12, %v13853_v10  ;;  %v29205_v53 = vstv %s23113_s4  ;;  %v13969_v10 = vrot.slane %v29209_v57, 1  ;;  %s23103_s4 = sld [smem:[#allocation10 + $0x1a]] }
 0x7ec   :  { %v14040_v42 = vmul.f32 %v29205_v53, %v29057_v8  ;;  %v29228_v24 = vmul.f32 %v29205_v53, %v29052_v0 }
 0x7ed   :  { %13569 = vrot.lane.b32.xlu0 %v13564_v14, %s26033_s17 }
 0x7ee   :  { %v14046_v48 = vrot.slane %v14040_v42, 1  ;;  %v14047_v22 = vrot.slane %v29228_v24, 1 }
 0x7f1   :  { %13821 = vrot.lane.b32.xlu0 %v13816_v13, %s26033_s17  ;;  %v14048_v13 = vsel %vm274_vm4, %v14046_v48, %v14047_v22  ;;  %v29321_v48 = vstv %s23083_s15  ;;  %s29668_s15 = sld [smem:[#allocation10 + $0x24]] }
 0x7f5   :  { %13607 = vrot.lane.b32.xlu0 %v13604_v17, %s26033_s17  ;;  %v13770_v17 = vstv %s23095_s27  ;;  %s29552_s27 = sld [smem:[#allocation10 + $0x3b]] }
 0x7f6   :  { %v13464_v3 = vpop.permute.xlu0 %13463 }
 0x7f7   :  { %v13485_v28 = vsel %vm178_vm2, 0.0, %v13464_v3  ;;  %v13772_v3 = vmul.f32 %v13770_v17, %v29052_v0 }
 0x7f8   :  { %v29159_v27 = vsel %vm13489_vm3, %v13485_v28, 0.0 }
 0x7f9   :  { %v13621_v38 = vmul.f32 %v13620_v16, %v29159_v27  ;;  %v13652_v2 = vmul.f32 %v13651_v31, %v29159_v27  ;;  %13859 = vrot.lane.b32.xlu0 %v13856_v20, %s26033_s17  ;;  %v13873_v15 = vmul.f32 %v13872_v32, %v29159_v27  ;;  %v13904_v62 = vmul.f32 %v29165_v5, %v29159_v27 }
 0x7fa   :  { %v13778_v35 = vrot.slane %v13772_v3, 1 }
 0x7fb   :  { %13625 = vrot.lane.b32.xlu1 %v13621_v38, %s26033_s17  ;;  %v13658_v29 = vrot.slane %v13652_v2, 1  ;;  %v13910_v47 = vrot.slane %v13904_v62, 1  ;;  %v29266_v2 = vstv %s23079_s29  ;;  %s29605_s29 = sld [smem:[#allocation10 + $0x1c]] }
 0x7fc   :  { %v29279_v62 = vmul.f32 %v29266_v2, %v29052_v0 }
 0x7fd   :  { %v13660_v37 = vsel %vm274_vm4, %v13658_v29, %v13659_v19  ;;  %v13912_v34 = vsel %vm274_vm4, %v13910_v47, %v13911_v59  ;;  %v29271_v29 = vstv %s23112_s30  ;;  %v13500_v47 = vstv %s29260_s12  ;;  %s23091_s30 = sld [smem:[#allocation10 + $0xe]] }
 0x7fe   :  { %s29644_s12 = sld [smem:[#allocation10 + $0x3d]] }
 0x7ff   :  { %13877 = vrot.lane.b32.xlu1 %v13873_v15, %s26033_s17 }
 0x803   :  { %13663 = vrot.lane.b32.xlu1 %v13660_v37, %s26033_s17  ;;  %v29285_v37 = vmul.f32 %v29271_v29, %v29052_v0 }
 0x807   :  { %13915 = vrot.lane.b32.xlu1 %v13912_v34, %s26033_s17  ;;  %v13771_v34 = vmul.f32 %v13770_v17, %v29057_v8 }
 0x808   :  { %v13466_v51 = vpop.permute.xlu1 %13465 }
 0x809   :  { %v13486_v63 = vsel %vm178_vm2, 0.0, %v13466_v51  ;;  %v13519_v51 = vmul.f32 %v29266_v2, %v29057_v8  ;;  %v13777_v42 = vrot.slane %v13771_v34, 1 }
 0x80a   :  { %v29186_v46 = vsel %vm13489_vm3, %v13486_v63, 0.0 }
 0x80b   :  { %v13622_v21 = vmul.f32 %v13620_v16, %v29186_v46  ;;  %v13654_v11 = vmul.f32 %v13651_v31, %v29186_v46  ;;  %v13874_v6 = vmul.f32 %v13872_v32, %v29186_v46  ;;  %v13773_v31 = vmul.f32 %v13770_v17, %v29086_v7 }
 0x80c   :  { %v29252_v55 = vpop.permute.xlu1 %13509  ;;  %v13752_v16 = vstv %s29254_s28  ;;  %v13808_v17 = vstv %s29268_s3  ;;  %s29581_s28 = sld [smem:[#allocation10 + $0xc]] }
 0x80d   :  { %13627 = vrot.lane.b32.xlu1 %v13622_v21, %s26033_s17  ;;  %v13661_v39 = vrot.slane %v13654_v11, 1  ;;  %v13780_v20 = vrot.slane %v13773_v31, 1  ;;  %v13754_v28 = vmul.f32 %v13752_v16, %v29086_v7  ;;  %v14004_v21 = vstv %s29264_s13  ;;  %s29663_s3 = sld [smem:[#allocation11]] }
 0x80e   :  { %v13906_v11 = vmul.f32 %v29165_v5, %v29186_v46  ;;  %v13753_v5 = vmul.f32 %v13752_v16, %v29057_v8  ;;  %v14066_v31 = vstv %s29275_s0  ;;  %v29330_v16 = vstv %s29281_s16  ;;  %s23142_s0 = sld [smem:[#allocation10 + $0x3f]] }
 0x80f   :  { %v13662_v1 = vsel %vm274_vm4, %v13661_v39, %v13659_v19  ;;  %v13781_v15 = vsel %vm274_vm4, %v13780_v20, %v13778_v35  ;;  %v13526_v39 = vrot.slane %v29279_v62, 1  ;;  %v13779_v20 = vsel %vm274_vm4, %v13777_v42, %v13778_v35  ;;  %s29683_s16 = sld [smem:[#allocation11 + $0x1]] }
 0x810   :  { %13665 = vrot.lane.b32.xlu0 %v13662_v1, %s26033_s17  ;;  %v29256_v12 = vpop.permute.xlu1 %13799  ;;  %v29297_v1 = vstv %s23117_s14  ;;  %v29358_v18 = vmul.f32 %v29330_v16, %v29052_v0  ;;  %v13577_v42 = vmul.f32 %v29321_v48, %v29108_v56  ;;  %s23107_s14 = sld [smem:[#allocation10 + $0x1e]] }
 0x811   :  { %s23129_s13 = sld [smem:[#allocation10 + $0x32]] }
 0x81a   :  { %v13468_v23 = vpop.permute.xlu0 %13467 }
 0x81b   :  { %v13487_v44 = vsel %vm178_vm2, 0.0, %v13468_v23  ;;  %v13501_v23 = vmul.f32 %v13500_v47, %v29057_v8 }
 0x81c   :  { %v29212_v36 = vsel %vm13489_vm3, %v13487_v44, 0.0 }
 0x81d   :  { %v13679_v54 = vmul.f32 %v13678_v4, %v29212_v36  ;;  %v13710_v9 = vmul.f32 %v29195_v49, %v29212_v36  ;;  %v13962_v40 = vmul.f32 %v29197_v52, %v29212_v36  ;;  %v13931_v61 = vmul.f32 %v13930_v58, %v29212_v36 }
 0x81f   :  { %13683 = vrot.lane.b32.xlu1 %v13679_v54, %s26033_s17  ;;  %v13716_v43 = vrot.slane %v13710_v9, 1  ;;  %v13968_v60 = vrot.slane %v13962_v40, 1  ;;  %v14023_v54 = vmul.f32 %v29271_v29, %v29057_v8  ;;  %v14030_v9 = vrot.slane %v29285_v37, 1 }
 0x821   :  { %v13718_v50 = vsel %vm274_vm4, %v13716_v43, %v13717_v41  ;;  %v13970_v14 = vsel %vm274_vm4, %v13968_v60, %v13969_v10 }
 0x822   :  { %13721 = vrot.lane.b32.xlu0 %v13718_v50, %s26033_s17  ;;  %v29319_v50 = vmul.f32 %v29297_v1, %v29052_v0 }
 0x823   :  { %13879 = vrot.lane.b32.xlu1 %v13874_v6, %s26033_s17  ;;  %v13525_v6 = vrot.slane %v13519_v51, 1 }
 0x824   :  { %v14105_v51 = vrot.slane %v29319_v50, 1 }
 0x826   :  { %13973 = vrot.lane.b32.xlu0 %v13970_v14, %s26033_s17 }
 0x827   :  { %14051 = vrot.lane.b32.xlu1 %v14048_v13, %s26033_s17  ;;  %v14005_v13 = vmul.f32 %v14004_v21, %v29057_v8 }
 0x82b   :  { %13935 = vrot.lane.b32.xlu1 %v13931_v61, %s26033_s17  ;;  %v13913_v61 = vrot.slane %v13906_v11, 1 }
 0x82d   :  { %v13914_v11 = vsel %vm274_vm4, %v13913_v61, %v13911_v59 }
 0x837   :  { %v13764_v32 = vpop.permute.xlu1 %13763 }
 0x838   :  { %v13768_v38 = vadd.f32 %v13764_v32, %v13754_v28  ;;  %v13527_v28 = vsel %vm274_vm4, %v13525_v6, %v13526_v39  ;;  %v13556_v32 = vstv %s29291_s18  ;;  %v13521_v6 = vmul.f32 %v29266_v2, %v29086_v7  ;;  %s23116_s18 = sld [smem:[#allocation10 + $0x26]] }
 0x839   :  { %v14042_v2 = vmul.f32 %v29205_v53, %v29086_v7  ;;  %v13558_v24 = vmul.f32 %v13556_v32, %v29139_v33 }
 0x83a   :  { %v29273_v19 = vadd.f32 %v13781_v15, %v13768_v38  ;;  %v29339_v38 = vmul.f32 %v29321_v48, %v29052_v0  ;;  %v13515_v15 = vadd.f32 %v29252_v55, %v13501_v23  ;;  %v13829_v55 = vmul.f32 %v29330_v16, %v29108_v56 }
 0x83b   :  { %v13809_v23 = vmul.f32 %v13808_v17, %v29108_v56 }
 0x83f   :  { %v13470_v63 = vpop.permute.xlu0 %13469 }
 0x840   :  { %v13488_v44 = vsel %vm178_vm2, 0.0, %v13470_v63  ;;  %vm21714_vm2 = vcmask 1041409  }
 0x841   :  { %v29307_v40 = vsel %vm13489_vm3, %v13488_v44, 0.0  ;;  %v14098_v44 = vmul.f32 %v29297_v1, %v29108_v56 }
 0x842   :  { %v13680_v43 = vmul.f32 %v13678_v4, %v29307_v40  ;;  %v13712_v60 = vmul.f32 %v29195_v49, %v29307_v40  ;;  %v14029_v49 = vrot.slane %v14023_v54, 1 }
 0x843   :  { %v13762_v14 = vpop.permute.xlu0 %13761 }
 0x844   :  { %v13767_v3 = vadd.f32 %v13762_v14, %v13753_v5  ;;  %13685 = vrot.lane.b32.xlu0 %v13680_v43, %s26033_s17  ;;  %v13719_v4 = vrot.slane %v13712_v60, 1  ;;  %v14031_v59 = vsel %vm274_vm4, %v14029_v49, %v14030_v9  ;;  %v14067_v5 = vmul.f32 %v14066_v31, %v29108_v56 }
 0x845   :  { %v29376_v43 = vstv %s29310_s19  ;;  %v13532_v60 = vadd.f32 %v13527_v28, %v13515_v15  ;;  %v13932_v14 = vmul.f32 %v13930_v58, %v29307_v40  ;;  %v13836_v49 = vrot.slane %v29358_v18, 1  ;;  %s23120_s19 = sld [smem:[#allocation10 + $0x2a]] }
 0x846   :  { %v13784_v34 = vadd.f32 %v13779_v20, %v13767_v3  ;;  %v13720_v35 = vsel %vm274_vm4, %v13719_v4, %v13717_v41  ;;  %v14104_v3 = vrot.slane %v14098_v44, 1  ;;  %v13835_v4 = vrot.slane %v13829_v55, 1 }
 0x847   :  { %13723 = vrot.lane.b32.xlu1 %v13720_v35, %s26033_s17  ;;  %v14014_v63 = vpop.permute.xlu0 %14013  ;;  %v13557_v20 = vmul.f32 %v13556_v32, %v29108_v56  ;;  %v13584_v58 = vrot.slane %v29339_v38, 1  ;;  %v14124_v35 = vstv %s29341_s20  ;;  %v13502_v55 = vmul.f32 %v13500_v47, %v29086_v7  ;;  %s29720_s20 = sld [smem:[#allocation10 + $0x28]] }
 0x848   :  { %v14019_v41 = vadd.f32 %v14014_v63, %v14005_v13  ;;  %13917 = vrot.lane.b32.xlu0 %v13914_v11, %s26033_s17  ;;  %v13805_v26 = vadd.f32 %v29256_v12, %v13784_v34  ;;  %v13583_v34 = vrot.slane %v13577_v42, 1  ;;  %v13528_v63 = vrot.slane %v13521_v6, 1 }
 0x849   :  { %v13568_v54 = vpop.permute.xlu1 %13567  ;;  %v29397_v11 = vmul.f32 %v29376_v43, %v29052_v0 }
 0x84a   :  { %v13811_v12 = vadd.f32 %v13809_v23, %v13805_v26  ;;  %v29383_v13 = vadd.f32 %v14031_v59, %v14019_v41  ;;  %v14156_v41 = vmul.f32 %v29376_v43, %v29159_v27  ;;  %v14106_v26 = vsel %vm274_vm4, %v14104_v3, %v14105_v51 }
 0x84b   :  { %14071 = vrot.lane.b32.xlu1 %v14067_v5, %s26033_s17  ;;  %v13548_v61 = vpop.permute.xlu0 %13547  ;;  %v14049_v59 = vrot.slane %v14042_v2, 1  ;;  %v13837_v5 = vsel %vm274_vm4, %v13835_v4, %v13836_v49  ;;  %v14163_v4 = vrot.slane %v29397_v11, 1 }
 0x84c   :  { %v13553_v28 = vadd.f32 %v13548_v61, %v13532_v60  ;;  %13937 = vrot.lane.b32.xlu0 %v13932_v14, %s26033_s17  ;;  %v14125_v60 = vmul.f32 %v14124_v35, %v29159_v27  ;;  %v13529_v14 = vsel %vm274_vm4, %v13528_v63, %v13526_v39  ;;  %v13614_v61 = vstv %s29378_s21  ;;  %s23124_s21 = sld [smem:[#allocation10 + $0x2e]] }
 0x84d   :  { %v13820_v15 = vpop.permute.xlu1 %13819  ;;  %v14162_v2 = vrot.slane %v14156_v41, 1  ;;  %v14050_v62 = vsel %vm274_vm4, %v14049_v59, %v14047_v22  ;;  %v14100_v39 = vmul.f32 %v29297_v1, %v29139_v33  ;;  %v14068_v22 = vmul.f32 %v14066_v31, %v29139_v33 }
 0x84e   :  { %v13825_v53 = vadd.f32 %v13820_v15, %v13811_v12  ;;  %v13559_v44 = vadd.f32 %v13557_v20, %v13553_v28  ;;  %v14182_v1 = vstv %s29399_s22  ;;  %v13810_v31 = vmul.f32 %v13808_v17, %v29139_v33  ;;  %s29750_s22 = sld [smem:[#allocation10 + $0x2c]] }
 0x84f   :  { %14015 = vrot.lane.b32.xlu1 %v29091_v25, %s26033_s17  ;;  %v13512_v23 = vpop.permute.xlu0 %13511  ;;  %v13585_v25 = vsel %vm274_vm4, %v13583_v34, %v13584_v58  ;;  %v13615_v34 = vmul.f32 %v13614_v61, %v29159_v27  ;;  %v14164_v63 = vsel %vm274_vm4, %v14162_v2, %v14163_v4  ;;  %v14183_v59 = vmul.f32 %v14182_v1, %v29212_v36 }
 0x850   :  { %v13516_v47 = vadd.f32 %v13512_v23, %v13502_v55  ;;  %14109 = vrot.lane.b32.xlu0 %v14106_v26, %s26033_s17  ;;  %v13573_v42 = vadd.f32 %v13568_v54, %v13559_v44  ;;  %v13842_v6 = vadd.f32 %v13837_v5, %v13825_v53  ;;  %v13964_v44 = vmul.f32 %v29197_v52, %v29307_v40 }
 0x851   :  { %v13606_v12 = vpop.permute.xlu1 %13605  ;;  %v14107_v23 = vrot.slane %v14100_v39, 1  ;;  %v29465_v26 = vstv %s29417_s5  ;;  %v13866_v52 = vstv %s29429_s6  ;;  %v29472_v5 = vstv %s29414_s1  ;;  %s29772_s1 = sld [smem:[#allocation10 + $0x30]] }
 0x852   :  { %v13590_v54 = vadd.f32 %v13585_v25, %v13573_v42  ;;  %v13533_v3 = vadd.f32 %v13529_v14, %v13516_v47  ;;  %v13579_v47 = vmul.f32 %v29321_v48, %v29139_v33  ;;  %v13971_v42 = vrot.slane %v13964_v44, 1  ;;  %s23133_s5 = sld [smem:[#allocation10 + $0x36]] }
 0x853   :  { %14129 = vrot.lane.b32.xlu1 %v14125_v60, %s26033_s17  ;;  %v13550_v20 = vpop.permute.xlu0 %13549  ;;  %v14108_v17 = vsel %vm274_vm4, %v14107_v23, %v14105_v51  ;;  %v14214_v60 = vmul.f32 %v29465_v26, %v29212_v36  ;;  %v29487_v48 = vmul.f32 %v29465_v26, %v29052_v0  ;;  %v29495_v50 = vmul.f32 %v29472_v5, %v29052_v0  ;;  %s29795_s6 = sld [smem:[#allocation10 + $0x34]] }
 0x854   :  { %v13611_v28 = vadd.f32 %v13606_v12, %v13590_v54  ;;  %v13554_v15 = vadd.f32 %v13550_v20, %v13533_v3  ;;  %14053 = vrot.lane.b32.xlu0 %v14050_v62, %s26033_s17  ;;  %v14260_v12 = vstv %s29438_s23  ;;  %v13867_v54 = vmul.f32 %v13866_v52, %v29159_v27  ;;  %s29798_s23 = sld [smem:[#allocation11 + $0x2]] }
 0x855   :  { %v14292_v51 = vmul.f32 %v29472_v5, %v29057_v8  ;;  %v13586_v3 = vrot.slane %v13579_v47, 1  ;;  %v13831_v2 = vmul.f32 %v29330_v16, %v29139_v33  ;;  %v13972_v20 = vsel %vm274_vm4, %v13971_v42, %v13969_v10 }
 0x856   :  { %v29454_v53 = vadd.f32 %v13615_v34, %v13611_v28  ;;  %v13560_v55 = vadd.f32 %v13558_v24, %v13554_v15  ;;  %v14261_v62 = vmul.f32 %v14260_v12, %v29057_v8  ;;  %v14220_v28 = vrot.slane %v14214_v60, 1 }
 0x857   :  { %14167 = vrot.lane.b32.xlu1 %v14164_v63, %s26033_s17  ;;  %v13802_v41 = vpop.permute.xlu0 %13801  ;;  %v14221_v15 = vrot.slane %v29487_v48, 1  ;;  %v14158_v16 = vmul.f32 %v29376_v43, %v29186_v46  ;;  %v14299_v57 = vrot.slane %v29495_v50, 1  ;;  %v14126_v10 = vmul.f32 %v14124_v35, %v29186_v46 }
 0x858   :  { %v13806_v32 = vadd.f32 %v13802_v41, %v29273_v19  ;;  %14073 = vrot.lane.b32.xlu0 %v14068_v22, %s26033_s17  ;;  %v14298_v24 = vrot.slane %v14292_v51, 1  ;;  %v13587_v22 = vsel %vm274_vm4, %v13586_v3, %v13584_v58  ;;  %v13838_v63 = vrot.slane %v13831_v2, 1 }
 0x859   :  { %v29523_v41 = vstv %s23087_s25  ;;  %v14165_v23 = vrot.slane %v14158_v16, 1  ;;  %v14318_v58 = vstv %s29499_s2  ;;  %v29546_v47 = vstv %s23103_s4  ;;  %s29825_s25 = sld [smem:[#allocation10 + $0x38]] }
 0x85a   :  { %v13812_v25 = vadd.f32 %v13810_v31, %v13806_v32  ;;  %v29530_v32 = vstv %s29476_s24  ;;  %v14300_v38 = vsel %vm274_vm4, %v14298_v24, %v14299_v57  ;;  %v13839_v31 = vsel %vm274_vm4, %v13838_v63, %v13836_v49  ;;  %s29818_s24 = sld [smem:[#allocation10 + $0x3a]] }
 0x85b   :  { %14187 = vrot.lane.b32.xlu1 %v14183_v59, %s26033_s17  ;;  %v13858_v19 = vpop.permute.xlu0 %13857  ;;  %v29544_v59 = vmul.f32 %v29523_v41, %v29052_v0  ;;  %v13635_v18 = vmul.f32 %v29523_v41, %v29159_v27  ;;  %v14319_v51 = vmul.f32 %v14318_v58, %v29108_v56  ;;  %v14184_v3 = vmul.f32 %v14182_v1, %v29307_v40  ;;  %s29863_s2 = sld [smem:[#allocation10 + $0x3c]] }
 0x85c   :  { %v13863_v14 = vadd.f32 %v13858_v19, %v13842_v6  ;;  %14111 = vrot.lane.b32.xlu0 %v14108_v17, %s26033_s17  ;;  %v14166_v19 = vsel %vm274_vm4, %v14165_v23, %v14163_v4  ;;  %v14350_v17 = vmul.f32 %v29530_v32, %v29108_v56  ;;  %v13868_v1 = vmul.f32 %v13866_v52, %v29186_v46  ;;  %s23141_s4 = sld [smem:[#allocation10 + $0x3e]] }
 0x85d   :  { %v13642_v11 = vrot.slane %v29544_v59, 1  ;;  %v14262_v24 = vmul.f32 %v14260_v12, %v29086_v7  ;;  %v13692_v59 = vstv %s23091_s30 }
 0x85e   :  { %v29503_v6 = vadd.f32 %v13867_v54, %v13863_v14  ;;  %v13616_v14 = vmul.f32 %v13614_v61, %v29186_v46  ;;  %v29568_v54 = vmul.f32 %v29546_v47, %v29052_v0  ;;  %v13887_v61 = vmul.f32 %v29546_v47, %v29159_v27 }
 0x85f   :  { %13975 = vrot.lane.b32.xlu1 %v13972_v20, %s26033_s17  ;;  %v13570_v39 = vpop.permute.xlu0 %13569  ;;  %v13641_v20 = vrot.slane %v13635_v18, 1 }
 0x860   :  { %v13574_v34 = vadd.f32 %v13570_v39, %v13560_v55  ;;  %14265 = vrot.lane.b32.xlu0 %v14261_v62, %s26033_s17  ;;  %v14222_v55 = vsel %vm274_vm4, %v14220_v28, %v14221_v15  ;;  %v14356_v39 = vrot.slane %v14350_v17, 1  ;;  %v14294_v28 = vmul.f32 %v29472_v5, %v29086_v7 }
 0x861   :  { %v14216_v5 = vmul.f32 %v29465_v26, %v29307_v40  ;;  %v13643_v52 = vsel %vm274_vm4, %v13641_v20, %v13642_v11 }
 0x862   :  { %v13591_v44 = vadd.f32 %v13587_v22, %v13574_v34  ;;  %v14376_v22 = vstv %s29540_s26  ;;  %v14301_v12 = vrot.slane %v14294_v28, 1  ;;  %s29894_s26 = sld [smem:[#allocation11 + $0x3]] }
 0x863   :  { %14131 = vrot.lane.b32.xlu1 %v14126_v10, %s26033_s17  ;;  %v13822_v43 = vpop.permute.xlu0 %13821  ;;  %v13894_v10 = vrot.slane %v29568_v54, 1  ;;  %v14377_v26 = vmul.f32 %v14376_v22, %v29159_v27 }
 0x864   :  { %v13826_v35 = vadd.f32 %v13822_v43, %v13812_v25  ;;  %14225 = vrot.lane.b32.xlu0 %v14222_v55, %s26033_s17  ;;  %v29550_v25 = vmul.f32 %v29530_v32, %v29052_v0  ;;  %v14407_v43 = vstv %s29552_s27  ;;  %v13893_v55 = vrot.slane %v13887_v61, 1 }
 0x866   :  { %v13843_v42 = vadd.f32 %v13839_v31, %v13826_v35  ;;  %v14357_v2 = vrot.slane %v29550_v25, 1  ;;  %v14408_v25 = vmul.f32 %v14407_v43, %v29159_v27  ;;  %v13895_v18 = vsel %vm274_vm4, %v13893_v55, %v13894_v10 }
 0x867   :  { %14303 = vrot.lane.b32.xlu1 %v14300_v38, %s26033_s17  ;;  %v13608_v49 = vpop.permute.xlu0 %13607  ;;  %v14409_v38 = vmul.f32 %v14407_v43, %v29052_v0 }
 0x868   :  { %v13612_v60 = vadd.f32 %v13608_v49, %v13591_v44  ;;  %14169 = vrot.lane.b32.xlu0 %v14166_v19, %s26033_s17  ;;  %v14358_v23 = vsel %vm274_vm4, %v14356_v39, %v14357_v2  ;;  %v13672_v49 = vstv %s29581_s28  ;;  %v14302_v19 = vsel %vm274_vm4, %v14301_v12, %v14299_v57 }
 0x869   :  { %v13673_v20 = vmul.f32 %v13672_v49, %v29212_v36  ;;  %v14414_v61 = vrot.slane %v14408_v25, 1  ;;  %v13924_v57 = vstv %s29605_s29  ;;  %v13674_v12 = vmul.f32 %v13672_v49, %v29307_v40 }
 0x86a   :  { %v29572_v4 = vadd.f32 %v13616_v14, %v13612_v60  ;;  %v14415_v14 = vrot.slane %v14409_v38, 1 }
 0x86b   :  { %14323 = vrot.lane.b32.xlu1 %v14319_v51, %s26033_s17  ;;  %v13860_v62 = vpop.permute.xlu0 %13859  ;;  %v14352_v51 = vmul.f32 %v29530_v32, %v29139_v33 }
 0x86c   :  { %v13864_v16 = vadd.f32 %v13860_v62, %v13843_v42  ;;  %14189 = vrot.lane.b32.xlu0 %v14184_v3, %s26033_s17  ;;  %v14223_v42 = vrot.slane %v14216_v5, 1  ;;  %v14416_v32 = vsel %vm274_vm4, %v14414_v61, %v14415_v14 }
 0x86d   :  { %v13626_v34 = vpop.permute.xlu1 %13625  ;;  %v14359_v48 = vrot.slane %v14352_v51, 1  ;;  %v13730_v51 = vstv %s29663_s3 }
 0x86e   :  { %v13631_v63 = vadd.f32 %v13626_v34, %v29454_v53  ;;  %v29595_v44 = vadd.f32 %v13868_v1, %v13864_v16  ;;  %v14224_v50 = vsel %vm274_vm4, %v14223_v42, %v14221_v15  ;;  %v13925_v16 = vmul.f32 %v13924_v57, %v29212_v36 }
 0x86f   :  { %14267 = vrot.lane.b32.xlu1 %v14262_v24, %s26033_s17  ;;  %v14360_v34 = vsel %vm274_vm4, %v14359_v48, %v14357_v2  ;;  %v14410_v24 = vmul.f32 %v14407_v43, %v29186_v46  ;;  %v13889_v42 = vmul.f32 %v29546_v47, %v29186_v46 }
 0x870   :  { %v13648_v53 = vadd.f32 %v13643_v52, %v13631_v63  ;;  %14361 = vrot.lane.b32.xlu0 %v14358_v23, %s26033_s17  ;;  %v14378_v52 = vmul.f32 %v14376_v22, %v29186_v46  ;;  %v13693_v22 = vmul.f32 %v13692_v59, %v29212_v36 }
 0x871   :  { %v13878_v35 = vpop.permute.xlu1 %13877  ;;  %v14417_v2 = vrot.slane %v14410_v24, 1 }
 0x872   :  { %v13883_v31 = vadd.f32 %v13878_v35, %v29503_v6  ;;  %v14320_v6 = vmul.f32 %v14318_v58, %v29139_v33  ;;  %v13637_v58 = vmul.f32 %v29523_v41, %v29186_v46  ;;  %v14434_v35 = vstv %s29644_s12  ;;  %s26043_s12 = smov [#allocation13]  }
 0x873   :  { %14381 = vrot.lane.b32.xlu1 %v14377_v26, %s26033_s17  ;;  %v29660_v26 = vmul.f32 %v13692_v59, %v29052_v0  ;;  %v13699_v38 = vrot.slane %v13693_v22, 1 }
 0x874   :  { %v13900_v17 = vadd.f32 %v13895_v18, %v13883_v31  ;;  %14305 = vrot.lane.b32.xlu0 %v14302_v19, %s26033_s17  ;;  %v13644_v1 = vrot.slane %v13637_v58, 1  ;;  %v13896_v19 = vrot.slane %v13889_v42, 1 }
 0x875   :  { %v13664_v60 = vpop.permute.xlu1 %13663  ;;  %v13700_v31 = vrot.slane %v29660_v26, 1 }
 0x876   :  { %v13669_v3 = vadd.f32 %v13664_v60, %v13648_v53  ;;  %v13645_v5 = vsel %vm274_vm4, %v13644_v1, %v13642_v11  ;;  %v14418_v53 = vsel %vm274_vm4, %v14417_v2, %v14415_v14  ;;  %v14436_v11 = vmul.f32 %v14434_v35, %v29307_v40 }
 0x877   :  { %14227 = vrot.lane.b32.xlu1 %v14224_v50, %s26033_s17  ;;  %v13701_v49 = vsel %vm274_vm4, %v13699_v38, %v13700_v31  ;;  %v13897_v61 = vsel %vm274_vm4, %v13896_v19, %v13894_v10  ;;  %v14080_v38 = vstv %s23116_s18 }
 0x878   :  { %v13675_v62 = vadd.f32 %v13673_v20, %v13669_v3  ;;  %14325 = vrot.lane.b32.xlu0 %v14320_v6, %s26033_s17  ;;  %v13944_v6 = vstv %s23107_s14  ;;  %v14081_v19 = vmul.f32 %v14080_v38, %v29108_v56  ;;  %s22874_s14 = sshll.u32 %s26043_s12, 4  ;;  %s22875_s14 = int_to_ptr.vmem [resolvable:$true] %s22874_s14 }
 0x879   :  { %v13916_v39 = vpop.permute.xlu1 %13915  ;;  %v13945_v47 = vmul.f32 %v13944_v6, %v29212_v36  ;;  %v29675_v50 = vmul.f32 %v13944_v6, %v29052_v0  ;;  %s25996_s3 = scalar_lea.vmem %s22875_s14, 32  ;;  %p26001_p3 = scmp.lt.s32.totalorder %s22875_s14, %s22875_s14 }
 0x87a   :  { %v13921_v28 = vadd.f32 %v13916_v39, %v13900_v17  ;;  %p25997_p2 = scmp.ne.s32.totalorder %s22875_s14, %s25996_s3  ;;  %p26002_p4 = scmp.lt.s32.totalorder %s25996_s3, %s25996_s3 }
 0x87b   :  { %14419 = vrot.lane.b32.xlu1 %v14416_v32, %s26033_s17  ;;  %v13951_v1 = vrot.slane %v13945_v47, 1  ;;  %v13952_v54 = vrot.slane %v29675_v50, 1  ;;  %v14025_v47 = vmul.f32 %v29271_v29, %v29086_v7 }
 0x87c   :  { %v29638_v15 = vadd.f32 %v13925_v16, %v13921_v28  ;;  %v14465_v16 = vstv %s23142_s0  ;;  %s26038_s0 = smov 4   ;;  %p26003_p5 = por %p26002_p4, %p26001_p3 }
 0x87d   :  { %v14468_v29 = vmul.f32 %v14465_v16, %v29307_v40 }
 0x87e   :  { %p26004_p6 = pnand %p26003_p5, %p25997_p2 }
 0x87f   :  { %v13628_v63 = vpop.permute.xlu1 %13627  ;;  %14363 = vrot.lane.b32.xlu1 %v14360_v34, %s26033_s17 }
 0x880   :  { %v13632_v41 = vadd.f32 %v13628_v63, %v29572_v4  ;;  %v14466_v63 = vmul.f32 %v14465_v16, %v29212_v36 }
 0x882   :  { %v13649_v55 = vadd.f32 %v13645_v5, %v13632_v41  ;;  %v13666_v23 = vpop.permute.xlu0 %13665  ;;  %v29694_v41 = vmul.f32 %v14465_v16, %v29052_v0 }
 0x883   :  { %14383 = vrot.lane.b32.xlu1 %v14378_v52, %s26033_s17 }
 0x884   :  { %v13670_v43 = vadd.f32 %v13666_v23, %v13649_v55  ;;  %v14435_v55 = vmul.f32 %v14434_v35, %v29212_v36  ;;  %v13982_v23 = vstv %s29683_s16  ;;  %v13695_v35 = vmul.f32 %v13692_v59, %v29307_v40  ;;  %s26039_s16 = smov 12  }
 0x886   :  { %v29653_v4 = vadd.f32 %v13674_v12, %v13670_v43  ;;  %v14472_v43 = vrot.slane %v14466_v63, 1  ;;  %v14473_v12 = vrot.slane %v29694_v41, 1  ;;  %v13702_v42 = vrot.slane %v13695_v35, 1 }
 0x887   :  { %14421 = vrot.lane.b32.xlu1 %v14418_v53, %s26033_s17  ;;  %v14118_v63 = vstv %s29720_s20 }
 0x88b   :  { %14441 = vrot.lane.b32.xlu1 %v14436_v11, %s26033_s17  ;;  %v14474_v11 = vsel %vm274_vm4, %v14472_v43, %v14473_v12 }
 0x891   :  { %v13684_v25 = vpop.permute.xlu1 %13683 }
 0x892   :  { %v13689_v18 = vadd.f32 %v13684_v25, %v13675_v62  ;;  %v14060_v62 = vstv %s29668_s15  ;;  %s26037_s15 = smov 8  }
 0x893   :  { %v14061_v48 = vmul.f32 %v14060_v62, %v29108_v56 }
 0x894   :  { %v13706_v17 = vadd.f32 %v13701_v49, %v13689_v18  ;;  %v13722_v60 = vpop.permute.xlu0 %13721  ;;  %v29718_v18 = vmul.f32 %v14080_v38, %v29052_v0 }
 0x895   :  { %v13880_v14 = vpop.permute.xlu1 %13879 }
 0x896   :  { %v13884_v3 = vadd.f32 %v13880_v14, %v29595_v44  ;;  %v13727_v20 = vadd.f32 %v13722_v60, %v13706_v17  ;;  %v13703_v17 = vsel %vm274_vm4, %v13702_v42, %v13700_v31  ;;  %v13947_v60 = vmul.f32 %v13944_v6, %v29307_v40 }
 0x897   :  { %v14087_v31 = vrot.slane %v14081_v19, 1  ;;  %v14083_v19 = vmul.f32 %v14080_v38, %v29139_v33 }
 0x898   :  { %v13731_v39 = vadd.f32 %v13730_v51, %v13727_v20  ;;  %v13901_v58 = vadd.f32 %v13897_v61, %v13884_v3  ;;  %v13974_v2 = vpop.permute.xlu0 %13973  ;;  %v14088_v20 = vrot.slane %v29718_v18, 1  ;;  %v29729_v61 = vstv %s23120_s19 }
 0x899   :  { %v14052_v28 = vpop.permute.xlu1 %14051  ;;  %v13954_v6 = vrot.slane %v13947_v60, 1 }
 0x89a   :  { %v13735_v32 = vrot.slane %v13731_v39, 1  ;;  %v14057_v44 = vadd.f32 %v14052_v28, %v29383_v13  ;;  %v13953_v13 = vsel %vm274_vm4, %v13951_v1, %v13952_v54  ;;  %v13926_v28 = vmul.f32 %v13924_v57, %v29307_v40 }
 0x89b   :  { %v14089_v57 = vsel %vm274_vm4, %v14087_v31, %v14088_v20  ;;  %v13955_v16 = vsel %vm274_vm4, %v13954_v6, %v13952_v54  ;;  %v29765_v54 = vstv %s23124_s21 }
 0x89c   :  { %v29690_v34 = vmax.f32 %v13731_v39, %v13735_v32  ;;  %v14063_v10 = vadd.f32 %v14061_v48, %v14057_v44  ;;  %v29780_v38 = vmul.f32 %v29765_v54, %v29052_v0 }
 0x89d   :  { %v13936_v24 = vpop.permute.xlu1 %13935 }
 0x89e   :  { %v13941_v5 = vadd.f32 %v13936_v24, %v29638_v15  ;;  %13743 = vrot.lane.b32.xlu0 %v29690_v34, %s26033_s17 }
 0x8a0   :  { %v13958_v52 = vadd.f32 %v13953_v13, %v13941_v5  ;;  %v29740_v5 = vmul.f32 %v29729_v61, %v29052_v0 }
 0x8a2   :  { %v13979_v53 = vadd.f32 %v13974_v2, %v13958_v52  ;;  %14439 = vrot.lane.b32.xlu0 %v14435_v55, %s26033_s17  ;;  %v14032_v52 = vrot.slane %v14025_v47, 1  ;;  %v14139_v55 = vmul.f32 %v29729_v61, %v29159_v27  ;;  %v14176_v47 = vstv %s29750_s22  ;;  %s26040_s22 = smov 32  }
 0x8a4   :  { %v13983_v15 = vadd.f32 %v13982_v23, %v13979_v53  ;;  %v14033_v50 = vsel %vm274_vm4, %v14032_v52, %v14030_v9 }
 0x8a6   :  { %v13987_v22 = vrot.slane %v13983_v15, 1  ;;  %14477 = vrot.lane.b32.xlu0 %v14474_v11, %s26033_s17 }
 0x8a8   :  { %v29712_v26 = vmax.f32 %v13983_v15, %v13987_v22  ;;  %v14475_v22 = vrot.slane %v14468_v29, 1  ;;  %v14204_v29 = vrot.slane %v29780_v38, 1 }
 0x8aa   :  { %13995 = vrot.lane.b32.xlu1 %v29712_v26, %s26033_s17  ;;  %v14476_v37 = vsel %vm274_vm4, %v14475_v22, %v14473_v12  ;;  %v14090_v12 = vrot.slane %v14083_v19, 1 }
 0x8b6   :  { %v13686_v25 = vpop.permute.xlu0 %13685 }
 0x8b7   :  { %v13690_v49 = vadd.f32 %v13686_v25, %v29653_v4  ;;  %v14145_v25 = vrot.slane %v14139_v55, 1 }
 0x8b9   :  { %v13724_v59 = vpop.permute.xlu1 %13723  ;;  %v13707_v14 = vadd.f32 %v13703_v17, %v13690_v49  ;;  %v14146_v49 = vrot.slane %v29740_v5, 1 }
 0x8ba   :  { %v13918_v3 = vpop.permute.xlu0 %13917 }
 0x8bb   :  { %v13728_v39 = vadd.f32 %v13724_v59, %v13707_v14  ;;  %v13922_v4 = vadd.f32 %v13918_v3, %v13901_v58  ;;  %v14062_v3 = vmul.f32 %v14060_v62, %v29139_v33  ;;  %v14147_v41 = vsel %vm274_vm4, %v14145_v25, %v14146_v49 }
 0x8bd   :  { %v13732_v32 = vadd.f32 %v13730_v51, %v13728_v39  ;;  %v14072_v44 = vpop.permute.xlu1 %14071  ;;  %v13928_v48 = vadd.f32 %v13926_v28, %v13922_v4  ;;  %v14006_v51 = vmul.f32 %v14004_v21, %v29086_v7  ;;  %v14119_v21 = vmul.f32 %v14118_v63, %v29159_v27 }
 0x8be   :  { %v14077_v1 = vadd.f32 %v14072_v44, %v14063_v10  ;;  %v13938_v24 = vpop.permute.xlu0 %13937  ;;  %v14197_v39 = vmul.f32 %v29765_v54, %v29212_v36  ;;  %v14177_v44 = vmul.f32 %v14176_v47, %v29212_v36 }
 0x8bf   :  { %v13736_v58 = vrot.slane %v13732_v32, 1  ;;  %v13942_v13 = vadd.f32 %v13938_v24, %v13928_v48  ;;  %v14274_v48 = vstv %s23129_s13  ;;  %s26041_s13 = smov 16  }
 0x8c0   :  { %v14094_v10 = vadd.f32 %v14089_v57, %v14077_v1  ;;  %v14091_v1 = vsel %vm274_vm4, %v14090_v12, %v14088_v20  ;;  %v14203_v24 = vrot.slane %v14197_v39, 1  ;;  %v29802_v55 = vmul.f32 %v14274_v48, %v29052_v0 }
 0x8c1   :  { %v29755_v2 = vmax.f32 %v13732_v32, %v13736_v58  ;;  %v14016_v43 = vpop.permute.xlu1 %14015  ;;  %v13959_v53 = vadd.f32 %v13955_v16, %v13942_v13  ;;  %v14120_v16 = vmul.f32 %v14118_v63, %v29186_v46 }
 0x8c2   :  { %v14020_v15 = vadd.f32 %v14016_v43, %v14006_v51  ;;  %v14110_v11 = vpop.permute.xlu0 %14109  ;;  %v14256_v51 = vstv %s29772_s1  ;;  %v14141_v43 = vmul.f32 %v29729_v61, %v29186_v46  ;;  %v14282_v63 = vrot.slane %v29802_v55, 1 }
 0x8c3   :  { %v14115_v35 = vadd.f32 %v14110_v11, %v14094_v10  ;;  %13745 = vrot.lane.b32.xlu0 %v29755_v2, %s26033_s17  ;;  %v14275_v10 = vmul.f32 %v14274_v48, %v29057_v8  ;;  %v14390_v55 = vstv %s29818_s24  ;;  %s26042_s24 = smov 48  }
 0x8c4   :  { %v14037_v42 = vadd.f32 %v14033_v50, %v14020_v15  ;;  %v14205_v15 = vsel %vm274_vm4, %v14203_v24, %v14204_v29  ;;  %v14257_v50 = vmul.f32 %v14256_v51, %v29057_v8  ;;  %v14148_v19 = vrot.slane %v14141_v43, 1 }
 0x8c5   :  { %v14130_v17 = vpop.permute.xlu1 %14129  ;;  %v14121_v60 = vadd.f32 %v14119_v21, %v14115_v35  ;;  %v14281_v25 = vrot.slane %v14275_v10, 1  ;;  %v14277_v24 = vmul.f32 %v14274_v48, %v29086_v7 }
 0x8c6   :  { %v14054_v59 = vpop.permute.xlu0 %14053 }
 0x8c7   :  { %v14135_v9 = vadd.f32 %v14130_v17, %v14121_v60  ;;  %v14058_v14 = vadd.f32 %v14054_v59, %v14037_v42  ;;  %14479 = vrot.lane.b32.xlu0 %v14476_v37, %s26033_s17  ;;  %v14332_v17 = vstv %s23133_s5  ;;  %v14312_v37 = vstv %s29795_s6 }
 0x8c8   :  { %v29823_v8 = vmul.f32 %v14332_v17, %v29052_v0  ;;  %v14283_v12 = vsel %vm274_vm4, %v14281_v25, %v14282_v63  ;;  %v14333_v39 = vmul.f32 %v14332_v17, %v29108_v56  ;;  %v14335_v38 = vmul.f32 %v14332_v17, %v29139_v33 }
 0x8c9   :  { %v14168_v4 = vpop.permute.xlu1 %14167  ;;  %v14152_v28 = vadd.f32 %v14147_v41, %v14135_v9  ;;  %v14064_v31 = vadd.f32 %v14062_v3, %v14058_v14 }
 0x8ca   :  { %v14074_v6 = vpop.permute.xlu0 %14073 }
 0x8cb   :  { %v14173_v32 = vadd.f32 %v14168_v4, %v14152_v28  ;;  %v14078_v62 = vadd.f32 %v14074_v6, %v14064_v31  ;;  %v14199_v6 = vmul.f32 %v29765_v54, %v29307_v40  ;;  %v14178_v54 = vmul.f32 %v14176_v47, %v29307_v40 }
 0x8cc   :  { %v14392_v47 = vmul.f32 %v14390_v55, %v29052_v0 }
 0x8cd   :  { %v14188_v58 = vpop.permute.xlu1 %14187  ;;  %v14179_v13 = vadd.f32 %v14177_v44, %v14173_v32  ;;  %v14095_v57 = vadd.f32 %v14091_v1, %v14078_v62  ;;  %v14340_v1 = vrot.slane %v29823_v8, 1  ;;  %v14206_v10 = vrot.slane %v14199_v6, 1 }
 0x8ce   :  { %v14112_v52 = vpop.permute.xlu0 %14111 }
 0x8cf   :  { %v14193_v18 = vadd.f32 %v14188_v58, %v14179_v13  ;;  %v14116_v20 = vadd.f32 %v14112_v52, %v14095_v57  ;;  %v14339_v57 = vrot.slane %v14333_v39, 1  ;;  %v14314_v39 = vmul.f32 %v14312_v37, %v29139_v33 }
 0x8d1   :  { %v13976_v11 = vpop.permute.xlu1 %13975  ;;  %v14122_v22 = vadd.f32 %v14120_v16, %v14116_v20  ;;  %v14210_v35 = vadd.f32 %v14205_v15, %v14193_v18  ;;  %v14370_v15 = vstv %s29825_s25  ;;  %v14341_v48 = vsel %vm274_vm4, %v14339_v57, %v14340_v1 }
 0x8d2   :  { %v13980_v21 = vadd.f32 %v13976_v11, %v13959_v53  ;;  %v14266_v42 = vpop.permute.xlu0 %14265  ;;  %v14234_v53 = vstv %s29798_s23 }
 0x8d3   :  { %v14271_v60 = vadd.f32 %v14266_v42, %v14257_v50  ;;  %v14207_v50 = vsel %vm274_vm4, %v14206_v10, %v14204_v29  ;;  %v14391_v42 = vmul.f32 %v14390_v55, %v29159_v27 }
 0x8d4   :  { %v13984_v61 = vadd.f32 %v13982_v23, %v13980_v21  ;;  %v14149_v23 = vsel %vm274_vm4, %v14148_v19, %v14146_v49  ;;  %v14313_v49 = vmul.f32 %v14312_v37, %v29108_v56  ;;  %v14393_v37 = vmul.f32 %v14390_v55, %v29186_v46 }
 0x8d5   :  { %v14132_v59 = vpop.permute.xlu1 %14131  ;;  %v14288_v28 = vadd.f32 %v14283_v12, %v14271_v60 }
 0x8d6   :  { %v13988_v9 = vrot.slane %v13984_v61, 1  ;;  %v14136_v14 = vadd.f32 %v14132_v59, %v14122_v22  ;;  %v14226_v3 = vpop.permute.xlu0 %14225  ;;  %v14284_v22 = vrot.slane %v14277_v24, 1 }
 0x8d7   :  { %v14231_v41 = vadd.f32 %v14226_v3, %v14210_v35  ;;  %v14258_v35 = vmul.f32 %v14256_v51, %v29086_v7  ;;  %v14397_v7 = vrot.slane %v14391_v42, 1  ;;  %v14398_v51 = vrot.slane %v14392_v47, 1 }
 0x8d8   :  { %v29832_v4 = vmax.f32 %v13984_v61, %v13988_v9  ;;  %v14153_v31 = vadd.f32 %v14149_v23, %v14136_v14  ;;  %v14371_v9 = vmul.f32 %v14370_v15, %v29159_v27  ;;  %v14285_v14 = vsel %vm274_vm4, %v14284_v22, %v14282_v63 }
 0x8d9   :  { %v14235_v32 = vadd.f32 %v14234_v53, %v14231_v41  ;;  %v14304_v62 = vpop.permute.xlu1 %14303  ;;  %v14399_v27 = vsel %vm274_vm4, %v14397_v7, %v14398_v51 }
 0x8da   :  { %v14309_v44 = vadd.f32 %v14304_v62, %v14288_v28  ;;  %13997 = vrot.lane.b32.xlu0 %v29832_v4, %s26033_s17  ;;  %v14170_v5 = vpop.permute.xlu0 %14169  ;;  %v14342_v28 = vrot.slane %v14335_v38, 1 }
 0x8db   :  { %v14239_v58 = vrot.slane %v14235_v32, 1  ;;  %v14174_v13 = vadd.f32 %v14170_v5, %v14153_v31  ;;  %v14428_v5 = vstv %s29863_s2 }
 0x8dc   :  { %v14315_v52 = vadd.f32 %v14313_v49, %v14309_v44  ;;  %v14343_v49 = vsel %vm274_vm4, %v14342_v28, %v14340_v1  ;;  %v14429_v33 = vmul.f32 %v14428_v5, %v29212_v36  ;;  %v14400_v1 = vrot.slane %v14393_v37, 1 }
 0x8dd   :  { %v29847_v18 = vmax.f32 %v14235_v32, %v14239_v58  ;;  %v14324_v20 = vpop.permute.xlu1 %14323  ;;  %v14180_v16 = vadd.f32 %v14178_v54, %v14174_v13 }
 0x8de   :  { %v14329_v43 = vadd.f32 %v14324_v20, %v14315_v52  ;;  %v14190_v56 = vpop.permute.xlu0 %14189 }
 0x8df   :  { %v14194_v11 = vadd.f32 %v14190_v56, %v14180_v16  ;;  %14247 = vrot.lane.b32.xlu1 %v29847_v18, %s26033_s17 }
 0x8e0   :  { %v14346_v21 = vadd.f32 %v14341_v48, %v14329_v43  ;;  %v14401_v48 = vsel %vm274_vm4, %v14400_v1, %v14398_v51 }
 0x8e1   :  { %v14268_v25 = vpop.permute.xlu1 %14267  ;;  %v14211_v19 = vadd.f32 %v14207_v50, %v14194_v11  ;;  %v14448_v11 = vstv %s23141_s4  ;;  %v14430_v50 = vmul.f32 %v14428_v5, %v29307_v40 }
 0x8e2   :  { %v14272_v61 = vadd.f32 %v14268_v25, %v14258_v35  ;;  %v14362_v60 = vpop.permute.xlu0 %14361  ;;  %v14451_v22 = vmul.f32 %v14448_v11, %v29307_v40  ;;  %v14450_v47 = vmul.f32 %v14448_v11, %v29052_v0 }
 0x8e3   :  { %v14367_v59 = vadd.f32 %v14362_v60, %v14346_v21 }
 0x8e4   :  { %v14289_v3 = vadd.f32 %v14285_v14, %v14272_v61  ;;  %v14458_v42 = vrot.slane %v14451_v22, 1  ;;  %v14449_v14 = vmul.f32 %v14448_v11, %v29212_v36 }
 0x8e5   :  { %v14382_v29 = vpop.permute.xlu1 %14381  ;;  %v14373_v8 = vadd.f32 %v14371_v9, %v14367_v59  ;;  %v14508_v59 = vsel %vm14507_vm0, %v30855_v30, 0 }
 0x8e6   :  { %v14306_v41 = vpop.permute.xlu0 %14305  ;;  %v29886_v9 = vsub.f32 %v14508_v59, %v14508_v59  ;;  %v14455_v51 = vrot.slane %v14449_v14, 1 }
 0x8e7   :  { %v14387_v12 = vadd.f32 %v14382_v29, %v14373_v8  ;;  %v14310_v23 = vadd.f32 %v14306_v41, %v14289_v3 }
 0x8e8   :  { %v29889_v0 = vand.u32 4294901760, %v29886_v9 }
 0x8e9   :  { %v14228_v63 = vpop.permute.xlu1 %14227  ;;  %v14316_v31 = vadd.f32 %v14314_v39, %v14310_v23  ;;  %v14404_v6 = vadd.f32 %v14399_v27, %v14387_v12  ;;  %v14486_v27 = vstv %s29894_s26 }
 0x8ea   :  { %v14232_v32 = vadd.f32 %v14228_v63, %v14211_v19  ;;  %v14326_v62 = vpop.permute.xlu0 %14325  ;;  %v14456_v19 = vrot.slane %v14450_v47, 1  ;;  %v14582_v40 = vsub.f32 %v29886_v9, %v29889_v0 }
 0x8eb   :  { %v14330_v44 = vadd.f32 %v14326_v62, %v14316_v31 }
 0x8ec   :  { %v14236_v17 = vadd.f32 %v14234_v53, %v14232_v32  ;;  %v14372_v53 = vmul.f32 %v14370_v15, %v29186_v46  ;;  %v14459_v61 = vsel %vm274_vm4, %v14458_v42, %v14456_v19  ;;  %v29898_v29 = vand.u32 4294901760, %v14582_v40 }
 0x8ed   :  { %v14420_v24 = vpop.permute.xlu1 %14419  ;;  %v14347_v58 = vadd.f32 %v14343_v49, %v14330_v44  ;;  %v14457_v36 = vsel %vm274_vm4, %v14455_v51, %v14456_v19 }
 0x8ee   :  { %v14240_v13 = vrot.slane %v14236_v17, 1  ;;  %v14425_v54 = vadd.f32 %v14420_v24, %v14404_v6 }
 0x8f0   :  { %v29874_v57 = vmax.f32 %v14236_v17, %v14240_v13  ;;  %v14431_v52 = vadd.f32 %v14429_v33, %v14425_v54 }
 0x8f1   :  { %v14364_v10 = vpop.permute.xlu1 %14363 }
 0x8f2   :  { %v14368_v20 = vadd.f32 %v14364_v10, %v14347_v58  ;;  %14249 = vrot.lane.b32.xlu0 %v29874_v57, %s26033_s17 }
 0x8f4   :  { %v14374_v16 = vadd.f32 %v14372_v53, %v14368_v20 }
 0x8f5   :  { %v14384_v43 = vpop.permute.xlu1 %14383 }
 0x8f6   :  { %v14388_v56 = vadd.f32 %v14384_v43, %v14374_v16 }
 0x8f8   :  { %v14405_v55 = vadd.f32 %v14401_v48, %v14388_v56 }
 0x8f9   :  { %v14422_v35 = vpop.permute.xlu1 %14421 }
 0x8fa   :  { %v14426_v21 = vadd.f32 %v14422_v35, %v14405_v55 }
 0x8fc   :  { %v14432_v25 = vadd.f32 %v14430_v50, %v14426_v21 }
 0x8fd   :  { %v14442_v46 = vpop.permute.xlu1 %14441 }
 0x8fe   :  { %v14446_v15 = vadd.f32 %v14442_v46, %v14432_v25 }
 0x900   :  { %v14463_v60 = vadd.f32 %v14459_v61, %v14446_v15 }
 0x910   :  { %v13744_v3 = vpop.permute.xlu0 %13743 }
 0x911   :  { %v13749_v7 = vmax.f32 %v29690_v34, %v13744_v3 }
 0x913   :  { %v14511_v38 = vsel %vm274_vm4, %v13749_v7, 0 }
 0x914   :  { %v14544_v8 = vand.u32 4294901760, %v14511_v38  ;;  %v14440_v41 = vpop.permute.xlu0 %14439 }
 0x915   :  { %v14445_v12 = vadd.f32 %v14440_v41, %v14431_v52 }
 0x916   :  { %v14621_v23 = vsub.f32 %v14511_v38, %v14544_v8  ;;  %25247 = vmatpush3.msra.mxu0 %v14544_v8 }
 0x917   :  { %25249 = vmatmul.mubr.f32.vlgmr.msra.gmra.mxu0 %v29898_v29  ;;  %25256 = vmatprep.subr.mxu0 %v30833_v45  ;;  %v14462_v39 = vadd.f32 %v14457_v36, %v14445_v12 }
 0x918   :  { %25257 = vmatpush3.msra.mxu0 %v14621_v23  ;;  %v14478_v34 = vpop.permute.xlu0 %14477  ;;  %25258 = vmatprep.mubr.msk.f32.mxu0 %vm26036_vm14, %v30833_v45  ;;  %v14622_v28 = vand.u32 4294901760, %v14621_v23 }
 0x919   :  { %v14483_v63 = vadd.f32 %v14478_v34, %v14462_v39  ;;  %25266 = vmatprep.subr.mxu0 %v30833_v45 }
 0x91a   :  { %v14623_v31 = vsub.f32 %v14621_v23, %v14622_v28 }
 0x91b   :  { %v14487_v6 = vadd.f32 %v14486_v27, %v14483_v63  ;;  %25259 = vmatmul.mubr.f32.vlgmr.msra.gmra.mxu0 %v29886_v9 }
 0x91c   :  { %25267 = vmatpush3.msra.mxu0 %v14622_v28  ;;  %v14624_v32 = vand.u32 4294901760, %v14623_v31  ;;  %25268 = vmatprep.mubr.msk.f32.mxu0 %vm26036_vm14, %v30833_v45  ;;  %v13996_v5 = vpop.permute.xlu1 %13995 }
 0x91d   :  { %v14491_v62 = vrot.slane %v14487_v6, 1  ;;  %25276 = vmatprep.subr.mxu0 %v30833_v45  ;;  %v14001_v17 = vmax.f32 %v29712_v26, %v13996_v5 }
 0x91e   :  { %25252 = vmatpush3.msra.mxu1 %v14624_v32 }
 0x91f   :  { %v29911_v44 = vmax.f32 %v14487_v6, %v14491_v62  ;;  %25254 = vmatmul.mubr.msk.f32.vlgmr.msra.gmra.mxu1 %vm14507_vm0, %v30855_v30  ;;  %25261 = vmatprep.subr.mxu1 %v30833_v45  ;;  %v15409_v58 = vsel %vm274_vm4, %v14001_v17, 0  ;;  %v30865_v62 = vld [vmem:[#allocation22_spill] sm:$0xff] }
 0x920   :  { %25262 = vmatpush3.msra.mxu1 %v14544_v8  ;;  %25263 = vmatprep.mubr.msk.f32.mxu1 %vm26036_vm14, %v30833_v45  ;;  %v29937_v52 = vand.u32 4294901760, %v15409_v58 }
 0x921   :  { %14499 = vrot.lane.b32.xlu1 %v29911_v44, %s26033_s17  ;;  %25271 = vmatprep.subr.mxu1 %v30833_v45 }
 0x922   :  { %25269 = vmatmul.mubr.msk.f32.vlgmr.msra.gmra.mxu0 %vm14507_vm0, %v30855_v30  ;;  %v15519_v53 = vsub.f32 %v15409_v58, %v29937_v52 }
 0x923   :  { %25264 = vmatmul.mubr.f32.vlgmr.msra.gmra.mxu1 %v29889_v0  ;;  %25278 = vmatprep.mubr.msk.f32.mxu0 %vm26036_vm14, %v30833_v45 }
 0x924   :  { %25272 = vmatpush3.msra.mxu1 %v14544_v8  ;;  %25273 = vmatprep.mubr.msk.f32.mxu1 %vm26036_vm14, %v30833_v45  ;;  %v15520_v56 = vand.u32 4294901760, %v15519_v53 }
 0x925   :  { %25281 = vmatprep.subr.mxu1 %v30833_v45 }
 0x926   :  { %v15521_v11 = vsub.f32 %v15519_v53, %v15520_v56 }
 0x927   :  { %25274 = vmatmul.mubr.msk.f32.vlgmr.msra.gmra.mxu1 %vm14507_vm0, %v30855_v30 }
 0x928   :  { %25283 = vmatprep.mubr.msk.f32.mxu1 %vm26036_vm14, %v30833_v45  ;;  %v15522_v48 = vand.u32 4294901760, %v15521_v11 }
 0x935   :  { %v13746_v49 = vpop.permute.xlu0 %13745 }
 0x936   :  { %v13750_v24 = vmax.f32 %v29755_v2, %v13746_v49 }
 0x938   :  { %v14960_v13 = vsel %vm274_vm4, %v13750_v24, 0 }
 0x939   :  { %v14993_v54 = vand.u32 4294901760, %v14960_v13  ;;  %v14480_v33 = vpop.permute.xlu0 %14479 }
 0x93a   :  { %v14484_v37 = vadd.f32 %v14480_v33, %v14463_v60 }
 0x93b   :  { %v15070_v10 = vsub.f32 %v14960_v13, %v14993_v54  ;;  %25277 = vmatpush3.msra.mxu0 %v14993_v54 }
 0x93c   :  { %v14488_v20 = vadd.f32 %v14486_v27, %v14484_v37  ;;  %25279 = vmatmul.mubr.f32.vlgmr.msra.gmra.mxu0 %v29898_v29  ;;  %25286 = vmatprep.subr.mxu0 %v30833_v45 }
 0x93d   :  { %25287 = vmatpush3.msra.mxu0 %v15070_v10  ;;  %25288 = vmatprep.mubr.msk.f32.mxu0 %vm26036_vm14, %v30833_v45  ;;  %v15071_v26 = vand.u32 4294901760, %v15070_v10 }
 0x93e   :  { %v14492_v2 = vrot.slane %v14488_v20, 1  ;;  %25296 = vmatprep.subr.mxu0 %v30833_v45 }
 0x93f   :  { %v15072_v1 = vsub.f32 %v15070_v10, %v15071_v26 }
 0x940   :  { %v29945_v16 = vmax.f32 %v14488_v20, %v14492_v2  ;;  %25289 = vmatmul.mubr.f32.vlgmr.msra.gmra.mxu0 %v29886_v9 }
 0x941   :  { %25297 = vmatpush3.msra.mxu0 %v15071_v26  ;;  %v15073_v43 = vand.u32 4294901760, %v15072_v1  ;;  %25298 = vmatprep.mubr.msk.f32.mxu0 %vm26036_vm14, %v30833_v45 }
 0x942   :  { %14501 = vrot.lane.b32.xlu0 %v29945_v16, %s26033_s17  ;;  %25306 = vmatprep.subr.mxu0 %v30833_v45 }
 0x943   :  { %25282 = vmatpush3.msra.mxu1 %v15073_v43 }
 0x944   :  { %25284 = vmatmul.mubr.msk.f32.vlgmr.msra.gmra.mxu1 %vm14507_vm0, %v30855_v30  ;;  %25291 = vmatprep.subr.mxu1 %v30833_v45 }
 0x945   :  { %25299 = vmatmul.mubr.msk.f32.vlgmr.msra.gmra.mxu0 %vm14507_vm0, %v30855_v30  ;;  %25292 = vmatpush3.msra.mxu1 %v14993_v54 }
 0x946   :  { %25307 = vmatpush3.msra.mxu0 %v29937_v52  ;;  %25293 = vmatprep.mubr.msk.f32.mxu1 %vm26036_vm14, %v30833_v45 }
 0x947   :  { %25301 = vmatprep.subr.mxu1 %v30833_v45  ;;  %25308 = vmatprep.mubr.msk.f32.mxu0 %vm26036_vm14, %v30833_v45 }
 0x948   :  { %25316 = vmatprep.subr.mxu0 %v30833_v45  ;;  %25294 = vmatmul.mubr.f32.vlgmr.msra.gmra.mxu1 %v29889_v0 }
 0x949   :  { %25302 = vmatpush3.msra.mxu1 %v14993_v54  ;;  %25309 = vmatmul.mubr.f32.vlgmr.msra.gmra.mxu0 %v29898_v29 }
 0x94a   :  { %25317 = vmatpush3.msra.mxu0 %v15519_v53  ;;  %25303 = vmatprep.mubr.msk.f32.mxu1 %vm26036_vm14, %v30833_v45 }
 0x94b   :  { %25311 = vmatprep.subr.mxu1 %v30833_v45  ;;  %25318 = vmatprep.mubr.msk.f32.mxu0 %vm26036_vm14, %v30833_v45 }
 0x94c   :  { %25326 = vmatprep.subr.mxu0 %v30833_v45  ;;  %25304 = vmatmul.mubr.msk.f32.vlgmr.msra.gmra.mxu1 %vm14507_vm0, %v30855_v30  ;;  %v13998_v22 = vpop.permute.xlu0 %13997 }
 0x94d   :  { %25312 = vmatpush3.msra.mxu1 %v15522_v48  ;;  %25319 = vmatmul.mubr.f32.vlgmr.msra.gmra.mxu0 %v29886_v9  ;;  %v14002_v55 = vmax.f32 %v29832_v4, %v13998_v22 }
 0x94e   :  { %25327 = vmatpush3.msra.mxu0 %v15520_v56  ;;  %25313 = vmatprep.mubr.msk.f32.mxu1 %vm26036_vm14, %v30833_v45 }
 0x94f   :  { %v15858_v47 = vsel %vm274_vm4, %v14002_v55, 0  ;;  %25321 = vmatprep.subr.mxu1 %v30833_v45  ;;  %25328 = vmatprep.mubr.msk.f32.mxu0 %vm26036_vm14, %v30833_v45 }
 0x950   :  { %v15891_v35 = vand.u32 4294901760, %v15858_v47  ;;  %25314 = vmatmul.mubr.msk.f32.vlgmr.msra.gmra.mxu1 %vm14507_vm0, %v30855_v30  ;;  %25336 = vmatprep.subr.mxu0 %v30833_v45 }
 0x951   :  { %25322 = vmatpush3.msra.mxu1 %v29937_v52  ;;  %25329 = vmatmul.mubr.msk.f32.vlgmr.msra.gmra.mxu0 %vm14507_vm0, %v30855_v30  ;;  %v14248_v4 = vpop.permute.xlu1 %14247 }
 0x952   :  { %v15968_v21 = vsub.f32 %v15858_v47, %v15891_v35  ;;  %v14253_v50 = vmax.f32 %v29847_v18, %v14248_v4  ;;  %25337 = vmatpush3.msra.mxu0 %v15891_v35  ;;  %25323 = vmatprep.mubr.msk.f32.mxu1 %vm26036_vm14, %v30833_v45 }
 0x953   :  { %25331 = vmatprep.subr.mxu1 %v30833_v45  ;;  %25338 = vmatprep.mubr.msk.f32.mxu0 %vm26036_vm14, %v30833_v45 }
 0x954   :  { %v16307_v42 = vsel %vm274_vm4, %v14253_v50, 0  ;;  %25346 = vmatprep.subr.mxu0 %v30833_v45  ;;  %25324 = vmatmul.mubr.f32.vlgmr.msra.gmra.mxu1 %v29889_v0  ;;  %v15969_v25 = vand.u32 4294901760, %v15968_v21 }
 0x955   :  { %v16340_v19 = vand.u32 4294901760, %v16307_v42  ;;  %25332 = vmatpush3.msra.mxu1 %v29937_v52  ;;  %25339 = vmatmul.mubr.f32.vlgmr.msra.gmra.mxu0 %v29898_v29 }
 0x956   :  { %25347 = vmatpush3.msra.mxu0 %v15968_v21  ;;  %25333 = vmatprep.mubr.msk.f32.mxu1 %vm26036_vm14, %v30833_v45  ;;  %v15970_v18 = vsub.f32 %v15968_v21, %v15969_v25 }
 0x957   :  { %v16417_v46 = vsub.f32 %v16307_v42, %v16340_v19  ;;  %25348 = vmatprep.mubr.msk.f32.mxu0 %vm26036_vm14, %v30833_v45  ;;  %25356 = vmatprep.subr.mxu0 %v30833_v45 }
 0x958   :  { %25334 = vmatmul.mubr.msk.f32.vlgmr.msra.gmra.mxu1 %vm14507_vm0, %v30855_v30  ;;  %25341 = vmatprep.subr.mxu1 %v30833_v45  ;;  %v15971_v15 = vand.u32 4294901760, %v15970_v18 }
 0x959   :  { %25349 = vmatmul.mubr.f32.vlgmr.msra.gmra.mxu0 %v29886_v9  ;;  %25343 = vmatprep.mubr.msk.f32.mxu1 %vm26036_vm14, %v30833_v45  ;;  %v16418_v61 = vand.u32 4294901760, %v16417_v46 }
 0x95a   :  { %25357 = vmatpush3.msra.mxu0 %v15969_v25  ;;  %25342 = vmatpush3.msra.mxu1 %v15971_v15 }
 0x95b   :  { %25351 = vmatprep.subr.mxu1 %v30833_v45  ;;  %25358 = vmatprep.mubr.msk.f32.mxu0 %vm26036_vm14, %v30833_v45  ;;  %v16419_v60 = vsub.f32 %v16417_v46, %v16418_v61 }
 0x95c   :  { %25366 = vmatprep.subr.mxu0 %v30833_v45  ;;  %25344 = vmatmul.mubr.msk.f32.vlgmr.msra.gmra.mxu1 %vm14507_vm0, %v30855_v30 }
 0x95d   :  { %25352 = vmatpush3.msra.mxu1 %v15891_v35  ;;  %25359 = vmatmul.mubr.msk.f32.vlgmr.msra.gmra.mxu0 %vm14507_vm0, %v30855_v30  ;;  %v16420_v59 = vand.u32 4294901760, %v16419_v60 }
 0x95e   :  { %25367 = vmatpush3.msra.mxu0 %v16340_v19  ;;  %25353 = vmatprep.mubr.msk.f32.mxu1 %vm26036_vm14, %v30833_v45 }
 0x95f   :  { %25361 = vmatprep.subr.mxu1 %v30833_v45  ;;  %25368 = vmatprep.mubr.msk.f32.mxu0 %vm26036_vm14, %v30833_v45 }
 0x960   :  { %25376 = vmatprep.subr.mxu0 %v30833_v45  ;;  %25354 = vmatmul.mubr.f32.vlgmr.msra.gmra.mxu1 %v29889_v0 }
 0x961   :  { %25362 = vmatpush3.msra.mxu1 %v15891_v35  ;;  %25369 = vmatmul.mubr.f32.vlgmr.msra.gmra.mxu0 %v29898_v29 }
 0x962   :  { %25377 = vmatpush3.msra.mxu0 %v16417_v46  ;;  %25363 = vmatprep.mubr.msk.f32.mxu1 %vm26036_vm14, %v30833_v45 }
 0x963   :  { %25371 = vmatprep.subr.mxu1 %v30833_v45  ;;  %25378 = vmatprep.mubr.msk.f32.mxu0 %vm26036_vm14, %v30833_v45 }
 0x964   :  { %25386 = vmatprep.subr.mxu0 %v30833_v45  ;;  %25364 = vmatmul.mubr.msk.f32.vlgmr.msra.gmra.mxu1 %vm14507_vm0, %v30855_v30  ;;  %v14250_v14 = vpop.permute.xlu0 %14249 }
 0x965   :  { %25372 = vmatpush3.msra.mxu1 %v16420_v59  ;;  %25379 = vmatmul.mubr.f32.vlgmr.msra.gmra.mxu0 %v29886_v9  ;;  %v14254_v40 = vmax.f32 %v29874_v57, %v14250_v14 }
 0x966   :  { %25387 = vmatpush3.msra.mxu0 %v16418_v61  ;;  %25373 = vmatprep.mubr.msk.f32.mxu1 %vm26036_vm14, %v30833_v45 }
 0x967   :  { %v16756_v3 = vsel %vm274_vm4, %v14254_v40, 0  ;;  %25381 = vmatprep.subr.mxu1 %v30833_v45  ;;  %25388 = vmatprep.mubr.msk.f32.mxu0 %vm26036_vm14, %v30833_v45 }
 0x968   :  { %v16789_v7 = vand.u32 4294901760, %v16756_v3  ;;  %25374 = vmatmul.mubr.msk.f32.vlgmr.msra.gmra.mxu1 %vm14507_vm0, %v30855_v30  ;;  %25396 = vmatprep.subr.mxu0 %v30833_v45 }
 0x969   :  { %25382 = vmatpush3.msra.mxu1 %v16340_v19  ;;  %25389 = vmatmul.mubr.msk.f32.vlgmr.msra.gmra.mxu0 %vm14507_vm0, %v30855_v30 }
 0x96a   :  { %v16866_v57 = vsub.f32 %v16756_v3, %v16789_v7  ;;  %25397 = vmatpush3.msra.mxu0 %v16789_v7  ;;  %25383 = vmatprep.mubr.msk.f32.mxu1 %vm26036_vm14, %v30833_v45 }
 0x96b   :  { %25391 = vmatprep.subr.mxu1 %v30833_v45  ;;  %25398 = vmatprep.mubr.msk.f32.mxu0 %vm26036_vm14, %v30833_v45 }
 0x96c   :  { %25406 = vmatprep.subr.mxu0 %v30833_v45  ;;  %25384 = vmatmul.mubr.f32.vlgmr.msra.gmra.mxu1 %v29889_v0  ;;  %v16867_v51 = vand.u32 4294901760, %v16866_v57 }
 0x96d   :  { %25392 = vmatpush3.msra.mxu1 %v16340_v19  ;;  %25399 = vmatmul.mubr.f32.vlgmr.msra.gmra.mxu0 %v29898_v29 }
 0x96e   :  { %25407 = vmatpush3.msra.mxu0 %v16866_v57  ;;  %25393 = vmatprep.mubr.msk.f32.mxu1 %vm26036_vm14, %v30833_v45  ;;  %v16868_v38 = vsub.f32 %v16866_v57, %v16867_v51 }
 0x96f   :  { %25408 = vmatprep.mubr.msk.f32.mxu0 %vm26036_vm14, %v30833_v45  ;;  %25416 = vmatprep.subr.mxu0 %v30833_v45 }
 0x970   :  { %25394 = vmatmul.mubr.msk.f32.vlgmr.msra.gmra.mxu1 %vm14507_vm0, %v30855_v30  ;;  %25401 = vmatprep.subr.mxu1 %v30833_v45  ;;  %v16869_v8 = vand.u32 4294901760, %v16868_v38 }
 0x971   :  { %25409 = vmatmul.mubr.f32.vlgmr.msra.gmra.mxu0 %v29886_v9  ;;  %25403 = vmatprep.mubr.msk.f32.mxu1 %vm26036_vm14, %v30833_v45 }
 0x972   :  { %25417 = vmatpush3.msra.mxu0 %v16867_v51  ;;  %25402 = vmatpush3.msra.mxu1 %v16869_v8 }
 0x973   :  { %25411 = vmatprep.subr.mxu1 %v30833_v45  ;;  %25418 = vmatprep.mubr.msk.f32.mxu0 %vm26036_vm14, %v30833_v45 }
 0x974   :  { %25404 = vmatmul.mubr.msk.f32.vlgmr.msra.gmra.mxu1 %vm14507_vm0, %v30855_v30  ;;  %25426 = vmatprep.subr.mxu0 %v30833_v45 }
 0x975   :  { %25412 = vmatpush3.msra.mxu1 %v16789_v7  ;;  %25419 = vmatmul.mubr.msk.f32.vlgmr.msra.gmra.mxu0 %vm14507_vm0, %v30855_v30 }
 0x976   :  { %25413 = vmatprep.mubr.msk.f32.mxu1 %vm26036_vm14, %v30833_v45  ;;  %25421 = vmatprep.subr.mxu1 %v30833_v45 }
 0x977   :  { %25428 = vmatprep.mubr.msk.f32.mxu0 %vm26036_vm14, %v30833_v45 }
 0x978   :  { %25414 = vmatmul.mubr.f32.vlgmr.msra.gmra.mxu1 %v29889_v0 }
 0x979   :  { %25422 = vmatpush3.msra.mxu1 %v16789_v7  ;;  %25423 = vmatprep.mubr.msk.f32.mxu1 %vm26036_vm14, %v30833_v45 }
 0x97a   :  { %25431 = vmatprep.subr.mxu1 %v30833_v45 }
 0x97c   :  { %25424 = vmatmul.mubr.msk.f32.vlgmr.msra.gmra.mxu1 %vm14507_vm0, %v30855_v30 }
 0x97d   :  { %25433 = vmatprep.mubr.msk.f32.mxu1 %vm26036_vm14, %v30833_v45 }
 0x993   :  { %v14500_v41 = vpop.permute.xlu1 %14499 }
 0x994   :  { %v14505_v12 = vmax.f32 %v29911_v44, %v14500_v41  ;;  %v18106_v44 = vsel %vm274_vm4, %v30865_v62, 0 }
 0x995   :  { %v30125_v49 = vsub.f32 %v18106_v44, %v18106_v44 }
 0x996   :  { %v17205_v23 = vsel %vm274_vm4, %v14505_v12, 0 }
 0x997   :  { %v17238_v36 = vand.u32 4294901760, %v17205_v23 }
 0x999   :  { %v17315_v39 = vsub.f32 %v17205_v23, %v17238_v36  ;;  %25427 = vmatpush3.msra.mxu0 %v17238_v36 }
 0x99a   :  { %25429 = vmatmul.mubr.f32.vlgmr.msra.gmra.mxu0 %v29898_v29  ;;  %25436 = vmatprep.subr.mxu0 %v30833_v45 }
 0x99b   :  { %25437 = vmatpush3.msra.mxu0 %v17315_v39  ;;  %25438 = vmatprep.mubr.msk.f32.mxu0 %vm26036_vm14, %v30833_v45  ;;  %v17316_v27 = vand.u32 4294901760, %v17315_v39 }
 0x99c   :  { %25446 = vmatprep.subr.mxu0 %v30833_v45 }
 0x99d   :  { %v17317_v34 = vsub.f32 %v17315_v39, %v17316_v27 }
 0x99e   :  { %25439 = vmatmul.mubr.f32.vlgmr.msra.gmra.mxu0 %v29886_v9 }
 0x99f   :  { %25447 = vmatpush3.msra.mxu0 %v17316_v27  ;;  %v17318_v28 = vand.u32 4294901760, %v17317_v34  ;;  %25448 = vmatprep.mubr.msk.f32.mxu0 %vm26036_vm14, %v30833_v45 }
 0x9a0   :  { %25456 = vmatprep.subr.mxu0 %v30833_v45 }
 0x9a1   :  { %25432 = vmatpush3.msra.mxu1 %v17318_v28 }
 0x9a2   :  { %25434 = vmatmul.mubr.msk.f32.vlgmr.msra.gmra.mxu1 %vm14507_vm0, %v30855_v30  ;;  %25441 = vmatprep.subr.mxu1 %v30833_v45 }
 0x9a3   :  { %25442 = vmatpush3.msra.mxu1 %v17238_v36  ;;  %25443 = vmatprep.mubr.msk.f32.mxu1 %vm26036_vm14, %v30833_v45 }
 0x9a4   :  { %25451 = vmatprep.subr.mxu1 %v30833_v45  ;;  %25449 = vmatmul.mubr.msk.f32.vlgmr.msra.gmra.mxu0 %vm14507_vm0, %v30855_v30 }
 0x9a5   :  { %25458 = vmatprep.mubr.msk.f32.mxu0 %vm26036_vm14, %v30833_v45 }
 0x9a6   :  { %25444 = vmatmul.mubr.f32.vlgmr.msra.gmra.mxu1 %v29889_v0 }
 0x9a7   :  { %25452 = vmatpush3.msra.mxu1 %v17238_v36  ;;  %25453 = vmatprep.mubr.msk.f32.mxu1 %vm26036_vm14, %v30833_v45 }
 0x9a8   :  { %25461 = vmatprep.subr.mxu1 %v30833_v45 }
 0x9aa   :  { %25454 = vmatmul.mubr.msk.f32.vlgmr.msra.gmra.mxu1 %vm14507_vm0, %v30855_v30 }
 0x9ab   :  { %25463 = vmatprep.mubr.msk.f32.mxu1 %vm26036_vm14, %v30833_v45 }
 0x9b4   :  { %v14502_v63 = vpop.permute.xlu0 %14501 }
 0x9b5   :  { %v14506_v31 = vmax.f32 %v29945_v16, %v14502_v63 }
 0x9b7   :  { %v17654_v6 = vsel %vm274_vm4, %v14506_v31, 0 }
 0x9b8   :  { %v17687_v32 = vand.u32 4294901760, %v17654_v6 }
 0x9ba   :  { %v17764_v5 = vsub.f32 %v17654_v6, %v17687_v32  ;;  %25457 = vmatpush3.msra.mxu0 %v17687_v32 }
 0x9bb   :  { %25459 = vmatmul.mubr.f32.vlgmr.msra.gmra.mxu0 %v29898_v29  ;;  %25466 = vmatprep.subr.mxu0 %v30833_v45  ;;  %v30132_v29 = vand.u32 4294901760, %v30125_v49 }
 0x9bc   :  { %25467 = vmatpush3.msra.mxu0 %v17764_v5  ;;  %25468 = vmatprep.mubr.msk.f32.mxu0 %vm26036_vm14, %v30833_v45  ;;  %v17765_v17 = vand.u32 4294901760, %v17764_v5 }
 0x9bd   :  { %25476 = vmatprep.subr.mxu0 %v30833_v45 }
 0x9be   :  { %v17766_v24 = vsub.f32 %v17764_v5, %v17765_v17 }
 0x9bf   :  { %25469 = vmatmul.mubr.f32.vlgmr.msra.gmra.mxu0 %v29886_v9  ;;  %v18218_v9 = vsub.f32 %v30125_v49, %v30132_v29 }
 0x9c0   :  { %25477 = vmatpush3.msra.mxu0 %v17765_v17  ;;  %v17767_v58 = vand.u32 4294901760, %v17766_v24  ;;  %25478 = vmatprep.mubr.msk.f32.mxu0 %vm26036_vm14, %v30833_v45 }
 0x9c1   :  { %25486 = vmatprep.subr.mxu0 %v30833_v45  ;;  %v30153_v13 = vand.u32 4294901760, %v18218_v9 }
 0x9c2   :  { %25462 = vmatpush3.msra.mxu1 %v17767_v58 }
 0x9c3   :  { %25464 = vmatmul.mubr.msk.f32.vlgmr.msra.gmra.mxu1 %vm14507_vm0, %v30855_v30  ;;  %25471 = vmatprep.subr.mxu1 %v30833_v45 }
 0x9c4   :  { %25472 = vmatpush3.msra.mxu1 %v17687_v32  ;;  %25473 = vmatprep.mubr.msk.f32.mxu1 %vm26036_vm14, %v30833_v45 }
 0x9c5   :  { %25481 = vmatprep.subr.mxu1 %v30833_v45  ;;  %25479 = vmatmul.mubr.msk.f32.vlgmr.msra.gmra.mxu0 %vm14507_vm0, %v30855_v30 }
 0x9c6   :  { %25487 = vmatpush3.msk.msra.mxu0 %vm274_vm4, %v30865_v62  ;;  %25488 = vmatprep.mubr.msk.f32.mxu0 %vm26036_vm14, %v30833_v45 }
 0x9c7   :  { %25474 = vmatmul.mubr.f32.vlgmr.msra.gmra.mxu1 %v29889_v0  ;;  %25496 = vmatprep.subr.mxu0 %v30833_v45 }
 0x9c8   :  { %25482 = vmatpush3.msra.mxu1 %v17687_v32  ;;  %25483 = vmatprep.mubr.msk.f32.mxu1 %vm26036_vm14, %v30833_v45 }
 0x9c9   :  { %25491 = vmatprep.subr.mxu1 %v30833_v45 }
 0x9cb   :  { %25484 = vmatmul.mubr.msk.f32.vlgmr.msra.gmra.mxu1 %vm14507_vm0, %v30855_v30 }
 0x9cc   :  { %25492 = vmatpush3.msra.mxu1 %v30153_v13  ;;  %25493 = vmatprep.mubr.msk.f32.mxu1 %vm26036_vm14, %v30833_v45 }
 0x9cd   :  { %25501 = vmatprep.subr.mxu1 %v30833_v45 }
 0x9d7   :  { %v14585_v0 = vpop.f32.mrf.mxu0 }
 0x9d9   :  { %v25250_v54 = vpop.f32.mrf.mxu0 }
 0x9db   :  { %v14735_v33 = vpop.f32.mrf.mxu0 }
 0x9dd   :  { %v25260_v37 = vpop.f32.mrf.mxu0 }
 0x9df   :  { %v14661_v52 = vpop.f32.mrf.mxu1 }
 0x9e0   :  { %v14662_v10 = vadd.f32 %v14661_v52, %v14585_v0 }
 0x9e1   :  { %v25255_v20 = vpop.f32.mrf.mxu1 }
 0x9e2   :  { %v14736_v26 = vadd.f32 %v14735_v33, %v14662_v10  ;;  %v14883_v2 = vpop.f32.mrf.mxu0 }
 0x9e3   :  { %v14809_v53 = vpop.f32.mrf.mxu1 }
 0x9e4   :  { %v14810_v1 = vadd.f32 %v14809_v53, %v14736_v26  ;;  %v25270_v16 = vpop.f32.mrf.mxu0 }
 0x9e5   :  { %v25265_v30 = vpop.f32.mrf.mxu1 }
 0x9e6   :  { %v14884_v43 = vadd.f32 %v14883_v2, %v14810_v1 }
 0x9e7   :  { %v14955_v56 = vpop.f32.mrf.mxu1 }
 0x9e8   :  { %v14956_v11 = vadd.f32 %v14955_v56, %v14884_v43 }
 0x9e9   :  { %v25275_v48 = vpop.f32.mrf.mxu1 }
 0x9ea   :  { %v18103_v22 = vsel %vm14507_vm0, %v14956_v11, 0 }
 0x9eb   :  { %v18174_v55 = vand.u32 4294901760, %v18103_v22 }
 0x9ed   :  { %v18175_v47 = vsub.f32 %v18103_v22, %v18174_v55  ;;  %25494 = vmatmul.mubr.f32.vlgmr.msra.gmra.mxu1 %v18174_v55 }
 0x9ee   :  { %25502 = vmatpush3.msk.msra.mxu1 %vm274_vm4, %v30865_v62  ;;  %25503 = vmatprep.mubr.msk.f32.mxu1 %vm26036_vm14, %v30833_v45 }
 0x9ef   :  { %v18176_v35 = vand.u32 4294901760, %v18175_v47  ;;  %25511 = vmatprep.subr.mxu1 %v30833_v45 }
 0x9f1   :  { %v18177_v4 = vsub.f32 %v18175_v47, %v18176_v35  ;;  %25504 = vmatmul.mubr.f32.vlgmr.msra.gmra.mxu1 %v18176_v35 }
 0x9f2   :  { %25512 = vmatpush3.msk.msra.mxu1 %vm274_vm4, %v30865_v62  ;;  %25513 = vmatprep.mubr.msk.f32.mxu1 %vm26036_vm14, %v30833_v45 }
 0x9f3   :  { %v18178_v21 = vand.u32 4294901760, %v18177_v4  ;;  %25521 = vmatprep.subr.mxu1 %v30833_v45 }
 0x9f5   :  { %25489 = vmatmul.mubr.f32.vlgmr.msra.gmra.mxu0 %v18178_v21  ;;  %25514 = vmatmul.mubr.f32.vlgmr.msra.gmra.mxu1 %v18174_v55 }
 0x9f6   :  { %25497 = vmatpush3.msra.mxu0 %v30125_v49  ;;  %25498 = vmatprep.mubr.msk.f32.mxu0 %vm26036_vm14, %v30833_v45 }
 0x9f7   :  { %25506 = vmatprep.subr.mxu0 %v30833_v45  ;;  %25522 = vmatpush3.msra.mxu1 %v30153_v13 }
 0x9f8   :  { %25523 = vmatprep.mubr.msk.f32.mxu1 %vm26036_vm14, %v30833_v45  ;;  %25531 = vmatprep.subr.mxu1 %v30833_v45 }
 0x9f9   :  { %25499 = vmatmul.mubr.f32.vlgmr.msra.gmra.mxu0 %v18175_v47 }
 0x9fa   :  { %25507 = vmatpush3.msra.mxu0 %v30132_v29  ;;  %25508 = vmatprep.mubr.msk.f32.mxu0 %vm26036_vm14, %v30833_v45 }
 0x9fb   :  { %25516 = vmatprep.subr.mxu0 %v30833_v45 }
 0x9fc   :  { %v15034_v50 = vpop.f32.mrf.mxu0 }
 0x9fd   :  { %25509 = vmatmul.mubr.f32.vlgmr.msra.gmra.mxu0 %v18174_v55 }
 0x9fe   :  { %v25280_v42 = vpop.f32.mrf.mxu0  ;;  %25517 = vmatpush3.msk.msra.mxu0 %vm274_vm4, %v30865_v62  ;;  %25518 = vmatprep.mubr.msk.f32.mxu0 %vm26036_vm14, %v30833_v45 }
 0x9ff   :  { %25526 = vmatprep.subr.mxu0 %v30833_v45 }
 0xa00   :  { %v15184_v25 = vpop.f32.mrf.mxu0 }
 0xa02   :  { %v25290_v19 = vpop.f32.mrf.mxu0 }
 0xa04   :  { %v15110_v18 = vpop.f32.mrf.mxu1 }
 0xa05   :  { %v15111_v46 = vadd.f32 %v15110_v18, %v15034_v50  ;;  %v15332_v15 = vpop.f32.mrf.mxu0 }
 0xa06   :  { %v25285_v61 = vpop.f32.mrf.mxu1 }
 0xa07   :  { %v15185_v60 = vadd.f32 %v15184_v25, %v15111_v46  ;;  %v25300_v59 = vpop.f32.mrf.mxu0 }
 0xa08   :  { %v15258_v14 = vpop.f32.mrf.mxu1 }
 0xa09   :  { %v15259_v40 = vadd.f32 %v15258_v14, %v15185_v60  ;;  %v15483_v3 = vpop.f32.mrf.mxu0 }
 0xa0a   :  { %v25295_v7 = vpop.f32.mrf.mxu1 }
 0xa0b   :  { %v15333_v57 = vadd.f32 %v15332_v15, %v15259_v40  ;;  %v25310_v51 = vpop.f32.mrf.mxu0 }
 0xa0c   :  { %v15404_v38 = vpop.f32.mrf.mxu1 }
 0xa0d   :  { %v15405_v8 = vadd.f32 %v15404_v38, %v15333_v57  ;;  %v15633_v41 = vpop.f32.mrf.mxu0 }
 0xa0e   :  { %v25305_v12 = vpop.f32.mrf.mxu1 }
 0xa0f   :  { %v18555_v23 = vsel %vm14507_vm0, %v15405_v8, 0  ;;  %v25320_v36 = vpop.f32.mrf.mxu0 }
 0xa10   :  { %v18623_v39 = vand.u32 4294901760, %v18555_v23  ;;  %v15559_v27 = vpop.f32.mrf.mxu1 }
 0xa11   :  { %v15560_v34 = vadd.f32 %v15559_v27, %v15483_v3  ;;  %v15781_v28 = vpop.f32.mrf.mxu0 }
 0xa12   :  { %v18624_v63 = vsub.f32 %v18555_v23, %v18623_v39  ;;  %v25315_v31 = vpop.f32.mrf.mxu1  ;;  %25524 = vmatmul.mubr.f32.vlgmr.msra.gmra.mxu1 %v18623_v39 }
 0xa13   :  { %v15634_v6 = vadd.f32 %v15633_v41, %v15560_v34  ;;  %v25330_v32 = vpop.f32.mrf.mxu0  ;;  %25532 = vmatpush3.msk.msra.mxu1 %vm274_vm4, %v30865_v62  ;;  %25533 = vmatprep.mubr.msk.f32.mxu1 %vm26036_vm14, %v30833_v45 }
 0xa14   :  { %v18625_v44 = vand.u32 4294901760, %v18624_v63  ;;  %v15707_v5 = vpop.f32.mrf.mxu1  ;;  %25541 = vmatprep.subr.mxu1 %v30833_v45 }
 0xa15   :  { %v15708_v17 = vadd.f32 %v15707_v5, %v15634_v6  ;;  %v15932_v24 = vpop.f32.mrf.mxu0 }
 0xa16   :  { %v18626_v58 = vsub.f32 %v18624_v63, %v18625_v44  ;;  %v25325_v9 = vpop.f32.mrf.mxu1  ;;  %25534 = vmatmul.mubr.f32.vlgmr.msra.gmra.mxu1 %v18625_v44 }
 0xa17   :  { %v15782_v0 = vadd.f32 %v15781_v28, %v15708_v17  ;;  %v25340_v54 = vpop.f32.mrf.mxu0  ;;  %25542 = vmatpush3.msk.msra.mxu1 %vm274_vm4, %v30865_v62  ;;  %25543 = vmatprep.mubr.msk.f32.mxu1 %vm26036_vm14, %v30833_v45 }
 0xa18   :  { %v18627_v33 = vand.u32 4294901760, %v18626_v58  ;;  %v15853_v37 = vpop.f32.mrf.mxu1  ;;  %25551 = vmatprep.subr.mxu1 %v30833_v45 }
 0xa19   :  { %v15854_v52 = vadd.f32 %v15853_v37, %v15782_v0  ;;  %v16082_v10 = vpop.f32.mrf.mxu0 }
 0xa1a   :  { %v25335_v20 = vpop.f32.mrf.mxu1  ;;  %25519 = vmatmul.mubr.f32.vlgmr.msra.gmra.mxu0 %v18627_v33  ;;  %25544 = vmatmul.mubr.f32.vlgmr.msra.gmra.mxu1 %v18623_v39 }
 0xa1b   :  { %v19004_v26 = vsel %vm14507_vm0, %v15854_v52, 0  ;;  %25527 = vmatpush3.msra.mxu0 %v30125_v49  ;;  %25528 = vmatprep.mubr.msk.f32.mxu0 %vm26036_vm14, %v30833_v45  ;;  %v25350_v2 = vpop.f32.mrf.mxu0 }
 0xa1c   :  { %v30205_v53 = vand.u32 4294901760, %v19004_v26  ;;  %v16008_v1 = vpop.f32.mrf.mxu1  ;;  %25536 = vmatprep.subr.mxu0 %v30833_v45  ;;  %25552 = vmatpush3.msra.mxu1 %v30153_v13 }
 0xa1d   :  { %v16009_v16 = vadd.f32 %v16008_v1, %v15932_v24  ;;  %v16230_v30 = vpop.f32.mrf.mxu0  ;;  %25553 = vmatprep.mubr.msk.f32.mxu1 %vm26036_vm14, %v30833_v45  ;;  %25561 = vmatprep.subr.mxu1 %v30833_v45 }
 0xa1e   :  { %v19073_v43 = vsub.f32 %v19004_v26, %v30205_v53  ;;  %v25345_v56 = vpop.f32.mrf.mxu1  ;;  %25529 = vmatmul.mubr.f32.vlgmr.msra.gmra.mxu0 %v18624_v63  ;;  %25554 = vmatmul.mubr.f32.vlgmr.msra.gmra.mxu1 %v30205_v53 }
 0xa1f   :  { %v16083_v11 = vadd.f32 %v16082_v10, %v16009_v16  ;;  %25537 = vmatpush3.msra.mxu0 %v30132_v29  ;;  %25538 = vmatprep.mubr.msk.f32.mxu0 %vm26036_vm14, %v30833_v45  ;;  %v25360_v48 = vpop.f32.mrf.mxu0 }
 0xa20   :  { %v19074_v22 = vand.u32 4294901760, %v19073_v43  ;;  %v16156_v55 = vpop.f32.mrf.mxu1  ;;  %25546 = vmatprep.subr.mxu0 %v30833_v45  ;;  %25562 = vmatpush3.msk.msra.mxu1 %vm274_vm4, %v30865_v62 }
 0xa21   :  { %v16157_v47 = vadd.f32 %v16156_v55, %v16083_v11  ;;  %v16381_v35 = vpop.f32.mrf.mxu0  ;;  %25563 = vmatprep.mubr.msk.f32.mxu1 %vm26036_vm14, %v30833_v45  ;;  %25571 = vmatprep.subr.mxu1 %v30833_v45 }
 0xa22   :  { %v19075_v4 = vsub.f32 %v19073_v43, %v19074_v22  ;;  %v25355_v21 = vpop.f32.mrf.mxu1  ;;  %25539 = vmatmul.mubr.f32.vlgmr.msra.gmra.mxu0 %v18623_v39  ;;  %25564 = vmatmul.mubr.f32.vlgmr.msra.gmra.mxu1 %v19074_v22 }
 0xa23   :  { %v16231_v50 = vadd.f32 %v16230_v30, %v16157_v47  ;;  %25547 = vmatpush3.msk.msra.mxu0 %vm274_vm4, %v30865_v62  ;;  %25548 = vmatprep.mubr.msk.f32.mxu0 %vm26036_vm14, %v30833_v45  ;;  %v25370_v42 = vpop.f32.mrf.mxu0 }
 0xa24   :  { %v19076_v25 = vand.u32 4294901760, %v19075_v4  ;;  %v16302_v19 = vpop.f32.mrf.mxu1  ;;  %25556 = vmatprep.subr.mxu0 %v30833_v45  ;;  %25572 = vmatpush3.msk.msra.mxu1 %vm274_vm4, %v30865_v62 }
 0xa25   :  { %v16303_v18 = vadd.f32 %v16302_v19, %v16231_v50  ;;  %v16531_v46 = vpop.f32.mrf.mxu0  ;;  %25573 = vmatprep.mubr.msk.f32.mxu1 %vm26036_vm14, %v30833_v45  ;;  %25581 = vmatprep.subr.mxu1 %v30833_v45 }
 0xa26   :  { %v25365_v15 = vpop.f32.mrf.mxu1  ;;  %25549 = vmatmul.mubr.f32.vlgmr.msra.gmra.mxu0 %v19076_v25  ;;  %25574 = vmatmul.mubr.f32.vlgmr.msra.gmra.mxu1 %v30205_v53 }
 0xa27   :  { %v19453_v61 = vsel %vm14507_vm0, %v16303_v18, 0  ;;  %25557 = vmatpush3.msra.mxu0 %v30125_v49  ;;  %25558 = vmatprep.mubr.msk.f32.mxu0 %vm26036_vm14, %v30833_v45  ;;  %v25380_v60 = vpop.f32.mrf.mxu0 }
 0xa28   :  { %v30238_v59 = vand.u32 4294901760, %v19453_v61  ;;  %v16457_v14 = vpop.f32.mrf.mxu1  ;;  %25566 = vmatprep.subr.mxu0 %v30833_v45  ;;  %25582 = vmatpush3.msra.mxu1 %v30153_v13 }
 0xa29   :  { %v16458_v40 = vadd.f32 %v16457_v14, %v16381_v35  ;;  %v16679_v3 = vpop.f32.mrf.mxu0  ;;  %25583 = vmatprep.mubr.msk.f32.mxu1 %vm26036_vm14, %v30833_v45  ;;  %25591 = vmatprep.subr.mxu1 %v30833_v45 }
 0xa2a   :  { %v19522_v7 = vsub.f32 %v19453_v61, %v30238_v59  ;;  %v25375_v57 = vpop.f32.mrf.mxu1  ;;  %25559 = vmatmul.mubr.f32.vlgmr.msra.gmra.mxu0 %v19073_v43  ;;  %25584 = vmatmul.mubr.f32.vlgmr.msra.gmra.mxu1 %v30238_v59 }
 0xa2b   :  { %v16532_v51 = vadd.f32 %v16531_v46, %v16458_v40  ;;  %25567 = vmatpush3.msra.mxu0 %v30132_v29  ;;  %25568 = vmatprep.mubr.msk.f32.mxu0 %vm26036_vm14, %v30833_v45  ;;  %v25390_v38 = vpop.f32.mrf.mxu0 }
 0xa2c   :  { %v19523_v8 = vand.u32 4294901760, %v19522_v7  ;;  %v16605_v41 = vpop.f32.mrf.mxu1  ;;  %25576 = vmatprep.subr.mxu0 %v30833_v45  ;;  %25592 = vmatpush3.msk.msra.mxu1 %vm274_vm4, %v30865_v62 }
 0xa2d   :  { %v16606_v12 = vadd.f32 %v16605_v41, %v16532_v51  ;;  %v16830_v23 = vpop.f32.mrf.mxu0  ;;  %25593 = vmatprep.mubr.msk.f32.mxu1 %vm26036_vm14, %v30833_v45  ;;  %25601 = vmatprep.subr.mxu1 %v30833_v45 }
 0xa2e   :  { %v19524_v36 = vsub.f32 %v19522_v7, %v19523_v8  ;;  %v25385_v39 = vpop.f32.mrf.mxu1  ;;  %25569 = vmatmul.mubr.f32.vlgmr.msra.gmra.mxu0 %v30205_v53  ;;  %25594 = vmatmul.mubr.f32.vlgmr.msra.gmra.mxu1 %v19523_v8 }
 0xa2f   :  { %v16680_v27 = vadd.f32 %v16679_v3, %v16606_v12  ;;  %25577 = vmatpush3.msk.msra.mxu0 %vm274_vm4, %v30865_v62  ;;  %25578 = vmatprep.mubr.msk.f32.mxu0 %vm26036_vm14, %v30833_v45  ;;  %v25400_v34 = vpop.f32.mrf.mxu0 }
 0xa30   :  { %v19525_v28 = vand.u32 4294901760, %v19524_v36  ;;  %v16751_v63 = vpop.f32.mrf.mxu1  ;;  %25586 = vmatprep.subr.mxu0 %v30833_v45  ;;  %25602 = vmatpush3.msk.msra.mxu1 %vm274_vm4, %v30865_v62 }
 0xa31   :  { %v16752_v31 = vadd.f32 %v16751_v63, %v16680_v27  ;;  %v16980_v6 = vpop.f32.mrf.mxu0  ;;  %25603 = vmatprep.mubr.msk.f32.mxu1 %vm26036_vm14, %v30833_v45  ;;  %25611 = vmatprep.subr.mxu1 %v30833_v45 }
 0xa32   :  { %v25395_v32 = vpop.f32.mrf.mxu1  ;;  %25579 = vmatmul.mubr.f32.vlgmr.msra.gmra.mxu0 %v19525_v28  ;;  %25604 = vmatmul.mubr.f32.vlgmr.msra.gmra.mxu1 %v30238_v59 }
 0xa33   :  { %v19902_v44 = vsel %vm14507_vm0, %v16752_v31, 0  ;;  %25587 = vmatpush3.msra.mxu0 %v30125_v49  ;;  %25588 = vmatprep.mubr.msk.f32.mxu0 %vm26036_vm14, %v30833_v45  ;;  %v25410_v5 = vpop.f32.mrf.mxu0 }
 0xa34   :  { %v19970_v17 = vand.u32 4294901760, %v19902_v44  ;;  %v16906_v24 = vpop.f32.mrf.mxu1  ;;  %25596 = vmatprep.subr.mxu0 %v30833_v45  ;;  %25612 = vmatpush3.msra.mxu1 %v30153_v13 }
 0xa35   :  { %v16907_v58 = vadd.f32 %v16906_v24, %v16830_v23  ;;  %v17128_v9 = vpop.f32.mrf.mxu0  ;;  %25613 = vmatprep.mubr.msk.f32.mxu1 %vm26036_vm14, %v30833_v45  ;;  %25621 = vmatprep.subr.mxu1 %v30833_v45 }
 0xa36   :  { %v19971_v0 = vsub.f32 %v19902_v44, %v19970_v17  ;;  %v25405_v54 = vpop.f32.mrf.mxu1  ;;  %25589 = vmatmul.mubr.f32.vlgmr.msra.gmra.mxu0 %v19522_v7  ;;  %25614 = vmatmul.mubr.f32.vlgmr.msra.gmra.mxu1 %v19970_v17 }
 0xa37   :  { %v16981_v33 = vadd.f32 %v16980_v6, %v16907_v58  ;;  %25597 = vmatpush3.msra.mxu0 %v30132_v29  ;;  %25598 = vmatprep.mubr.msk.f32.mxu0 %vm26036_vm14, %v30833_v45  ;;  %v25420_v37 = vpop.f32.mrf.mxu0 }
 0xa38   :  { %v19972_v52 = vand.u32 4294901760, %v19971_v0  ;;  %v17054_v10 = vpop.f32.mrf.mxu1  ;;  %25606 = vmatprep.subr.mxu0 %v30833_v45  ;;  %25622 = vmatpush3.msk.msra.mxu1 %vm274_vm4, %v30865_v62 }
 0xa39   :  { %v17055_v20 = vadd.f32 %v17054_v10, %v16981_v33  ;;  %25623 = vmatprep.mubr.msk.f32.mxu1 %vm26036_vm14, %v30833_v45  ;;  %25631 = vmatprep.subr.mxu1 %v30833_v45 }
 0xa3a   :  { %v19973_v26 = vsub.f32 %v19971_v0, %v19972_v52  ;;  %v25415_v2 = vpop.f32.mrf.mxu1  ;;  %25599 = vmatmul.mubr.f32.vlgmr.msra.gmra.mxu0 %v30238_v59  ;;  %25624 = vmatmul.mubr.f32.vlgmr.msra.gmra.mxu1 %v19972_v52 }
 0xa3b   :  { %v17129_v53 = vadd.f32 %v17128_v9, %v17055_v20  ;;  %25607 = vmatpush3.msk.msra.mxu0 %vm274_vm4, %v30865_v62  ;;  %25608 = vmatprep.mubr.msk.f32.mxu0 %vm26036_vm14, %v30833_v45 }
 0xa3c   :  { %v19974_v1 = vand.u32 4294901760, %v19973_v26  ;;  %v17200_v16 = vpop.f32.mrf.mxu1  ;;  %25616 = vmatprep.subr.mxu0 %v30833_v45  ;;  %25632 = vmatpush3.msk.msra.mxu1 %vm274_vm4, %v30865_v62 }
 0xa3d   :  { %v17201_v30 = vadd.f32 %v17200_v16, %v17129_v53  ;;  %25633 = vmatprep.mubr.msk.f32.mxu1 %vm26036_vm14, %v30833_v45  ;;  %25641 = vmatprep.subr.mxu1 %v30833_v45 }
 0xa3e   :  { %25609 = vmatmul.mubr.f32.vlgmr.msra.gmra.mxu0 %v19974_v1  ;;  %v25425_v43 = vpop.f32.mrf.mxu1  ;;  %25634 = vmatmul.mubr.f32.vlgmr.msra.gmra.mxu1 %v19970_v17 }
 0xa3f   :  { %v20351_v56 = vsel %vm14507_vm0, %v17201_v30, 0  ;;  %25617 = vmatpush3.msra.mxu0 %v30125_v49  ;;  %25618 = vmatprep.mubr.msk.f32.mxu0 %vm26036_vm14, %v30833_v45 }
 0xa40   :  { %v20419_v11 = vand.u32 4294901760, %v20351_v56  ;;  %25626 = vmatprep.subr.mxu0 %v30833_v45  ;;  %25642 = vmatpush3.msra.mxu1 %v30153_v13 }
 0xa41   :  { %25643 = vmatprep.mubr.msk.f32.mxu1 %vm26036_vm14, %v30833_v45  ;;  %25651 = vmatprep.subr.mxu1 %v30833_v45 }
 0xa42   :  { %v20420_v48 = vsub.f32 %v20351_v56, %v20419_v11  ;;  %25619 = vmatmul.mubr.f32.vlgmr.msra.gmra.mxu0 %v19971_v0  ;;  %25644 = vmatmul.mubr.f32.vlgmr.msra.gmra.mxu1 %v20419_v11 }
 0xa43   :  { %25627 = vmatpush3.msra.mxu0 %v30132_v29  ;;  %25628 = vmatprep.mubr.msk.f32.mxu0 %vm26036_vm14, %v30833_v45 }
 0xa44   :  { %v20421_v22 = vand.u32 4294901760, %v20420_v48  ;;  %25636 = vmatprep.subr.mxu0 %v30833_v45  ;;  %25652 = vmatpush3.msk.msra.mxu1 %vm274_vm4, %v30865_v62 }
 0xa45   :  { %25653 = vmatprep.mubr.msk.f32.mxu1 %vm26036_vm14, %v30833_v45  ;;  %25661 = vmatprep.subr.mxu1 %v30833_v45 }
 0xa46   :  { %v20422_v55 = vsub.f32 %v20420_v48, %v20421_v22  ;;  %25629 = vmatmul.mubr.f32.vlgmr.msra.gmra.mxu0 %v19970_v17  ;;  %25654 = vmatmul.mubr.f32.vlgmr.msra.gmra.mxu1 %v20421_v22 }
 0xa47   :  { %25637 = vmatpush3.msk.msra.mxu0 %vm274_vm4, %v30865_v62  ;;  %25638 = vmatprep.mubr.msk.f32.mxu0 %vm26036_vm14, %v30833_v45 }
 0xa48   :  { %v20423_v47 = vand.u32 4294901760, %v20422_v55  ;;  %25646 = vmatprep.subr.mxu0 %v30833_v45  ;;  %25662 = vmatpush3.msk.msra.mxu1 %vm274_vm4, %v30865_v62 }
 0xa49   :  { %25663 = vmatprep.mubr.msk.f32.mxu1 %vm26036_vm14, %v30833_v45  ;;  %25671 = vmatprep.subr.mxu1 %v30833_v45 }
 0xa4a   :  { %25639 = vmatmul.mubr.f32.vlgmr.msra.gmra.mxu0 %v20423_v47  ;;  %25664 = vmatmul.mubr.f32.vlgmr.msra.gmra.mxu1 %v20419_v11 }
 0xa4b   :  { %25647 = vmatpush3.msra.mxu0 %v30125_v49  ;;  %25648 = vmatprep.mubr.msk.f32.mxu0 %vm26036_vm14, %v30833_v45 }
 0xa4c   :  { %25656 = vmatprep.subr.mxu0 %v30833_v45  ;;  %25672 = vmatpush3.msra.mxu1 %v30153_v13 }
 0xa4d   :  { %25673 = vmatprep.mubr.msk.f32.mxu1 %vm26036_vm14, %v30833_v45  ;;  %25681 = vmatprep.subr.mxu1 %v30833_v45 }
 0xa4e   :  { %25649 = vmatmul.mubr.f32.vlgmr.msra.gmra.mxu0 %v20420_v48 }
 0xa4f   :  { %25657 = vmatpush3.msra.mxu0 %v30132_v29  ;;  %25658 = vmatprep.mubr.msk.f32.mxu0 %vm26036_vm14, %v30833_v45 }
 0xa50   :  { %25666 = vmatprep.subr.mxu0 %v30833_v45 }
 0xa52   :  { %25659 = vmatmul.mubr.f32.vlgmr.msra.gmra.mxu0 %v20419_v11 }
 0xa53   :  { %25667 = vmatpush3.msk.msra.mxu0 %vm274_vm4, %v30865_v62  ;;  %25668 = vmatprep.mubr.msk.f32.mxu0 %vm26036_vm14, %v30833_v45 }
 0xa54   :  { %25676 = vmatprep.subr.mxu0 %v30833_v45 }
 0xa5a   :  { %v17279_v35 = vpop.f32.mrf.mxu0 }
 0xa5c   :  { %v25430_v4 = vpop.f32.mrf.mxu0 }
 0xa5e   :  { %v17429_v21 = vpop.f32.mrf.mxu0 }
 0xa60   :  { %v25440_v50 = vpop.f32.mrf.mxu0 }
 0xa62   :  { %v17355_v42 = vpop.f32.mrf.mxu1 }
 0xa63   :  { %v17356_v25 = vadd.f32 %v17355_v42, %v17279_v35 }
 0xa64   :  { %v25435_v19 = vpop.f32.mrf.mxu1  ;;  %v17577_v18 = vpop.f32.mrf.mxu0 }
 0xa65   :  { %v17430_v46 = vadd.f32 %v17429_v21, %v17356_v25 }
 0xa66   :  { %v17503_v15 = vpop.f32.mrf.mxu1  ;;  %v25450_v61 = vpop.f32.mrf.mxu0 }
 0xa67   :  { %v17504_v60 = vadd.f32 %v17503_v15, %v17430_v46 }
 0xa68   :  { %v25445_v59 = vpop.f32.mrf.mxu1 }
 0xa69   :  { %v17578_v14 = vadd.f32 %v17577_v18, %v17504_v60 }
 0xa6a   :  { %v17649_v40 = vpop.f32.mrf.mxu1 }
 0xa6b   :  { %v17650_v3 = vadd.f32 %v17649_v40, %v17578_v14 }
 0xa6c   :  { %v25455_v7 = vpop.f32.mrf.mxu1 }
 0xa6d   :  { %v20800_v57 = vsel %vm14507_vm0, %v17650_v3, 0 }
 0xa6e   :  { %v20868_v51 = vand.u32 4294901760, %v20800_v57 }
 0xa70   :  { %v20869_v38 = vsub.f32 %v20800_v57, %v20868_v51  ;;  %25674 = vmatmul.mubr.f32.vlgmr.msra.gmra.mxu1 %v20868_v51 }
 0xa71   :  { %25682 = vmatpush3.msk.msra.mxu1 %vm274_vm4, %v30865_v62  ;;  %25683 = vmatprep.mubr.msk.f32.mxu1 %vm26036_vm14, %v30833_v45 }
 0xa72   :  { %v20870_v8 = vand.u32 4294901760, %v20869_v38  ;;  %25691 = vmatprep.subr.mxu1 %v30833_v45 }
 0xa74   :  { %v20871_v41 = vsub.f32 %v20869_v38, %v20870_v8  ;;  %25684 = vmatmul.mubr.f32.vlgmr.msra.gmra.mxu1 %v20870_v8 }
 0xa75   :  { %25692 = vmatpush3.msk.msra.mxu1 %vm274_vm4, %v30865_v62  ;;  %25693 = vmatprep.mubr.msk.f32.mxu1 %vm26036_vm14, %v30833_v45 }
 0xa76   :  { %v20872_v12 = vand.u32 4294901760, %v20871_v41  ;;  %25701 = vmatprep.subr.mxu1 %v30833_v45 }
 0xa78   :  { %25669 = vmatmul.mubr.f32.vlgmr.msra.gmra.mxu0 %v20872_v12  ;;  %25694 = vmatmul.mubr.f32.vlgmr.msra.gmra.mxu1 %v20868_v51 }
 0xa79   :  { %25677 = vmatpush3.msra.mxu0 %v30125_v49  ;;  %25678 = vmatprep.mubr.msk.f32.mxu0 %vm26036_vm14, %v30833_v45 }
 0xa7a   :  { %25686 = vmatprep.subr.mxu0 %v30833_v45  ;;  %25702 = vmatpush3.msra.mxu1 %v30153_v13 }
 0xa7b   :  { %v17728_v23 = vpop.f32.mrf.mxu0  ;;  %25703 = vmatprep.mubr.msk.f32.mxu1 %vm26036_vm14, %v30833_v45  ;;  %25711 = vmatprep.subr.mxu1 %v30833_v45 }
 0xa7c   :  { %25679 = vmatmul.mubr.f32.vlgmr.msra.gmra.mxu0 %v20869_v38 }
 0xa7d   :  { %25687 = vmatpush3.msra.mxu0 %v30132_v29  ;;  %25688 = vmatprep.mubr.msk.f32.mxu0 %vm26036_vm14, %v30833_v45  ;;  %v25460_v36 = vpop.f32.mrf.mxu0 }
 0xa7e   :  { %25696 = vmatprep.subr.mxu0 %v30833_v45 }
 0xa7f   :  { %v17878_v39 = vpop.f32.mrf.mxu0 }
 0xa80   :  { %25689 = vmatmul.mubr.f32.vlgmr.msra.gmra.mxu0 %v20868_v51 }
 0xa81   :  { %v25470_v27 = vpop.f32.mrf.mxu0  ;;  %25697 = vmatpush3.msk.msra.mxu0 %vm274_vm4, %v30865_v62  ;;  %25698 = vmatprep.mubr.msk.f32.mxu0 %vm26036_vm14, %v30833_v45 }
 0xa82   :  { %25706 = vmatprep.subr.mxu0 %v30833_v45 }
 0xa83   :  { %v17804_v13 = vpop.f32.mrf.mxu1 }
 0xa84   :  { %v17805_v34 = vadd.f32 %v17804_v13, %v17728_v23 }
 0xa85   :  { %v25465_v28 = vpop.f32.mrf.mxu1  ;;  %v18026_v63 = vpop.f32.mrf.mxu0 }
 0xa86   :  { %v17879_v31 = vadd.f32 %v17878_v39, %v17805_v34 }
 0xa87   :  { %v17952_v6 = vpop.f32.mrf.mxu1  ;;  %v25480_v32 = vpop.f32.mrf.mxu0 }
 0xa88   :  { %v17953_v44 = vadd.f32 %v17952_v6, %v17879_v31 }
 0xa89   :  { %v25475_v5 = vpop.f32.mrf.mxu1 }
 0xa8a   :  { %v18027_v17 = vadd.f32 %v18026_v63, %v17953_v44 }
 0xa8b   :  { %v18098_v24 = vpop.f32.mrf.mxu1 }
 0xa8c   :  { %v18099_v58 = vadd.f32 %v18098_v24, %v18027_v17 }
 0xa8d   :  { %v25485_v9 = vpop.f32.mrf.mxu1 }
 0xa8e   :  { %v21249_v0 = vsel %vm14507_vm0, %v18099_v58, 0 }
 0xa8f   :  { %v21317_v54 = vand.u32 4294901760, %v21249_v0 }
 0xa91   :  { %v21318_v33 = vsub.f32 %v21249_v0, %v21317_v54  ;;  %25704 = vmatmul.mubr.f32.vlgmr.msra.gmra.mxu1 %v21317_v54 }
 0xa92   :  { %25712 = vmatpush3.msk.msra.mxu1 %vm274_vm4, %v30865_v62  ;;  %25713 = vmatprep.mubr.msk.f32.mxu1 %vm26036_vm14, %v30833_v45 }
 0xa93   :  { %v21319_v37 = vand.u32 4294901760, %v21318_v33  ;;  %25721 = vmatprep.subr.mxu1 %v30833_v45 }
 0xa95   :  { %v21320_v52 = vsub.f32 %v21318_v33, %v21319_v37  ;;  %25714 = vmatmul.mubr.f32.vlgmr.msra.gmra.mxu1 %v21319_v37 }
 0xa96   :  { %25722 = vmatpush3.msk.msra.mxu1 %vm274_vm4, %v30865_v62  ;;  %25723 = vmatprep.mubr.msk.f32.mxu1 %vm26036_vm14, %v30833_v45  ;;  %vm21717_vm4 = vcmask 1042434  }
 0xa97   :  { %v21321_v10 = vand.u32 4294901760, %v21320_v52  ;;  %25745 = vmatprep.subr.mxu1 %v30833_v45 }
 0xa99   :  { %25699 = vmatmul.mubr.f32.vlgmr.msra.gmra.mxu0 %v21321_v10  ;;  %25724 = vmatmul.mubr.f32.vlgmr.msra.gmra.mxu1 %v21317_v54 }
 0xa9a   :  { %25707 = vmatpush3.msra.mxu0 %v30125_v49  ;;  %25708 = vmatprep.mubr.msk.f32.mxu0 %vm26036_vm14, %v30833_v45 }
 0xa9b   :  { %25716 = vmatprep.subr.mxu0 %v30833_v45  ;;  %25761 = vmatprep.mubr.msk.f32.mxu1 %vm26036_vm14, %v30833_v45 }
 0xa9d   :  { %25709 = vmatmul.mubr.f32.vlgmr.msra.gmra.mxu0 %v21318_v33 }
 0xa9e   :  { %25717 = vmatpush3.msra.mxu0 %v30132_v29  ;;  %25718 = vmatprep.mubr.msk.f32.mxu0 %vm26036_vm14, %v30833_v45 }
 0xa9f   :  { %25726 = vmatprep.subr.mxu0 %v30833_v45 }
 0xaa1   :  { %25719 = vmatmul.mubr.f32.vlgmr.msra.gmra.mxu0 %v21317_v54 }
 0xaa2   :  { %25742 = vmatprep.mubr.msk.f32.mxu0 %vm26036_vm14, %v30833_v45 }
 0xaad   :  { %v18256_v62 = vpop.f32.mrf.mxu1 }
 0xaaf   :  { %v25495_v49 = vpop.f32.mrf.mxu1 }
 0xab1   :  { %v18404_v20 = vpop.f32.mrf.mxu1 }
 0xab3   :  { %v25505_v26 = vpop.f32.mrf.mxu1 }
 0xab5   :  { %v18180_v2 = vpop.f32.mrf.mxu0  ;;  %v18550_v53 = vpop.f32.mrf.mxu1 }
 0xab6   :  { %v18257_v1 = vadd.f32 %v18256_v62, %v18180_v2 }
 0xab7   :  { %v25490_v16 = vpop.f32.mrf.mxu0  ;;  %v25515_v30 = vpop.f32.mrf.mxu1 }
 0xab9   :  { %v18330_v43 = vpop.f32.mrf.mxu0 }
 0xaba   :  { %v18331_v29 = vadd.f32 %v18330_v43, %v18257_v1 }
 0xabb   :  { %v25500_v56 = vpop.f32.mrf.mxu0 }
 0xabc   :  { %v18405_v11 = vadd.f32 %v18404_v20, %v18331_v29 }
 0xabd   :  { %v18478_v48 = vpop.f32.mrf.mxu0 }
 0xabe   :  { %v18479_v22 = vadd.f32 %v18478_v48, %v18405_v11 }
 0xabf   :  { %v25510_v55 = vpop.f32.mrf.mxu0 }
 0xac0   :  { %v18551_v47 = vadd.f32 %v18550_v53, %v18479_v22 }
 0xac2   :  { %v21697_v40 = vmax.f32 %v18551_v47, 0.0 }
 0xac4   :  { %v21735_v41 = vrot.slane %v21697_v40, 1  ;;  %v21752_v39 = vrot.slane %v21697_v40, 2  ;;  %v21769_v27 = vrot.slane %v21697_v40, 3 }
 0xad2   :  { %v18705_v35 = vpop.f32.mrf.mxu1 }
 0xad4   :  { %v25525_v4 = vpop.f32.mrf.mxu1 }
 0xad6   :  { %v18853_v21 = vpop.f32.mrf.mxu1 }
 0xad8   :  { %v25535_v50 = vpop.f32.mrf.mxu1 }
 0xada   :  { %v18629_v42 = vpop.f32.mrf.mxu0  ;;  %v18999_v25 = vpop.f32.mrf.mxu1 }
 0xadb   :  { %v18706_v19 = vadd.f32 %v18705_v35, %v18629_v42 }
 0xadc   :  { %v25520_v18 = vpop.f32.mrf.mxu0  ;;  %v25545_v46 = vpop.f32.mrf.mxu1 }
 0xade   :  { %v18779_v15 = vpop.f32.mrf.mxu0  ;;  %v19154_v61 = vpop.f32.mrf.mxu1 }
 0xadf   :  { %v18780_v60 = vadd.f32 %v18779_v15, %v18706_v19 }
 0xae0   :  { %v25530_v59 = vpop.f32.mrf.mxu0  ;;  %v25555_v14 = vpop.f32.mrf.mxu1 }
 0xae1   :  { %v18854_v3 = vadd.f32 %v18853_v21, %v18780_v60 }
 0xae2   :  { %v18927_v7 = vpop.f32.mrf.mxu0  ;;  %v19302_v57 = vpop.f32.mrf.mxu1 }
 0xae3   :  { %v18928_v51 = vadd.f32 %v18927_v7, %v18854_v3 }
 0xae4   :  { %v25540_v38 = vpop.f32.mrf.mxu0  ;;  %v25565_v8 = vpop.f32.mrf.mxu1 }
 0xae5   :  { %v19000_v12 = vadd.f32 %v18999_v25, %v18928_v51 }
 0xae6   :  { %v19078_v23 = vpop.f32.mrf.mxu0  ;;  %v19448_v36 = vpop.f32.mrf.mxu1 }
 0xae7   :  { %v21698_v13 = vmax.f32 %v19000_v12, 0.0  ;;  %v19155_v34 = vadd.f32 %v19154_v61, %v19078_v23 }
 0xae8   :  { %v25550_v28 = vpop.f32.mrf.mxu0  ;;  %v25575_v63 = vpop.f32.mrf.mxu1 }
 0xae9   :  { %v21713_v31 = vrot.slane %v21698_v13, 7  ;;  %v21736_v6 = vsel %vm21714_vm2, %v21698_v13, %v21735_v41  ;;  %v21753_v32 = vrot.slane %v21698_v13, 1  ;;  %v21770_v44 = vrot.slane %v21698_v13, 2 }
 0xaea   :  { %v19228_v5 = vpop.f32.mrf.mxu0  ;;  %v19603_v17 = vpop.f32.mrf.mxu1 }
 0xaeb   :  { %v21715_v24 = vsel %vm21714_vm2, %v21713_v31, %v21697_v40  ;;  %v19229_v58 = vadd.f32 %v19228_v5, %v19155_v34  ;;  %v21754_v9 = vsel %vm21714_vm2, %v21753_v32, %v21752_v39  ;;  %v21771_v0 = vsel %vm21714_vm2, %v21770_v44, %v21769_v27 }
 0xaec   :  { %v25560_v54 = vpop.f32.mrf.mxu0  ;;  %v25585_v33 = vpop.f32.mrf.mxu1 }
 0xaed   :  { %v19303_v37 = vadd.f32 %v19302_v57, %v19229_v58 }
 0xaee   :  { %v19376_v52 = vpop.f32.mrf.mxu0  ;;  %v19751_v10 = vpop.f32.mrf.mxu1 }
 0xaef   :  { %v19377_v62 = vadd.f32 %v19376_v52, %v19303_v37 }
 0xaf0   :  { %v25570_v49 = vpop.f32.mrf.mxu0  ;;  %v25595_v20 = vpop.f32.mrf.mxu1 }
 0xaf1   :  { %v19449_v26 = vadd.f32 %v19448_v36, %v19377_v62 }
 0xaf2   :  { %v19527_v2 = vpop.f32.mrf.mxu0  ;;  %v19897_v53 = vpop.f32.mrf.mxu1 }
 0xaf3   :  { %v21699_v1 = vmax.f32 %v19449_v26, 0.0  ;;  %v19604_v16 = vadd.f32 %v19603_v17, %v19527_v2 }
 0xaf4   :  { %v25580_v30 = vpop.f32.mrf.mxu0  ;;  %v25605_v43 = vpop.f32.mrf.mxu1 }
 0xaf5   :  { %v21716_v29 = vrot.slane %v21699_v1, 6  ;;  %v21737_v56 = vrot.slane %v21699_v1, 7  ;;  %v21755_v11 = vsel %vm21717_vm4, %v21699_v1, %v21754_v9  ;;  %v21772_v48 = vrot.slane %v21699_v1, 1 }
 0xaf6   :  { %v19677_v22 = vpop.f32.mrf.mxu0  ;;  %v20052_v55 = vpop.f32.mrf.mxu1 }
 0xaf7   :  { %v21718_v47 = vsel %vm21717_vm4, %v21716_v29, %v21715_v24  ;;  %v21738_v35 = vsel %vm21717_vm4, %v21737_v56, %v21736_v6  ;;  %v19678_v4 = vadd.f32 %v19677_v22, %v19604_v16  ;;  %v21773_v21 = vsel %vm21717_vm4, %v21772_v48, %v21771_v0 }
 0xaf8   :  { %v25590_v50 = vpop.f32.mrf.mxu0  ;;  %v25615_v42 = vpop.f32.mrf.mxu1 }
 0xaf9   :  { %v19752_v25 = vadd.f32 %v19751_v10, %v19678_v4 }
 0xafa   :  { %v19825_v19 = vpop.f32.mrf.mxu0  ;;  %v20200_v18 = vpop.f32.mrf.mxu1 }
 0xafb   :  { %v19826_v46 = vadd.f32 %v19825_v19, %v19752_v25 }
 0xafc   :  { %v25600_v15 = vpop.f32.mrf.mxu0  ;;  %v25625_v61 = vpop.f32.mrf.mxu1 }
 0xafd   :  { %v19898_v60 = vadd.f32 %v19897_v53, %v19826_v46 }
 0xafe   :  { %v19976_v59 = vpop.f32.mrf.mxu0  ;;  %v20346_v14 = vpop.f32.mrf.mxu1 }
 0xaff   :  { %v21700_v40 = vmax.f32 %v19898_v60, 0.0  ;;  %v20053_v3 = vadd.f32 %v20052_v55, %v19976_v59 }
 0xb00   :  { %v25610_v7 = vpop.f32.mrf.mxu0  ;;  %v25635_v57 = vpop.f32.mrf.mxu1 }
 0xb01   :  { %v21719_v51 = vrot.slane %v21700_v40, 5  ;;  %v21739_v38 = vrot.slane %v21700_v40, 6  ;;  %v21756_v8 = vrot.slane %v21700_v40, 7  ;;  %v21774_v41 = vsel %vm21720_vm5, %v21700_v40, %v21773_v21 }
 0xb02   :  { %v20126_v12 = vpop.f32.mrf.mxu0  ;;  %v20501_v23 = vpop.f32.mrf.mxu1 }
 0xb03   :  { %v20127_v36 = vadd.f32 %v20126_v12, %v20053_v3  ;;  %v21757_v39 = vsel %vm21720_vm5, %v21756_v8, %v21755_v11  ;;  %v21740_v27 = vsel %vm21720_vm5, %v21739_v38, %v21738_v35  ;;  %v21721_v13 = vsel %vm21720_vm5, %v21719_v51, %v21718_v47 }
 0xb04   :  { %v25620_v34 = vpop.f32.mrf.mxu0  ;;  %v25645_v28 = vpop.f32.mrf.mxu1 }
 0xb05   :  { %v20201_v63 = vadd.f32 %v20200_v18, %v20127_v36 }
 0xb06   :  { %v20274_v31 = vpop.f32.mrf.mxu0  ;;  %v20649_v6 = vpop.f32.mrf.mxu1 }
 0xb07   :  { %v20275_v32 = vadd.f32 %v20274_v31, %v20201_v63 }
 0xb08   :  { %v25630_v44 = vpop.f32.mrf.mxu0  ;;  %v25655_v5 = vpop.f32.mrf.mxu1 }
 0xb09   :  { %v20347_v17 = vadd.f32 %v20346_v14, %v20275_v32 }
 0xb0a   :  { %v20425_v24 = vpop.f32.mrf.mxu0  ;;  %v20795_v58 = vpop.f32.mrf.mxu1 }
 0xb0b   :  { %v21701_v9 = vmax.f32 %v20347_v17, 0.0  ;;  %v20502_v0 = vadd.f32 %v20501_v23, %v20425_v24 }
 0xb0c   :  { %v25640_v54 = vpop.f32.mrf.mxu0  ;;  %v25665_v33 = vpop.f32.mrf.mxu1 }
 0xb0d   :  { %v21722_v37 = vrot.slane %v21701_v9, 4  ;;  %v21741_v52 = vrot.slane %v21701_v9, 5  ;;  %v21758_v10 = vrot.slane %v21701_v9, 6  ;;  %v21775_v62 = vrot.slane %v21701_v9, 7 }
 0xb0e   :  { %v20575_v49 = vpop.f32.mrf.mxu0 }
 0xb0f   :  { %v20576_v20 = vadd.f32 %v20575_v49, %v20502_v0  ;;  %v21759_v26 = vsel %vm21723_vm6, %v21758_v10, %v21757_v39  ;;  %v21742_v2 = vsel %vm21723_vm6, %v21741_v52, %v21740_v27  ;;  %v21776_v53 = vsel %vm21723_vm6, %v21775_v62, %v21774_v41 }
 0xb10   :  { %v25650_v1 = vpop.f32.mrf.mxu0  ;;  %v21724_v16 = vsel %vm21723_vm6, %v21722_v37, %v21721_v13 }
 0xb11   :  { %v20650_v30 = vadd.f32 %v20649_v6, %v20576_v20  ;;  %v21816_v1 = vld [vmem:[%s30739_s7 + $0x30] sm:$0xff] }
 0xb12   :  { %v20723_v43 = vpop.f32.mrf.mxu0 }
 0xb13   :  { %v20724_v29 = vadd.f32 %v20723_v43, %v20650_v30 }
 0xb14   :  { %v25660_v56 = vpop.f32.mrf.mxu0 }
 0xb15   :  { %v20796_v11 = vadd.f32 %v20795_v58, %v20724_v29 }
 0xb17   :  { %v21702_v48 = vmax.f32 %v20796_v11, 0.0  ;;  %v21814_v11 = vld [vmem:[%s30739_s7 + $0x20] sm:$0xff] }
 0xb19   :  { %v21725_v22 = vrot.slane %v21702_v48, 3  ;;  %v21743_v55 = vrot.slane %v21702_v48, 4  ;;  %v21760_v47 = vrot.slane %v21702_v48, 5  ;;  %v21777_v35 = vrot.slane %v21702_v48, 6 }
 0xb1b   :  { %v21761_v4 = vsel %vm21726_vm7, %v21760_v47, %v21759_v26  ;;  %v21744_v21 = vsel %vm21726_vm7, %v21743_v55, %v21742_v2  ;;  %v30397_v50 = vsel %vm21726_vm7, %v21777_v35, %v21776_v53  ;;  %v21727_v42 = vsel %vm21726_vm7, %v21725_v22, %v21724_v16  ;;  %v21817_v53 = vld [vmem:[%s30739_s7 + $0x38] sm:$0xff]  ;;  %v21815_v16 = vld [vmem:[%s30739_s7 + $0x28] sm:$0xff] }
 0xb1c   :  { %v30417_v48 = vand.u32 4294901760, %v21817_v53  ;;  %v30419_v22 = vand.u32 4294901760, %v21816_v1  ;;  %v30421_v55 = vand.u32 4294901760, %v21815_v16  ;;  %v30423_v47 = vand.u32 4294901760, %v21814_v11 }
 0xb1e   :  { %25727 = vmatpush3.msra.mxu0 %v30417_v48 }
 0xb1f   :  { %25728 = vmatprep.subr.mxu0 %v30833_v45 }
 0xb20   :  { %25729 = vmatpush3.msra.mxu0 %v30419_v22 }
 0xb21   :  { %25730 = vmatprep.subr.mxu0 %v30833_v45 }
 0xb22   :  { %25731 = vmatpush3.msra.mxu0 %v30421_v55 }
 0xb23   :  { %25732 = vmatprep.subr.mxu0 %v30833_v45 }
 0xb24   :  { %25733 = vmatpush3.msra.mxu0 %v30423_v47 }
 0xb25   :  { %25734 = vmatprep.subr.mxu0 %v30833_v45 }
 0xb30   :  { %v20950_v25 = vpop.f32.mrf.mxu1 }
 0xb32   :  { %v25675_v19 = vpop.f32.mrf.mxu1 }
 0xb34   :  { %v21098_v18 = vpop.f32.mrf.mxu1 }
 0xb36   :  { %v25685_v46 = vpop.f32.mrf.mxu1 }
 0xb38   :  { %v20874_v15 = vpop.f32.mrf.mxu0  ;;  %v21244_v61 = vpop.f32.mrf.mxu1 }
 0xb39   :  { %v20951_v60 = vadd.f32 %v20950_v25, %v20874_v15  ;;  %v30437_v25 = vsub.f32 %v21814_v11, %v30423_v47 }
 0xb3a   :  { %v25670_v59 = vpop.f32.mrf.mxu0  ;;  %v25695_v14 = vpop.f32.mrf.mxu1 }
 0xb3b   :  { %v21952_v15 = vand.u32 4294901760, %v30437_v25 }
 0xb3c   :  { %v21024_v40 = vpop.f32.mrf.mxu0 }
 0xb3d   :  { %v21025_v3 = vadd.f32 %v21024_v40, %v20951_v60 }
 0xb3e   :  { %v25680_v7 = vpop.f32.mrf.mxu0 }
 0xb3f   :  { %v21099_v57 = vadd.f32 %v21098_v18, %v21025_v3  ;;  %v21953_v3 = vsub.f32 %v30437_v25, %v21952_v15 }
 0xb40   :  { %v21172_v51 = vpop.f32.mrf.mxu0 }
 0xb41   :  { %v21173_v38 = vadd.f32 %v21172_v51, %v21099_v57  ;;  %v21954_v57 = vand.u32 4294901760, %v21953_v3  ;;  %v21813_v51 = vld [vmem:[%s30739_s7 + $0x18] sm:$0xff] }
 0xb42   :  { %v25690_v8 = vpop.f32.mrf.mxu0 }
 0xb43   :  { %v21245_v41 = vadd.f32 %v21244_v61, %v21173_v38  ;;  %v21812_v38 = vld [vmem:[%s30739_s7 + $0x10] sm:$0xff]  ;;  %v30474_v8 = vand.u32 4294901760, %v21813_v51 }
 0xb45   :  { %v21703_v12 = vmax.f32 %v21245_v41, 0.0  ;;  %v30476_v41 = vand.u32 4294901760, %v21812_v38  ;;  %25735 = vmatpush3.msra.mxu0 %v30474_v8 }
 0xb46   :  { %25736 = vmatprep.subr.mxu0 %v30833_v45 }
 0xb47   :  { %v21728_v23 = vrot.slane %v21703_v12, 2  ;;  %v21745_v33 = vrot.slane %v21703_v12, 3  ;;  %v21762_v37 = vrot.slane %v21703_v12, 4  ;;  %v21779_v10 = vrot.slane %v21703_v12, 5  ;;  %25737 = vmatpush3.msra.mxu0 %v30476_v41 }
 0xb48   :  { %v30479_v12 = vsub.f32 %v21813_v51, %v30474_v8  ;;  %25738 = vmatprep.subr.mxu0 %v30833_v45 }
 0xb49   :  { %v21730_v36 = vsel %vm21729_vm8, %v21728_v23, %v21727_v42  ;;  %v21763_v26 = vsel %vm21729_vm8, %v21762_v37, %v21761_v4  ;;  %v21746_v2 = vsel %vm21729_vm8, %v21745_v33, %v21744_v21  ;;  %v21780_v35 = vsel %vm21729_vm8, %v21779_v10, %v30397_v50 }
 0xb4a   :  { %v30428_v4 = vsub.f32 %v21817_v53, %v30417_v48  ;;  %v30431_v21 = vsub.f32 %v21816_v1, %v30419_v22  ;;  %v30434_v42 = vsub.f32 %v21815_v16, %v30421_v55  ;;  %v30482_v23 = vsub.f32 %v21812_v38, %v30476_v41 }
 0xb4c   :  { %v21931_v50 = vand.u32 4294901760, %v30428_v4  ;;  %v21938_v18 = vand.u32 4294901760, %v30431_v21  ;;  %v21945_v46 = vand.u32 4294901760, %v30434_v42 }
 0xb4e   :  { %v21932_v61 = vsub.f32 %v30428_v4, %v21931_v50  ;;  %v21939_v60 = vsub.f32 %v30431_v21, %v21938_v18  ;;  %v21946_v59 = vsub.f32 %v30434_v42, %v21945_v46 }
 0xb50   :  { %v21933_v14 = vand.u32 4294901760, %v21932_v61  ;;  %v21940_v40 = vand.u32 4294901760, %v21939_v60  ;;  %v21947_v7 = vand.u32 4294901760, %v21946_v59 }
 0xb51   :  { %v21399_v39 = vpop.f32.mrf.mxu1 }
 0xb52   :  { %25746 = vmatpush3.msra.mxu1 %v21933_v14 }
 0xb53   :  { %v25705_v27 = vpop.f32.mrf.mxu1  ;;  %25747 = vmatprep.subr.mxu1 %v30833_v45 }
 0xb54   :  { %25748 = vmatpush3.msra.mxu1 %v21940_v40  ;;  %v21966_v27 = vand.u32 4294901760, %v30482_v23 }
 0xb55   :  { %v21547_v13 = vpop.f32.mrf.mxu1  ;;  %25749 = vmatprep.subr.mxu1 %v30833_v45 }
 0xb56   :  { %25750 = vmatpush3.msra.mxu1 %v21947_v7 }
 0xb57   :  { %v25715_v34 = vpop.f32.mrf.mxu1  ;;  %25751 = vmatprep.subr.mxu1 %v30833_v45 }
 0xb58   :  { %25752 = vmatpush3.msra.mxu1 %v21954_v57 }
 0xb59   :  { %v21323_v28 = vpop.f32.mrf.mxu0  ;;  %v21693_v63 = vpop.f32.mrf.mxu1  ;;  %25753 = vmatprep.subr.mxu1 %v30833_v45 }
 0xb5a   :  { %v21400_v32 = vadd.f32 %v21399_v39, %v21323_v28  ;;  %v21959_v39 = vand.u32 4294901760, %v30479_v12 }
 0xb5b   :  { %v25700_v31 = vpop.f32.mrf.mxu0  ;;  %v25725_v6 = vpop.f32.mrf.mxu1 }
 0xb5c   :  { %v21960_v28 = vsub.f32 %v30479_v12, %v21959_v39 }
 0xb5d   :  { %v21473_v44 = vpop.f32.mrf.mxu0 }
 0xb5e   :  { %v21474_v5 = vadd.f32 %v21473_v44, %v21400_v32  ;;  %v21961_v32 = vand.u32 4294901760, %v21960_v28 }
 0xb5f   :  { %v25710_v17 = vpop.f32.mrf.mxu0 }
 0xb60   :  { %v21548_v24 = vadd.f32 %v21547_v13, %v21474_v5  ;;  %25754 = vmatpush3.msra.mxu1 %v21961_v32 }
 0xb61   :  { %v21621_v58 = vpop.f32.mrf.mxu0  ;;  %25755 = vmatprep.subr.mxu1 %v30833_v45 }
 0xb62   :  { %v21622_v9 = vadd.f32 %v21621_v58, %v21548_v24  ;;  %v21811_v58 = vld [vmem:[%s30739_s7 + $0x8] sm:$0xff] }
 0xb63   :  { %v25720_v0 = vpop.f32.mrf.mxu0 }
 0xb64   :  { %v21694_v54 = vadd.f32 %v21693_v63, %v21622_v9  ;;  %v21967_v63 = vsub.f32 %v30482_v23, %v21966_v27  ;;  %v21810_v9 = vld [vmem:[%s30739_s7] sm:$0xff] }
 0xb65   :  { %v30507_v33 = vand.u32 4294901760, %v21810_v9 }
 0xb66   :  { %v21704_v52 = vmax.f32 %v21694_v54, 0.0  ;;  %v21968_v5 = vand.u32 4294901760, %v21967_v63  ;;  %v30505_v54 = vand.u32 4294901760, %v21811_v58 }
 0xb68   :  { %v21764_v62 = vrot.slane %v21704_v52, 3  ;;  %v21747_v49 = vrot.slane %v21704_v52, 2  ;;  %v21731_v20 = vrot.slane %v21704_v52, 1  ;;  %v21781_v29 = vrot.slane %v21704_v52, 4  ;;  %25756 = vmatpush3.msra.mxu1 %v21968_v5  ;;  %25739 = vmatpush3.msra.mxu0 %v30505_v54 }
 0xb69   :  { %25757 = vmatprep.subr.mxu1 %v30833_v45  ;;  %v30510_v37 = vsub.f32 %v21811_v58, %v30505_v54  ;;  %v30513_v52 = vsub.f32 %v21810_v9, %v30507_v33  ;;  %25740 = vmatprep.subr.mxu0 %v30833_v45 }
 0xb6a   :  { %v21765_v30 = vsel %vm21732_vm9, %v21764_v62, %v21763_v26  ;;  %v21748_v43 = vsel %vm21732_vm9, %v21747_v49, %v21746_v2  ;;  %v21733_v56 = vsel %vm21732_vm9, %v21731_v20, %v21730_v36  ;;  %v21782_v19 = vsel %vm21732_vm9, %v21781_v29, %v21780_v35  ;;  %25741 = vmatpush3.msra.mxu0 %v30507_v33 }
 0xb6b   :  { %21766 = vrot.lane.b32.xlu0 %v21765_v30, %s26037_s15  ;;  %21749 = vrot.lane.b32.xlu1 %v21748_v43, %s26038_s0  ;;  %v21973_v10 = vand.u32 4294901760, %v30510_v37  ;;  %v21980_v62 = vand.u32 4294901760, %v30513_v52 }
 0xb6c   :  { %25764 = vmatprep.subr.mxu0 %v30833_v45 }
 0xb6d   :  { %v21974_v49 = vsub.f32 %v30510_v37, %v21973_v10  ;;  %v21981_v20 = vsub.f32 %v30513_v52, %v21980_v62 }
 0xb6f   :  { %21783 = vrot.lane.b32.xlu1 %v21782_v19, %s26039_s16  ;;  %v21975_v26 = vand.u32 4294901760, %v21974_v49  ;;  %v21982_v2 = vand.u32 4294901760, %v21981_v20 }
 0xb71   :  { %25758 = vmatpush3.msra.mxu1 %v21975_v26 }
 0xb72   :  { %25759 = vmatprep.subr.mxu1 %v30833_v45 }
 0xb73   :  { %25760 = vmatpush3.msra.mxu1 %v21982_v2 }
 0xb74   :  { %25783 = vmatprep.subr.mxu1 %v30833_v45 }
 0xbdd   :  { %v21750_v36 = vpop.permute.xlu1 %21749  ;;  %v21767_v13 = vpop.permute.xlu0 %21766 }
 0xbde   :  { %v21787_v34 = vsel %vm21786_vm10, %v21733_v56, %v21750_v36 }
 0xbdf   :  { %v21788_v6 = vsel %vm13489_vm3, %v21787_v34, %v21767_v13 }
 0xbe1   :  { %v21784_v31 = vpop.permute.xlu1 %21783 }
 0xbe2   :  { %v21790_v44 = vsel %vm21789_vm11, %v21788_v6, %v21784_v31  ;;  %v23192_v6 = vld [vmem:[%s30740_s8] ss:$0 sm:$0xff] }
 0xbe3   :  { %v21792_v17 = vrot.slane %v21790_v44, 2  ;;  %v21796_v24 = vrot.slane %v21790_v44, 4  ;;  %v21800_v0 = vrot.slane %v21790_v44, 6 }
 0xbe5   :  { %21797 = vrot.lane.b32.xlu1 %v21796_v24, %s26040_s22  ;;  %21793 = vrot.lane.b32.xlu0 %v21792_v17, %s26041_s13 }
 0xbe9   :  { %21801 = vrot.lane.b32.xlu0 %v21800_v0, %s26042_s24 }
 0xc57   :  { %v21794_v53 = vpop.permute.xlu0 %21793  ;;  %v21798_v1 = vpop.permute.xlu1 %21797 }
 0xc58   :  { %v21805_v16 = vsel %vm21804_vm12, %v21790_v44, %v21794_v53 }
 0xc59   :  { %v21807_v30 = vsel %vm21806_vm13, %v21805_v16, %v21798_v1 }
 0xc5b   :  { %v21802_v43 = vpop.permute.xlu0 %21801 }
 0xc5c   :  { %v21809_v29 = vsel %vm21808_vm15, %v21807_v30, %v21802_v43 }
 0xc5d   :  { %v21827_v56 = vsel %vm21825_vm1, %v21809_v29, 0  ;;  %v23193_v29 = vld [vmem:[%s30742_s10] ss:$0 sm:$0xff] }
 0xc5e   :  { %v30530_v11 = vand.u32 4294901760, %v21827_v56 }
 0xc60   :  { %v21903_v35 = vsub.f32 %v21827_v56, %v30530_v11  ;;  %25762 = vmatmul.mubr.f32.vlgmr.msra.gmra.mxu1 %v30530_v11 }
 0xc61   :  { %25784 = vmatpush3.msra.mxu1 %v30417_v48  ;;  %25799 = vmatprep.mubr.msk.f32.mxu1 %vm26036_vm14, %v30833_v45 }
 0xc62   :  { %v21904_v19 = vand.u32 4294901760, %v21903_v35  ;;  %25785 = vmatprep.subr.mxu1 %v30833_v45 }
 0xc63   :  { %25786 = vmatpush3.msra.mxu1 %v30419_v22 }
 0xc64   :  { %v21905_v61 = vsub.f32 %v21903_v35, %v21904_v19  ;;  %25787 = vmatprep.subr.mxu1 %v30833_v45 }
 0xc65   :  { %25788 = vmatpush3.msra.mxu1 %v30421_v55 }
 0xc66   :  { %v21906_v60 = vand.u32 4294901760, %v21905_v61  ;;  %25789 = vmatprep.subr.mxu1 %v30833_v45 }
 0xc67   :  { %25790 = vmatpush3.msra.mxu1 %v30423_v47 }
 0xc68   :  { %25791 = vmatprep.subr.mxu1 %v30833_v45  ;;  %25743 = vmatmul.mubr.f32.vlgmr.msra.gmra.mxu0 %v21906_v60 }
 0xc69   :  { %25765 = vmatpush3.msra.mxu0 %v30428_v4  ;;  %25792 = vmatpush3.msra.mxu1 %v30474_v8 }
 0xc6a   :  { %25766 = vmatprep.subr.mxu0 %v30833_v45  ;;  %25793 = vmatprep.subr.mxu1 %v30833_v45 }
 0xc6b   :  { %25767 = vmatpush3.msra.mxu0 %v30431_v21  ;;  %25794 = vmatpush3.msra.mxu1 %v30476_v41 }
 0xc6c   :  { %25768 = vmatprep.subr.mxu0 %v30833_v45  ;;  %25795 = vmatprep.subr.mxu1 %v30833_v45 }
 0xc6d   :  { %25769 = vmatpush3.msra.mxu0 %v30434_v42  ;;  %25796 = vmatpush3.msra.mxu1 %v30505_v54  ;;  %v22367_v42 = vld [vmem:[%s30741_s9] sm:$0xff] }
 0xc6e   :  { %25770 = vmatprep.subr.mxu0 %v30833_v45  ;;  %25797 = vmatprep.subr.mxu1 %v30833_v45 }
 0xc6f   :  { %25771 = vmatpush3.msra.mxu0 %v30437_v25  ;;  %25798 = vmatpush3.msra.mxu1 %v30507_v33  ;;  %v30638_v25 = vand.u32 4294901760, %v22367_v42 }
 0xc70   :  { %25772 = vmatprep.subr.mxu0 %v30833_v45  ;;  %25800 = vmatmul.mubr.f32.vlgmr.msra.gmra.mxu1 %v21904_v19 }
 0xc71   :  { %25821 = vmatprep.subr.mxu1 %v30833_v45  ;;  %25773 = vmatpush3.msra.mxu0 %v30479_v12 }
 0xc72   :  { %25822 = vmatpush3.msra.mxu1 %v30417_v48  ;;  %25774 = vmatprep.subr.mxu0 %v30833_v45  ;;  %v22370_v48 = vld [vmem:[%s30741_s9 + $0x18] sm:$0xff] }
 0xc73   :  { %25823 = vmatprep.subr.mxu1 %v30833_v45  ;;  %25775 = vmatpush3.msra.mxu0 %v30482_v23 }
 0xc74   :  { %25824 = vmatpush3.msra.mxu1 %v30419_v22  ;;  %25776 = vmatprep.subr.mxu0 %v30833_v45  ;;  %v22369_v22 = vld [vmem:[%s30741_s9 + $0x10] sm:$0xff] }
 0xc75   :  { %25825 = vmatprep.subr.mxu1 %v30833_v45  ;;  %25777 = vmatpush3.msra.mxu0 %v30510_v37  ;;  %v30631_v4 = vand.u32 4294901760, %v22369_v22 }
 0xc76   :  { %25826 = vmatpush3.msra.mxu1 %v30421_v55  ;;  %25778 = vmatprep.subr.mxu0 %v30833_v45  ;;  %v22368_v55 = vld [vmem:[%s30741_s9 + $0x8] sm:$0xff] }
 0xc77   :  { %25827 = vmatprep.subr.mxu1 %v30833_v45  ;;  %25779 = vmatpush3.msra.mxu0 %v30513_v52  ;;  %v30633_v21 = vand.u32 4294901760, %v22368_v55 }
 0xc78   :  { %25780 = vmatprep.mubr.msk.f32.mxu0 %vm26036_vm14, %v30833_v45  ;;  %25828 = vmatpush3.msra.mxu1 %v30423_v47  ;;  %v30629_v47 = vand.u32 4294901760, %v22370_v48 }
 0xc79   :  { %25781 = vmatmul.mubr.f32.vlgmr.msra.gmra.mxu0 %v21903_v35  ;;  %25802 = vmatprep.subr.mxu0 %v30833_v45 }
 0xc7a   :  { %25829 = vmatprep.subr.mxu1 %v30833_v45  ;;  %25803 = vmatpush3.msra.mxu0 %v21931_v50  ;;  %v30641_v50 = vsub.f32 %v22370_v48, %v30629_v47 }
 0xc7b   :  { %25830 = vmatpush3.msra.mxu1 %v30474_v8  ;;  %25804 = vmatprep.subr.mxu0 %v30833_v45 }
 0xc7c   :  { %25831 = vmatprep.subr.mxu1 %v30833_v45  ;;  %25805 = vmatpush3.msra.mxu0 %v21938_v18  ;;  %v30644_v18 = vsub.f32 %v22369_v22, %v30631_v4  ;;  %v22487_v59 = vand.u32 4294901760, %v30641_v50 }
 0xc7d   :  { %25832 = vmatpush3.msra.mxu1 %v30476_v41  ;;  %25806 = vmatprep.subr.mxu0 %v30833_v45 }
 0xc7e   :  { %25833 = vmatprep.subr.mxu1 %v30833_v45  ;;  %25807 = vmatpush3.msra.mxu0 %v21945_v46  ;;  %v30647_v46 = vsub.f32 %v22368_v55, %v30633_v21  ;;  %v22494_v14 = vand.u32 4294901760, %v30644_v18  ;;  %v22488_v7 = vsub.f32 %v30641_v50, %v22487_v59 }
 0xc7f   :  { %25834 = vmatpush3.msra.mxu1 %v30505_v54  ;;  %25808 = vmatprep.subr.mxu0 %v30833_v45 }
 0xc80   :  { %25835 = vmatprep.subr.mxu1 %v30833_v45  ;;  %25809 = vmatpush3.msra.mxu0 %v21952_v15  ;;  %v30651_v15 = vsub.f32 %v22367_v42, %v30638_v25  ;;  %v22501_v40 = vand.u32 4294901760, %v30647_v46  ;;  %v22495_v57 = vsub.f32 %v30644_v18, %v22494_v14  ;;  %v22489_v38 = vand.u32 4294901760, %v22488_v7 }
 0xc81   :  { %25836 = vmatpush3.msra.mxu1 %v30507_v33  ;;  %25837 = vmatprep.mubr.msk.f32.mxu1 %vm26036_vm14, %v30833_v45 }
 0xc82   :  { %25810 = vmatprep.subr.mxu0 %v30833_v45  ;;  %25838 = vmatmul.mubr.f32.vlgmr.msra.gmra.mxu1 %v30530_v11  ;;  %v22508_v3 = vand.u32 4294901760, %v30651_v15  ;;  %v22502_v51 = vsub.f32 %v30647_v46, %v22501_v40  ;;  %v22496_v8 = vand.u32 4294901760, %v22495_v57 }
 0xc83   :  { %25811 = vmatpush3.msra.mxu0 %v21959_v39  ;;  %25818 = vmatprep.mubr.msk.f32.mxu0 %vm26036_vm14, %v30833_v45 }
 0xc84   :  { %25812 = vmatprep.subr.mxu0 %v30833_v45  ;;  %25851 = vmatprep.subr.mxu1 %v30833_v45  ;;  %v22509_v41 = vsub.f32 %v30651_v15, %v22508_v3  ;;  %v22503_v12 = vand.u32 4294901760, %v22502_v51 }
 0xc85   :  { %25813 = vmatpush3.msra.mxu0 %v21966_v27  ;;  %25859 = vmatprep.mubr.msk.f32.mxu1 %vm26036_vm14, %v30833_v45 }
 0xc86   :  { %25814 = vmatprep.subr.mxu0 %v30833_v45  ;;  %25852 = vmatpush3.msra.mxu1 %v22489_v38  ;;  %v22510_v23 = vand.u32 4294901760, %v22509_v41 }
 0xc87   :  { %25815 = vmatpush3.msra.mxu0 %v21973_v10  ;;  %25853 = vmatprep.subr.mxu1 %v30833_v45 }
 0xc88   :  { %25816 = vmatprep.subr.mxu0 %v30833_v45  ;;  %25854 = vmatpush3.msra.mxu1 %v22496_v8 }
 0xc89   :  { %25817 = vmatpush3.msra.mxu0 %v21980_v62  ;;  %25855 = vmatprep.subr.mxu1 %v30833_v45 }
 0xc8a   :  { %25819 = vmatmul.mubr.f32.vlgmr.msra.gmra.mxu0 %v30530_v11  ;;  %25840 = vmatprep.subr.mxu0 %v30833_v45 }
 0xc8b   :  { %25848 = vmatprep.mubr.msk.f32.mxu0 %vm26036_vm14, %v30833_v45  ;;  %25841 = vmatpush3.msra.mxu0 %v30629_v47 }
 0xc8c   :  { %25842 = vmatprep.subr.mxu0 %v30833_v45  ;;  %25856 = vmatpush3.msra.mxu1 %v22503_v12 }
 0xc8d   :  { %25843 = vmatpush3.msra.mxu0 %v30631_v4  ;;  %25857 = vmatprep.subr.mxu1 %v30833_v45 }
 0xc8e   :  { %25844 = vmatprep.subr.mxu0 %v30833_v45  ;;  %25858 = vmatpush3.msra.mxu1 %v22510_v23 }
 0xc8f   :  { %25845 = vmatpush3.msra.mxu0 %v30633_v21  ;;  %25873 = vmatprep.subr.mxu1 %v30833_v45 }
 0xc90   :  { %25846 = vmatprep.subr.mxu0 %v30833_v45 }
 0xc91   :  { %25847 = vmatpush3.msra.mxu0 %v30638_v25 }
 0xc92   :  { %25862 = vmatprep.subr.mxu0 %v30833_v45 }
 0xd20   :  { %v22019_v36 = vpop.f32.mrf.mxu1 }
 0xd22   :  { %v25763_v39 = vpop.f32.mrf.mxu1 }
 0xd28   :  { %v21908_v27 = vpop.f32.mrf.mxu0 }
 0xd29   :  { %v21909_v32 = vadd.f32 %v23192_v6, %v21908_v27 }
 0xd2a   :  { %v25744_v13 = vpop.f32.mrf.mxu0 }
 0xd2b   :  { %v22020_v5 = vadd.f32 %v22019_v36, %v21909_v32 }
 0xd30   :  { %v22188_v34 = vpop.f32.mrf.mxu1 }
 0xd32   :  { %v25801_v28 = vpop.f32.mrf.mxu1 }
 0xd39   :  { %v22107_v63 = vpop.f32.mrf.mxu0 }
 0xd3a   :  { %v22108_v24 = vadd.f32 %v22107_v63, %v22020_v5 }
 0xd3b   :  { %v25782_v31 = vpop.f32.mrf.mxu0 }
 0xd3c   :  { %v22189_v58 = vadd.f32 %v22188_v34, %v22108_v24 }
 0xd42   :  { %v22362_v44 = vpop.f32.mrf.mxu1 }
 0xd44   :  { %v25839_v17 = vpop.f32.mrf.mxu1 }
 0xd4a   :  { %v22283_v9 = vpop.f32.mrf.mxu0 }
 0xd4b   :  { %v22284_v0 = vadd.f32 %v22283_v9, %v22189_v58 }
 0xd4c   :  { %v25820_v54 = vpop.f32.mrf.mxu0 }
 0xd4d   :  { %v22363_v33 = vadd.f32 %v22362_v44, %v22284_v0 }
 0xd4f   :  { %v22366_v37 = vmax.f32 %v22363_v33, 0.0 }
 0xd51   :  { %v22379_v52 = vsel %vm21806_vm13, %v22366_v37, 0 }
 0xd52   :  { %v22450_v10 = vand.u32 4294901760, %v22379_v52 }
 0xd54   :  { %v22451_v62 = vsub.f32 %v22379_v52, %v22450_v10  ;;  %25860 = vmatmul.mubr.f32.vlgmr.msra.gmra.mxu1 %v22450_v10 }
 0xd55   :  { %25874 = vmatpush3.msra.mxu1 %v30629_v47  ;;  %25881 = vmatprep.mubr.msk.f32.mxu1 %vm26036_vm14, %v30833_v45 }
 0xd56   :  { %v22452_v49 = vand.u32 4294901760, %v22451_v62  ;;  %25875 = vmatprep.subr.mxu1 %v30833_v45 }
 0xd57   :  { %25876 = vmatpush3.msra.mxu1 %v30631_v4 }
 0xd58   :  { %v22453_v20 = vsub.f32 %v22451_v62, %v22452_v49  ;;  %25877 = vmatprep.subr.mxu1 %v30833_v45 }
 0xd59   :  { %25878 = vmatpush3.msra.mxu1 %v30633_v21 }
 0xd5a   :  { %v22454_v26 = vand.u32 4294901760, %v22453_v20  ;;  %25879 = vmatprep.subr.mxu1 %v30833_v45 }
 0xd5b   :  { %25880 = vmatpush3.msra.mxu1 %v30638_v25 }
 0xd5c   :  { %25882 = vmatmul.mubr.f32.vlgmr.msra.gmra.mxu1 %v22452_v49  ;;  %25895 = vmatprep.subr.mxu1 %v30833_v45 }
 0xd5d   :  { %25849 = vmatmul.mubr.f32.vlgmr.msra.gmra.mxu0 %v22454_v26  ;;  %25896 = vmatpush3.msra.mxu1 %v30629_v47 }
 0xd5e   :  { %25863 = vmatpush3.msra.mxu0 %v30641_v50  ;;  %25897 = vmatprep.subr.mxu1 %v30833_v45 }
 0xd5f   :  { %25864 = vmatprep.subr.mxu0 %v30833_v45  ;;  %25898 = vmatpush3.msra.mxu1 %v30631_v4 }
 0xd60   :  { %25865 = vmatpush3.msra.mxu0 %v30644_v18  ;;  %25899 = vmatprep.subr.mxu1 %v30833_v45 }
 0xd61   :  { %25866 = vmatprep.subr.mxu0 %v30833_v45  ;;  %25900 = vmatpush3.msra.mxu1 %v30633_v21 }
 0xd62   :  { %25867 = vmatpush3.msra.mxu0 %v30647_v46  ;;  %25901 = vmatprep.subr.mxu1 %v30833_v45 }
 0xd63   :  { %25868 = vmatprep.subr.mxu0 %v30833_v45  ;;  %25870 = vmatprep.mubr.msk.f32.mxu0 %vm26036_vm14, %v30833_v45 }
 0xd64   :  { %25869 = vmatpush3.msra.mxu0 %v30651_v15  ;;  %25902 = vmatpush3.msra.mxu1 %v30638_v25 }
 0xd65   :  { %25903 = vmatprep.mubr.msk.f32.mxu1 %vm26036_vm14, %v30833_v45  ;;  %25871 = vmatmul.mubr.f32.vlgmr.msra.gmra.mxu0 %v22451_v62 }
 0xd66   :  { %25884 = vmatprep.subr.mxu0 %v30833_v45  ;;  %25904 = vmatmul.mubr.f32.vlgmr.msra.gmra.mxu1 %v22450_v10 }
 0xd67   :  { %25885 = vmatpush3.msra.mxu0 %v22487_v59  ;;  %25892 = vmatprep.mubr.msk.f32.mxu0 %vm26036_vm14, %v30833_v45  ;;  %vm22866_vm14 = vcmask 74752  }
 0xd68   :  { %25886 = vmatprep.subr.mxu0 %v30833_v45 }
 0xd69   :  { %25887 = vmatpush3.msra.mxu0 %v22494_v14 }
 0xd6a   :  { %25888 = vmatprep.subr.mxu0 %v30833_v45 }
 0xd6b   :  { %25889 = vmatpush3.msra.mxu0 %v22501_v40 }
 0xd6c   :  { %25890 = vmatprep.subr.mxu0 %v30833_v45 }
 0xd6d   :  { %25891 = vmatpush3.msra.mxu0 %v22508_v3 }
 0xd6e   :  { %25893 = vmatmul.mubr.f32.vlgmr.msra.gmra.mxu0 %v22450_v10 }
 0xe14   :  { %v22547_v2 = vpop.f32.mrf.mxu1 }
 0xe16   :  { %v25861_v53 = vpop.f32.mrf.mxu1 }
 0xe1c   :  { %v22704_v1 = vpop.f32.mrf.mxu1 }
 0xe1d   :  { %v22456_v16 = vpop.f32.mrf.mxu0 }
 0xe1e   :  { %v25883_v30 = vpop.f32.mrf.mxu1  ;;  %v22457_v56 = vadd.f32 %v23193_v29, %v22456_v16 }
 0xe1f   :  { %v25850_v43 = vpop.f32.mrf.mxu0 }
 0xe20   :  { %v22548_v19 = vadd.f32 %v22547_v2, %v22457_v56 }
 0xe25   :  { %v22627_v11 = vpop.f32.mrf.mxu0 }
 0xe26   :  { %v22862_v35 = vpop.f32.mrf.mxu1  ;;  %v22628_v60 = vadd.f32 %v22627_v11, %v22548_v19 }
 0xe27   :  { %v25872_v61 = vpop.f32.mrf.mxu0 }
 0xe28   :  { %v25905_v45 = vpop.f32.mrf.mxu1  ;;  %v22705_v48 = vadd.f32 %v22704_v1, %v22628_v60 }
 0xe2e   :  { %v22787_v22 = vpop.f32.mrf.mxu0 }
 0xe2f   :  { %v22788_v55 = vadd.f32 %v22787_v22, %v22705_v48 }
 0xe30   :  { %v25894_v47 = vpop.f32.mrf.mxu0 }
 0xe31   :  { %v22863_v4 = vadd.f32 %v22862_v35, %v22788_v55 }
 0xe33   :  { %22867 = vst.msk [vmem:[#allocation13] sm:$0x3] %vm22866_vm14, %v22863_v4 }
 0xe34   :  { %26007 = shalt.err (!%p26004_p6)
}
 0xe35   :  { %22877 = dma.vmem_to_hbm [thread:$0]  %s22875_s14, 32, %s30743_s11, [#allocation3]  }
 0xe36   :  { %26024 = dma.done.wait [#allocation3], 32  }
 0xe37   :  { %26025 = vsyncadd [#allocation3], 4294967264 }
 0xe38   :  { %22881 = vsyncpa [#allocation3], 1 }
 0xe39   :  { %22882 = vsyncpa [#allocation4], 1 }
 0xe3a   :  { %22883 = vsyncpa [#allocation6], 1 }
 0xe3b   :  { %22884 = vsyncpa [#allocation9], 1 }
 0xe3c   :  { %22885 = vsyncpa [#allocation12], 1 }

</bundles_post_ra>
